<compile_context>
chip_gen: v6e
topology: v6e:2x2x1
jax: 0.10.0
libtpu: 0.0.40
codegen_flags: <defaults>
</compile_context>

<pallas_src>
import numpy as np
import jax
import jax.numpy as jnp
from jax.experimental import pallas as pl
from jax.experimental.pallas import tpu as pltpu

IMAGE_SIZE = (3, 32, 32)
LATENT_DIM = 100
PAD_LATENT = 128                       # zero-padded latent width (exact math)
HIDDENS = (128, 256, 512, 1024)
OUT_DIM = int(np.prod(IMAGE_SIZE))     # 3072
BN_EPS = 1e-5
N_SPLIT = 2                            # split of final layer's N over the grid
OUT_TILE = OUT_DIM // N_SPLIT          # 1536 (lane-dense, multiple of 128)


def _gelu_exact(x):
    # torch's default (exact erf) GELU
    return 0.5 * x * (1.0 + jax.lax.erf(x * (1.0 / np.sqrt(2.0))))


def generator_kernel(z_ref,
                     w1_ref, g1_ref, be1_ref,
                     w2_ref, g2_ref, be2_ref,
                     w3_ref, g3_ref, be3_ref,
                     w4_ref, g4_ref, be4_ref,
                     w5_ref, b5_ref,
                     out_ref):
    """Fused Linear->BN(batch stats)->GELU x4 -> Linear(+bias) -> Sigmoid.

    Weights are bf16; activations cast to bf16 only at the MXU operand,
    f32 accumulation and f32 BN/GELU math.  Biases of layers 1-4 are omitted:
    (xW+b) - mean(xW+b) == xW - mean(xW) under train-mode BatchNorm.
    """

    def linear(x, w_ref):
        return jnp.dot(x.astype(jnp.bfloat16), w_ref[...],
                       preferred_element_type=jnp.float32)

    def bn_gelu(x, g_ref, be_ref):
        mean = jnp.mean(x, axis=0, keepdims=True)
        var = jnp.mean((x - mean) ** 2, axis=0, keepdims=True)   # biased var
        s = g_ref[...] * jax.lax.rsqrt(var + BN_EPS)             # folded scale
        t = be_ref[...] - mean * s                               # folded shift
        return _gelu_exact(x * s + t)                            # one FMA/elt

    x = z_ref[...].astype(jnp.float32)
    x = bn_gelu(linear(x, w1_ref), g1_ref, be1_ref)
    x = bn_gelu(linear(x, w2_ref), g2_ref, be2_ref)
    x = bn_gelu(linear(x, w3_ref), g3_ref, be3_ref)
    x = bn_gelu(linear(x, w4_ref), g4_ref, be4_ref)
    # Final layer: this grid step only produces its OUT_TILE slice of N.
    x = jnp.dot(x.astype(jnp.bfloat16), w5_ref[...],
                preferred_element_type=jnp.float32) + b5_ref[...]
    out_ref[...] = jax.nn.sigmoid(x)


def init_params(key):
    """PyTorch-style uniform fan-in init for linears, gamma=1/beta=0 for BN.
    Weights are stored in bf16 (DMA-bound kernel); biases/BN params in f32.
    Biases b1..b4 are created to mirror the torch module but are a no-op
    under train-mode BatchNorm (exact cancellation) and are not passed in."""
    dims = (LATENT_DIM,) + HIDDENS + (OUT_DIM,)
    lin_params = []
    keys = jax.random.split(key, len(dims) - 1)
    for i in range(len(dims) - 1):
        fan_in, fan_out = dims[i], dims[i + 1]
        bound = 1.0 / np.sqrt(fan_in)
        wk, bk = jax.random.split(keys[i])
        w = jax.random.uniform(wk, (fan_in, fan_out), jnp.float32, -bound, bound)
        b = jax.random.uniform(bk, (1, fan_out), jnp.float32, -bound, bound)
        lin_params.append((w.astype(jnp.bfloat16), b))
    bn_params = [(jnp.ones((1, h), jnp.float32), jnp.zeros((1, h), jnp.float32))
                 for h in HIDDENS]
    return lin_params, bn_params


def generator_forward(z, lin_params, bn_params):
    B = z.shape[0]
    assert B % 8 == 0, "batch must be a multiple of 8 (sublane tiling)"

    # Zero-pad latent K=100 -> 128: exact, gives full-vreg loads / aligned MXU K.
    w1, _b1 = lin_params[0]
    zp = jnp.pad(z.astype(jnp.float32), ((0, 0), (0, PAD_LATENT - LATENT_DIM)))
    w1p = jnp.pad(w1, ((0, PAD_LATENT - LATENT_DIM), (0, 0)))

    flat_args = [zp, w1p, bn_params[0][0], bn_params[0][1]]
    for i in range(1, 4):
        w, _b = lin_params[i]        # b1..b4 cancelled by train-mode BN
        g, be = bn_params[i]
        flat_args += [w, g, be]
    w5, b5 = lin_params[4]
    flat_args += [w5, b5]

    def full_block(arr):
        # whole array resident, same block for every grid step (no re-fetch)
        return pl.BlockSpec(arr.shape, lambda j: (0,) * arr.ndim)

    in_specs = [full_block(a) for a in flat_args[:-2]]
    in_specs += [
        pl.BlockSpec((w5.shape[0], OUT_TILE), lambda j: (0, j)),   # w5 N-split
        pl.BlockSpec((1, OUT_TILE), lambda j: (0, j)),             # b5 N-split
    ]
    out_specs = pl.BlockSpec((B, OUT_TILE), lambda j: (0, j))

    dims = (PAD_LATENT,) + HIDDENS + (OUT_DIM,)
    flops = 2 * B * sum(dims[i] * dims[i + 1] for i in range(len(dims) - 1))
    transcendentals = B * (sum(HIDDENS) + OUT_DIM)     # erf per hidden + sigmoid
    bytes_accessed = (sum(int(np.prod(a.shape)) * a.dtype.itemsize
                          for a in flat_args)
                      + B * OUT_DIM * 4)

    out = pl.pallas_call(
        generator_kernel,
        out_shape=jax.ShapeDtypeStruct((B, OUT_DIM), jnp.float32),
        grid=(N_SPLIT,),
        in_specs=in_specs,
        out_specs=out_specs,
        compiler_params=pltpu.CompilerParams(
            dimension_semantics=("parallel",),      # megacore split on v7x
            vmem_limit_bytes=32 << 20,              # fits v7x's 64 MiB VMEM
        ),
        cost_estimate=pl.CostEstimate(
            flops=flops,
            transcendentals=transcendentals,
            bytes_accessed=bytes_accessed,
        ),
    )(*flat_args)
    # glue: reshape to NCHW image, like output.reshape(z.shape[0], *image_size)
    return out.reshape(B, *IMAGE_SIZE)


def generator_reference(z, lin_params, bn_params):
    """Pure-JAX reference in matching precision (bf16 weights / f32 accum).
    Biases b1..b4 are omitted here too: mathematically they are exactly
    cancelled by the train-mode BatchNorm mean subtraction."""
    x = z.astype(jnp.float32)
    for i in range(4):
        w, _b = lin_params[i]
        g, be = bn_params[i]
        x = jnp.dot(x.astype(jnp.bfloat16), w, preferred_element_type=jnp.float32)
        mean = jnp.mean(x, axis=0, keepdims=True)
        var = jnp.mean((x - mean) ** 2, axis=0, keepdims=True)
        s = g * jax.lax.rsqrt(var + BN_EPS)
        x = _gelu_exact(x * s + (be - mean * s))
    w5, b5 = lin_params[4]
    x = jax.nn.sigmoid(jnp.dot(x.astype(jnp.bfloat16), w5,
                               preferred_element_type=jnp.float32) + b5)
    return x.reshape(z.shape[0], *IMAGE_SIZE)


if __name__ == "__main__":
    key = jax.random.PRNGKey(0)
    pkey, zkey = jax.random.split(key)
    lin_params, bn_params = init_params(pkey)

    B = 8  # BatchNorm1d in train mode needs batch > 1; multiple of 8 sublanes
    z = jax.random.normal(zkey, (B, LATENT_DIM), jnp.float32)

    img = generator_forward(z, lin_params, bn_params)
    img = jax.block_until_ready(img)

    ref = generator_reference(z, lin_params, bn_params)
    assert img.shape == (B, *IMAGE_SIZE), img.shape
    # Tolerance covers Mosaic-vs-XLA transcendental/reduction-order deltas
    # amplified through the bf16 operand casts; real bugs are O(0.1+).
    np.testing.assert_allclose(np.asarray(img), np.asarray(ref),
                               rtol=2e-3, atol=2e-3)

    print("KERNEL_OK")
</pallas_src>

<mosaic_0001>
module attributes {stable_mosaic.version = 11 : i64} {
  func.func @generator_kernel(%arg0: i32, %arg1: memref<8x128xf32, #tpu.memory_space<vmem>>, %arg2: memref<128x128xbf16, #tpu.memory_space<vmem>>, %arg3: memref<1x128xf32, #tpu.memory_space<vmem>>, %arg4: memref<1x128xf32, #tpu.memory_space<vmem>>, %arg5: memref<128x256xbf16, #tpu.memory_space<vmem>>, %arg6: memref<1x256xf32, #tpu.memory_space<vmem>>, %arg7: memref<1x256xf32, #tpu.memory_space<vmem>>, %arg8: memref<256x512xbf16, #tpu.memory_space<vmem>>, %arg9: memref<1x512xf32, #tpu.memory_space<vmem>>, %arg10: memref<1x512xf32, #tpu.memory_space<vmem>>, %arg11: memref<512x1024xbf16, #tpu.memory_space<vmem>>, %arg12: memref<1x1024xf32, #tpu.memory_space<vmem>>, %arg13: memref<1x1024xf32, #tpu.memory_space<vmem>>, %arg14: memref<1024x1536xbf16, #tpu.memory_space<vmem>>, %arg15: memref<1x1536xf32, #tpu.memory_space<vmem>>, %arg16: memref<8x1536xf32, #tpu.memory_space<vmem>>) attributes {dimension_semantics = [#tpu.dimension_semantics<parallel>], iteration_bounds = array<i64: 2>, scalar_prefetch = 0 : i64, scratch_operands = 0 : i64, tpu.core_type = #tpu.core_type<tc>, window_params = [{pipeline_mode = #tpu.pipeline_mode<synchronous>, transform_indices = @transform_0, window_bounds = array<i64: 8, 128>}, {pipeline_mode = #tpu.pipeline_mode<synchronous>, transform_indices = @transform_1, window_bounds = array<i64: 128, 128>}, {pipeline_mode = #tpu.pipeline_mode<synchronous>, transform_indices = @transform_2, window_bounds = array<i64: 1, 128>}, {pipeline_mode = #tpu.pipeline_mode<synchronous>, transform_indices = @transform_3, window_bounds = array<i64: 1, 128>}, {pipeline_mode = #tpu.pipeline_mode<synchronous>, transform_indices = @transform_4, window_bounds = array<i64: 128, 256>}, {pipeline_mode = #tpu.pipeline_mode<synchronous>, transform_indices = @transform_5, window_bounds = array<i64: 1, 256>}, {pipeline_mode = #tpu.pipeline_mode<synchronous>, transform_indices = @transform_6, window_bounds = array<i64: 1, 256>}, {pipeline_mode = #tpu.pipeline_mode<synchronous>, transform_indices = @transform_7, window_bounds = array<i64: 256, 512>}, {pipeline_mode = #tpu.pipeline_mode<synchronous>, transform_indices = @transform_8, window_bounds = array<i64: 1, 512>}, {pipeline_mode = #tpu.pipeline_mode<synchronous>, transform_indices = @transform_9, window_bounds = array<i64: 1, 512>}, {pipeline_mode = #tpu.pipeline_mode<synchronous>, transform_indices = @transform_10, window_bounds = array<i64: 512, 1024>}, {pipeline_mode = #tpu.pipeline_mode<synchronous>, transform_indices = @transform_11, window_bounds = array<i64: 1, 1024>}, {pipeline_mode = #tpu.pipeline_mode<synchronous>, transform_indices = @transform_12, window_bounds = array<i64: 1, 1024>}, {transform_indices = @transform_13, window_bounds = array<i64: 1024, 1536>}, {transform_indices = @transform_14, window_bounds = array<i64: 1, 1536>}, {transform_indices = @transform_15, window_bounds = array<i64: 8, 1536>}]} {
    %c0 = arith.constant 0 : index
    %c0_0 = arith.constant 0 : index
    %0 = vector.load %arg1[%c0, %c0_0] : memref<8x128xf32, #tpu.memory_space<vmem>>, vector<8x128xf32>
    %1 = arith.truncf %0 : vector<8x128xf32> to vector<8x128xbf16>
    %c0_1 = arith.constant 0 : index
    %c0_2 = arith.constant 0 : index
    %2 = vector.load %arg2[%c0_1, %c0_2] : memref<128x128xbf16, #tpu.memory_space<vmem>>, vector<128x128xbf16>
    %cst = arith.constant dense<0.000000e+00> : vector<8x128xf32>
    %3 = tpu.matmul %1, %2, %cst {dimension_numbers = #tpu.dot_dimension_numbers<[1], [0], [0], [1], [0, 0, 1, 1], [], []>} : vector<8x128xbf16>, vector<128x128xbf16>, vector<8x128xf32> -> vector<8x128xf32>
    %cst_3 = arith.constant dense<0.000000e+00> : vector<128xf32>
    %4 = vector.multi_reduction <add>, %3, %cst_3 [0] : vector<8x128xf32> to vector<128xf32>
    %5 = vector.shape_cast %4 : vector<128xf32> to vector<1x128xf32>
    %cst_4 = arith.constant 8.000000e+00 : f32
    %6 = vector.broadcast %cst_4 : f32 to vector<1x128xf32>
    %7 = arith.divf %5, %6 : vector<1x128xf32>
    %8 = vector.broadcast %7 : vector<1x128xf32> to vector<8x128xf32>
    %9 = arith.subf %3, %8 : vector<8x128xf32>
    %10 = arith.mulf %9, %9 : vector<8x128xf32>
    %cst_5 = arith.constant dense<0.000000e+00> : vector<128xf32>
    %11 = vector.multi_reduction <add>, %10, %cst_5 [0] : vector<8x128xf32> to vector<128xf32>
    %12 = vector.shape_cast %11 : vector<128xf32> to vector<1x128xf32>
    %cst_6 = arith.constant 8.000000e+00 : f32
    %13 = vector.broadcast %cst_6 : f32 to vector<1x128xf32>
    %14 = arith.divf %12, %13 : vector<1x128xf32>
    %c0_7 = arith.constant 0 : index
    %c0_8 = arith.constant 0 : index
    %15 = vector.load %arg3[%c0_7, %c0_8] : memref<1x128xf32, #tpu.memory_space<vmem>>, vector<1x128xf32>
    %cst_9 = arith.constant 9.99999974E-6 : f32
    %16 = vector.broadcast %cst_9 : f32 to vector<1x128xf32>
    %17 = arith.addf %14, %16 : vector<1x128xf32>
    %18 = math.rsqrt %17 : vector<1x128xf32>
    %19 = arith.mulf %15, %18 : vector<1x128xf32>
    %c0_10 = arith.constant 0 : index
    %c0_11 = arith.constant 0 : index
    %20 = vector.load %arg4[%c0_10, %c0_11] : memref<1x128xf32, #tpu.memory_space<vmem>>, vector<1x128xf32>
    %21 = arith.mulf %7, %19 : vector<1x128xf32>
    %22 = arith.subf %20, %21 : vector<1x128xf32>
    %23 = vector.broadcast %19 : vector<1x128xf32> to vector<8x128xf32>
    %24 = arith.mulf %3, %23 : vector<8x128xf32>
    %25 = vector.broadcast %22 : vector<1x128xf32> to vector<8x128xf32>
    %26 = arith.addf %24, %25 : vector<8x128xf32>
    %cst_12 = arith.constant 5.000000e-01 : f32
    %27 = vector.broadcast %cst_12 : f32 to vector<8x128xf32>
    %28 = arith.mulf %27, %26 : vector<8x128xf32>
    %cst_13 = arith.constant 0.707106769 : f32
    %29 = vector.broadcast %cst_13 : f32 to vector<8x128xf32>
    %30 = arith.mulf %26, %29 : vector<8x128xf32>
    %31 = math.erf %30 : vector<8x128xf32>
    %cst_14 = arith.constant 1.000000e+00 : f32
    %32 = vector.broadcast %cst_14 : f32 to vector<8x128xf32>
    %33 = arith.addf %32, %31 : vector<8x128xf32>
    %34 = arith.mulf %28, %33 : vector<8x128xf32>
    %35 = arith.truncf %34 : vector<8x128xf32> to vector<8x128xbf16>
    %c0_15 = arith.constant 0 : index
    %c0_16 = arith.constant 0 : index
    %36 = vector.load %arg5[%c0_15, %c0_16] : memref<128x256xbf16, #tpu.memory_space<vmem>>, vector<128x256xbf16>
    %cst_17 = arith.constant dense<0.000000e+00> : vector<8x256xf32>
    %37 = tpu.matmul %35, %36, %cst_17 {dimension_numbers = #tpu.dot_dimension_numbers<[1], [0], [0], [1], [0, 0, 1, 1], [], []>} : vector<8x128xbf16>, vector<128x256xbf16>, vector<8x256xf32> -> vector<8x256xf32>
    %cst_18 = arith.constant dense<0.000000e+00> : vector<256xf32>
    %38 = vector.multi_reduction <add>, %37, %cst_18 [0] : vector<8x256xf32> to vector<256xf32>
    %39 = vector.shape_cast %38 : vector<256xf32> to vector<1x256xf32>
    %cst_19 = arith.constant 8.000000e+00 : f32
    %40 = vector.broadcast %cst_19 : f32 to vector<1x256xf32>
    %41 = arith.divf %39, %40 : vector<1x256xf32>
    %42 = vector.broadcast %41 : vector<1x256xf32> to vector<8x256xf32>
    %43 = arith.subf %37, %42 : vector<8x256xf32>
    %44 = arith.mulf %43, %43 : vector<8x256xf32>
    %cst_20 = arith.constant dense<0.000000e+00> : vector<256xf32>
    %45 = vector.multi_reduction <add>, %44, %cst_20 [0] : vector<8x256xf32> to vector<256xf32>
    %46 = vector.shape_cast %45 : vector<256xf32> to vector<1x256xf32>
    %cst_21 = arith.constant 8.000000e+00 : f32
    %47 = vector.broadcast %cst_21 : f32 to vector<1x256xf32>
    %48 = arith.divf %46, %47 : vector<1x256xf32>
    %c0_22 = arith.constant 0 : index
    %c0_23 = arith.constant 0 : index
    %49 = vector.load %arg6[%c0_22, %c0_23] : memref<1x256xf32, #tpu.memory_space<vmem>>, vector<1x256xf32>
    %cst_24 = arith.constant 9.99999974E-6 : f32
    %50 = vector.broadcast %cst_24 : f32 to vector<1x256xf32>
    %51 = arith.addf %48, %50 : vector<1x256xf32>
    %52 = math.rsqrt %51 : vector<1x256xf32>
    %53 = arith.mulf %49, %52 : vector<1x256xf32>
    %c0_25 = arith.constant 0 : index
    %c0_26 = arith.constant 0 : index
    %54 = vector.load %arg7[%c0_25, %c0_26] : memref<1x256xf32, #tpu.memory_space<vmem>>, vector<1x256xf32>
    %55 = arith.mulf %41, %53 : vector<1x256xf32>
    %56 = arith.subf %54, %55 : vector<1x256xf32>
    %57 = vector.broadcast %53 : vector<1x256xf32> to vector<8x256xf32>
    %58 = arith.mulf %37, %57 : vector<8x256xf32>
    %59 = vector.broadcast %56 : vector<1x256xf32> to vector<8x256xf32>
    %60 = arith.addf %58, %59 : vector<8x256xf32>
    %cst_27 = arith.constant 5.000000e-01 : f32
    %61 = vector.broadcast %cst_27 : f32 to vector<8x256xf32>
    %62 = arith.mulf %61, %60 : vector<8x256xf32>
    %cst_28 = arith.constant 0.707106769 : f32
    %63 = vector.broadcast %cst_28 : f32 to vector<8x256xf32>
    %64 = arith.mulf %60, %63 : vector<8x256xf32>
    %65 = math.erf %64 : vector<8x256xf32>
    %cst_29 = arith.constant 1.000000e+00 : f32
    %66 = vector.broadcast %cst_29 : f32 to vector<8x256xf32>
    %67 = arith.addf %66, %65 : vector<8x256xf32>
    %68 = arith.mulf %62, %67 : vector<8x256xf32>
    %69 = arith.truncf %68 : vector<8x256xf32> to vector<8x256xbf16>
    %c0_30 = arith.constant 0 : index
    %c0_31 = arith.constant 0 : index
    %70 = vector.load %arg8[%c0_30, %c0_31] : memref<256x512xbf16, #tpu.memory_space<vmem>>, vector<256x512xbf16>
    %cst_32 = arith.constant dense<0.000000e+00> : vector<8x512xf32>
    %71 = tpu.matmul %69, %70, %cst_32 {dimension_numbers = #tpu.dot_dimension_numbers<[1], [0], [0], [1], [0, 0, 1, 1], [], []>} : vector<8x256xbf16>, vector<256x512xbf16>, vector<8x512xf32> -> vector<8x512xf32>
    %cst_33 = arith.constant dense<0.000000e+00> : vector<512xf32>
    %72 = vector.multi_reduction <add>, %71, %cst_33 [0] : vector<8x512xf32> to vector<512xf32>
    %73 = vector.shape_cast %72 : vector<512xf32> to vector<1x512xf32>
    %cst_34 = arith.constant 8.000000e+00 : f32
    %74 = vector.broadcast %cst_34 : f32 to vector<1x512xf32>
    %75 = arith.divf %73, %74 : vector<1x512xf32>
    %76 = vector.broadcast %75 : vector<1x512xf32> to vector<8x512xf32>
    %77 = arith.subf %71, %76 : vector<8x512xf32>
    %78 = arith.mulf %77, %77 : vector<8x512xf32>
    %cst_35 = arith.constant dense<0.000000e+00> : vector<512xf32>
    %79 = vector.multi_reduction <add>, %78, %cst_35 [0] : vector<8x512xf32> to vector<512xf32>
    %80 = vector.shape_cast %79 : vector<512xf32> to vector<1x512xf32>
    %cst_36 = arith.constant 8.000000e+00 : f32
    %81 = vector.broadcast %cst_36 : f32 to vector<1x512xf32>
    %82 = arith.divf %80, %81 : vector<1x512xf32>
    %c0_37 = arith.constant 0 : index
    %c0_38 = arith.constant 0 : index
    %83 = vector.load %arg9[%c0_37, %c0_38] : memref<1x512xf32, #tpu.memory_space<vmem>>, vector<1x512xf32>
    %cst_39 = arith.constant 9.99999974E-6 : f32
    %84 = vector.broadcast %cst_39 : f32 to vector<1x512xf32>
    %85 = arith.addf %82, %84 : vector<1x512xf32>
    %86 = math.rsqrt %85 : vector<1x512xf32>
    %87 = arith.mulf %83, %86 : vector<1x512xf32>
    %c0_40 = arith.constant 0 : index
    %c0_41 = arith.constant 0 : index
    %88 = vector.load %arg10[%c0_40, %c0_41] : memref<1x512xf32, #tpu.memory_space<vmem>>, vector<1x512xf32>
    %89 = arith.mulf %75, %87 : vector<1x512xf32>
    %90 = arith.subf %88, %89 : vector<1x512xf32>
    %91 = vector.broadcast %87 : vector<1x512xf32> to vector<8x512xf32>
    %92 = arith.mulf %71, %91 : vector<8x512xf32>
    %93 = vector.broadcast %90 : vector<1x512xf32> to vector<8x512xf32>
    %94 = arith.addf %92, %93 : vector<8x512xf32>
    %cst_42 = arith.constant 5.000000e-01 : f32
    %95 = vector.broadcast %cst_42 : f32 to vector<8x512xf32>
    %96 = arith.mulf %95, %94 : vector<8x512xf32>
    %cst_43 = arith.constant 0.707106769 : f32
    %97 = vector.broadcast %cst_43 : f32 to vector<8x512xf32>
    %98 = arith.mulf %94, %97 : vector<8x512xf32>
    %99 = math.erf %98 : vector<8x512xf32>
    %cst_44 = arith.constant 1.000000e+00 : f32
    %100 = vector.broadcast %cst_44 : f32 to vector<8x512xf32>
    %101 = arith.addf %100, %99 : vector<8x512xf32>
    %102 = arith.mulf %96, %101 : vector<8x512xf32>
    %103 = arith.truncf %102 : vector<8x512xf32> to vector<8x512xbf16>
    %c0_45 = arith.constant 0 : index
    %c0_46 = arith.constant 0 : index
    %104 = vector.load %arg11[%c0_45, %c0_46] : memref<512x1024xbf16, #tpu.memory_space<vmem>>, vector<512x1024xbf16>
    %cst_47 = arith.constant dense<0.000000e+00> : vector<8x1024xf32>
    %105 = tpu.matmul %103, %104, %cst_47 {dimension_numbers = #tpu.dot_dimension_numbers<[1], [0], [0], [1], [0, 0, 1, 1], [], []>} : vector<8x512xbf16>, vector<512x1024xbf16>, vector<8x1024xf32> -> vector<8x1024xf32>
    %cst_48 = arith.constant dense<0.000000e+00> : vector<1024xf32>
    %106 = vector.multi_reduction <add>, %105, %cst_48 [0] : vector<8x1024xf32> to vector<1024xf32>
    %107 = vector.shape_cast %106 : vector<1024xf32> to vector<1x1024xf32>
    %cst_49 = arith.constant 8.000000e+00 : f32
    %108 = vector.broadcast %cst_49 : f32 to vector<1x1024xf32>
    %109 = arith.divf %107, %108 : vector<1x1024xf32>
    %110 = vector.broadcast %109 : vector<1x1024xf32> to vector<8x1024xf32>
    %111 = arith.subf %105, %110 : vector<8x1024xf32>
    %112 = arith.mulf %111, %111 : vector<8x1024xf32>
    %cst_50 = arith.constant dense<0.000000e+00> : vector<1024xf32>
    %113 = vector.multi_reduction <add>, %112, %cst_50 [0] : vector<8x1024xf32> to vector<1024xf32>
    %114 = vector.shape_cast %113 : vector<1024xf32> to vector<1x1024xf32>
    %cst_51 = arith.constant 8.000000e+00 : f32
    %115 = vector.broadcast %cst_51 : f32 to vector<1x1024xf32>
    %116 = arith.divf %114, %115 : vector<1x1024xf32>
    %c0_52 = arith.constant 0 : index
    %c0_53 = arith.constant 0 : index
    %117 = vector.load %arg12[%c0_52, %c0_53] : memref<1x1024xf32, #tpu.memory_space<vmem>>, vector<1x1024xf32>
    %cst_54 = arith.constant 9.99999974E-6 : f32
    %118 = vector.broadcast %cst_54 : f32 to vector<1x1024xf32>
    %119 = arith.addf %116, %118 : vector<1x1024xf32>
    %120 = math.rsqrt %119 : vector<1x1024xf32>
    %121 = arith.mulf %117, %120 : vector<1x1024xf32>
    %c0_55 = arith.constant 0 : index
    %c0_56 = arith.constant 0 : index
    %122 = vector.load %arg13[%c0_55, %c0_56] : memref<1x1024xf32, #tpu.memory_space<vmem>>, vector<1x1024xf32>
    %123 = arith.mulf %109, %121 : vector<1x1024xf32>
    %124 = arith.subf %122, %123 : vector<1x1024xf32>
    %125 = vector.broadcast %121 : vector<1x1024xf32> to vector<8x1024xf32>
    %126 = arith.mulf %105, %125 : vector<8x1024xf32>
    %127 = vector.broadcast %124 : vector<1x1024xf32> to vector<8x1024xf32>
    %128 = arith.addf %126, %127 : vector<8x1024xf32>
    %cst_57 = arith.constant 5.000000e-01 : f32
    %129 = vector.broadcast %cst_57 : f32 to vector<8x1024xf32>
    %130 = arith.mulf %129, %128 : vector<8x1024xf32>
    %cst_58 = arith.constant 0.707106769 : f32
    %131 = vector.broadcast %cst_58 : f32 to vector<8x1024xf32>
    %132 = arith.mulf %128, %131 : vector<8x1024xf32>
    %133 = math.erf %132 : vector<8x1024xf32>
    %cst_59 = arith.constant 1.000000e+00 : f32
    %134 = vector.broadcast %cst_59 : f32 to vector<8x1024xf32>
    %135 = arith.addf %134, %133 : vector<8x1024xf32>
    %136 = arith.mulf %130, %135 : vector<8x1024xf32>
    %137 = arith.truncf %136 : vector<8x1024xf32> to vector<8x1024xbf16>
    %c0_60 = arith.constant 0 : index
    %c0_61 = arith.constant 0 : index
    %138 = vector.load %arg14[%c0_60, %c0_61] : memref<1024x1536xbf16, #tpu.memory_space<vmem>>, vector<1024x1536xbf16>
    %cst_62 = arith.constant dense<0.000000e+00> : vector<8x1536xf32>
    %139 = tpu.matmul %137, %138, %cst_62 {dimension_numbers = #tpu.dot_dimension_numbers<[1], [0], [0], [1], [0, 0, 1, 1], [], []>} : vector<8x1024xbf16>, vector<1024x1536xbf16>, vector<8x1536xf32> -> vector<8x1536xf32>
    %c0_63 = arith.constant 0 : index
    %c0_64 = arith.constant 0 : index
    %140 = vector.load %arg15[%c0_63, %c0_64] : memref<1x1536xf32, #tpu.memory_space<vmem>>, vector<1x1536xf32>
    %141 = vector.broadcast %140 : vector<1x1536xf32> to vector<8x1536xf32>
    %142 = arith.addf %139, %141 : vector<8x1536xf32>
    %143 = arith.negf %142 : vector<8x1536xf32>
    %144 = math.exp %143 : vector<8x1536xf32>
    %cst_65 = arith.constant 1.000000e+00 : f32
    %145 = vector.broadcast %cst_65 : f32 to vector<8x1536xf32>
    %146 = arith.addf %145, %144 : vector<8x1536xf32>
    %147 = arith.divf %145, %146 : vector<8x1536xf32>
    %c0_66 = arith.constant 0 : index
    %c0_67 = arith.constant 0 : index
    %148 = vector.load %arg16[%c0_66, %c0_67] : memref<8x1536xf32, #tpu.memory_space<vmem>>, vector<8x1536xf32>
    tpu.vector_store %arg16[%c0_66, %c0_67], %147 {strides = array<i32>} : memref<8x1536xf32, #tpu.memory_space<vmem>>, vector<8x1536xf32>,
    return
  }
  func.func @transform_0(%arg0: i32) -> (i32, i32) {
    %c0_i32 = arith.constant 0 : i32
    %c0_i32_0 = arith.constant 0 : i32
    %c0_i32_1 = arith.constant 0 : i32
    return %c0_i32, %c0_i32_0 : i32, i32
  }
  func.func @transform_1(%arg0: i32) -> (i32, i32) {
    %c0_i32 = arith.constant 0 : i32
    %c0_i32_0 = arith.constant 0 : i32
    %c0_i32_1 = arith.constant 0 : i32
    return %c0_i32, %c0_i32_0 : i32, i32
  }
  func.func @transform_2(%arg0: i32) -> (i32, i32) {
    %c0_i32 = arith.constant 0 : i32
    %c0_i32_0 = arith.constant 0 : i32
    %c0_i32_1 = arith.constant 0 : i32
    return %c0_i32, %c0_i32_0 : i32, i32
  }
  func.func @transform_3(%arg0: i32) -> (i32, i32) {
    %c0_i32 = arith.constant 0 : i32
    %c0_i32_0 = arith.constant 0 : i32
    %c0_i32_1 = arith.constant 0 : i32
    return %c0_i32, %c0_i32_0 : i32, i32
  }
  func.func @transform_4(%arg0: i32) -> (i32, i32) {
    %c0_i32 = arith.constant 0 : i32
    %c0_i32_0 = arith.constant 0 : i32
    %c0_i32_1 = arith.constant 0 : i32
    return %c0_i32, %c0_i32_0 : i32, i32
  }
  func.func @transform_5(%arg0: i32) -> (i32, i32) {
    %c0_i32 = arith.constant 0 : i32
    %c0_i32_0 = arith.constant 0 : i32
    %c0_i32_1 = arith.constant 0 : i32
    return %c0_i32, %c0_i32_0 : i32, i32
  }
  func.func @transform_6(%arg0: i32) -> (i32, i32) {
    %c0_i32 = arith.constant 0 : i32
    %c0_i32_0 = arith.constant 0 : i32
    %c0_i32_1 = arith.constant 0 : i32
    return %c0_i32, %c0_i32_0 : i32, i32
  }
  func.func @transform_7(%arg0: i32) -> (i32, i32) {
    %c0_i32 = arith.constant 0 : i32
    %c0_i32_0 = arith.constant 0 : i32
    %c0_i32_1 = arith.constant 0 : i32
    return %c0_i32, %c0_i32_0 : i32, i32
  }
  func.func @transform_8(%arg0: i32) -> (i32, i32) {
    %c0_i32 = arith.constant 0 : i32
    %c0_i32_0 = arith.constant 0 : i32
    %c0_i32_1 = arith.constant 0 : i32
    return %c0_i32, %c0_i32_0 : i32, i32
  }
  func.func @transform_9(%arg0: i32) -> (i32, i32) {
    %c0_i32 = arith.constant 0 : i32
    %c0_i32_0 = arith.constant 0 : i32
    %c0_i32_1 = arith.constant 0 : i32
    return %c0_i32, %c0_i32_0 : i32, i32
  }
  func.func @transform_10(%arg0: i32) -> (i32, i32) {
    %c0_i32 = arith.constant 0 : i32
    %c0_i32_0 = arith.constant 0 : i32
    %c0_i32_1 = arith.constant 0 : i32
    return %c0_i32, %c0_i32_0 : i32, i32
  }
  func.func @transform_11(%arg0: i32) -> (i32, i32) {
    %c0_i32 = arith.constant 0 : i32
    %c0_i32_0 = arith.constant 0 : i32
    %c0_i32_1 = arith.constant 0 : i32
    return %c0_i32, %c0_i32_0 : i32, i32
  }
  func.func @transform_12(%arg0: i32) -> (i32, i32) {
    %c0_i32 = arith.constant 0 : i32
    %c0_i32_0 = arith.constant 0 : i32
    %c0_i32_1 = arith.constant 0 : i32
    return %c0_i32, %c0_i32_0 : i32, i32
  }
  func.func @transform_13(%arg0: i32) -> (i32, i32) {
    %c0_i32 = arith.constant 0 : i32
    %c0_i32_0 = arith.constant 0 : i32
    return %c0_i32, %arg0 : i32, i32
  }
  func.func @transform_14(%arg0: i32) -> (i32, i32) {
    %c0_i32 = arith.constant 0 : i32
    %c0_i32_0 = arith.constant 0 : i32
    return %c0_i32, %arg0 : i32, i32
  }
  func.func @transform_15(%arg0: i32) -> (i32, i32) {
    %c0_i32 = arith.constant 0 : i32
    %c0_i32_0 = arith.constant 0 : i32
    return %c0_i32, %arg0 : i32, i32
  }
}

</mosaic_0001>

<bundles_post_ra>
// kernel: tpu_custom_call.1
= control target key start
LH: loop header
LB: loop body
LE: loop exit
PB: predicated region body
PF: predicated region fallthrough
CT: control target
= control target key end

     0   :  { %s14939_s0 = inlined_call_operand.hbm [shape: f32[8,128], index: 0, kind: input, shape index: {}]   ;;  %s14940_s1 = inlined_call_operand.hbm [shape: bf16[128,128], index: 1, kind: input, shape index: {}]   ;;  %s14941_s2 = inlined_call_operand.hbm [shape: f32[1,128], index: 2, kind: input, shape index: {}]   ;;  %s14942_s3 = inlined_call_operand.hbm [shape: f32[1,128], index: 3, kind: input, shape index: {}]   ;;  %s14943_s4 = inlined_call_operand.hbm [shape: bf16[128,256], index: 4, kind: input, shape index: {}]   ;;  %s14944_s5 = inlined_call_operand.hbm [shape: f32[1,256], index: 5, kind: input, shape index: {}]   ;;  %s14945_s6 = inlined_call_operand.hbm [shape: f32[1,256], index: 6, kind: input, shape index: {}]   ;;  %s14946_s7 = inlined_call_operand.hbm [shape: bf16[256,512], index: 7, kind: input, shape index: {}]   ;;  %s14947_s8 = inlined_call_operand.hbm [shape: f32[1,512], index: 8, kind: input, shape index: {}]   ;;  %s14948_s9 = inlined_call_operand.hbm [shape: f32[1,512], index: 9, kind: input, shape index: {}]   ;;  %s14949_s10 = inlined_call_operand.hbm [shape: bf16[512,1024], index: 10, kind: input, shape index: {}]   ;;  %s14950_s11 = inlined_call_operand.hbm [shape: f32[1,1024], index: 11, kind: input, shape index: {}]   ;;  %s14951_s12 = inlined_call_operand.hbm [shape: f32[1,1024], index: 12, kind: input, shape index: {}]   ;;  %s14952_s13 = inlined_call_operand.hbm [shape: bf16[1024,3072], index: 13, kind: input, shape index: {}]   ;;  %s14953_s14 = inlined_call_operand.hbm [shape: f32[1,3072], index: 14, kind: input, shape index: {}]   ;;  %s14954_s15 = inlined_call_operand.hbm [shape: f32[8,3072], index: 15, kind: output, shape index: {}]  }
   0x1   :  { %14968 = sst [smem:[#allocation38_spill]] %s14939_s0 }
   0x2   :  { %14969 = sst [smem:[#allocation39_spill]] %s14940_s1 }
   0x3   :  { %14970 = sst [smem:[#allocation40_spill]] %s14941_s2 }
   0x4   :  { %14971 = sst [smem:[#allocation41_spill]] %s14942_s3 }
   0x5   :  { %14972 = sst [smem:[#allocation42_spill]] %s14944_s5 }
   0x6   :  { %14973 = sst [smem:[#allocation43_spill]] %s14946_s7 }
   0x7   :  { %14974 = sst [smem:[#allocation44_spill]] %s14948_s9 }
   0x8   :  { %14975 = sst [smem:[#allocation45_spill]] %s14950_s11 }
   0x9   :  { %14976 = sst [smem:[#allocation46_spill]] %s14951_s12 }
   0xa   :  { %14977 = sst [smem:[#allocation47_spill]] %s14952_s13 }
   0xb   :  { %14978 = sst [smem:[#allocation48_spill]] %s14953_s14 }
   0xc   :  { %14979 = sst [smem:[#allocation49_spill]] %s14954_s15 }
   0xd   :  { %20 = vsyncpa [#allocation3], 0 }
   0xe   :  { %21 = vsyncpa [#allocation6], 0 }
   0xf   :  { %22 = vsyncpa [#allocation9], 0 }
  0x10   :  { %23 = vsyncpa [#allocation12], 0 }
  0x11   :  { %24 = vsyncpa [#allocation15], 0 }
  0x12   :  { %25 = vsyncpa [#allocation18], 0 }
  0x13   :  { %26 = vsyncpa [#allocation21], 0 }
  0x14   :  { %27 = vsyncpa [#allocation24], 0 }
  0x15   :  { %29 = vsyncpa [#allocation24 + $0x1], 0 }
  0x16   :  { %30 = vsyncpa [#allocation4], 0 }
  0x17   :  { %32 = vsyncpa [#allocation4 + $0x1], 0  ;;  %s13438_s18 = smov 0   ;;  %s13440_s19 = smov 0  }
  0x18   :  { %s13442_s20 = smov 0   ;;  %s13444_s21 = smov 0  }
  0x19 LB: > { %s13327_s22 = smov [#allocation5]   ;;  %s13459_s24 = sadd.s32 4294967295, %s13325_s21   ;;  %s13325_s21 = sphi %s13444_s21, %s15031_s21   ;;  %s13321_s20 = sphi %s13442_s20, %s15030_s20   ;;  %s13317_s19 = sphi %s13440_s19, %s15029_s19   ;;  %s13313_s18 = sphi %s13438_s18, %s15028_s18  }
  0x1a   : > { %s417_s23 = sshll.u32 %s13327_s22, 4  ;;  %p10058_p0 = scmp.ge.s32.totalorder %s13325_s21, 1  ;;  %s418_s23 = int_to_ptr.vmem [resolvable:$true] %s417_s23 }
  0x1b   : > { %p14958_p1 = scmp.eq.s32.totalorder %s13459_s24, 0  ;;  %p394_p2 = scmp.lt.s32.totalorder %s13325_s21, 3 }
  0x1c   : > { %s13328_s26 = smov [#allocation8]   ;;  %s13329_s29 = smov [#allocation11]  }
  0x1d   : > { %p13464_p3 = pnand %p10058_p0, %p394_p2  ;;  %s442_s27 = sshll.u32 %s13328_s26, 4  ;;  %s443_s27 = int_to_ptr.vmem [resolvable:$true] %s442_s27 }
  0x1e   : > { %s466_s30 = sshll.u32 %s13329_s29, 4  ;;  %s12850_s17 = scalar_lea.vmem %s418_s23, 1024  ;;  %s13477_s30 = int_to_ptr.vmem [resolvable:$true] %s466_s30 }
  0x1f   : > { %s14980_s25 = scalar_select %p13464_p3, 1, 0 }
  0x20   : > { %p11311_p5 = pneg %p13464_p3  ;;  %p12851_p8 = scmp.ne.s32.totalorder %s418_s23, %s12850_s17 }
  0x21   : > { %14981 = sst [smem:[#allocation36_spill]] %s14980_s25  ;;  %p12858_p11 = scmp.lt.s32.totalorder %s418_s23, %s418_s23 }
  0x22   : > { %p13473_p6 = pnand %p11311_p5, %p14958_p1  ;;  %p12859_p12 = scmp.lt.s32.totalorder %s12850_s17, %s12850_s17 }
  0x24   : > { %s14982_s28 = scalar_select %p13473_p6, 1, 0 }
  0x25   : > { %p13481_p7 = pneg %p13473_p6  ;;  %p12860_p13 = por %p12859_p12, %p12858_p11 }
  0x27   : > { %p12853_p9 = pnand %p12851_p8, %p13481_p7 }
  0x29   : > { %p12854_p10 = pneg %p12853_p9 }
  0x2b   : > { %p12861_p0 = pnand %p12860_p13, %p12854_p10 }
  0x2d   : > { %12864 = shalt.err (!%p12861_p0)
}
  0x2e   : > { %s13330_s22 = smov 64   ;;  %s13331_s26 = smov 4  }
  0x2f   : > { %s14984_s1 = sld [smem:[#allocation39_spill]]  ;;  %s12876_s25 = scalar_lea.vmem %s443_s27, 16 }
  0x30   : > { %p12877_p2 = scmp.ne.s32.totalorder %s443_s27, %s12876_s25  ;;  %s12883_s14 = scalar_lea.vmem %s443_s27, 32 }
  0x31   : > { %p12884_p9 = scmp.lt.s32.totalorder %s443_s27, %s443_s27  ;;  %p12885_p4 = scmp.lt.s32.totalorder %s12883_s14, %s12876_s25 }
  0x32   : > { %p12879_p5 = pnand %p12877_p2, %p13481_p7 }
  0x33   : > { %p12886_p11 = por %p12885_p4, %p12884_p9 }
  0x34   : > { %p12880_p8 = pneg %p12879_p5 }
  0x35   : > { %11317 = dma.hbm_to_vmem [thread:$0]  (!%p13473_p6), %s14984_s1, 1024, %s418_s23, [#allocation6], %s13330_s22, %s13330_s22, %s13331_s26  }
  0x36   : > { %p12887_p10 = pnand %p12886_p11, %p12880_p8 }
  0x38   : > { %12890 = shalt.err (!%p12887_p10)
}
  0x39   : > { %s14985_s3 = sld [smem:[#allocation41_spill]]  ;;  %s12902_s15 = scalar_lea.vmem %s13477_s30, 32 }
  0x3a   : > { %p12903_p12 = scmp.ne.s32.totalorder %s13477_s30, %s12902_s15  ;;  %p12910_p2 = scmp.lt.s32.totalorder %s13477_s30, %s13477_s30 }
  0x3b   : > { %p12911_p4 = scmp.lt.s32.totalorder %s12902_s15, %s12902_s15 }
  0x3c   : > { %p12905_p13 = pnand %p12903_p12, %p13481_p7 }
  0x3d   : > { %p12912_p5 = por %p12911_p4, %p12910_p2 }
  0x3e   : > { %p12906_p0 = pneg %p12905_p13 }
  0x3f   : > { %11323 = dma.hbm_to_vmem [thread:$0]  (!%p13473_p6), %s14985_s3, 16, %s443_s27, [#allocation9]  }
  0x40   : > { %p12913_p8 = pnand %p12912_p5, %p12906_p0 }
  0x42   : > { %12916 = shalt.err (!%p12913_p8)
}
  0x43   : > { %s14986_s5 = sld [smem:[#allocation42_spill]]  ;;  %s13332_s23 = smov [#allocation14]  }
  0x44   : > { %s487_s25 = sshll.u32 %s13332_s23, 4  ;;  %s488_s25 = int_to_ptr.vmem [resolvable:$true] %s487_s25 }
  0x45   : > { %s12928_s27 = scalar_lea.vmem %s488_s25, 8192  ;;  %p12936_p12 = scmp.lt.s32.totalorder %s488_s25, %s488_s25 }
  0x46   : > { %p12929_p9 = scmp.ne.s32.totalorder %s488_s25, %s12928_s27  ;;  %p12937_p13 = scmp.lt.s32.totalorder %s12928_s27, %s12928_s27 }
  0x48   : > { %p12931_p11 = pnand %p12929_p9, %p13481_p7  ;;  %p12938_p0 = por %p12937_p13, %p12936_p12 }
  0x49   : > { %11329 = dma.hbm_to_vmem [thread:$0]  (!%p13473_p6), %s14986_s5, 32, %s13477_s30, [#allocation12]  }
  0x4a   : > { %p12932_p10 = pneg %p12931_p11 }
  0x4c   : > { %p12939_p2 = pnand %p12938_p0, %p12932_p10 }
  0x4e   : > { %12942 = shalt.err (!%p12939_p2)
}
  0x4f   : > { %s13333_s22 = smov 256   ;;  %s13334_s26 = smov 16  }
  0x50   : > { %s14987_s7 = sld [smem:[#allocation43_spill]]  ;;  %s13335_s17 = smov [#allocation17]  }
  0x51   : > { %s512_s15 = sshll.u32 %s13335_s17, 4  ;;  %s13336_s12 = smov [#allocation20]   ;;  %s513_s15 = int_to_ptr.vmem [resolvable:$true] %s512_s15 }
  0x52   : > { %s536_s14 = sshll.u32 %s13336_s12, 4  ;;  %s12954_s23 = scalar_lea.vmem %s513_s15, 64  ;;  %s537_s14 = int_to_ptr.vmem [resolvable:$true] %s536_s14 }
  0x53   : > { %p12955_p4 = scmp.ne.s32.totalorder %s513_s15, %s12954_s23  ;;  %p12962_p9 = scmp.lt.s32.totalorder %s513_s15, %s513_s15 }
  0x54   : > { %p12963_p11 = scmp.lt.s32.totalorder %s12954_s23, %s12954_s23 }
  0x55   : > { %p12957_p5 = pnand %p12955_p4, %p13481_p7 }
  0x56   : > { %11335 = dma.hbm_to_vmem [thread:$0]  (!%p13473_p6), %s14987_s7, 8192, %s488_s25, [#allocation15], %s13333_s22, %s13333_s22, %s13334_s26  }
  0x57   : > { %p12958_p8 = pneg %p12957_p5  ;;  %p12964_p10 = por %p12963_p11, %p12962_p9 }
  0x59   : > { %p12965_p12 = pnand %p12964_p10, %p12958_p8 }
  0x5b   : > { %12968 = shalt.err (!%p12965_p12)
}
  0x5c   : > { %s14988_s9 = sld [smem:[#allocation44_spill]]  ;;  %s12980_s22 = scalar_lea.vmem %s537_s14, 128 }
  0x5d   : > { %p12981_p13 = scmp.ne.s32.totalorder %s537_s14, %s12980_s22  ;;  %p12988_p1 = scmp.lt.s32.totalorder %s537_s14, %s537_s14 }
  0x5e   : > { %p12989_p4 = scmp.lt.s32.totalorder %s12980_s22, %s12980_s22 }
  0x5f   : > { %p12983_p0 = pnand %p12981_p13, %p13481_p7 }
  0x60   : > { %p12990_p5 = por %p12989_p4, %p12988_p1 }
  0x61   : > { %p12984_p2 = pneg %p12983_p0 }
  0x62   : > { %11341 = dma.hbm_to_vmem [thread:$0]  (!%p13473_p6), %s14988_s9, 64, %s513_s15, [#allocation18]  }
  0x63   : > { %p12991_p3 = pnand %p12990_p5, %p12984_p2 }
  0x65   : > { %12994 = shalt.err (!%p12991_p3)
}
  0x66   : > { %s14989_s11 = sld [smem:[#allocation45_spill]]  ;;  %s10057_s30 = sadd.s32 4294967294, %s13325_s21  }
  0x67   : > { %s13534_s17 = sadd.s32 1, %s13325_s21   ;;  %s318_s12 = sadd.s32 1, %s13321_s20 }
  0x68   : > { %s315_s15 = ssub.s32 %s13325_s21, %s13534_s17  ;;  %p325_p3 = scmp.ne.s32.totalorder %s13321_s20, %s13317_s19 }
  0x69   : > { %p316_p1 = scmp.eq.s32.totalorder %s315_s15, 0  ;;  %p326_p8 = scmp.eq.s32.totalorder %s13325_s21, 0 }
  0x6a   : > { %p331_p9 = scmp.ne.s32.totalorder %s13317_s19, %s13313_s18  ;;  %p14991_p10 = scmp.eq.s32.totalorder %s13459_s24, 0 }
  0x6b   : > { %s13545_s23 = scalar_select %p316_p1, %s13321_s20, %s318_s12  }
  0x6c   : > { %11347 = dma.hbm_to_vmem [thread:$0]  (!%p13473_p6), %s14989_s11, 128, %s537_s14, [#allocation21]  }
  0x6d   : > { %14990 = sst [smem:[#allocation37_spill]] %s13545_s23  ;;  %p327_p11 = por %p326_p8, %p325_p3 }
  0x6e   : > { %p13549_p12 = por %p14991_p10, %p331_p9  ;;  %p381_p13 = scmp.eq.s32.totalorder %s13459_s24, 1 }
  0x6f   : > { %p387_p0 = scmp.eq.s32.totalorder %s10057_s30, 1  ;;  %p11375_p2 = scmp.lt.s32.totalorder %s13325_s21, 2 }
  0x70   : > { %s14992_s27 = scalar_select %p13549_p12, 1, 0 }
  0x71   : > { %s558_s14 = sand.u32 1, %s13325_s21   ;;  %p13556_p4 = por %p381_p13, %p325_p3 }
  0x72   : > { %p13560_p5 = por %p387_p0, %p331_p9  ;;  %s14960_s26 = sand.u32 1, %s13321_s20  }
  0x73   : > { %s14993_s25 = scalar_select %p13556_p4, 1, 0 }
  0x74   : > { %s14994_s22 = scalar_select %p13560_p5, 1, 0 }
  0x75   : > { %s11248_s29 = smul.u32 6144, %s14960_s26  ;;  %p13567_p1 = pnand %p11375_p2, %p327_p11 }
  0x76   : > { %s11216_s30 = smul.u32 768, %s13325_s21  ;;  %s14996_s13 = sld [smem:[#allocation47_spill]] }
  0x77   : > { %s14995_s15 = scalar_select %p13567_p1, 1, 0 }
  0x78   : > { %s562_s5 = scalar_lea.vmem [#allocation23], %s11248_s29  ;;  %s13579_s26 = scalar_lea.sflag [#allocation24], %s558_s14 }
  0x79   : > { %s569_s7 = sshll.u32 %s562_s5, 4  ;;  %p14965_p8 = pneg %p13567_p1  ;;  %s13577_s7 = int_to_ptr.vmem [resolvable:$true] %s569_s7 }
  0x7c   : > { %s13575_s3 = scalar_lea.hbm %s14996_s13, %s11216_s30  ;;  %s13000_s12 = scalar_lea.hbm %s14996_s13, 196608 }
  0x7d   : > { %s12995_s9 = scalar_lea.hbm %s13575_s3, 98304  ;;  %p13001_p10 = scmp.lt.s32.totalorder %s13575_s3, %s14996_s13 }
  0x7e   : > { %p12996_p3 = scmp.ne.s32.totalorder %s13575_s3, %s12995_s9  ;;  %p13002_p13 = scmp.lt.s32.totalorder %s13000_s12, %s12995_s9 }
  0x80   : > { %p12998_p9 = pnand %p14965_p8, %p12996_p3  ;;  %p13003_p0 = por %p13002_p13, %p13001_p10 }
  0x82   : > { %p12999_p11 = pneg %p12998_p9 }
  0x84   : > { %p13004_p2 = pnand %p13003_p0, %p12999_p11 }
  0x86   : > { %13007 = shalt.err (!%p13004_p2)
}
  0x87   : > { %s13008_s5 = scalar_lea.vmem %s13577_s7, 98304  ;;  %s13337_s14 = smov [#allocation23]  }
  0x88   : > { %p13009_p5 = scmp.ne.s32.totalorder %s13577_s7, %s13008_s5  ;;  %s13013_s29 = sshll.u32 %s13337_s14, 4  ;;  %s13014_s29 = int_to_ptr.vmem [resolvable:$false] %s13013_s29 }
  0x89   : > { %s13015_s1 = scalar_lea.vmem %s13014_s29, 196608  ;;  %p13016_p4 = scmp.lt.s32.totalorder %s13577_s7, %s13014_s29 }
  0x8a   : > { %p13011_p3 = pnand %p13009_p5, %p14965_p8  ;;  %p13017_p12 = scmp.lt.s32.totalorder %s13015_s1, %s13008_s5 }
  0x8c   : > { %p13012_p9 = pneg %p13011_p3  ;;  %p13018_p6 = por %p13017_p12, %p13016_p4 }
  0x8e   : > { %p13019_p10 = pnand %p13018_p6, %p13012_p9 }
  0x90   : > { %13022 = shalt.err (!%p13019_p10)
}
  0x91   : > { %s13338_s9 = smov 1536   ;;  %s13339_s11 = smov 768  }
  0x92   : > { %s13340_s23 = smov 48   ;;  %s13341_s30 = smov [#allocation2]  }
  0x93   : > { %11354 = dma.hbm_to_vmem [thread:$0]  (!%p13567_p1), %s13575_s3, 98304, %s13577_s7, %s13579_s26, %s13338_s9, %s13339_s11, %s13340_s23  }
  0x94   : > { %s407_s12 = sshll.u32 %s13341_s30, 4  ;;  %s13342_s14 = smov [#allocation7]   ;;  %s408_s12 = int_to_ptr.vmem [resolvable:$true] %s407_s12 }
  0x95   : > { %s431_s13 = sshll.u32 %s13342_s14, 4  ;;  %s13034_s29 = scalar_lea.vmem %s408_s12, 128  ;;  %s432_s13 = int_to_ptr.vmem [resolvable:$true] %s431_s13 }
  0x96   : > { %p13035_p5 = scmp.ne.s32.totalorder %s408_s12, %s13034_s29  ;;  %p13042_p4 = scmp.lt.s32.totalorder %s408_s12, %s408_s12 }
  0x97   : > { %p13043_p11 = scmp.lt.s32.totalorder %s13034_s29, %s13034_s29 }
  0x98   : > { %p13037_p6 = pnand %p13035_p5, %p13481_p7 }
  0x99   : > { %p13044_p13 = por %p13043_p11, %p13042_p4 }
  0x9a   : > { %p13038_p12 = pneg %p13037_p6 }
  0x9c   : > { %p13045_p0 = pnand %p13044_p13, %p13038_p12 }
  0x9e   : > { %13048 = shalt.err (!%p13045_p0)
}
  0x9f   : > { %p14997_p2 = scmp.ne.s32.totalorder %s14982_s28, 0  ;;  %s14998_s0 = sld [smem:[#allocation38_spill]] }
  0xa0   : > { %s13060_s3 = scalar_lea.vmem %s432_s13, 16  ;;  %s13067_s7 = scalar_lea.vmem %s432_s13, 32 }
  0xa1   : > { %p13061_p3 = scmp.ne.s32.totalorder %s432_s13, %s13060_s3  ;;  %p13068_p5 = scmp.lt.s32.totalorder %s432_s13, %s432_s13 }
  0xa2   : > { %p13069_p6 = scmp.lt.s32.totalorder %s13067_s7, %s13060_s3 }
  0xa3   : > { %p13063_p9 = pnand %p13061_p3, %p13481_p7 }
  0xa4   : > { %p13070_p8 = por %p13069_p6, %p13068_p5 }
  0xa5   : > { %11314 = dma.hbm_to_vmem [thread:$0]  (!%p14997_p2), %s14998_s0, 128, %s408_s12, [#allocation3]  }
  0xa6   : > { %p13064_p10 = pneg %p13063_p9 }
  0xa8   : > { %p13071_p4 = pnand %p13070_p8, %p13064_p10 }
  0xaa   : > { %13074 = shalt.err (!%p13071_p4)
}
  0xab   : > { %s14999_s2 = sld [smem:[#allocation40_spill]]  ;;  %s13343_s23 = smov [#allocation10]  }
  0xac   : > { %s452_s30 = sshll.u32 %s13343_s23, 4  ;;  %s453_s30 = int_to_ptr.vmem [resolvable:$true] %s452_s30 }
  0xad   : > { %s13086_s12 = scalar_lea.vmem %s453_s30, 2048  ;;  %p13094_p0 = scmp.lt.s32.totalorder %s453_s30, %s453_s30 }
  0xae   : > { %p13087_p12 = scmp.ne.s32.totalorder %s453_s30, %s13086_s12  ;;  %p13095_p3 = scmp.lt.s32.totalorder %s13086_s12, %s13086_s12 }
  0xb0   : > { %p13089_p11 = pnand %p13087_p12, %p13481_p7  ;;  %p13096_p9 = por %p13095_p3, %p13094_p0 }
  0xb1   : > { %11320 = dma.hbm_to_vmem [thread:$0]  (!%p14997_p2), %s14999_s2, 16, %s432_s13, [#allocation6]  }
  0xb2   : > { %p13090_p13 = pneg %p13089_p11 }
  0xb4   : > { %p13097_p8 = pnand %p13096_p9, %p13090_p13 }
  0xb6   : > { %13100 = shalt.err (!%p13097_p8)
}
  0xb7   : > { %s13344_s14 = smov 128   ;;  %s13345_s29 = smov 8  }
  0xb8   : > { %11326 = dma.hbm_to_vmem [thread:$0]  (!%p14997_p2), %s14943_s4, 2048, %s453_s30, [#allocation9], %s13344_s14, %s13344_s14, %s13345_s29  }
  0xb9   : > { %s13346_s1 = smov [#allocation13]   ;;  %s13347_s7 = smov [#allocation16]  }
  0xba   : > { %s477_s3 = sshll.u32 %s13346_s1, 4  ;;  %s501_s9 = sshll.u32 %s13347_s7, 4  ;;  %s478_s3 = int_to_ptr.vmem [resolvable:$true] %s477_s3  ;;  %s502_s9 = int_to_ptr.vmem [resolvable:$true] %s501_s9 }
  0xbb   : > { %s13112_s11 = scalar_lea.vmem %s478_s3, 32  ;;  %p13120_p4 = scmp.lt.s32.totalorder %s478_s3, %s478_s3 }
  0xbc   : > { %p13113_p10 = scmp.ne.s32.totalorder %s478_s3, %s13112_s11  ;;  %p13121_p12 = scmp.lt.s32.totalorder %s13112_s11, %s13112_s11 }
  0xbe   : > { %p13115_p5 = pnand %p13113_p10, %p13481_p7  ;;  %p13122_p11 = por %p13121_p12, %p13120_p4 }
  0xc0   : > { %p13116_p6 = pneg %p13115_p5 }
  0xc2   : > { %p13123_p13 = pnand %p13122_p11, %p13116_p6 }
  0xc4   : > { %13126 = shalt.err (!%p13123_p13)
}
  0xc5   : > { %11332 = dma.hbm_to_vmem [thread:$0]  (!%p14997_p2), %s14945_s6, 32, %s478_s3, [#allocation12]  }
  0xc6   : > { %s13138_s12 = scalar_lea.vmem %s502_s9, 64  ;;  %p13146_p8 = scmp.lt.s32.totalorder %s502_s9, %s502_s9 }
  0xc7   : > { %p13139_p0 = scmp.ne.s32.totalorder %s502_s9, %s13138_s12  ;;  %p13147_p10 = scmp.lt.s32.totalorder %s13138_s12, %s13138_s12 }
  0xc9   : > { %p13141_p3 = pnand %p13139_p0, %p13481_p7  ;;  %p13148_p5 = por %p13147_p10, %p13146_p8 }
  0xcb   : > { %p13142_p9 = pneg %p13141_p3 }
  0xcd   : > { %p13149_p1 = pnand %p13148_p5, %p13142_p9 }
  0xcf   : > { %13152 = shalt.err (!%p13149_p1)
}
  0xd0   : > { %11338 = dma.hbm_to_vmem [thread:$0]  (!%p14997_p2), %s14947_s8, 64, %s502_s9, [#allocation15]  }
  0xd1   : > { %s13348_s5 = smov [#allocation19]  }
  0xd2   : > { %s522_s13 = sshll.u32 %s13348_s5, 4  ;;  %s523_s13 = int_to_ptr.vmem [resolvable:$true] %s522_s13 }
  0xd3   : > { %s13164_s1 = scalar_lea.vmem %s523_s13, 32768  ;;  %p13172_p11 = scmp.lt.s32.totalorder %s523_s13, %s523_s13 }
  0xd4   : > { %p13165_p6 = scmp.ne.s32.totalorder %s523_s13, %s13164_s1  ;;  %p13173_p13 = scmp.lt.s32.totalorder %s13164_s1, %s13164_s1 }
  0xd6   : > { %p13167_p4 = pnand %p13165_p6, %p13481_p7  ;;  %p13174_p0 = por %p13173_p13, %p13172_p11 }
  0xd8   : > { %p13168_p12 = pneg %p13167_p4 }
  0xda   : > { %p13175_p3 = pnand %p13174_p0, %p13168_p12 }
  0xdc   : > { %13178 = shalt.err (!%p13175_p3)
}
  0xdd   : > { %s13349_s3 = smov 512   ;;  %s13350_s7 = smov 32  }
  0xde   : > { %11344 = dma.hbm_to_vmem [thread:$0]  (!%p14997_p2), %s14949_s10, 32768, %s523_s13, [#allocation18], %s13349_s3, %s13349_s3, %s13350_s7  }
  0xdf   : > { %s13351_s23 = smov [#allocation22]   ;;  %s15000_s12 = sand.u32 1, %s13321_s20  }
  0xe0   : > { %s547_s30 = sshll.u32 %s13351_s23, 4  ;;  %s11249_s14 = smul.u32 12, %s15000_s12  ;;  %s548_s30 = int_to_ptr.vmem [resolvable:$true] %s547_s30 }
  0xe1   : > { %s11217_s29 = smul.u32 192, %s13325_s21  ;;  %s13190_s5 = scalar_lea.vmem %s548_s30, 128 }
  0xe2   : > { %p13191_p1 = scmp.ne.s32.totalorder %s548_s30, %s13190_s5  ;;  %p13198_p10 = scmp.lt.s32.totalorder %s548_s30, %s548_s30 }
  0xe3   : > { %p13199_p5 = scmp.lt.s32.totalorder %s13190_s5, %s13190_s5 }
  0xe4   : > { %p13193_p9 = pnand %p13191_p1, %p13481_p7 }
  0xe5   : > { %p13200_p6 = por %p13199_p5, %p13198_p10 }
  0xe6   : > { %p13194_p8 = pneg %p13193_p9 }
  0xe8   : > { %p13201_p4 = pnand %p13200_p6, %p13194_p8 }
  0xea   : > { %13204 = shalt.err (!%p13201_p4)
}
  0xeb   : > { %s15001_s3 = sld [smem:[#allocation46_spill]]  ;;  %s583_s12 = scalar_lea.vmem [#allocation25], %s11249_s14 }
  0xec   : > { %s15002_s11 = sld [smem:[#allocation48_spill]]  ;;  %s591_s16 = sshll.u32 %s583_s12, 4  ;;  %s592_s16 = int_to_ptr.vmem [resolvable:$true] %s591_s16 }
  0xed   : > { %p15003_p12 = scmp.ne.s32.totalorder %s14995_s15, 0 }
  0xef   : > { %p15004_p11 = pneg %p15003_p12 }
  0xf1   : > { %11350 = dma.hbm_to_vmem [thread:$0]  (!%p14997_p2), %s15001_s3, 128, %s548_s30, [#allocation21]  }
  0xf2   : > { %s589_s23 = scalar_lea.hbm %s15002_s11, %s11217_s29  ;;  %s13210_s2 = scalar_lea.hbm %s15002_s11, 384 }
  0xf3   : > { %s13205_s0 = scalar_lea.hbm %s589_s23, 192  ;;  %p13211_p2 = scmp.lt.s32.totalorder %s589_s23, %s15002_s11 }
  0xf4   : > { %p13206_p7 = scmp.ne.s32.totalorder %s589_s23, %s13205_s0  ;;  %p13212_p3 = scmp.lt.s32.totalorder %s13210_s2, %s13205_s0 }
  0xf6   : > { %p13208_p13 = pnand %p13206_p7, %p15004_p11  ;;  %p13213_p1 = por %p13212_p3, %p13211_p2 }
  0xf8   : > { %p13209_p0 = pneg %p13208_p13 }
  0xfa   : > { %p13214_p9 = pnand %p13213_p1, %p13209_p0 }
  0xfc   : > { %13217 = shalt.err (!%p13214_p9)
}
  0xfd   : > { %s13218_s30 = scalar_lea.vmem %s592_s16, 192  ;;  %p15005_p10 = pmov %p15004_p11 }
  0xfe   : > { %p13219_p8 = scmp.ne.s32.totalorder %s592_s16, %s13218_s30  ;;  %s13352_s14 = smov [#allocation25]  }
  0xff   : > { %s13223_s29 = sshll.u32 %s13352_s14, 4  ;;  %s13224_s29 = int_to_ptr.vmem [resolvable:$false] %s13223_s29 }
 0x100   : > { %p13221_p5 = pnand %p13219_p8, %p15005_p10  ;;  %s13225_s3 = scalar_lea.vmem %s13224_s29, 384 }
 0x101   : > { %p13226_p4 = scmp.lt.s32.totalorder %s592_s16, %s13224_s29  ;;  %p13227_p7 = scmp.lt.s32.totalorder %s13225_s3, %s13218_s30 }
 0x102   : > { %p13222_p6 = pneg %p13221_p5 }
 0x103   : > { %p13228_p11 = por %p13227_p7, %p13226_p4 }
 0x105   : > { %p13229_p13 = pnand %p13228_p11, %p13222_p6 }
 0x107   : > { %13232 = shalt.err (!%p13229_p13)
}
 0x108   : > { %11357 = dma.hbm_to_vmem [thread:$0]  (!%p15003_p12), %s589_s23, 192, %s592_s16, %s13579_s26  }
 0x109   : > { %s15006_s0 = sld [smem:[#allocation36_spill]] }
 0x10f   : > { %p15007_p0 = scmp.ne.s32.totalorder %s15006_s0, 0 }
 0x110   : > { %p15008_p2 = scmp.eq.s32.totalorder (!%p15007_p0), %s13459_s24, 0 }
 0x111   : > { %600 = sbr.rel (%p15007_p0) target bundleno = 2638 (0xa4e), region = 80 }
 0x116   : > { %13276 = dma.done.wait (%p15008_p2), [#allocation3], 128   ;;  %p15009_p3 = pmov %p15008_p2 }
 0x117   : > { %p15010_p1 = pmov %p15008_p2 }
 0x118   : > { %13278 = vsyncadd (%p15009_p3), [#allocation3], 4294967168 }
 0x119   : > { %13280 = dma.done.wait (%p15010_p1), [#allocation6], 1040   ;;  %p15011_p9 = pmov %p15010_p1 }
 0x11a   : > { %p15012_p8 = pmov %p15010_p1 }
 0x11b   : > { %13282 = vsyncadd (%p15011_p9), [#allocation6], 4294966256 }
 0x11c   : > { %13284 = dma.done.wait (%p15012_p8), [#allocation9], 2064   ;;  %p15013_p12 = pmov %p15010_p1 }
 0x11d   : > { %p15014_p10 = pmov %p15010_p1 }
 0x11e   : > { %13286 = vsyncadd (%p15013_p12), [#allocation9], 4294965232 }
 0x11f   : > { %13288 = dma.done.wait (%p15014_p10), [#allocation12], 64   ;;  %p15015_p5 = pmov %p15010_p1 }
 0x120   : > { %p15016_p6 = pmov %p15010_p1 }
 0x121   : > { %13290 = vsyncadd (%p15015_p5), [#allocation12], 4294967232 }
 0x122   : > { %13292 = dma.done.wait (%p15016_p6), [#allocation15], 8256   ;;  %p15017_p4 = pmov %p15010_p1 }
 0x123   : > { %p15018_p7 = pmov %p15010_p1 }
 0x124   : > { %13294 = vsyncadd (%p15017_p4), [#allocation15], 4294959040 }
 0x125   : > { %13296 = dma.done.wait (%p15018_p7), [#allocation18], 32832   ;;  %p15019_p11 = pmov %p15010_p1 }
 0x126   : > { %p15020_p13 = pmov %p15010_p1 }
 0x127   : > { %13298 = vsyncadd (%p15019_p11), [#allocation18], 4294934464 }
 0x128   : > { %13300 = dma.done.wait (%p15020_p13), [#allocation21], 256   ;;  %p15021_p0 = pmov %p15010_p1 }
 0x129   : > { %s654_s2 = sand.u32 1, %s13459_s24   ;;  %s13708_s26 = sand.u32 1, %s13317_s19  }
 0x12a   : > { %13302 = vsyncadd (%p15021_p0), [#allocation21], 4294967040  ;;  %s11250_s15 = smul.u32 6144, %s13708_s26  ;;  %s655_s7 = scalar_lea.sflag [#allocation24], %s654_s2 }
 0x12b   : > { %p15022_p2 = scmp.ne.s32.totalorder %s14992_s27, 0 }
 0x12c   : > { %s13711_s9 = scalar_lea.vmem [#allocation23], %s11250_s15 }
 0x12d   : > { %13304 = dma.done.wait (%p15022_p2), %s655_s7, 98496  }
 0x12e   : > { %13306 = vsyncadd (%p15022_p2), %s655_s7, 4294868800  ;;  %v13353_v0 = vmov 0.0   ;;  %vm13354_vm0 = vmmov 0   ;;  %v11450_v1 = vld [vmem:[#allocation5 + $0x38] sm:$0xff]   ;;  %v11451_v2 = vld [vmem:[#allocation5 + $0x30] sm:$0xff]   ;;  %v13355_v22 = vmov 0   ;;  %v854_v49 = vlaneseq }
 0x12f   : > { %11228 = vmatprep.subr.bf16.mxu0 %v13353_v0  ;;  %11244 = vmatprep.mubr.msk.bf16.mxu0 %vm13354_vm0, %v13353_v0  ;;  %v11452_v3 = vld [vmem:[#allocation5 + $0x28] sm:$0xff]   ;;  %v11453_v4 = vld [vmem:[#allocation5 + $0x20] sm:$0xff]   ;;  %v11454_v5 = vld [vmem:[#allocation5 + $0x18] sm:$0xff]   ;;  %s11251_s27 = smul.u32 12, %s13708_s26  ;;  %s15023_s30 = sld [smem:[#allocation49_spill]] }
 0x130   : > { %11229 = vmatpush3.bf16.msra.mxu0 %v11450_v1  ;;  %v11455_v6 = vld [vmem:[#allocation5 + $0x10] sm:$0xff]   ;;  %v11456_v7 = vld [vmem:[#allocation5 + $0x8] sm:$0xff]   ;;  %v11457_v8 = vld [vmem:[#allocation5] sm:$0xff]   ;;  %1001 = vmatprep.mubr.bf16.mxu1 %v13355_v22  ;;  %v13717_v50 = vshrl.u32 %v854_v49, 7  ;;  %s11252_s12 = smul.u32 96, %s13708_s26  ;;  %s9827_s29 = scalar_lea.sflag [#allocation4], %s13708_s26 }
 0x131   : > { %11230 = vmatprep.subr.bf16.mxu0 %v13353_v0  ;;  %v723_v9 = vld [vmem:[#allocation2] sm:$0xff]  ;;  %v11461_v13 = vld [vmem:[#allocation10 + $0x64] ss:$8 sps:$4 sm:$0xff]   ;;  %v11463_v14 = vld [vmem:[#allocation10 + $0x60] ss:$8 sps:$4 sm:$0xff]   ;;  %s14329_s23 = scalar_lea.vmem [#allocation25], %s11251_s27 }
 0x132   : > { %v724_v10 = vpack.c.bf16 %v723_v9, %v723_v9  ;;  %v11458_v11 = vld [vmem:[#allocation10 + $0x74] ss:$8 sps:$4 sm:$0xff]   ;;  %v11460_v12 = vld [vmem:[#allocation10 + $0x70] ss:$8 sps:$4 sm:$0xff]   ;;  %v11467_v17 = vld [vmem:[#allocation10 + $0x44] ss:$8 sps:$4 sm:$0xff]  }
 0x133   : > { %969 = vmatprep.subr.bf16.mxu1 %v11458_v11  ;;  %v11464_v15 = vld [vmem:[#allocation10 + $0x54] ss:$8 sps:$4 sm:$0xff]   ;;  %v11466_v16 = vld [vmem:[#allocation10 + $0x50] ss:$8 sps:$4 sm:$0xff]   ;;  %v11469_v18 = vld [vmem:[#allocation10 + $0x40] ss:$8 sps:$4 sm:$0xff]  }
 0x134   : > { %11231 = vmatpush3.bf16.msra.mxu0 %v11451_v2  ;;  %970 = vmatpush1.bf16.msra.mxu1 %v11460_v12  ;;  %v11470_v19 = vld [vmem:[#allocation10 + $0x34] ss:$8 sps:$4 sm:$0xff]   ;;  %v11472_v20 = vld [vmem:[#allocation10 + $0x30] ss:$8 sps:$4 sm:$0xff]   ;;  %v11473_v21 = vld [vmem:[#allocation10 + $0x24] ss:$8 sps:$4 sm:$0xff]  }
 0x135   : > { %11232 = vmatprep.subr.bf16.mxu0 %v13353_v0  ;;  %971 = vmatprep.subr.bf16.mxu1 %v11461_v13  ;;  %v11475_v23 = vld [vmem:[#allocation10 + $0x20] ss:$8 sps:$4 sm:$0xff]   ;;  %v11476_v24 = vld [vmem:[#allocation10 + $0x14] ss:$8 sps:$4 sm:$0xff]   ;;  %v11478_v25 = vld [vmem:[#allocation10 + $0x10] ss:$8 sps:$4 sm:$0xff]  }
 0x136   : > { %v11479_v26 = vld [vmem:[#allocation10 + $0x4] ss:$8 sps:$4 sm:$0xff]   ;;  %v11481_v27 = vld [vmem:[#allocation10] ss:$8 sps:$4 sm:$0xff]   ;;  %v846_v51 = vld [vmem:[#allocation7] sm:$0x1] }
 0x137   : > { %v13720_v52 = vsub.s32 0, %v13717_v50  ;;  %v850_v54 = vld [vmem:[#allocation8] sm:$0x1]  ;;  %v11493_v9 = vld [vmem:[#allocation14 + $0xcc] ss:$16 sps:$4 sm:$0xff]   ;;  %s14395_s16 = scalar_lea.vmem [#allocation26], %s11252_s12 }
 0x138   : > { %11233 = vmatpush3.bf16.msra.mxu0 %v11452_v3  ;;  %972 = vmatpush1.bf16.msra.mxu1 %v11463_v14  ;;  %v11491_v11 = vld [vmem:[#allocation14 + $0xc8] ss:$16 sps:$4 sm:$0xff]   ;;  %v11496_v12 = vld [vmem:[#allocation14 + $0xa4] ss:$16 sps:$4 sm:$0xff]   ;;  %v11499_v13 = vld [vmem:[#allocation14 + $0xac] ss:$16 sps:$4 sm:$0xff]  }
 0x139   : > { %11234 = vmatprep.subr.bf16.mxu0 %v13353_v0  ;;  %973 = vmatprep.subr.bf16.mxu1 %v11464_v15  ;;  %v11494_v14 = vld [vmem:[#allocation14 + $0xa0] ss:$16 sps:$4 sm:$0xff]   ;;  %v11497_v15 = vld [vmem:[#allocation14 + $0xa8] ss:$16 sps:$4 sm:$0xff]   ;;  %v11550_v49 = vld [vmem:[#allocation14 + $0x184] ss:$16 sps:$4 sm:$0xff]  }
 0x13a   : > { %v11506_v22 = vld [vmem:[#allocation14 + $0x60] ss:$16 sps:$4 sm:$0xff]   ;;  %s11218_s5 = smul.u32 1536, %s13459_s24  ;;  %s9841_s28 = sshll.u32 %s14395_s16, 4  ;;  %s9842_s28 = int_to_ptr.vmem [resolvable:$true] %s9841_s28 }
 0x13b   : > { %s13233_s3 = scalar_lea.vmem %s9842_s28, 1536  ;;  %p15024_p1 = scmp.ne.s32.totalorder %s14993_s25, 0 }
 0x13c   : > { %11235 = vmatpush3.bf16.msra.mxu0 %v11453_v4  ;;  %974 = vmatpush1.bf16.msra.mxu1 %v11466_v16  ;;  %v11484_v4 = vld [vmem:[#allocation14 + $0xe4] ss:$16 sps:$4 sm:$0xff]   ;;  %s14901_s14 = scalar_lea.hbm %s15023_s30, %s11218_s5  ;;  %p13234_p3 = scmp.ne.s32.totalorder %s9842_s28, %s13233_s3 }
 0x13d   : > { %11236 = vmatprep.subr.bf16.mxu0 %v13353_v0  ;;  %975 = vmatprep.subr.bf16.mxu1 %v11467_v17  ;;  %v11502_v16 = vld [vmem:[#allocation14 + $0x84] ss:$16 sps:$4 sm:$0xff]   ;;  %v11505_v17 = vld [vmem:[#allocation14 + $0x8c] ss:$16 sps:$4 sm:$0xff]   ;;  %s13357_s0 = smov [#allocation26]  }
 0x13e   : > { %p13235_p9 = pnand %p13234_p3, %p15024_p1  ;;  %s13237_s2 = sshll.u32 %s13357_s0, 4  ;;  %s13238_s2 = int_to_ptr.vmem [resolvable:$false] %s13237_s2 }
 0x13f   : > { %s13239_s24 = scalar_lea.vmem %s13238_s2, 3072  ;;  %p13240_p12 = scmp.lt.s32.totalorder %s9842_s28, %s13238_s2 }
 0x140   : > { %11237 = vmatpush3.bf16.msra.mxu0 %v11454_v5  ;;  %976 = vmatpush1.bf16.msra.mxu1 %v11469_v18  ;;  %v11487_v5 = vld [vmem:[#allocation14 + $0xec] ss:$16 sps:$4 sm:$0xff]   ;;  %v11500_v18 = vld [vmem:[#allocation14 + $0x80] ss:$16 sps:$4 sm:$0xff]   ;;  %p13236_p8 = pneg %p13235_p9  ;;  %p13241_p10 = scmp.lt.s32.totalorder %s13239_s24, %s13233_s3 }
 0x141   : > { %11238 = vmatprep.subr.bf16.mxu0 %v13353_v0  ;;  %977 = vmatprep.subr.bf16.mxu1 %v11470_v19  ;;  %v11503_v19 = vld [vmem:[#allocation14 + $0x88] ss:$16 sps:$4 sm:$0xff]  }
 0x142   : > { %p13242_p5 = por %p13241_p10, %p13240_p12 }
 0x144   : > { %11239 = vmatpush3.bf16.msra.mxu0 %v11455_v6  ;;  %978 = vmatpush1.bf16.msra.mxu1 %v11472_v20  ;;  %v11482_v6 = vld [vmem:[#allocation14 + $0xe0] ss:$16 sps:$4 sm:$0xff]   ;;  %v11508_v20 = vld [vmem:[#allocation14 + $0x64] ss:$16 sps:$4 sm:$0xff]   ;;  %p13243_p6 = pnand %p13242_p5, %p13236_p8 }
 0x145   : > { %11240 = vmatprep.subr.bf16.mxu0 %v13353_v0  ;;  %979 = vmatprep.subr.bf16.mxu1 %v11473_v21  ;;  %v11511_v21 = vld [vmem:[#allocation14 + $0x6c] ss:$16 sps:$4 sm:$0xff]  }
 0x148   : > { %11241 = vmatpush3.bf16.msra.mxu0 %v11456_v7  ;;  %980 = vmatpush1.bf16.msra.mxu1 %v11475_v23  ;;  %v11485_v7 = vld [vmem:[#allocation14 + $0xe8] ss:$16 sps:$4 sm:$0xff]  }
 0x149   : > { %11242 = vmatprep.subr.bf16.mxu0 %v13353_v0  ;;  %981 = vmatprep.subr.bf16.mxu1 %v11476_v24  ;;  %v11509_v23 = vld [vmem:[#allocation14 + $0x68] ss:$16 sps:$4 sm:$0xff]   ;;  %v11514_v24 = vld [vmem:[#allocation14 + $0x44] ss:$16 sps:$4 sm:$0xff]  }
 0x14c   : > { %11243 = vmatpush3.bf16.msra.mxu0 %v11457_v8  ;;  %982 = vmatpush1.bf16.msra.mxu1 %v11478_v25  ;;  %v11490_v8 = vld [vmem:[#allocation14 + $0xc4] ss:$16 sps:$4 sm:$0xff]   ;;  %v11517_v25 = vld [vmem:[#allocation14 + $0x4c] ss:$16 sps:$4 sm:$0xff]  }
 0x14d   : > { %983 = vmatprep.subr.bf16.mxu1 %v11479_v26  ;;  %1510 = vmatprep.subr.bf16.mxu0 %v11484_v4  ;;  %v11512_v26 = vld [vmem:[#allocation14 + $0x40] ss:$16 sps:$4 sm:$0xff]  }
 0x14e   : > { %v11572_v4 = vld [vmem:[#allocation14 + $0x100] ss:$16 sps:$4 sm:$0xff]  }
 0x14f   : > { %11245 = vmatmul.mubr.bf16.vlgmr.msra.gmra.mxu0 %v724_v10  ;;  %v11488_v10 = vld [vmem:[#allocation14 + $0xc0] ss:$16 sps:$4 sm:$0xff]  }
 0x150   : > { %984 = vmatpush1.bf16.msra.mxu1 %v11481_v27  ;;  %1511 = vmatpush1.bf16.msra.mxu0 %v11482_v6  ;;  %v11515_v27 = vld [vmem:[#allocation14 + $0x48] ss:$16 sps:$4 sm:$0xff]  }
 0x151   : > { %1551 = vmatprep.subr.bf16.mxu1 %v11487_v5  ;;  %1512 = vmatprep.subr.bf16.mxu0 %v11490_v8  ;;  %v11575_v5 = vld [vmem:[#allocation14 + $0x108] ss:$16 sps:$4 sm:$0xff]  }
 0x154   : > { %1513 = vmatpush1.bf16.msra.mxu0 %v11488_v10 }
 0x155   : > { %1514 = vmatprep.subr.bf16.mxu0 %v11496_v12 }
 0x158   : > { %1515 = vmatpush1.bf16.msra.mxu0 %v11494_v14 }
 0x159   : > { %1516 = vmatprep.subr.bf16.mxu0 %v11502_v16 }
 0x15c   : > { %1517 = vmatpush1.bf16.msra.mxu0 %v11500_v18 }
 0x15d   : > { %1518 = vmatprep.subr.bf16.mxu0 %v11508_v20 }
 0x160   : > { %1519 = vmatpush1.bf16.msra.mxu0 %v11506_v22 }
 0x161   : > { %1520 = vmatprep.subr.bf16.mxu0 %v11514_v24 }
 0x164   : > { %1521 = vmatpush1.bf16.msra.mxu0 %v11512_v26 }
 0x20f   : > { %v823_v28 = vpop.f32.mrf.mxu0 }
 0x210   : > { %v829_v29 = vrot.slane %v823_v28, 4 }
 0x211   : > { %v11246_v30 = vpop.f32.mrf.mxu0 }
 0x212   : > { %v830_v31 = vadd.f32 %v829_v29, %v823_v28  ;;  %v11523_v29 = vld [vmem:[#allocation14 + $0x2c] ss:$16 sps:$4 sm:$0xff]   ;;  %v11518_v30 = vld [vmem:[#allocation14 + $0x20] ss:$16 sps:$4 sm:$0xff]  }
 0x213   : > { %v826_v32 = vpop.f32.mrf.mxu0 }
 0x214   : > { %v831_v33 = vrot.slane %v830_v31, 2  ;;  %v11526_v32 = vld [vmem:[#allocation14 + $0x4] ss:$16 sps:$4 sm:$0xff]  }
 0x215   : > { %v11247_v34 = vpop.f32.mrf.mxu0 }
 0x216   : > { %v832_v35 = vadd.f32 %v831_v33, %v830_v31  ;;  %v11521_v31 = vld [vmem:[#allocation14 + $0x28] ss:$16 sps:$4 sm:$0xff]   ;;  %v11529_v33 = vld [vmem:[#allocation14 + $0xc] ss:$16 sps:$4 sm:$0xff]   ;;  %v11524_v34 = vld [vmem:[#allocation14] ss:$16 sps:$4 sm:$0xff]  }
 0x218   : > { %v833_v36 = vrot.slane %v832_v35, 1 }
 0x21a   : > { %v834_v37 = vadd.f32 %v833_v36, %v832_v35  ;;  %v11527_v35 = vld [vmem:[#allocation14 + $0x8] ss:$16 sps:$4 sm:$0xff]   ;;  %v11532_v36 = vld [vmem:[#allocation14 + $0x1e4] ss:$16 sps:$4 sm:$0xff]  }
 0x21c   : > { %v836_v38 = vmul.f32 0.125, %v834_v37  ;;  %v11535_v37 = vld [vmem:[#allocation14 + $0x1ec] ss:$16 sps:$4 sm:$0xff]  }
 0x21e   : > { %v837_v39 = vsub.f32 %v823_v28, %v836_v38 }
 0x220   : > { %v838_v40 = vmul.f32 %v837_v39, %v837_v39  ;;  %v11533_v39 = vld [vmem:[#allocation14 + $0x1e8] ss:$16 sps:$4 sm:$0xff]  }
 0x222   : > { %v839_v41 = vrot.slane %v838_v40, 4 }
 0x224   : > { %v840_v42 = vadd.f32 %v839_v41, %v838_v40  ;;  %v11538_v40 = vld [vmem:[#allocation14 + $0x1c4] ss:$16 sps:$4 sm:$0xff]   ;;  %v11541_v41 = vld [vmem:[#allocation14 + $0x1cc] ss:$16 sps:$4 sm:$0xff]  }
 0x226   : > { %v841_v43 = vrot.slane %v840_v42, 2 }
 0x228   : > { %v842_v44 = vadd.f32 %v841_v43, %v840_v42  ;;  %v11536_v42 = vld [vmem:[#allocation14 + $0x1c0] ss:$16 sps:$4 sm:$0xff]   ;;  %v11539_v43 = vld [vmem:[#allocation14 + $0x1c8] ss:$16 sps:$4 sm:$0xff]  }
 0x22a   : > { %v843_v45 = vrot.slane %v842_v44, 1 }
 0x22c   : > { %v844_v46 = vadd.f32 %v843_v45, %v842_v44  ;;  %v11544_v44 = vld [vmem:[#allocation14 + $0x1a4] ss:$16 sps:$4 sm:$0xff]   ;;  %v11547_v45 = vld [vmem:[#allocation14 + $0x1ac] ss:$16 sps:$4 sm:$0xff]  }
 0x22e   : > { %v845_v47 = vmul.f32 0.125, %v844_v46  ;;  %v11542_v46 = vld [vmem:[#allocation14 + $0x1a0] ss:$16 sps:$4 sm:$0xff]  }
 0x230   : > { %v847_v48 = vadd.f32 1e-05, %v845_v47  ;;  %v11545_v47 = vld [vmem:[#allocation14 + $0x1a8] ss:$16 sps:$4 sm:$0xff]  }
 0x232   : > { %12730 = vrsqrt.f32 %v847_v48  ;;  %v11548_v48 = vld [vmem:[#allocation14 + $0x180] ss:$16 sps:$4 sm:$0xff]  }
 0x23f   : > { %v12731_v53 = vpop.eup %12730 }
 0x240   : > { %v849_v55 = vmul.f32 %v12731_v53, %v846_v51  ;;  %v11551_v51 = vld [vmem:[#allocation14 + $0x188] ss:$16 sps:$4 sm:$0xff]   ;;  %v11553_v53 = vld [vmem:[#allocation14 + $0x18c] ss:$16 sps:$4 sm:$0xff]  }
 0x242   : > { %v851_v56 = vmul.f32 %v849_v55, %v836_v38  ;;  %v857_v57 = vrot.slane %v849_v55, %v13720_v52  ;;  %v11530_v38 = vld [vmem:[#allocation14 + $0x1e0] ss:$16 sps:$4 sm:$0xff]   ;;  %v11559_v55 = vld [vmem:[#allocation14 + $0x16c] ss:$16 sps:$4 sm:$0xff]  }
 0x244   : > { %v852_v58 = vsub.f32 %v850_v54, %v851_v56  ;;  %v859_v59 = vmul.f32 %v857_v57, %v823_v28  ;;  %v11520_v28 = vld [vmem:[#allocation14 + $0x24] ss:$16 sps:$4 sm:$0xff]   ;;  %v11554_v56 = vld [vmem:[#allocation14 + $0x160] ss:$16 sps:$4 sm:$0xff]   ;;  %v11557_v57 = vld [vmem:[#allocation14 + $0x168] ss:$16 sps:$4 sm:$0xff]  }
 0x245   : > { %1522 = vmatprep.subr.bf16.mxu0 %v11520_v28  ;;  %v11556_v54 = vld [vmem:[#allocation14 + $0x164] ss:$16 sps:$4 sm:$0xff]  }
 0x246   : > { %v864_v60 = vrot.slane %v852_v58, %v13720_v52  ;;  %1523 = vmatpush1.bf16.msra.mxu0 %v11518_v30  ;;  %v11562_v58 = vld [vmem:[#allocation14 + $0x144] ss:$16 sps:$4 sm:$0xff]  }
 0x247   : > { %1524 = vmatprep.subr.bf16.mxu0 %v11526_v32 }
 0x248   : > { %v866_v61 = vadd.f32 %v864_v60, %v859_v59  ;;  %v11565_v59 = vld [vmem:[#allocation14 + $0x14c] ss:$16 sps:$4 sm:$0xff]   ;;  %v11560_v60 = vld [vmem:[#allocation14 + $0x140] ss:$16 sps:$4 sm:$0xff]  }
 0x24a   : > { %v868_v62 = vmul.f32 0.70710677, %v866_v61  ;;  %v867_v0 = vmul.f32 0.5, %v866_v61  ;;  %1525 = vmatpush1.bf16.msra.mxu0 %v11524_v34  ;;  %v11563_v61 = vld [vmem:[#allocation14 + $0x148] ss:$16 sps:$4 sm:$0xff]  }
 0x24b   : > { %1526 = vmatprep.subr.bf16.mxu0 %v11532_v36 }
 0x24c   : > { %12732 = verf.f32 %v868_v62  ;;  %v11568_v62 = vld [vmem:[#allocation14 + $0x124] ss:$16 sps:$4 sm:$0xff]  }
 0x24e   : > { %1527 = vmatpush2.bf16.msra.mxu0 %v11530_v38 }
 0x24f   : > { %1528 = vmatprep.subr.bf16.mxu0 %v11538_v40 }
 0x252   : > { %1529 = vmatpush2.bf16.msra.mxu0 %v11536_v42 }
 0x253   : > { %1530 = vmatprep.subr.bf16.mxu0 %v11544_v44  ;;  %v13356_v44 = vmov 1966171168  }
 0x256   : > { %1531 = vmatpush2.bf16.msra.mxu0 %v11542_v46 }
 0x257   : > { %1532 = vmatprep.subr.bf16.mxu0 %v11550_v49 }
 0x259   : > { %v12733_v63 = vpop.eup %12732 }
 0x25a   : > { %v870_v1 = vadd.f32 1.0, %v12733_v63  ;;  %1533 = vmatpush2.bf16.msra.mxu0 %v11548_v48  ;;  %v11571_v63 = vld [vmem:[#allocation14 + $0x12c] ss:$16 sps:$4 sm:$0xff]  }
 0x25b   : > { %1534 = vmatprep.subr.bf16.mxu0 %v11556_v54  ;;  %v1042_v54 = vld [vmem:[#allocation11] sm:$0x3] }
 0x25c   : > { %v871_v2 = vmul.f32 %v870_v1, %v867_v0  ;;  %v11566_v0 = vld [vmem:[#allocation14 + $0x120] ss:$16 sps:$4 sm:$0xff]   ;;  %v11569_v1 = vld [vmem:[#allocation14 + $0x128] ss:$16 sps:$4 sm:$0xff]  }
 0x25e   : > { %v872_v3 = vpack.c.bf16 %v871_v2, %v871_v2  ;;  %1535 = vmatpush2.bf16.msra.mxu0 %v11554_v56  ;;  %v11574_v2 = vld [vmem:[#allocation14 + $0x104] ss:$16 sps:$4 sm:$0xff]   ;;  %v13730_v56 = vsub.s32 1, %v13717_v50 }
 0x25f   : > { %1536 = vmatprep.subr.bf16.mxu0 %v11562_v58 }
 0x260   : > { %1002 = vmatmul.mubr.bf16.vlgmr.msra.gmra.mxu1 %v872_v3  ;;  %v11577_v3 = vld [vmem:[#allocation14 + $0x10c] ss:$16 sps:$4 sm:$0xff]  }
 0x261   : > { %1552 = vmatpush1.bf16.msra.mxu1 %v11485_v7 }
 0x262   : > { %1553 = vmatprep.subr.bf16.mxu1 %v11493_v9  ;;  %1537 = vmatpush2.bf16.msra.mxu0 %v11560_v60 }
 0x263   : > { %1538 = vmatprep.subr.bf16.mxu0 %v11568_v62 }
 0x265   : > { %1554 = vmatpush1.bf16.msra.mxu1 %v11491_v11 }
 0x266   : > { %1555 = vmatprep.subr.bf16.mxu1 %v11499_v13  ;;  %1539 = vmatpush2.bf16.msra.mxu0 %v11566_v0  ;;  %v1066_v0 = vld [vmem:[#allocation13] sm:$0x3] }
 0x267   : > { %1540 = vmatprep.subr.bf16.mxu0 %v11574_v2 }
 0x269   : > { %1556 = vmatpush1.bf16.msra.mxu1 %v11497_v15 }
 0x26a   : > { %1557 = vmatprep.subr.bf16.mxu1 %v11505_v17  ;;  %1541 = vmatpush2.bf16.msra.mxu0 %v11572_v4 }
 0x26d   : > { %1558 = vmatpush1.bf16.msra.mxu1 %v11503_v19 }
 0x26e   : > { %1559 = vmatprep.subr.bf16.mxu1 %v11511_v21 }
 0x271   : > { %1560 = vmatpush1.bf16.msra.mxu1 %v11509_v23 }
 0x272   : > { %1561 = vmatprep.subr.bf16.mxu1 %v11517_v25 }
 0x275   : > { %1562 = vmatpush1.bf16.msra.mxu1 %v11515_v27 }
 0x276   : > { %1563 = vmatprep.subr.bf16.mxu1 %v11523_v29 }
 0x279   : > { %1564 = vmatpush1.bf16.msra.mxu1 %v11521_v31 }
 0x27a   : > { %1565 = vmatprep.subr.bf16.mxu1 %v11529_v33 }
 0x27d   : > { %1566 = vmatpush1.bf16.msra.mxu1 %v11527_v35 }
 0x27e   : > { %1567 = vmatprep.subr.bf16.mxu1 %v11535_v37 }
 0x281   : > { %1568 = vmatpush2.bf16.msra.mxu1 %v11533_v39 }
 0x282   : > { %1569 = vmatprep.subr.bf16.mxu1 %v11541_v41 }
 0x285   : > { %1570 = vmatpush2.bf16.msra.mxu1 %v11539_v43 }
 0x286   : > { %1571 = vmatprep.subr.bf16.mxu1 %v11547_v45  ;;  %v1051_v45 = vunpack.c.l.s4 %v13356_v44 }
 0x288   : > { %v1052_v46 = vunpack.c.0.s8 %v1051_v45  ;;  %v1836_v45 = vld [vmem:[#allocation19 + $0x100] sm:$0xff] }
 0x289   : > { %1572 = vmatpush2.bf16.msra.mxu1 %v11545_v47 }
 0x28a   : > { %1573 = vmatprep.subr.bf16.mxu1 %v11553_v53  ;;  %v13725_v48 = vsub.s32 %v1052_v46, %v13717_v50  ;;  %v1840_v46 = vld [vmem:[#allocation19 + $0x120] sm:$0xff] }
 0x28d   : > { %1574 = vmatpush2.bf16.msra.mxu1 %v11551_v51 }
 0x28e   : > { %1575 = vmatprep.subr.bf16.mxu1 %v11559_v55 }
 0x291   : > { %1576 = vmatpush2.bf16.msra.mxu1 %v11557_v57 }
 0x292   : > { %1577 = vmatprep.subr.bf16.mxu1 %v11565_v59 }
 0x295   : > { %1578 = vmatpush2.bf16.msra.mxu1 %v11563_v61 }
 0x296   : > { %1579 = vmatprep.subr.bf16.mxu1 %v11571_v63 }
 0x299   : > { %1580 = vmatpush2.bf16.msra.mxu1 %v11569_v1 }
 0x29a   : > { %1581 = vmatprep.subr.bf16.mxu1 %v11577_v3 }
 0x29d   : > { %1582 = vmatpush2.bf16.msra.mxu1 %v11575_v5 }
 0x320   : > { %v1003_v6 = vpop.f32.mrf.mxu1 }
 0x321   : > { %v1010_v7 = vrot.slane %v1003_v6, 4 }
 0x322   : > { %v1005_v8 = vpop.f32.mrf.mxu1 }
 0x323   : > { %v1011_v9 = vadd.f32 %v1010_v7, %v1003_v6  ;;  %v1016_v10 = vrot.slane %v1005_v8, 4 }
 0x324   : > { %v1007_v11 = vpop.f32.mrf.mxu1 }
 0x325   : > { %v1012_v12 = vrot.slane %v1011_v9, 2  ;;  %v1017_v13 = vadd.f32 %v1016_v10, %v1005_v8 }
 0x326   : > { %v1008_v14 = vpop.f32.mrf.mxu1 }
 0x327   : > { %v1013_v15 = vadd.f32 %v1012_v12, %v1011_v9  ;;  %v1018_v16 = vrot.slane %v1017_v13, 2 }
 0x329   : > { %v1014_v17 = vrot.slane %v1013_v15, 1  ;;  %v1019_v18 = vadd.f32 %v1018_v16, %v1017_v13 }
 0x32b   : > { %v1015_v19 = vadd.f32 %v1014_v17, %v1013_v15  ;;  %v1020_v20 = vrot.slane %v1019_v18, 1 }
 0x32d   : > { %v1022_v21 = vmul.f32 0.125, %v1015_v19  ;;  %v1021_v22 = vadd.f32 %v1020_v20, %v1019_v18 }
 0x32f   : > { %v1024_v23 = vsub.f32 %v1003_v6, %v1022_v21  ;;  %v1023_v24 = vmul.f32 0.125, %v1021_v22  ;;  %v1864_v22 = vld [vmem:[#allocation19 + $0x1e0] sm:$0xff] }
 0x331   : > { %v1026_v25 = vmul.f32 %v1024_v23, %v1024_v23  ;;  %v1025_v26 = vsub.f32 %v1005_v8, %v1023_v24  ;;  %v1988_v23 = vld [vmem:[#allocation19 + $0x5c0] sm:$0xff] }
 0x333   : > { %v1028_v27 = vrot.slane %v1026_v25, 4  ;;  %v1027_v28 = vmul.f32 %v1025_v26, %v1025_v26 }
 0x335   : > { %v1029_v29 = vadd.f32 %v1028_v27, %v1026_v25  ;;  %v1034_v30 = vrot.slane %v1027_v28, 4  ;;  %v1992_v25 = vld [vmem:[#allocation19 + $0x5e0] sm:$0xff] }
 0x336   : > { %v10361_v27 = vcombine.low %v1988_v23, %v1992_v25 }
 0x337   : > { %v1030_v31 = vrot.slane %v1029_v29, 2  ;;  %v1035_v32 = vadd.f32 %v1034_v30, %v1027_v28  ;;  %v10362_v28 = vcombine.high %v1988_v23, %v1992_v25  ;;  %v1856_v30 = vld [vmem:[#allocation19 + $0x1a0] sm:$0xff] }
 0x338   : > { %v1924_v25 = vld [vmem:[#allocation19 + $0x3c0] sm:$0xff] }
 0x339   : > { %v1031_v33 = vadd.f32 %v1030_v31, %v1029_v29  ;;  %v1036_v34 = vrot.slane %v1035_v32, 2  ;;  %3381 = vmatprep.subr.bf16.mxu1 %v10362_v28  ;;  %v1852_v29 = vld [vmem:[#allocation19 + $0x180] sm:$0xff] }
 0x33a   : > { %v1980_v31 = vld [vmem:[#allocation19 + $0x580] sm:$0xff] }
 0x33b   : > { %v1032_v35 = vrot.slane %v1031_v33, 1  ;;  %v1037_v36 = vadd.f32 %v1036_v34, %v1035_v32  ;;  %v10226_v32 = vcombine.high %v1852_v29, %v1856_v30  ;;  %v10225_v34 = vcombine.low %v1852_v29, %v1856_v30  ;;  %v2056_v29 = vld [vmem:[#allocation19 + $0x7e0] sm:$0xff] }
 0x33d   : > { %v1033_v37 = vadd.f32 %v1032_v35, %v1031_v33  ;;  %v1038_v38 = vrot.slane %v1037_v36, 1  ;;  %v1984_v33 = vld [vmem:[#allocation19 + $0x5a0] sm:$0xff] }
 0x33e   : > { %v10353_v35 = vcombine.low %v1980_v31, %v1984_v33 }
 0x33f   : > { %v1040_v39 = vmul.f32 0.125, %v1033_v37  ;;  %v1039_v40 = vadd.f32 %v1038_v38, %v1037_v36  ;;  %v10354_v36 = vcombine.high %v1980_v31, %v1984_v33  ;;  %v1844_v37 = vld [vmem:[#allocation19 + $0x140] sm:$0xff] }
 0x340   : > { %v1848_v38 = vld [vmem:[#allocation19 + $0x160] sm:$0xff] }
 0x341   : > { %v1043_v41 = vadd.f32 1e-05, %v1040_v39  ;;  %v1041_v42 = vmul.f32 0.125, %v1039_v40  ;;  %v1972_v39 = vld [vmem:[#allocation19 + $0x540] sm:$0xff]  ;;  %v10218_v40 = vcombine.high %v1844_v37, %v1848_v38 }
 0x342   : > { %v1916_v33 = vld [vmem:[#allocation19 + $0x380] sm:$0xff] }
 0x343   : > { %v1044_v43 = vadd.f32 1e-05, %v1041_v42  ;;  %12734 = vrsqrt.f32 %v1043_v41  ;;  %v1976_v41 = vld [vmem:[#allocation19 + $0x560] sm:$0xff]  ;;  %v10217_v42 = vcombine.low %v1844_v37, %v1848_v38 }
 0x344   : > { %v10346_v44 = vcombine.high %v1972_v39, %v1976_v41  ;;  %v2048_v37 = vld [vmem:[#allocation19 + $0x7a0] sm:$0xff] }
 0x345   : > { %12736 = vrsqrt.f32 %v1044_v43  ;;  %v10345_v43 = vcombine.low %v1972_v39, %v1976_v41  ;;  %v1908_v41 = vld [vmem:[#allocation19 + $0x340] sm:$0xff] }
 0x350   : > { %v12735_v47 = vpop.eup %12734 }
 0x352   : > { %v12737_v49 = vpop.eup %12736 }
 0x353   : > { %v1049_v51 = vcombine.low %v12735_v47, %v12737_v49  ;;  %v1964_v47 = vld [vmem:[#allocation19 + $0x500] sm:$0xff]  ;;  %v10210_v49 = vcombine.high %v1836_v45, %v1840_v46 }
 0x355   : > { %v1056_v53 = vrot.slane %v1049_v51, %v13725_v48  ;;  %v1968_v51 = vld [vmem:[#allocation19 + $0x520] sm:$0xff] }
 0x357   : > { %v1063_v55 = vrot.slane %v1056_v53, %v13725_v48  ;;  %v10209_v53 = vcombine.low %v1836_v45, %v1840_v46  ;;  %v2040_v45 = vld [vmem:[#allocation19 + $0x760] sm:$0xff] }
 0x359   : > { %v1065_v57 = vmul.f32 %v1063_v55, %v1042_v54  ;;  %v10337_v54 = vcombine.low %v1964_v47, %v1968_v51  ;;  %v10338_v55 = vcombine.high %v1964_v47, %v1968_v51  ;;  %v1900_v51 = vld [vmem:[#allocation19 + $0x300] sm:$0xff] }
 0x35b   : > { %v1071_v58 = vrot.slane %v1065_v57, %v13720_v52  ;;  %v1075_v59 = vrot.slane %v1065_v57, %v13730_v56  ;;  %v1828_v57 = vld [vmem:[#allocation19 + $0xc0] sm:$0xff] }
 0x35d   : > { %v1078_v60 = vmul.f32 %v1071_v58, %v1022_v21  ;;  %v1079_v61 = vmul.f32 %v1075_v59, %v1023_v24  ;;  %v1099_v3 = vmul.f32 %v1071_v58, %v1003_v6  ;;  %v1100_v4 = vmul.f32 %v1075_v59, %v1005_v8  ;;  %v1860_v21 = vld [vmem:[#allocation19 + $0x1c0] sm:$0xff] }
 0x35e   : > { %v10234_v24 = vcombine.high %v1860_v21, %v1864_v22  ;;  %v10233_v26 = vcombine.low %v1860_v21, %v1864_v22  ;;  %v1832_v58 = vld [vmem:[#allocation19 + $0xe0] sm:$0xff] }
 0x35f   : > { %v1082_v62 = vcombine.low %v1078_v60, %v1079_v61  ;;  %v1956_v59 = vld [vmem:[#allocation19 + $0x4c0] sm:$0xff]  ;;  %v10202_v60 = vcombine.high %v1828_v57, %v1832_v58 }
 0x360   : > { %3340 = vmatprep.subr.bf16.mxu0 %v10234_v24  ;;  %v1960_v61 = vld [vmem:[#allocation19 + $0x4e0] sm:$0xff] }
 0x361   : > { %v1089_v63 = vrot.slane %v1082_v62, %v13725_v48  ;;  %v10201_v62 = vcombine.low %v1828_v57, %v1832_v58  ;;  %v1936_v21 = vld [vmem:[#allocation19 + $0x420] sm:$0xff] }
 0x362   : > { %v2032_v57 = vld [vmem:[#allocation19 + $0x720] sm:$0xff] }
 0x363   : > { %v1096_v1 = vrot.slane %v1089_v63, %v13725_v48  ;;  %v10329_v63 = vcombine.low %v1956_v59, %v1960_v61 }
 0x365   : > { %v1098_v2 = vsub.f32 %v1066_v0, %v1096_v1  ;;  %v10330_v0 = vcombine.high %v1956_v59, %v1960_v61  ;;  %v1820_v1 = vld [vmem:[#allocation19 + $0x80] sm:$0xff] }
 0x366   : > { %v1892_v61 = vld [vmem:[#allocation19 + $0x2c0] sm:$0xff] }
 0x367   : > { %v1105_v5 = vrot.slane %v1098_v2, %v13720_v52  ;;  %v1109_v7 = vrot.slane %v1098_v2, %v13730_v56  ;;  %v1824_v2 = vld [vmem:[#allocation19 + $0xa0] sm:$0xff] }
 0x369   : > { %v1113_v9 = vadd.f32 %v1109_v7, %v1100_v4  ;;  %v1112_v10 = vadd.f32 %v1105_v5, %v1099_v3  ;;  %v1948_v3 = vld [vmem:[#allocation19 + $0x480] sm:$0xff]  ;;  %v10194_v4 = vcombine.high %v1820_v1, %v1824_v2  ;;  %v10193_v7 = vcombine.low %v1820_v1, %v1824_v2 }
 0x36a   : > { %v1952_v5 = vld [vmem:[#allocation19 + $0x4a0] sm:$0xff] }
 0x36b   : > { %v1117_v11 = vmul.f32 0.70710677, %v1113_v9  ;;  %v1116_v12 = vmul.f32 0.70710677, %v1112_v10  ;;  %v1115_v15 = vmul.f32 0.5, %v1113_v9  ;;  %v1114_v17 = vmul.f32 0.5, %v1112_v10 }
 0x36c   : > { %v10321_v9 = vcombine.low %v1948_v3, %v1952_v5  ;;  %v10322_v10 = vcombine.high %v1948_v3, %v1952_v5  ;;  %v2024_v1 = vld [vmem:[#allocation19 + $0x6e0] sm:$0xff] }
 0x36d   : > { %12738 = verf.f32 %v1117_v11  ;;  %v1812_v11 = vld [vmem:[#allocation19 + $0x40] sm:$0xff] }
 0x36e   : > { %12740 = verf.f32 %v1116_v12  ;;  %v1816_v12 = vld [vmem:[#allocation19 + $0x60] sm:$0xff] }
 0x36f   : > { %v1884_v2 = vld [vmem:[#allocation19 + $0x280] sm:$0xff] }
 0x370   : > { %v1888_v3 = vld [vmem:[#allocation19 + $0x2a0] sm:$0xff] }
 0x37a   : > { %v12739_v13 = vpop.eup %12738 }
 0x37b   : > { %v12741_v14 = vpop.eup %12740  ;;  %v1121_v16 = vadd.f32 1.0, %v12739_v13  ;;  %v10186_v13 = vcombine.high %v1812_v11, %v1816_v12 }
 0x37c   : > { %v1120_v18 = vadd.f32 1.0, %v12741_v14  ;;  %v1940_v14 = vld [vmem:[#allocation19 + $0x440] sm:$0xff] }
 0x37d   : > { %v1123_v19 = vmul.f32 %v1121_v16, %v1115_v15  ;;  %v1944_v15 = vld [vmem:[#allocation19 + $0x460] sm:$0xff]  ;;  %v10185_v16 = vcombine.low %v1812_v11, %v1816_v12  ;;  %v10258_v11 = vcombine.high %v1884_v2, %v1888_v3 }
 0x37e   : > { %v1122_v20 = vmul.f32 %v1120_v18, %v1114_v17  ;;  %v10313_v17 = vcombine.low %v1940_v14, %v1944_v15  ;;  %v10314_v18 = vcombine.high %v1940_v14, %v1944_v15  ;;  %v1880_v14 = vld [vmem:[#allocation19 + $0x260] sm:$0xff] }
 0x37f   : > { %v1125_v6 = vpack.c.bf16 %v1123_v19, %v1123_v19  ;;  %v1804_v19 = vld [vmem:[#allocation19] sm:$0xff] }
 0x380   : > { %v1124_v8 = vpack.c.bf16 %v1122_v20, %v1122_v20  ;;  %v1808_v20 = vld [vmem:[#allocation19 + $0x20] sm:$0xff] }
 0x381   : > { %1542 = vmatprep.mubr.bf16.mxu0 %v1125_v6  ;;  %1583 = vmatprep.mubr.bf16.mxu1 %v1125_v6  ;;  %v1932_v6 = vld [vmem:[#allocation19 + $0x400] sm:$0xff]  ;;  %v10177_v22 = vcombine.low %v1804_v19, %v1808_v20 }
 0x382   : > { %1543 = vmatmul.mubr.bf16.vlgmr.msra.gmra.mxu0 %v1124_v8  ;;  %1584 = vmatmul.mubr.bf16.vlgmr.msra.gmra.mxu1 %v1124_v8  ;;  %v10178_v8 = vcombine.high %v1804_v19, %v1808_v20  ;;  %v10305_v23 = vcombine.low %v1932_v6, %v1936_v21  ;;  %v10306_v24 = vcombine.high %v1932_v6, %v1936_v21  ;;  %v2004_v15 = vld [vmem:[#allocation19 + $0x640] sm:$0xff] }
 0x383   : > { %3341 = vmatpush1.bf16.msra.mxu0 %v10233_v26  ;;  %3382 = vmatpush1.bf16.msra.mxu1 %v10361_v27  ;;  %v1928_v26 = vld [vmem:[#allocation19 + $0x3e0] sm:$0xff] }
 0x384   : > { %3342 = vmatprep.subr.bf16.mxu0 %v10226_v32  ;;  %3383 = vmatprep.subr.bf16.mxu1 %v10354_v36  ;;  %v2052_v27 = vld [vmem:[#allocation19 + $0x7c0] sm:$0xff]  ;;  %v10298_v28 = vcombine.high %v1924_v25, %v1928_v26  ;;  %v10297_v30 = vcombine.low %v1924_v25, %v1928_v26 }
 0x385   : > { %v10425_v31 = vcombine.low %v2052_v27, %v2056_v29  ;;  %v10426_v32 = vcombine.high %v2052_v27, %v2056_v29  ;;  %v1868_v6 = vld [vmem:[#allocation19 + $0x200] sm:$0xff]  ;;  %v13738_v29 = vld [vmem:[#allocation19 + $0x1c8] sm:$0xff] }
 0x386   : > { %v1996_v21 = vld [vmem:[#allocation19 + $0x600] sm:$0xff] }
 0x387   : > { %3343 = vmatpush1.bf16.msra.mxu0 %v10225_v34  ;;  %3384 = vmatpush1.bf16.msra.mxu1 %v10353_v35  ;;  %v1920_v34 = vld [vmem:[#allocation19 + $0x3a0] sm:$0xff] }
 0x388   : > { %3344 = vmatprep.subr.bf16.mxu0 %v10218_v40  ;;  %3385 = vmatprep.subr.bf16.mxu1 %v10346_v44  ;;  %v2044_v35 = vld [vmem:[#allocation19 + $0x780] sm:$0xff]  ;;  %v10290_v36 = vcombine.high %v1916_v33, %v1920_v34  ;;  %v10289_v38 = vcombine.low %v1916_v33, %v1920_v34  ;;  %v13746_v33 = vld [vmem:[#allocation19 + $0x5e8] sm:$0xff] }
 0x389   : > { %v10417_v39 = vcombine.low %v2044_v35, %v2048_v37  ;;  %v10418_v40 = vcombine.high %v2044_v35, %v2048_v37 }
 0x38b   : > { %3345 = vmatpush1.bf16.msra.mxu0 %v10217_v42  ;;  %3386 = vmatpush1.bf16.msra.mxu1 %v10345_v43  ;;  %v1912_v42 = vld [vmem:[#allocation19 + $0x360] sm:$0xff] }
 0x38c   : > { %3346 = vmatprep.subr.bf16.mxu0 %v10210_v49  ;;  %3387 = vmatprep.subr.bf16.mxu1 %v10338_v55  ;;  %v2036_v43 = vld [vmem:[#allocation19 + $0x740] sm:$0xff]  ;;  %v10282_v44 = vcombine.high %v1908_v41, %v1912_v42  ;;  %v10281_v46 = vcombine.low %v1908_v41, %v1912_v42 }
 0x38d   : > { %v10409_v47 = vcombine.low %v2036_v43, %v2040_v45  ;;  %v10410_v49 = vcombine.high %v2036_v43, %v2040_v45 }
 0x38f   : > { %3347 = vmatpush1.bf16.msra.mxu0 %v10209_v53  ;;  %3388 = vmatpush1.bf16.msra.mxu1 %v10337_v54  ;;  %v1904_v53 = vld [vmem:[#allocation19 + $0x320] sm:$0xff] }
 0x390   : > { %3348 = vmatprep.subr.bf16.mxu0 %v10202_v60  ;;  %3389 = vmatprep.subr.bf16.mxu1 %v10330_v0  ;;  %v2028_v54 = vld [vmem:[#allocation19 + $0x700] sm:$0xff]  ;;  %v10274_v55 = vcombine.high %v1900_v51, %v1904_v53  ;;  %v10273_v58 = vcombine.low %v1900_v51, %v1904_v53 }
 0x391   : > { %v10401_v59 = vcombine.low %v2028_v54, %v2032_v57  ;;  %v10402_v60 = vcombine.high %v2028_v54, %v2032_v57 }
 0x393   : > { %3349 = vmatpush1.bf16.msra.mxu0 %v10201_v62  ;;  %3390 = vmatpush1.bf16.msra.mxu1 %v10329_v63  ;;  %v1896_v62 = vld [vmem:[#allocation19 + $0x2e0] sm:$0xff] }
 0x394   : > { %3350 = vmatprep.subr.bf16.mxu0 %v10194_v4  ;;  %3391 = vmatprep.subr.bf16.mxu1 %v10322_v10  ;;  %v2020_v63 = vld [vmem:[#allocation19 + $0x6c0] sm:$0xff]  ;;  %v10266_v0 = vcombine.high %v1892_v61, %v1896_v62  ;;  %v10265_v4 = vcombine.low %v1892_v61, %v1896_v62 }
 0x395   : > { %v10394_v5 = vcombine.high %v2020_v63, %v2024_v1  ;;  %v10393_v10 = vcombine.low %v2020_v63, %v2024_v1 }
 0x397   : > { %3351 = vmatpush1.bf16.msra.mxu0 %v10193_v7  ;;  %3392 = vmatpush1.bf16.msra.mxu1 %v10321_v9  ;;  %v2012_v7 = vld [vmem:[#allocation19 + $0x680] sm:$0xff] }
 0x398   : > { %3352 = vmatprep.subr.bf16.mxu0 %v10186_v13  ;;  %3393 = vmatprep.subr.bf16.mxu1 %v10314_v18  ;;  %v2016_v9 = vld [vmem:[#allocation19 + $0x6a0] sm:$0xff] }
 0x399   : > { %v10386_v12 = vcombine.high %v2012_v7, %v2016_v9  ;;  %v1876_v13 = vld [vmem:[#allocation19 + $0x240] sm:$0xff]  ;;  %v10385_v18 = vcombine.low %v2012_v7, %v2016_v9 }
 0x39a   : > { %v10250_v19 = vcombine.high %v1876_v13, %v1880_v14 }
 0x39b   : > { %3353 = vmatpush1.bf16.msra.mxu0 %v10185_v16  ;;  %3394 = vmatpush1.bf16.msra.mxu1 %v10313_v17  ;;  %v2008_v16 = vld [vmem:[#allocation19 + $0x660] sm:$0xff]  ;;  %v10257_v17 = vcombine.low %v1884_v2, %v1888_v3 }
 0x39c   : > { %3354 = vmatprep.subr.bf16.mxu0 %v10178_v8  ;;  %3395 = vmatprep.subr.bf16.mxu1 %v10306_v24  ;;  %v10378_v20 = vcombine.high %v2004_v15, %v2008_v16  ;;  %v1872_v8 = vld [vmem:[#allocation19 + $0x220] sm:$0xff]  ;;  %v10377_v24 = vcombine.low %v2004_v15, %v2008_v16 }
 0x39d   : > { %v10242_v25 = vcombine.high %v1868_v6, %v1872_v8  ;;  %v10241_v27 = vcombine.low %v1868_v6, %v1872_v8 }
 0x39f   : > { %3355 = vmatpush1.bf16.msra.mxu0 %v10177_v22  ;;  %3396 = vmatpush1.bf16.msra.mxu1 %v10305_v23  ;;  %v2000_v22 = vld [vmem:[#allocation19 + $0x620] sm:$0xff]  ;;  %v10249_v23 = vcombine.low %v1876_v13, %v1880_v14 }
 0x3a0   : > { %3356 = vmatprep.subr.bf16.mxu0 %v10298_v28  ;;  %3397 = vmatprep.subr.bf16.mxu1 %v10426_v32  ;;  %v10370_v26 = vcombine.high %v1996_v21, %v2000_v22  ;;  %v10369_v28 = vcombine.low %v1996_v21, %v2000_v22 }
 0x3a3   : > { %3357 = vmatpush2.bf16.msra.mxu0 %v10297_v30  ;;  %3398 = vmatpush2.bf16.msra.mxu1 %v10425_v31  ;;  %v13740_v30 = vld [vmem:[#allocation19 + $0x1e8] sm:$0xff] }
 0x3a4   : > { %3358 = vmatprep.subr.bf16.mxu0 %v10290_v36  ;;  %3399 = vmatprep.subr.bf16.mxu1 %v10418_v40  ;;  %v13742_v31 = vld [vmem:[#allocation19 + $0x5c8] sm:$0xff]  ;;  %v10236_v32 = vcombine.high %v13738_v29, %v13740_v30  ;;  %v10235_v34 = vcombine.low %v13738_v29, %v13740_v30 }
 0x3a5   : > { %v10363_v35 = vcombine.low %v13742_v31, %v13746_v33  ;;  %v10364_v36 = vcombine.high %v13742_v31, %v13746_v33 }
 0x3a7   : > { %3359 = vmatpush2.bf16.msra.mxu0 %v10289_v38  ;;  %3400 = vmatpush2.bf16.msra.mxu1 %v10417_v39 }
 0x3a8   : > { %3360 = vmatprep.subr.bf16.mxu0 %v10282_v44  ;;  %3401 = vmatprep.subr.bf16.mxu1 %v10410_v49 }
 0x3ab   : > { %3361 = vmatpush2.bf16.msra.mxu0 %v10281_v46  ;;  %3402 = vmatpush2.bf16.msra.mxu1 %v10409_v47 }
 0x3ac   : > { %3362 = vmatprep.subr.bf16.mxu0 %v10274_v55  ;;  %3403 = vmatprep.subr.bf16.mxu1 %v10402_v60 }
 0x3af   : > { %3363 = vmatpush2.bf16.msra.mxu0 %v10273_v58  ;;  %3404 = vmatpush2.bf16.msra.mxu1 %v10401_v59 }
 0x3b0   : > { %3364 = vmatprep.subr.bf16.mxu0 %v10266_v0  ;;  %3405 = vmatprep.subr.bf16.mxu1 %v10394_v5 }
 0x3b3   : > { %3365 = vmatpush2.bf16.msra.mxu0 %v10265_v4  ;;  %3406 = vmatpush2.bf16.msra.mxu1 %v10393_v10 }
 0x3b4   : > { %3366 = vmatprep.subr.bf16.mxu0 %v10258_v11  ;;  %3407 = vmatprep.subr.bf16.mxu1 %v10386_v12 }
 0x3b7   : > { %3367 = vmatpush2.bf16.msra.mxu0 %v10257_v17  ;;  %3408 = vmatpush2.bf16.msra.mxu1 %v10385_v18 }
 0x3b8   : > { %3368 = vmatprep.subr.bf16.mxu0 %v10250_v19  ;;  %3409 = vmatprep.subr.bf16.mxu1 %v10378_v20 }
 0x3bb   : > { %3369 = vmatpush2.bf16.msra.mxu0 %v10249_v23  ;;  %3410 = vmatpush2.bf16.msra.mxu1 %v10377_v24 }
 0x3bc   : > { %3370 = vmatprep.subr.bf16.mxu0 %v10242_v25  ;;  %3411 = vmatprep.subr.bf16.mxu1 %v10370_v26 }
 0x3bf   : > { %3371 = vmatpush2.bf16.msra.mxu0 %v10241_v27  ;;  %3412 = vmatpush2.bf16.msra.mxu1 %v10369_v28 }
 0x3c0   : > { %3422 = vmatprep.subr.bf16.mxu0 %v10236_v32  ;;  %3463 = vmatprep.subr.bf16.mxu1 %v10364_v36 }
 0x442   : > { %v13754_v37 = vpop.f32.mrf.mxu0  ;;  %v13756_v38 = vpop.f32.mrf.mxu1 }
 0x443   : > { %v1592_v39 = vrot.slane %v13754_v37, 4  ;;  %v1604_v40 = vrot.slane %v13756_v38, 4 }
 0x444   : > { %v13760_v41 = vpop.f32.mrf.mxu0  ;;  %v13762_v42 = vpop.f32.mrf.mxu1 }
 0x445   : > { %v1593_v43 = vadd.f32 %v1592_v39, %v13754_v37  ;;  %v1605_v44 = vadd.f32 %v1604_v40, %v13756_v38  ;;  %v1598_v45 = vrot.slane %v13760_v41, 4  ;;  %v1610_v46 = vrot.slane %v13762_v42, 4 }
 0x446   : > { %v1548_v47 = vpop.f32.mrf.mxu0  ;;  %v1589_v49 = vpop.f32.mrf.mxu1 }
 0x447   : > { %v1594_v51 = vrot.slane %v1593_v43, 2  ;;  %v1606_v53 = vrot.slane %v1605_v44, 2  ;;  %v1599_v54 = vadd.f32 %v1598_v45, %v13760_v41  ;;  %v1611_v55 = vadd.f32 %v1610_v46, %v13762_v42 }
 0x448   : > { %v1549_v57 = vpop.f32.mrf.mxu0  ;;  %v1590_v58 = vpop.f32.mrf.mxu1 }
 0x449   : > { %v1595_v59 = vadd.f32 %v1594_v51, %v1593_v43  ;;  %v1607_v60 = vadd.f32 %v1606_v53, %v1605_v44  ;;  %v1600_v61 = vrot.slane %v1599_v54, 2  ;;  %v1612_v62 = vrot.slane %v1611_v55, 2 }
 0x44b   : > { %v1596_v63 = vrot.slane %v1595_v59, 1  ;;  %v1608_v0 = vrot.slane %v1607_v60, 1  ;;  %v1601_v1 = vadd.f32 %v1600_v61, %v1599_v54  ;;  %v1613_v2 = vadd.f32 %v1612_v62, %v1611_v55 }
 0x44d   : > { %v1597_v3 = vadd.f32 %v1596_v63, %v1595_v59  ;;  %v1609_v4 = vadd.f32 %v1608_v0, %v1607_v60  ;;  %v1602_v5 = vrot.slane %v1601_v1, 1  ;;  %v1614_v7 = vrot.slane %v1613_v2, 1 }
 0x44f   : > { %v13770_v9 = vmul.f32 0.125, %v1597_v3  ;;  %v13772_v10 = vmul.f32 0.125, %v1609_v4  ;;  %v1603_v11 = vadd.f32 %v1602_v5, %v1601_v1  ;;  %v1615_v12 = vadd.f32 %v1614_v7, %v1613_v2 }
 0x451   : > { %v1620_v13 = vsub.f32 %v13754_v37, %v13770_v9  ;;  %v1622_v14 = vsub.f32 %v13756_v38, %v13772_v10  ;;  %v13778_v15 = vmul.f32 0.125, %v1603_v11  ;;  %v13780_v16 = vmul.f32 0.125, %v1615_v12 }
 0x453   : > { %v1624_v17 = vmul.f32 %v1620_v13, %v1620_v13  ;;  %v1626_v18 = vmul.f32 %v1622_v14, %v1622_v14  ;;  %v1621_v19 = vsub.f32 %v13760_v41, %v13778_v15  ;;  %v1623_v20 = vsub.f32 %v13762_v42, %v13780_v16 }
 0x455   : > { %v1628_v6 = vrot.slane %v1624_v17, 4  ;;  %v1640_v8 = vrot.slane %v1626_v18, 4  ;;  %v1625_v21 = vmul.f32 %v1621_v19, %v1621_v19  ;;  %v1627_v22 = vmul.f32 %v1623_v20, %v1623_v20 }
 0x456   : > { %v13790_v20 = vsub.s32 2, %v13717_v50 }
 0x457   : > { %v1629_v23 = vadd.f32 %v1628_v6, %v1624_v17  ;;  %v1641_v24 = vadd.f32 %v1640_v8, %v1626_v18  ;;  %v1634_v25 = vrot.slane %v1625_v21, 4  ;;  %v1646_v26 = vrot.slane %v1627_v22, 4  ;;  %v1656_v18 = vld [vmem:[#allocation16] sm:$0xf] }
 0x458   : > { %v13793_v6 = vsub.s32 3, %v13717_v50 }
 0x459   : > { %v1630_v27 = vrot.slane %v1629_v23, 2  ;;  %v1642_v28 = vrot.slane %v1641_v24, 2  ;;  %v1635_v32 = vadd.f32 %v1634_v25, %v1625_v21  ;;  %v1647_v36 = vadd.f32 %v1646_v26, %v1627_v22 }
 0x45b   : > { %v1631_v39 = vadd.f32 %v1630_v27, %v1629_v23  ;;  %v1643_v40 = vadd.f32 %v1642_v28, %v1641_v24  ;;  %v1636_v43 = vrot.slane %v1635_v32, 2  ;;  %v1648_v44 = vrot.slane %v1647_v36, 2 }
 0x45d   : > { %v1632_v45 = vrot.slane %v1631_v39, 1  ;;  %v1644_v46 = vrot.slane %v1643_v40, 1  ;;  %v1637_v47 = vadd.f32 %v1636_v43, %v1635_v32  ;;  %v1649_v49 = vadd.f32 %v1648_v44, %v1647_v36  ;;  %v1695_v44 = vld [vmem:[#allocation17] sm:$0xf] }
 0x45f   : > { %v1633_v51 = vadd.f32 %v1632_v45, %v1631_v39  ;;  %v1645_v53 = vadd.f32 %v1644_v46, %v1643_v40  ;;  %v1638_v54 = vrot.slane %v1637_v47, 1  ;;  %v1650_v55 = vrot.slane %v1649_v49, 1 }
 0x461   : > { %v1652_v57 = vmul.f32 0.125, %v1633_v51  ;;  %v1654_v58 = vmul.f32 0.125, %v1645_v53  ;;  %v1639_v59 = vadd.f32 %v1638_v54, %v1637_v47  ;;  %v1651_v60 = vadd.f32 %v1650_v55, %v1649_v49 }
 0x463   : > { %v1657_v61 = vadd.f32 1e-05, %v1652_v57  ;;  %v1659_v62 = vadd.f32 1e-05, %v1654_v58  ;;  %v1653_v63 = vmul.f32 0.125, %v1639_v59  ;;  %v1655_v0 = vmul.f32 0.125, %v1651_v60 }
 0x465   : > { %12742 = vrsqrt.f32 %v1657_v61  ;;  %v1658_v1 = vadd.f32 1e-05, %v1653_v63  ;;  %v1660_v2 = vadd.f32 1e-05, %v1655_v0 }
 0x466   : > { %12744 = vrsqrt.f32 %v1659_v62 }
 0x467   : > { %12746 = vrsqrt.f32 %v1658_v1 }
 0x468   : > { %12748 = vrsqrt.f32 %v1660_v2 }
 0x472   : > { %v12743_v3 = vpop.eup %12742 }
 0x473   : > { %v12745_v4 = vpop.eup %12744 }
 0x474   : > { %v12747_v5 = vpop.eup %12746 }
 0x475   : > { %v12749_v7 = vpop.eup %12748  ;;  %v1669_v11 = vcombine.low %v12743_v3, %v12747_v5 }
 0x476   : > { %v1670_v12 = vcombine.low %v12745_v4, %v12749_v7 }
 0x477   : > { %v1677_v13 = vrot.slane %v1669_v11, %v13725_v48 }
 0x478   : > { %v1684_v14 = vrot.slane %v1670_v12, %v13725_v48 }
 0x47a   : > { %v1685_v17 = vcombine.low %v1677_v13, %v1684_v14 }
 0x47c   : > { %v1692_v19 = vrot.slane %v1685_v17, %v13725_v48  ;;  %v1853_v17 = vld [vmem:[#allocation19 + $0x188] sm:$0xff] }
 0x47e   : > { %v1694_v8 = vmul.f32 %v1692_v19, %v1656_v18  ;;  %v1857_v18 = vld [vmem:[#allocation19 + $0x1a8] sm:$0xff] }
 0x480   : > { %v1700_v21 = vrot.slane %v1694_v8, %v13720_v52  ;;  %v1704_v22 = vrot.slane %v1694_v8, %v13730_v56  ;;  %v1708_v23 = vrot.slane %v1694_v8, %v13790_v20  ;;  %v1712_v24 = vrot.slane %v1694_v8, %v13793_v6 }
 0x482   : > { %v1717_v25 = vmul.f32 %v1700_v21, %v13770_v9  ;;  %v1718_v26 = vmul.f32 %v1704_v22, %v13778_v15  ;;  %v1719_v27 = vmul.f32 %v1708_v23, %v13772_v10  ;;  %v1720_v28 = vmul.f32 %v1712_v24, %v13780_v16 }
 0x483   : > { %v1754_v47 = vmul.f32 %v1712_v24, %v13762_v42  ;;  %v1752_v9 = vmul.f32 %v1704_v22, %v13760_v41  ;;  %v1751_v15 = vmul.f32 %v1700_v21, %v13754_v37  ;;  %v1753_v10 = vmul.f32 %v1708_v23, %v13756_v38  ;;  %v1981_v21 = vld [vmem:[#allocation19 + $0x588] sm:$0xff] }
 0x484   : > { %v1725_v32 = vcombine.low %v1717_v25, %v1718_v26  ;;  %v1726_v36 = vcombine.low %v1719_v27, %v1720_v28  ;;  %v1985_v22 = vld [vmem:[#allocation19 + $0x5a8] sm:$0xff]  ;;  %v10228_v25 = vcombine.high %v1853_v17, %v1857_v18 }
 0x485   : > { %v1845_v26 = vld [vmem:[#allocation19 + $0x148] sm:$0xff]  ;;  %v10356_v28 = vcombine.high %v1981_v21, %v1985_v22 }
 0x486   : > { %v1733_v39 = vrot.slane %v1725_v32, %v13725_v48  ;;  %v1740_v40 = vrot.slane %v1726_v36, %v13725_v48  ;;  %v1849_v27 = vld [vmem:[#allocation19 + $0x168] sm:$0xff] }
 0x487   : > { %v1973_v32 = vld [vmem:[#allocation19 + $0x548] sm:$0xff]  ;;  %v10219_v29 = vcombine.low %v1845_v26, %v1849_v27 }
 0x488   : > { %v1741_v43 = vcombine.low %v1733_v39, %v1740_v40  ;;  %v1977_v36 = vld [vmem:[#allocation19 + $0x568] sm:$0xff]  ;;  %v10227_v39 = vcombine.low %v1853_v17, %v1857_v18  ;;  %v10355_v40 = vcombine.low %v1981_v21, %v1985_v22 }
 0x489   : > { %v10347_v30 = vcombine.low %v1973_v32, %v1977_v36  ;;  %v1925_v18 = vld [vmem:[#allocation19 + $0x3c8] sm:$0xff] }
 0x48a   : > { %v1748_v45 = vrot.slane %v1741_v43, %v13725_v48  ;;  %v10220_v43 = vcombine.high %v1845_v26, %v1849_v27  ;;  %v2053_v21 = vld [vmem:[#allocation19 + $0x7c8] sm:$0xff] }
 0x48b   : > { %v2057_v22 = vld [vmem:[#allocation19 + $0x7e8] sm:$0xff] }
 0x48c   : > { %v1750_v46 = vsub.f32 %v1695_v44, %v1748_v45  ;;  %v10348_v44 = vcombine.high %v1973_v32, %v1977_v36  ;;  %v1837_v45 = vld [vmem:[#allocation19 + $0x108] sm:$0xff] }
 0x48d   : > { %v1917_v32 = vld [vmem:[#allocation19 + $0x388] sm:$0xff] }
 0x48e   : > { %v1771_v16 = vrot.slane %v1750_v46, %v13793_v6  ;;  %v1763_v49 = vrot.slane %v1750_v46, %v13730_v56  ;;  %v1759_v51 = vrot.slane %v1750_v46, %v13720_v52  ;;  %v1767_v53 = vrot.slane %v1750_v46, %v13790_v20  ;;  %v1841_v46 = vld [vmem:[#allocation19 + $0x128] sm:$0xff] }
 0x48f   : > { %v10212_v31 = vcombine.high %v1837_v45, %v1841_v46  ;;  %v1921_v36 = vld [vmem:[#allocation19 + $0x3a8] sm:$0xff] }
 0x490   : > { %v1779_v54 = vadd.f32 %v1771_v16, %v1754_v47  ;;  %v1777_v55 = vadd.f32 %v1763_v49, %v1752_v9  ;;  %v1776_v57 = vadd.f32 %v1759_v51, %v1751_v15  ;;  %v1778_v58 = vadd.f32 %v1767_v53, %v1753_v10  ;;  %v1965_v47 = vld [vmem:[#allocation19 + $0x508] sm:$0xff] }
 0x491   : > { %v1969_v9 = vld [vmem:[#allocation19 + $0x528] sm:$0xff]  ;;  %v10211_v16 = vcombine.low %v1837_v45, %v1841_v46  ;;  %v10292_v45 = vcombine.high %v1917_v32, %v1921_v36 }
 0x492   : > { %v1787_v59 = vmul.f32 0.70710677, %v1779_v54  ;;  %v1785_v42 = vmul.f32 0.70710677, %v1777_v55  ;;  %v1784_v60 = vmul.f32 0.70710677, %v1776_v57  ;;  %v10340_v33 = vcombine.high %v1965_v47, %v1969_v9 }
 0x493   : > { %v1786_v41 = vmul.f32 0.70710677, %v1778_v58  ;;  %v1783_v61 = vmul.f32 0.5, %v1779_v54  ;;  %v1781_v0 = vmul.f32 0.5, %v1777_v55  ;;  %v1780_v4 = vmul.f32 0.5, %v1776_v57  ;;  %v1957_v15 = vld [vmem:[#allocation19 + $0x4c8] sm:$0xff] }
 0x494   : > { %12750 = verf.f32 %v1787_v59  ;;  %v1782_v11 = vmul.f32 0.5, %v1778_v58  ;;  %v1961_v10 = vld [vmem:[#allocation19 + $0x4e8] sm:$0xff]  ;;  %v10339_v49 = vcombine.low %v1965_v47, %v1969_v9 }
 0x495   : > { %12752 = verf.f32 %v1785_v42  ;;  %v10332_v53 = vcombine.high %v1957_v15, %v1961_v10  ;;  %v1821_v54 = vld [vmem:[#allocation19 + $0x88] sm:$0xff]  ;;  %v10331_v42 = vcombine.low %v1957_v15, %v1961_v10 }
 0x496   : > { %12754 = verf.f32 %v1784_v60  ;;  %v1825_v55 = vld [vmem:[#allocation19 + $0xa8] sm:$0xff] }
 0x497   : > { %12756 = verf.f32 %v1786_v41  ;;  %v1949_v57 = vld [vmem:[#allocation19 + $0x488] sm:$0xff]  ;;  %v10196_v60 = vcombine.high %v1821_v54, %v1825_v55 }
 0x498   : > { %v1953_v58 = vld [vmem:[#allocation19 + $0x4a8] sm:$0xff] }
 0x499   : > { %v10324_v41 = vcombine.high %v1949_v57, %v1953_v58  ;;  %v1909_v47 = vld [vmem:[#allocation19 + $0x348] sm:$0xff] }
 0x49a   : > { %v1913_v9 = vld [vmem:[#allocation19 + $0x368] sm:$0xff] }
 0x49b   : > { %v1901_v15 = vld [vmem:[#allocation19 + $0x308] sm:$0xff] }
 0x49c   : > { %v1905_v10 = vld [vmem:[#allocation19 + $0x328] sm:$0xff] }
 0x4a1   : > { %v12751_v37 = vpop.eup %12750 }
 0x4a2   : > { %v12753_v38 = vpop.eup %12752  ;;  %v1795_v62 = vadd.f32 1.0, %v12751_v37  ;;  %v1813_v37 = vld [vmem:[#allocation19 + $0x48] sm:$0xff] }
 0x4a3   : > { %v12755_v63 = vpop.eup %12754  ;;  %v1793_v1 = vadd.f32 1.0, %v12753_v38  ;;  %v1817_v38 = vld [vmem:[#allocation19 + $0x68] sm:$0xff] }
 0x4a4   : > { %v12757_v2 = vpop.eup %12756  ;;  %v1799_v3 = vmul.f32 %v1795_v62, %v1783_v61  ;;  %v1792_v5 = vadd.f32 1.0, %v12755_v63  ;;  %v1941_v61 = vld [vmem:[#allocation19 + $0x448] sm:$0xff]  ;;  %v10195_v63 = vcombine.low %v1821_v54, %v1825_v55  ;;  %v10276_v54 = vcombine.high %v1901_v15, %v1905_v10 }
 0x4a5   : > { %v1797_v7 = vmul.f32 %v1793_v1, %v1781_v0  ;;  %v1794_v12 = vadd.f32 1.0, %v12757_v2  ;;  %v1945_v62 = vld [vmem:[#allocation19 + $0x468] sm:$0xff]  ;;  %v10323_v0 = vcombine.low %v1949_v57, %v1953_v58  ;;  %v10188_v1 = vcombine.high %v1813_v37, %v1817_v38 }
 0x4a6   : > { %v13814_v13 = vpack.c.bf16 %v1799_v3, %v1799_v3  ;;  %v1796_v14 = vmul.f32 %v1792_v5, %v1780_v4  ;;  %v10316_v2 = vcombine.high %v1941_v61, %v1945_v62  ;;  %v1805_v3 = vld [vmem:[#allocation19 + $0x8] sm:$0xff] }
 0x4a7   : > { %v13816_v19 = vpack.c.bf16 %v1797_v7, %v1797_v7  ;;  %v1798_v8 = vmul.f32 %v1794_v12, %v1782_v11  ;;  %v1809_v4 = vld [vmem:[#allocation19 + $0x28] sm:$0xff]  ;;  %v10187_v11 = vcombine.low %v1813_v37, %v1817_v38  ;;  %v10315_v12 = vcombine.low %v1941_v61, %v1945_v62 }
 0x4a8   : > { %3413 = vmatprep.mubr.bf16.mxu1 %v13814_v13  ;;  %v13819_v23 = vpack.c.bf16 %v1796_v14, %v1796_v14  ;;  %v1933_v5 = vld [vmem:[#allocation19 + $0x408] sm:$0xff]  ;;  %v10180_v14 = vcombine.high %v1805_v3, %v1809_v4 }
 0x4a9   : > { %3372 = vmatprep.mubr.bf16.mxu0 %v13816_v19  ;;  %v13822_v24 = vpack.c.bf16 %v1798_v8, %v1798_v8  ;;  %v1937_v7 = vld [vmem:[#allocation19 + $0x428] sm:$0xff] }
 0x4aa   : > { %3373 = vmatmul.mubr.bf16.vlgmr.msra.gmra.mxu0 %v13819_v23  ;;  %v10308_v17 = vcombine.high %v1933_v5, %v1937_v7  ;;  %v1929_v8 = vld [vmem:[#allocation19 + $0x3e8] sm:$0xff]  ;;  %v10307_v26 = vcombine.low %v1933_v5, %v1937_v7 }
 0x4ab   : > { %3414 = vmatmul.mubr.bf16.vlgmr.msra.gmra.mxu1 %v13822_v24  ;;  %3423 = vmatpush1.bf16.msra.mxu0 %v10235_v34  ;;  %v1829_v34 = vld [vmem:[#allocation19 + $0xc8] sm:$0xff]  ;;  %v10300_v27 = vcombine.high %v1925_v18, %v1929_v8 }
 0x4ac   : > { %3464 = vmatpush1.bf16.msra.mxu1 %v10363_v35  ;;  %3454 = vmatprep.mubr.bf16.mxu0 %v13816_v19  ;;  %v1833_v35 = vld [vmem:[#allocation19 + $0xe8] sm:$0xff] }
 0x4ad   : > { %3495 = vmatprep.mubr.bf16.mxu1 %v13814_v13  ;;  %3424 = vmatprep.subr.bf16.mxu0 %v10228_v25  ;;  %v10204_v51 = vcombine.high %v1829_v34, %v1833_v35  ;;  %v10203_v59 = vcombine.low %v1829_v34, %v1833_v35  ;;  %v10179_v25 = vcombine.low %v1805_v3, %v1809_v4  ;;  %v1893_v57 = vld [vmem:[#allocation19 + $0x2c8] sm:$0xff] }
 0x4ae   : > { %3465 = vmatprep.subr.bf16.mxu1 %v10356_v28  ;;  %v10428_v28 = vcombine.high %v2053_v21, %v2057_v22  ;;  %v10284_v34 = vcombine.high %v1909_v47, %v1913_v9  ;;  %v1897_v58 = vld [vmem:[#allocation19 + $0x2e8] sm:$0xff] }
 0x4af   : > { %3425 = vmatpush1.bf16.msra.mxu0 %v10227_v39  ;;  %v2045_v39 = vld [vmem:[#allocation19 + $0x788] sm:$0xff]  ;;  %v10268_v37 = vcombine.high %v1893_v57, %v1897_v58 }
 0x4b0   : > { %3466 = vmatpush1.bf16.msra.mxu1 %v10355_v40  ;;  %3426 = vmatprep.subr.bf16.mxu0 %v10220_v43  ;;  %v2049_v40 = vld [vmem:[#allocation19 + $0x7a8] sm:$0xff]  ;;  %v10299_v43 = vcombine.low %v1925_v18, %v1929_v8 }
 0x4b1   : > { %3467 = vmatprep.subr.bf16.mxu1 %v10348_v44  ;;  %v10427_v44 = vcombine.low %v2053_v21, %v2057_v22  ;;  %v10420_v46 = vcombine.high %v2045_v39, %v2049_v40  ;;  %v1885_v61 = vld [vmem:[#allocation19 + $0x288] sm:$0xff] }
 0x4b2   : > { %v1889_v62 = vld [vmem:[#allocation19 + $0x2a8] sm:$0xff] }
 0x4b3   : > { %3427 = vmatpush1.bf16.msra.mxu0 %v10219_v29  ;;  %v2037_v29 = vld [vmem:[#allocation19 + $0x748] sm:$0xff]  ;;  %v10260_v3 = vcombine.high %v1885_v61, %v1889_v62 }
 0x4b4   : > { %3468 = vmatpush1.bf16.msra.mxu1 %v10347_v30  ;;  %3428 = vmatprep.subr.bf16.mxu0 %v10212_v31  ;;  %v2041_v30 = vld [vmem:[#allocation19 + $0x768] sm:$0xff]  ;;  %v10291_v31 = vcombine.low %v1917_v32, %v1921_v36 }
 0x4b5   : > { %3469 = vmatprep.subr.bf16.mxu1 %v10340_v33  ;;  %v10419_v33 = vcombine.low %v2045_v39, %v2049_v40  ;;  %v10412_v35 = vcombine.high %v2037_v29, %v2041_v30  ;;  %v1877_v5 = vld [vmem:[#allocation19 + $0x248] sm:$0xff]  ;;  %v1862_v39 = vld [vmem:[#allocation19 + $0x1d0] sm:$0xff] }
 0x4b6   : > { %v1881_v7 = vld [vmem:[#allocation19 + $0x268] sm:$0xff]  ;;  %v1866_v40 = vld [vmem:[#allocation19 + $0x1f0] sm:$0xff] }
 0x4b7   : > { %3429 = vmatpush1.bf16.msra.mxu0 %v10211_v16  ;;  %v2029_v16 = vld [vmem:[#allocation19 + $0x708] sm:$0xff]  ;;  %v10252_v18 = vcombine.high %v1877_v5, %v1881_v7 }
 0x4b8   : > { %3470 = vmatpush1.bf16.msra.mxu1 %v10339_v49  ;;  %3430 = vmatprep.subr.bf16.mxu0 %v10204_v51  ;;  %v2033_v49 = vld [vmem:[#allocation19 + $0x728] sm:$0xff]  ;;  %v10283_v51 = vcombine.low %v1909_v47, %v1913_v9  ;;  %v10238_v47 = vcombine.high %v1862_v39, %v1866_v40 }
 0x4b9   : > { %3471 = vmatprep.subr.bf16.mxu1 %v10332_v53  ;;  %v10411_v53 = vcombine.low %v2037_v29, %v2041_v30  ;;  %v10404_v55 = vcombine.high %v2029_v16, %v2033_v49  ;;  %v1869_v21 = vld [vmem:[#allocation19 + $0x208] sm:$0xff]  ;;  %v1854_v29 = vld [vmem:[#allocation19 + $0x190] sm:$0xff] }
 0x4ba   : > { %v1873_v22 = vld [vmem:[#allocation19 + $0x228] sm:$0xff]  ;;  %v1858_v30 = vld [vmem:[#allocation19 + $0x1b0] sm:$0xff] }
 0x4bb   : > { %3431 = vmatpush1.bf16.msra.mxu0 %v10203_v59  ;;  %v2021_v59 = vld [vmem:[#allocation19 + $0x6c8] sm:$0xff]  ;;  %v10244_v32 = vcombine.high %v1869_v21, %v1873_v22 }
 0x4bc   : > { %3472 = vmatpush1.bf16.msra.mxu1 %v10331_v42  ;;  %3432 = vmatprep.subr.bf16.mxu0 %v10196_v60  ;;  %v2025_v42 = vld [vmem:[#allocation19 + $0x6e8] sm:$0xff]  ;;  %v10275_v60 = vcombine.low %v1901_v15, %v1905_v10  ;;  %v10230_v15 = vcombine.high %v1854_v29, %v1858_v30  ;;  %v1846_v10 = vld [vmem:[#allocation19 + $0x150] sm:$0xff] }
 0x4bd   : > { %3473 = vmatprep.subr.bf16.mxu1 %v10324_v41  ;;  %v10403_v41 = vcombine.low %v2029_v16, %v2033_v49  ;;  %v10396_v38 = vcombine.high %v2021_v59, %v2025_v42  ;;  %v1850_v16 = vld [vmem:[#allocation19 + $0x170] sm:$0xff] }
 0x4bf   : > { %3433 = vmatpush1.bf16.msra.mxu0 %v10195_v63  ;;  %v2013_v63 = vld [vmem:[#allocation19 + $0x688] sm:$0xff] }
 0x4c0   : > { %3474 = vmatpush1.bf16.msra.mxu1 %v10323_v0  ;;  %3434 = vmatprep.subr.bf16.mxu0 %v10188_v1  ;;  %v2017_v0 = vld [vmem:[#allocation19 + $0x6a8] sm:$0xff]  ;;  %v10267_v1 = vcombine.low %v1893_v57, %v1897_v58  ;;  %v10222_v57 = vcombine.high %v1846_v10, %v1850_v16 }
 0x4c1   : > { %3475 = vmatprep.subr.bf16.mxu1 %v10316_v2  ;;  %v10395_v2 = vcombine.low %v2021_v59, %v2025_v42  ;;  %v10388_v4 = vcombine.high %v2013_v63, %v2017_v0  ;;  %v1838_v59 = vld [vmem:[#allocation19 + $0x110] sm:$0xff] }
 0x4c2   : > { %v1842_v42 = vld [vmem:[#allocation19 + $0x130] sm:$0xff] }
 0x4c3   : > { %3435 = vmatpush1.bf16.msra.mxu0 %v10187_v11  ;;  %v2005_v11 = vld [vmem:[#allocation19 + $0x648] sm:$0xff] }
 0x4c4   : > { %3476 = vmatpush1.bf16.msra.mxu1 %v10315_v12  ;;  %3436 = vmatprep.subr.bf16.mxu0 %v10180_v14  ;;  %v2009_v12 = vld [vmem:[#allocation19 + $0x668] sm:$0xff]  ;;  %v10259_v14 = vcombine.low %v1885_v61, %v1889_v62  ;;  %v10214_v61 = vcombine.high %v1838_v59, %v1842_v42 }
 0x4c5   : > { %3477 = vmatprep.subr.bf16.mxu1 %v10308_v17  ;;  %v10387_v17 = vcombine.low %v2013_v63, %v2017_v0  ;;  %v10380_v8 = vcombine.high %v2005_v11, %v2009_v12  ;;  %v1830_v63 = vld [vmem:[#allocation19 + $0xd0] sm:$0xff] }
 0x4c6   : > { %v1834_v0 = vld [vmem:[#allocation19 + $0xf0] sm:$0xff] }
 0x4c7   : > { %3437 = vmatpush1.bf16.msra.mxu0 %v10179_v25  ;;  %v1997_v25 = vld [vmem:[#allocation19 + $0x608] sm:$0xff] }
 0x4c8   : > { %3478 = vmatpush1.bf16.msra.mxu1 %v10307_v26  ;;  %3438 = vmatprep.subr.bf16.mxu0 %v10300_v27  ;;  %v2001_v26 = vld [vmem:[#allocation19 + $0x628] sm:$0xff]  ;;  %v10251_v27 = vcombine.low %v1877_v5, %v1881_v7  ;;  %v10206_v5 = vcombine.high %v1830_v63, %v1834_v0 }
 0x4c9   : > { %3479 = vmatprep.subr.bf16.mxu1 %v10428_v28  ;;  %v10379_v28 = vcombine.low %v2005_v11, %v2009_v12  ;;  %v10372_v36 = vcombine.high %v1997_v25, %v2001_v26  ;;  %v1822_v11 = vld [vmem:[#allocation19 + $0x90] sm:$0xff] }
 0x4ca   : > { %v1826_v12 = vld [vmem:[#allocation19 + $0xb0] sm:$0xff] }
 0x4cb   : > { %3439 = vmatpush2.bf16.msra.mxu0 %v10299_v43  ;;  %v1990_v43 = vld [vmem:[#allocation19 + $0x5d0] sm:$0xff] }
 0x4cc   : > { %3480 = vmatpush2.bf16.msra.mxu1 %v10427_v44  ;;  %3440 = vmatprep.subr.bf16.mxu0 %v10292_v45  ;;  %v1994_v44 = vld [vmem:[#allocation19 + $0x5f0] sm:$0xff]  ;;  %v10243_v45 = vcombine.low %v1869_v21, %v1873_v22  ;;  %v10198_v21 = vcombine.high %v1822_v11, %v1826_v12 }
 0x4cd   : > { %3481 = vmatprep.subr.bf16.mxu1 %v10420_v46  ;;  %v10371_v46 = vcombine.low %v1997_v25, %v2001_v26  ;;  %v10366_v9 = vcombine.high %v1990_v43, %v1994_v44  ;;  %v1814_v25 = vld [vmem:[#allocation19 + $0x50] sm:$0xff] }
 0x4ce   : > { %v1818_v26 = vld [vmem:[#allocation19 + $0x70] sm:$0xff] }
 0x4cf   : > { %3441 = vmatpush2.bf16.msra.mxu0 %v10291_v31  ;;  %v10237_v31 = vcombine.low %v1862_v39, %v1866_v40  ;;  %v10190_v39 = vcombine.high %v1814_v25, %v1818_v26 }
 0x4d0   : > { %3482 = vmatpush2.bf16.msra.mxu1 %v10419_v33  ;;  %3442 = vmatprep.subr.bf16.mxu0 %v10284_v34  ;;  %v1982_v33 = vld [vmem:[#allocation19 + $0x590] sm:$0xff] }
 0x4d1   : > { %3483 = vmatprep.subr.bf16.mxu1 %v10412_v35  ;;  %v1986_v34 = vld [vmem:[#allocation19 + $0x5b0] sm:$0xff]  ;;  %v10365_v35 = vcombine.low %v1990_v43, %v1994_v44 }
 0x4d2   : > { %v10358_v49 = vcombine.high %v1982_v33, %v1986_v34  ;;  %v1806_v43 = vld [vmem:[#allocation19 + $0x10] sm:$0xff] }
 0x4d3   : > { %3443 = vmatpush2.bf16.msra.mxu0 %v10283_v51  ;;  %v1974_v51 = vld [vmem:[#allocation19 + $0x550] sm:$0xff] }
 0x4d4   : > { %3484 = vmatpush2.bf16.msra.mxu1 %v10411_v53  ;;  %3444 = vmatprep.subr.bf16.mxu0 %v10276_v54  ;;  %v1978_v53 = vld [vmem:[#allocation19 + $0x570] sm:$0xff]  ;;  %v10229_v54 = vcombine.low %v1854_v29, %v1858_v30 }
 0x4d5   : > { %3485 = vmatprep.subr.bf16.mxu1 %v10404_v55  ;;  %v10357_v55 = vcombine.low %v1982_v33, %v1986_v34  ;;  %v10350_v58 = vcombine.high %v1974_v51, %v1978_v53  ;;  %v1810_v44 = vld [vmem:[#allocation19 + $0x30] sm:$0xff] }
 0x4d6   : > { %v10182_v29 = vcombine.high %v1806_v43, %v1810_v44  ;;  %v1930_v33 = vld [vmem:[#allocation19 + $0x3f0] sm:$0xff] }
 0x4d7   : > { %3445 = vmatpush2.bf16.msra.mxu0 %v10275_v60  ;;  %v1966_v60 = vld [vmem:[#allocation19 + $0x510] sm:$0xff] }
 0x4d8   : > { %3486 = vmatpush2.bf16.msra.mxu1 %v10403_v41  ;;  %3446 = vmatprep.subr.bf16.mxu0 %v10268_v37  ;;  %v1970_v41 = vld [vmem:[#allocation19 + $0x530] sm:$0xff]  ;;  %v10221_v37 = vcombine.low %v1846_v10, %v1850_v16 }
 0x4d9   : > { %3487 = vmatprep.subr.bf16.mxu1 %v10396_v38  ;;  %v10349_v38 = vcombine.low %v1974_v51, %v1978_v53  ;;  %v10342_v62 = vcombine.high %v1966_v60, %v1970_v41  ;;  %v2054_v34 = vld [vmem:[#allocation19 + $0x7d0] sm:$0xff] }
 0x4da   : > { %v1918_v51 = vld [vmem:[#allocation19 + $0x390] sm:$0xff] }
 0x4db   : > { %3447 = vmatpush2.bf16.msra.mxu0 %v10267_v1  ;;  %v1958_v1 = vld [vmem:[#allocation19 + $0x4d0] sm:$0xff] }
 0x4dc   : > { %3488 = vmatpush2.bf16.msra.mxu1 %v10395_v2  ;;  %3448 = vmatprep.subr.bf16.mxu0 %v10260_v3  ;;  %v1962_v2 = vld [vmem:[#allocation19 + $0x4f0] sm:$0xff]  ;;  %v10213_v3 = vcombine.low %v1838_v59, %v1842_v42 }
 0x4dd   : > { %3489 = vmatprep.subr.bf16.mxu1 %v10388_v4  ;;  %v10341_v4 = vcombine.low %v1966_v60, %v1970_v41  ;;  %v10334_v7 = vcombine.high %v1958_v1, %v1962_v2  ;;  %v1922_v53 = vld [vmem:[#allocation19 + $0x3b0] sm:$0xff] }
 0x4de   : > { %v10294_v59 = vcombine.high %v1918_v51, %v1922_v53  ;;  %v1910_v60 = vld [vmem:[#allocation19 + $0x350] sm:$0xff] }
 0x4df   : > { %3449 = vmatpush2.bf16.msra.mxu0 %v10259_v14  ;;  %v1950_v14 = vld [vmem:[#allocation19 + $0x490] sm:$0xff] }
 0x4e0   : > { %3490 = vmatpush2.bf16.msra.mxu1 %v10387_v17  ;;  %3450 = vmatprep.subr.bf16.mxu0 %v10252_v18  ;;  %v1954_v17 = vld [vmem:[#allocation19 + $0x4b0] sm:$0xff]  ;;  %v10205_v18 = vcombine.low %v1830_v63, %v1834_v0 }
 0x4e1   : > { %3491 = vmatprep.subr.bf16.mxu1 %v10380_v8  ;;  %v10333_v8 = vcombine.low %v1958_v1, %v1962_v2  ;;  %v10326_v22 = vcombine.high %v1950_v14, %v1954_v17  ;;  %v1914_v41 = vld [vmem:[#allocation19 + $0x370] sm:$0xff] }
 0x4e2   : > { %v10286_v63 = vcombine.high %v1910_v60, %v1914_v41  ;;  %v1902_v1 = vld [vmem:[#allocation19 + $0x310] sm:$0xff] }
 0x4e3   : > { %3451 = vmatpush2.bf16.msra.mxu0 %v10251_v27  ;;  %v1942_v27 = vld [vmem:[#allocation19 + $0x450] sm:$0xff] }
 0x4e4   : > { %3492 = vmatpush2.bf16.msra.mxu1 %v10379_v28  ;;  %3452 = vmatprep.subr.bf16.mxu0 %v10244_v32  ;;  %v1946_v28 = vld [vmem:[#allocation19 + $0x470] sm:$0xff]  ;;  %v10197_v32 = vcombine.low %v1822_v11, %v1826_v12 }
 0x4e5   : > { %3493 = vmatprep.subr.bf16.mxu1 %v10372_v36  ;;  %v10325_v36 = vcombine.low %v1950_v14, %v1954_v17  ;;  %v10318_v40 = vcombine.high %v1942_v27, %v1946_v28  ;;  %v1906_v2 = vld [vmem:[#allocation19 + $0x330] sm:$0xff] }
 0x4e6   : > { %v10278_v11 = vcombine.high %v1902_v1, %v1906_v2  ;;  %v1894_v14 = vld [vmem:[#allocation19 + $0x2d0] sm:$0xff] }
 0x4e7   : > { %3453 = vmatpush2.bf16.msra.mxu0 %v10243_v45  ;;  %v1934_v45 = vld [vmem:[#allocation19 + $0x410] sm:$0xff] }
 0x4e8   : > { %3494 = vmatpush2.bf16.msra.mxu1 %v10371_v46  ;;  %3504 = vmatprep.subr.bf16.mxu0 %v10238_v47  ;;  %v1938_v46 = vld [vmem:[#allocation19 + $0x430] sm:$0xff]  ;;  %v10189_v47 = vcombine.low %v1814_v25, %v1818_v26 }
 0x4e9   : > { %3545 = vmatprep.subr.bf16.mxu1 %v10366_v9  ;;  %v10317_v9 = vcombine.low %v1942_v27, %v1946_v28  ;;  %v10310_v30 = vcombine.high %v1934_v45, %v1938_v46  ;;  %v10309_v10 = vcombine.low %v1934_v45, %v1938_v46  ;;  %v1898_v17 = vld [vmem:[#allocation19 + $0x2f0] sm:$0xff] }
 0x4ea   : > { %3455 = vmatmul.mubr.bf16.vlgmr.msra.gmra.mxu0 %v13819_v23  ;;  %v10270_v25 = vcombine.high %v1894_v14, %v1898_v17  ;;  %v1886_v27 = vld [vmem:[#allocation19 + $0x290] sm:$0xff] }
 0x4eb   : > { %3496 = vmatmul.mubr.bf16.vlgmr.msra.gmra.mxu1 %v13822_v24  ;;  %3505 = vmatpush1.bf16.msra.mxu0 %v10237_v31  ;;  %v1926_v31 = vld [vmem:[#allocation19 + $0x3d0] sm:$0xff] }
 0x4ec   : > { %3536 = vmatprep.mubr.bf16.mxu0 %v13816_v19  ;;  %3546 = vmatpush1.bf16.msra.mxu1 %v10365_v35  ;;  %v2058_v35 = vld [vmem:[#allocation19 + $0x7f0] sm:$0xff]  ;;  %v10302_v16 = vcombine.high %v1926_v31, %v1930_v33 }
 0x4ed   : > { %3577 = vmatprep.mubr.bf16.mxu1 %v13814_v13  ;;  %3506 = vmatprep.subr.bf16.mxu0 %v10230_v15  ;;  %v10181_v15 = vcombine.low %v1806_v43, %v1810_v44  ;;  %v1890_v28 = vld [vmem:[#allocation19 + $0x2b0] sm:$0xff] }
 0x4ee   : > { %3547 = vmatprep.subr.bf16.mxu1 %v10358_v49  ;;  %v10430_v49 = vcombine.high %v2054_v34, %v2058_v35  ;;  %v10262_v43 = vcombine.high %v1886_v27, %v1890_v28  ;;  %v1878_v45 = vld [vmem:[#allocation19 + $0x250] sm:$0xff] }
 0x4ef   : > { %3507 = vmatpush1.bf16.msra.mxu0 %v10229_v54  ;;  %v2046_v54 = vld [vmem:[#allocation19 + $0x790] sm:$0xff] }
 0x4f0   : > { %3548 = vmatpush1.bf16.msra.mxu1 %v10357_v55  ;;  %3508 = vmatprep.subr.bf16.mxu0 %v10222_v57  ;;  %v2050_v55 = vld [vmem:[#allocation19 + $0x7b0] sm:$0xff]  ;;  %v10301_v57 = vcombine.low %v1926_v31, %v1930_v33 }
 0x4f1   : > { %3549 = vmatprep.subr.bf16.mxu1 %v10350_v58  ;;  %v10429_v58 = vcombine.low %v2054_v34, %v2058_v35  ;;  %v10422_v42 = vcombine.high %v2046_v54, %v2050_v55  ;;  %v1882_v46 = vld [vmem:[#allocation19 + $0x270] sm:$0xff] }
 0x4f2   : > { %v10254_v31 = vcombine.high %v1878_v45, %v1882_v46  ;;  %v1870_v34 = vld [vmem:[#allocation19 + $0x210] sm:$0xff] }
 0x4f3   : > { %3509 = vmatpush1.bf16.msra.mxu0 %v10221_v37  ;;  %v2038_v37 = vld [vmem:[#allocation19 + $0x750] sm:$0xff] }
 0x4f4   : > { %3550 = vmatpush1.bf16.msra.mxu1 %v10349_v38  ;;  %3510 = vmatprep.subr.bf16.mxu0 %v10214_v61  ;;  %v2042_v38 = vld [vmem:[#allocation19 + $0x770] sm:$0xff]  ;;  %v10293_v61 = vcombine.low %v1918_v51, %v1922_v53 }
 0x4f5   : > { %3551 = vmatprep.subr.bf16.mxu1 %v10342_v62  ;;  %v10421_v62 = vcombine.low %v2046_v54, %v2050_v55  ;;  %v10414_v0 = vcombine.high %v2038_v37, %v2042_v38  ;;  %v1874_v35 = vld [vmem:[#allocation19 + $0x230] sm:$0xff]  ;;  %v1863_v54 = vld [vmem:[#allocation19 + $0x1d8] sm:$0xff] }
 0x4f6   : > { %v10246_v51 = vcombine.high %v1870_v34, %v1874_v35  ;;  %v1867_v55 = vld [vmem:[#allocation19 + $0x1f8] sm:$0xff] }
 0x4f7   : > { %3511 = vmatpush1.bf16.msra.mxu0 %v10213_v3  ;;  %v2030_v3 = vld [vmem:[#allocation19 + $0x710] sm:$0xff] }
 0x4f8   : > { %3552 = vmatpush1.bf16.msra.mxu1 %v10341_v4  ;;  %3512 = vmatprep.subr.bf16.mxu0 %v10206_v5  ;;  %v2034_v4 = vld [vmem:[#allocation19 + $0x730] sm:$0xff]  ;;  %v10285_v5 = vcombine.low %v1910_v60, %v1914_v41  ;;  %v10240_v60 = vcombine.high %v1863_v54, %v1867_v55 }
 0x4f9   : > { %3553 = vmatprep.subr.bf16.mxu1 %v10334_v7  ;;  %v10413_v7 = vcombine.low %v2038_v37, %v2042_v38  ;;  %v10406_v12 = vcombine.high %v2030_v3, %v2034_v4  ;;  %v1855_v37 = vld [vmem:[#allocation19 + $0x198] sm:$0xff] }
 0x4fa   : > { %v1859_v38 = vld [vmem:[#allocation19 + $0x1b8] sm:$0xff] }
 0x4fb   : > { %3513 = vmatpush1.bf16.msra.mxu0 %v10205_v18  ;;  %v2022_v18 = vld [vmem:[#allocation19 + $0x6d0] sm:$0xff] }
 0x4fc   : > { %3554 = vmatpush1.bf16.msra.mxu1 %v10333_v8  ;;  %3514 = vmatprep.subr.bf16.mxu0 %v10198_v21  ;;  %v2026_v8 = vld [vmem:[#allocation19 + $0x6f0] sm:$0xff]  ;;  %v10277_v21 = vcombine.low %v1902_v1, %v1906_v2  ;;  %v10232_v1 = vcombine.high %v1855_v37, %v1859_v38  ;;  %v1847_v2 = vld [vmem:[#allocation19 + $0x158] sm:$0xff] }
 0x4fd   : > { %3555 = vmatprep.subr.bf16.mxu1 %v10326_v22  ;;  %v10405_v22 = vcombine.low %v2030_v3, %v2034_v4  ;;  %v10398_v26 = vcombine.high %v2022_v18, %v2026_v8  ;;  %v1851_v3 = vld [vmem:[#allocation19 + $0x178] sm:$0xff] }
 0x4ff   : > { %3515 = vmatpush1.bf16.msra.mxu0 %v10197_v32  ;;  %v2014_v32 = vld [vmem:[#allocation19 + $0x690] sm:$0xff] }
 0x500   : > { %3556 = vmatpush1.bf16.msra.mxu1 %v10325_v36  ;;  %3516 = vmatprep.subr.bf16.mxu0 %v10190_v39  ;;  %v2018_v36 = vld [vmem:[#allocation19 + $0x6b0] sm:$0xff]  ;;  %v10269_v39 = vcombine.low %v1894_v14, %v1898_v17  ;;  %v10224_v14 = vcombine.high %v1847_v2, %v1851_v3 }
 0x501   : > { %3557 = vmatprep.subr.bf16.mxu1 %v10318_v40  ;;  %v10397_v40 = vcombine.low %v2022_v18, %v2026_v8  ;;  %v10390_v44 = vcombine.high %v2014_v32, %v2018_v36  ;;  %v1839_v18 = vld [vmem:[#allocation19 + $0x118] sm:$0xff] }
 0x502   : > { %v1843_v8 = vld [vmem:[#allocation19 + $0x138] sm:$0xff] }
 0x503   : > { %3517 = vmatpush1.bf16.msra.mxu0 %v10189_v47  ;;  %v2006_v47 = vld [vmem:[#allocation19 + $0x650] sm:$0xff] }
 0x504   : > { %3558 = vmatpush1.bf16.msra.mxu1 %v10317_v9  ;;  %3518 = vmatprep.subr.bf16.mxu0 %v10182_v29  ;;  %v2010_v9 = vld [vmem:[#allocation19 + $0x670] sm:$0xff]  ;;  %v10261_v29 = vcombine.low %v1886_v27, %v1890_v28  ;;  %v10216_v27 = vcombine.high %v1839_v18, %v1843_v8  ;;  %v1831_v28 = vld [vmem:[#allocation19 + $0xd8] sm:$0xff] }
 0x505   : > { %3559 = vmatprep.subr.bf16.mxu1 %v10310_v30  ;;  %v10389_v30 = vcombine.low %v2014_v32, %v2018_v36  ;;  %v10382_v33 = vcombine.high %v2006_v47, %v2010_v9  ;;  %v1835_v32 = vld [vmem:[#allocation19 + $0xf8] sm:$0xff] }
 0x506   : > { %v1959_v36 = vld [vmem:[#allocation19 + $0x4d8] sm:$0xff] }
 0x507   : > { %3519 = vmatpush1.bf16.msra.mxu0 %v10181_v15  ;;  %v1998_v15 = vld [vmem:[#allocation19 + $0x610] sm:$0xff] }
 0x508   : > { %3560 = vmatpush1.bf16.msra.mxu1 %v10309_v10  ;;  %3520 = vmatprep.subr.bf16.mxu0 %v10302_v16  ;;  %v2002_v10 = vld [vmem:[#allocation19 + $0x630] sm:$0xff]  ;;  %v10253_v16 = vcombine.low %v1878_v45, %v1882_v46  ;;  %v1823_v45 = vld [vmem:[#allocation19 + $0x98] sm:$0xff] }
 0x509   : > { %3561 = vmatprep.subr.bf16.mxu1 %v10430_v49  ;;  %v10381_v49 = vcombine.low %v2006_v47, %v2010_v9  ;;  %v10374_v53 = vcombine.high %v1998_v15, %v2002_v10  ;;  %v1827_v46 = vld [vmem:[#allocation19 + $0xb8] sm:$0xff] }
 0x50a   : > { %v1951_v47 = vld [vmem:[#allocation19 + $0x498] sm:$0xff] }
 0x50b   : > { %3521 = vmatpush2.bf16.msra.mxu0 %v10301_v57  ;;  %v1991_v57 = vld [vmem:[#allocation19 + $0x5d8] sm:$0xff] }
 0x50c   : > { %3562 = vmatpush2.bf16.msra.mxu1 %v10429_v58  ;;  %3522 = vmatprep.subr.bf16.mxu0 %v10294_v59  ;;  %v1995_v58 = vld [vmem:[#allocation19 + $0x5f8] sm:$0xff]  ;;  %v10245_v59 = vcombine.low %v1870_v34, %v1874_v35 }
 0x50d   : > { %3563 = vmatprep.subr.bf16.mxu1 %v10422_v42  ;;  %v10373_v42 = vcombine.low %v1998_v15, %v2002_v10  ;;  %v10368_v41 = vcombine.high %v1991_v57, %v1995_v58  ;;  %v1955_v9 = vld [vmem:[#allocation19 + $0x4b8] sm:$0xff] }
 0x50e   : > { %v1815_v34 = vld [vmem:[#allocation19 + $0x58] sm:$0xff] }
 0x50f   : > { %3523 = vmatpush2.bf16.msra.mxu0 %v10293_v61  ;;  %v10239_v61 = vcombine.low %v1863_v54, %v1867_v55  ;;  %v1819_v35 = vld [vmem:[#allocation19 + $0x78] sm:$0xff] }
 0x510   : > { %3564 = vmatpush2.bf16.msra.mxu1 %v10421_v62  ;;  %3524 = vmatprep.subr.bf16.mxu0 %v10286_v63  ;;  %v1983_v62 = vld [vmem:[#allocation19 + $0x598] sm:$0xff] }
 0x511   : > { %3565 = vmatprep.subr.bf16.mxu1 %v10414_v0  ;;  %v1987_v63 = vld [vmem:[#allocation19 + $0x5b8] sm:$0xff]  ;;  %v10367_v0 = vcombine.low %v1991_v57, %v1995_v58 }
 0x512   : > { %v10360_v4 = vcombine.high %v1983_v62, %v1987_v63  ;;  %v1943_v15 = vld [vmem:[#allocation19 + $0x458] sm:$0xff] }
 0x513   : > { %3525 = vmatpush2.bf16.msra.mxu0 %v10285_v5  ;;  %v1975_v5 = vld [vmem:[#allocation19 + $0x558] sm:$0xff] }
 0x514   : > { %3566 = vmatpush2.bf16.msra.mxu1 %v10413_v7  ;;  %3526 = vmatprep.subr.bf16.mxu0 %v10278_v11  ;;  %v1979_v7 = vld [vmem:[#allocation19 + $0x578] sm:$0xff]  ;;  %v10231_v11 = vcombine.low %v1855_v37, %v1859_v38 }
 0x515   : > { %3567 = vmatprep.subr.bf16.mxu1 %v10406_v12  ;;  %v10359_v12 = vcombine.low %v1983_v62, %v1987_v63  ;;  %v10352_v17 = vcombine.high %v1975_v5, %v1979_v7  ;;  %v1947_v10 = vld [vmem:[#allocation19 + $0x478] sm:$0xff] }
 0x516   : > { %v1807_v54 = vld [vmem:[#allocation19 + $0x18] sm:$0xff] }
 0x517   : > { %3527 = vmatpush2.bf16.msra.mxu0 %v10277_v21  ;;  %v1967_v21 = vld [vmem:[#allocation19 + $0x518] sm:$0xff] }
 0x518   : > { %3568 = vmatpush2.bf16.msra.mxu1 %v10405_v22  ;;  %3528 = vmatprep.subr.bf16.mxu0 %v10270_v25  ;;  %v1971_v22 = vld [vmem:[#allocation19 + $0x538] sm:$0xff]  ;;  %v10223_v25 = vcombine.low %v1847_v2, %v1851_v3 }
 0x519   : > { %3569 = vmatprep.subr.bf16.mxu1 %v10398_v26  ;;  %v10351_v26 = vcombine.low %v1975_v5, %v1979_v7  ;;  %v1811_v55 = vld [vmem:[#allocation19 + $0x38] sm:$0xff] }
 0x51a   : > { %v1935_v57 = vld [vmem:[#allocation19 + $0x418] sm:$0xff]  ;;  %v10183_v63 = vcombine.low %v1807_v54, %v1811_v55 }
 0x51b   : > { %3529 = vmatpush2.bf16.msra.mxu0 %v10269_v39  ;;  %v1963_v39 = vld [vmem:[#allocation19 + $0x4f8] sm:$0xff] }
 0x51c   : > { %3570 = vmatpush2.bf16.msra.mxu1 %v10397_v40  ;;  %3530 = vmatprep.subr.bf16.mxu0 %v10262_v43  ;;  %v10343_v40 = vcombine.low %v1967_v21, %v1971_v22  ;;  %v10208_v43 = vcombine.high %v1831_v28, %v1835_v32  ;;  %v1939_v58 = vld [vmem:[#allocation19 + $0x438] sm:$0xff] }
 0x51d   : > { %3571 = vmatprep.subr.bf16.mxu1 %v10390_v44  ;;  %v10336_v44 = vcombine.high %v1959_v36, %v1963_v39  ;;  %v1927_v37 = vld [vmem:[#allocation19 + $0x3d8] sm:$0xff] }
 0x51e   : > { %v1931_v38 = vld [vmem:[#allocation19 + $0x3f8] sm:$0xff] }
 0x51f   : > { %3531 = vmatpush2.bf16.msra.mxu0 %v10261_v29  ;;  %v10207_v29 = vcombine.low %v1831_v28, %v1835_v32  ;;  %v2059_v62 = vld [vmem:[#allocation19 + $0x7f8] sm:$0xff] }
 0x520   : > { %3572 = vmatpush2.bf16.msra.mxu1 %v10389_v30  ;;  %3532 = vmatprep.subr.bf16.mxu0 %v10254_v31  ;;  %v10335_v30 = vcombine.low %v1959_v36, %v1963_v39  ;;  %v10200_v31 = vcombine.high %v1823_v45, %v1827_v46  ;;  %v1919_v3 = vld [vmem:[#allocation19 + $0x398] sm:$0xff] }
 0x521   : > { %3573 = vmatprep.subr.bf16.mxu1 %v10382_v33  ;;  %v10328_v33 = vcombine.high %v1951_v47, %v1955_v9  ;;  %v2047_v5 = vld [vmem:[#allocation19 + $0x798] sm:$0xff] }
 0x522   : > { %v2051_v7 = vld [vmem:[#allocation19 + $0x7b8] sm:$0xff] }
 0x523   : > { %3533 = vmatpush2.bf16.msra.mxu0 %v10253_v16  ;;  %v10199_v16 = vcombine.low %v1823_v45, %v1827_v46  ;;  %v1903_v28 = vld [vmem:[#allocation19 + $0x318] sm:$0xff] }
 0x524   : > { %3574 = vmatpush2.bf16.msra.mxu1 %v10381_v49  ;;  %3534 = vmatprep.subr.bf16.mxu0 %v10246_v51  ;;  %v10327_v49 = vcombine.low %v1951_v47, %v1955_v9  ;;  %v10192_v51 = vcombine.high %v1815_v34, %v1819_v35  ;;  %v1907_v32 = vld [vmem:[#allocation19 + $0x338] sm:$0xff] }
 0x525   : > { %3575 = vmatprep.subr.bf16.mxu1 %v10374_v53  ;;  %v10320_v53 = vcombine.high %v1943_v15, %v1947_v10  ;;  %v2031_v36 = vld [vmem:[#allocation19 + $0x718] sm:$0xff] }
 0x526   : > { %v2035_v39 = vld [vmem:[#allocation19 + $0x738] sm:$0xff] }
 0x527   : > { %3535 = vmatpush2.bf16.msra.mxu0 %v10245_v59  ;;  %v10191_v59 = vcombine.low %v1815_v34, %v1819_v35  ;;  %v1895_v45 = vld [vmem:[#allocation19 + $0x2d8] sm:$0xff] }
 0x528   : > { %3576 = vmatpush2.bf16.msra.mxu1 %v10373_v42  ;;  %3586 = vmatprep.subr.bf16.mxu0 %v10240_v60  ;;  %v10319_v42 = vcombine.low %v1943_v15, %v1947_v10  ;;  %v10184_v60 = vcombine.high %v1807_v54, %v1811_v55  ;;  %v1899_v46 = vld [vmem:[#allocation19 + $0x2f8] sm:$0xff] }
 0x529   : > { %3627 = vmatprep.subr.bf16.mxu1 %v10368_v41  ;;  %v10312_v41 = vcombine.high %v1935_v57, %v1939_v58  ;;  %v2023_v47 = vld [vmem:[#allocation19 + $0x6d8] sm:$0xff] }
 0x52a   : > { %3537 = vmatmul.mubr.bf16.vlgmr.msra.gmra.mxu0 %v13819_v23  ;;  %v2027_v9 = vld [vmem:[#allocation19 + $0x6f8] sm:$0xff] }
 0x52b   : > { %3578 = vmatmul.mubr.bf16.vlgmr.msra.gmra.mxu1 %v13822_v24  ;;  %3587 = vmatpush1.bf16.msra.mxu0 %v10239_v61  ;;  %v2055_v61 = vld [vmem:[#allocation19 + $0x7d8] sm:$0xff] }
 0x52c   : > { %3618 = vmatprep.mubr.bf16.mxu0 %v13816_v19  ;;  %3628 = vmatpush1.bf16.msra.mxu1 %v10367_v0  ;;  %v10344_v19 = vcombine.high %v1967_v21, %v1971_v22  ;;  %v10311_v0 = vcombine.low %v1935_v57, %v1939_v58  ;;  %v10432_v2 = vcombine.high %v2055_v61, %v2059_v62  ;;  %v2039_v21 = vld [vmem:[#allocation19 + $0x758] sm:$0xff] }
 0x52d   : > { %3659 = vmatprep.mubr.bf16.mxu1 %v13814_v13  ;;  %3588 = vmatprep.subr.bf16.mxu0 %v10232_v1  ;;  %v10215_v13 = vcombine.low %v1839_v18, %v1843_v8  ;;  %v10304_v1 = vcombine.high %v1927_v37, %v1931_v38  ;;  %v1911_v18 = vld [vmem:[#allocation19 + $0x358] sm:$0xff] }
 0x52e   : > { %3629 = vmatprep.subr.bf16.mxu1 %v10360_v4  ;;  %v1923_v4 = vld [vmem:[#allocation19 + $0x3b8] sm:$0xff] }
 0x52f   : > { %3589 = vmatpush1.bf16.msra.mxu0 %v10231_v11  ;;  %v10303_v11 = vcombine.low %v1927_v37, %v1931_v38  ;;  %v1915_v8 = vld [vmem:[#allocation19 + $0x378] sm:$0xff] }
 0x530   : > { %3630 = vmatpush1.bf16.msra.mxu1 %v10359_v12  ;;  %3590 = vmatprep.subr.bf16.mxu0 %v10224_v14  ;;  %v10431_v12 = vcombine.low %v2055_v61, %v2059_v62  ;;  %v10296_v14 = vcombine.high %v1919_v3, %v1923_v4  ;;  %v2043_v22 = vld [vmem:[#allocation19 + $0x778] sm:$0xff] }
 0x531   : > { %3631 = vmatprep.subr.bf16.mxu1 %v10352_v17  ;;  %v10424_v17 = vcombine.high %v2047_v5, %v2051_v7  ;;  %v1887_v34 = vld [vmem:[#allocation19 + $0x298] sm:$0xff] }
 0x532   : > { %v1891_v35 = vld [vmem:[#allocation19 + $0x2b8] sm:$0xff] }
 0x533   : > { %3591 = vmatpush1.bf16.msra.mxu0 %v10223_v25  ;;  %v10295_v25 = vcombine.low %v1919_v3, %v1923_v4  ;;  %v2015_v15 = vld [vmem:[#allocation19 + $0x698] sm:$0xff] }
 0x534   : > { %3632 = vmatpush1.bf16.msra.mxu1 %v10351_v26  ;;  %3592 = vmatprep.subr.bf16.mxu0 %v10216_v27  ;;  %v10423_v26 = vcombine.low %v2047_v5, %v2051_v7  ;;  %v10288_v27 = vcombine.high %v1911_v18, %v1915_v8  ;;  %v2019_v10 = vld [vmem:[#allocation19 + $0x6b8] sm:$0xff] }
 0x535   : > { %3633 = vmatprep.subr.bf16.mxu1 %v10344_v19  ;;  %v10416_v19 = vcombine.high %v2039_v21, %v2043_v22  ;;  %v1879_v54 = vld [vmem:[#allocation19 + $0x258] sm:$0xff] }
 0x536   : > { %v1883_v55 = vld [vmem:[#allocation19 + $0x278] sm:$0xff] }
 0x537   : > { %3593 = vmatpush1.bf16.msra.mxu0 %v10215_v13  ;;  %v10287_v13 = vcombine.low %v1911_v18, %v1915_v8  ;;  %v2007_v57 = vld [vmem:[#allocation19 + $0x658] sm:$0xff] }
 0x538   : > { %3634 = vmatpush1.bf16.msra.mxu1 %v10343_v40  ;;  %3594 = vmatprep.subr.bf16.mxu0 %v10208_v43  ;;  %v10415_v40 = vcombine.low %v2039_v21, %v2043_v22  ;;  %v10280_v43 = vcombine.high %v1903_v28, %v1907_v32  ;;  %v2011_v58 = vld [vmem:[#allocation19 + $0x678] sm:$0xff] }
 0x539   : > { %3635 = vmatprep.subr.bf16.mxu1 %v10336_v44  ;;  %v10408_v44 = vcombine.high %v2031_v36, %v2035_v39  ;;  %v1871_v37 = vld [vmem:[#allocation19 + $0x218] sm:$0xff] }
 0x53a   : > { %v1875_v38 = vld [vmem:[#allocation19 + $0x238] sm:$0xff] }
 0x53b   : > { %3595 = vmatpush1.bf16.msra.mxu0 %v10207_v29  ;;  %v10279_v29 = vcombine.low %v1903_v28, %v1907_v32  ;;  %v1999_v61 = vld [vmem:[#allocation19 + $0x618] sm:$0xff]  ;;  %v10247_v3 = vcombine.low %v1871_v37, %v1875_v38 }
 0x53c   : > { %3636 = vmatpush1.bf16.msra.mxu1 %v10335_v30  ;;  %3596 = vmatprep.subr.bf16.mxu0 %v10200_v31  ;;  %v10407_v30 = vcombine.low %v2031_v36, %v2035_v39  ;;  %v10272_v31 = vcombine.high %v1895_v45, %v1899_v46  ;;  %v2003_v62 = vld [vmem:[#allocation19 + $0x638] sm:$0xff] }
 0x53d   : > { %3637 = vmatprep.subr.bf16.mxu1 %v10328_v33  ;;  %v10400_v33 = vcombine.high %v2023_v47, %v2027_v9  ;;  %v10375_v4 = vcombine.low %v1999_v61, %v2003_v62 }
 0x53f   : > { %3597 = vmatpush1.bf16.msra.mxu0 %v10199_v16  ;;  %v10271_v16 = vcombine.low %v1895_v45, %v1899_v46  ;;  %v11586_v45 = vld [vmem:[%s13711_s9 + $0x244] ss:$48 sps:$4 sm:$0xff]  }
 0x540   : > { %3638 = vmatpush1.bf16.msra.mxu1 %v10327_v49  ;;  %3598 = vmatprep.subr.bf16.mxu0 %v10192_v51  ;;  %v10399_v49 = vcombine.low %v2023_v47, %v2027_v9  ;;  %v10264_v51 = vcombine.high %v1887_v34, %v1891_v35  ;;  %v11589_v46 = vld [vmem:[%s13711_s9 + $0x844] ss:$48 sps:$4 sm:$0xff]   ;;  %v11584_v47 = vld [vmem:[%s13711_s9 + $0x240] ss:$48 sps:$4 sm:$0xff]  }
 0x541   : > { %3639 = vmatprep.subr.bf16.mxu1 %v10320_v53  ;;  %v10392_v53 = vcombine.high %v2015_v15, %v2019_v10  ;;  %v11587_v9 = vld [vmem:[%s13711_s9 + $0x840] ss:$48 sps:$4 sm:$0xff]  }
 0x543   : > { %3599 = vmatpush1.bf16.msra.mxu0 %v10191_v59  ;;  %v10263_v59 = vcombine.low %v1887_v34, %v1891_v35  ;;  %v11598_v34 = vld [vmem:[%s13711_s9 + $0x184] ss:$48 sps:$4 sm:$0xff]  }
 0x544   : > { %3640 = vmatpush1.bf16.msra.mxu1 %v10319_v42  ;;  %3600 = vmatprep.subr.bf16.mxu0 %v10184_v60  ;;  %v10391_v42 = vcombine.low %v2015_v15, %v2019_v10  ;;  %v10256_v60 = vcombine.high %v1879_v54, %v1883_v55  ;;  %v11601_v35 = vld [vmem:[%s13711_s9 + $0x784] ss:$48 sps:$4 sm:$0xff]   ;;  %v11596_v15 = vld [vmem:[%s13711_s9 + $0x180] ss:$48 sps:$4 sm:$0xff]  }
 0x545   : > { %3641 = vmatprep.subr.bf16.mxu1 %v10312_v41  ;;  %v10384_v41 = vcombine.high %v2007_v57, %v2011_v58  ;;  %v11599_v10 = vld [vmem:[%s13711_s9 + $0x780] ss:$48 sps:$4 sm:$0xff]  }
 0x547   : > { %3601 = vmatpush1.bf16.msra.mxu0 %v10183_v63  ;;  %v10255_v63 = vcombine.low %v1879_v54, %v1883_v55  ;;  %v11610_v55 = vld [vmem:[%s13711_s9 + $0xc4] ss:$48 sps:$4 sm:$0xff]  }
 0x548   : > { %3642 = vmatpush1.bf16.msra.mxu1 %v10311_v0  ;;  %3602 = vmatprep.subr.bf16.mxu0 %v10304_v1  ;;  %v10383_v0 = vcombine.low %v2007_v57, %v2011_v58  ;;  %v10248_v1 = vcombine.high %v1871_v37, %v1875_v38  ;;  %v11613_v57 = vld [vmem:[%s13711_s9 + $0x6c4] ss:$48 sps:$4 sm:$0xff]  }
 0x549   : > { %3643 = vmatprep.subr.bf16.mxu1 %v10432_v2  ;;  %v10376_v2 = vcombine.high %v1999_v61, %v2003_v62  ;;  %v11616_v62 = vld [vmem:[%s13711_s9 + $0x64] ss:$48 sps:$4 sm:$0xff]  }
 0x54b   : > { %3603 = vmatpush2.bf16.msra.mxu0 %v10303_v11 }
 0x54c   : > { %3644 = vmatpush2.bf16.msra.mxu1 %v10431_v12  ;;  %3604 = vmatprep.subr.bf16.mxu0 %v10296_v14 }
 0x54d   : > { %3645 = vmatprep.subr.bf16.mxu1 %v10424_v17 }
 0x54f   : > { %3605 = vmatpush2.bf16.msra.mxu0 %v10295_v25 }
 0x550   : > { %3646 = vmatpush2.bf16.msra.mxu1 %v10423_v26  ;;  %3606 = vmatprep.subr.bf16.mxu0 %v10288_v27 }
 0x551   : > { %3647 = vmatprep.subr.bf16.mxu1 %v10416_v19 }
 0x553   : > { %3607 = vmatpush2.bf16.msra.mxu0 %v10287_v13  ;;  %v11580_v13 = vld [vmem:[%s13711_s9 + $0x2a4] ss:$48 sps:$4 sm:$0xff]  }
 0x554   : > { %3648 = vmatpush2.bf16.msra.mxu1 %v10415_v40  ;;  %3608 = vmatprep.subr.bf16.mxu0 %v10280_v43  ;;  %v11583_v40 = vld [vmem:[%s13711_s9 + $0x8a4] ss:$48 sps:$4 sm:$0xff]   ;;  %v11578_v43 = vld [vmem:[%s13711_s9 + $0x2a0] ss:$48 sps:$4 sm:$0xff]  }
 0x555   : > { %3649 = vmatprep.subr.bf16.mxu1 %v10408_v44  ;;  %v11581_v44 = vld [vmem:[%s13711_s9 + $0x8a0] ss:$48 sps:$4 sm:$0xff]  }
 0x557   : > { %3609 = vmatpush2.bf16.msra.mxu0 %v10279_v29  ;;  %v11592_v29 = vld [vmem:[%s13711_s9 + $0x1e4] ss:$48 sps:$4 sm:$0xff]  }
 0x558   : > { %3650 = vmatpush2.bf16.msra.mxu1 %v10407_v30  ;;  %3610 = vmatprep.subr.bf16.mxu0 %v10272_v31  ;;  %v11595_v30 = vld [vmem:[%s13711_s9 + $0x7e4] ss:$48 sps:$4 sm:$0xff]   ;;  %v11590_v31 = vld [vmem:[%s13711_s9 + $0x1e0] ss:$48 sps:$4 sm:$0xff]  }
 0x559   : > { %3651 = vmatprep.subr.bf16.mxu1 %v10400_v33  ;;  %v11593_v33 = vld [vmem:[%s13711_s9 + $0x7e0] ss:$48 sps:$4 sm:$0xff]  }
 0x55b   : > { %3611 = vmatpush2.bf16.msra.mxu0 %v10271_v16  ;;  %v11604_v16 = vld [vmem:[%s13711_s9 + $0x124] ss:$48 sps:$4 sm:$0xff]  }
 0x55c   : > { %3652 = vmatpush2.bf16.msra.mxu1 %v10399_v49  ;;  %3612 = vmatprep.subr.bf16.mxu0 %v10264_v51  ;;  %v11607_v49 = vld [vmem:[%s13711_s9 + $0x724] ss:$48 sps:$4 sm:$0xff]   ;;  %v11602_v51 = vld [vmem:[%s13711_s9 + $0x120] ss:$48 sps:$4 sm:$0xff]  }
 0x55d   : > { %3653 = vmatprep.subr.bf16.mxu1 %v10392_v53  ;;  %v11605_v53 = vld [vmem:[%s13711_s9 + $0x720] ss:$48 sps:$4 sm:$0xff]  }
 0x55f   : > { %3613 = vmatpush2.bf16.msra.mxu0 %v10263_v59  ;;  %v11608_v59 = vld [vmem:[%s13711_s9 + $0xc0] ss:$48 sps:$4 sm:$0xff]  }
 0x560   : > { %3654 = vmatpush2.bf16.msra.mxu1 %v10391_v42  ;;  %3614 = vmatprep.subr.bf16.mxu0 %v10256_v60 }
 0x561   : > { %3655 = vmatprep.subr.bf16.mxu1 %v10384_v41  ;;  %v11611_v41 = vld [vmem:[%s13711_s9 + $0x6c0] ss:$48 sps:$4 sm:$0xff]  }
 0x563   : > { %3615 = vmatpush2.bf16.msra.mxu0 %v10255_v63  ;;  %v11619_v63 = vld [vmem:[%s13711_s9 + $0x664] ss:$48 sps:$4 sm:$0xff]  }
 0x564   : > { %3656 = vmatpush2.bf16.msra.mxu1 %v10383_v0  ;;  %3616 = vmatprep.subr.bf16.mxu0 %v10248_v1  ;;  %v11614_v1 = vld [vmem:[%s13711_s9 + $0x60] ss:$48 sps:$4 sm:$0xff]  }
 0x565   : > { %3657 = vmatprep.subr.bf16.mxu1 %v10376_v2  ;;  %v11617_v2 = vld [vmem:[%s13711_s9 + $0x660] ss:$48 sps:$4 sm:$0xff]  }
 0x567   : > { %3617 = vmatpush2.bf16.msra.mxu0 %v10247_v3 }
 0x568   : > { %3658 = vmatpush2.bf16.msra.mxu1 %v10375_v4  ;;  %8758 = vmatprep.subr.bf16.mxu0 %v11580_v13  ;;  %v11646_v13 = vld [vmem:[%s13711_s9 + $0x484] ss:$48 sps:$4 sm:$0xff]  }
 0x569   : > { %8799 = vmatprep.subr.bf16.mxu1 %v11583_v40  ;;  %v11649_v40 = vld [vmem:[%s13711_s9 + $0xa84] ss:$48 sps:$4 sm:$0xff]  }
 0x56a   : > { %3619 = vmatmul.mubr.bf16.vlgmr.msra.gmra.mxu0 %v13819_v23  ;;  %v3374_v5 = vpop.f32.mrf.mxu0 }
 0x56b   : > { %3660 = vmatmul.mubr.bf16.vlgmr.msra.gmra.mxu1 %v13822_v24  ;;  %v3415_v7 = vpop.f32.mrf.mxu1  ;;  %8759 = vmatpush1.bf16.msra.mxu0 %v11578_v43  ;;  %v11644_v43 = vld [vmem:[%s13711_s9 + $0x480] ss:$48 sps:$4 sm:$0xff]  }
 0x56c   : > { %v13844_v11 = vadd.f32 %v3415_v7, %v3374_v5  ;;  %v3376_v12 = vpop.f32.mrf.mxu0  ;;  %8800 = vmatpush1.bf16.msra.mxu1 %v11581_v44  ;;  %8760 = vmatprep.subr.bf16.mxu0 %v11586_v45  ;;  %v11622_v5 = vld [vmem:[%s13711_s9 + $0x4] ss:$48 sps:$4 sm:$0xff]   ;;  %v11647_v44 = vld [vmem:[%s13711_s9 + $0xa80] ss:$48 sps:$4 sm:$0xff]  }
 0x56d   : > { %v3417_v14 = vpop.f32.mrf.mxu1  ;;  %8801 = vmatprep.subr.bf16.mxu1 %v11589_v46  ;;  %v11625_v7 = vld [vmem:[%s13711_s9 + $0x604] ss:$48 sps:$4 sm:$0xff]  }
 0x56e   : > { %v13846_v17 = vadd.f32 %v3417_v14, %v3376_v12  ;;  %v3378_v18 = vpop.f32.mrf.mxu0  ;;  %v11620_v12 = vld [vmem:[%s13711_s9] ss:$48 sps:$4 sm:$0xff]  }
 0x56f   : > { %v3419_v8 = vpop.f32.mrf.mxu1  ;;  %8761 = vmatpush1.bf16.msra.mxu0 %v11584_v47  ;;  %v11623_v14 = vld [vmem:[%s13711_s9 + $0x600] ss:$48 sps:$4 sm:$0xff]   ;;  %v11628_v18 = vld [vmem:[%s13711_s9 + $0x5a4] ss:$48 sps:$4 sm:$0xff]  }
 0x570   : > { %v3379_v21 = vpop.f32.mrf.mxu0  ;;  %8802 = vmatpush1.bf16.msra.mxu1 %v11587_v9  ;;  %8762 = vmatprep.subr.bf16.mxu0 %v11592_v29  ;;  %v11631_v8 = vld [vmem:[%s13711_s9 + $0xba4] ss:$48 sps:$4 sm:$0xff]   ;;  %v3674_v45 = vrot.slane %v13846_v17, 4  ;;  %v11650_v29 = vld [vmem:[%s13711_s9 + $0x420] ss:$48 sps:$4 sm:$0xff]  }
 0x571   : > { %v3420_v22 = vpop.f32.mrf.mxu1  ;;  %8803 = vmatprep.subr.bf16.mxu1 %v11595_v30  ;;  %v11626_v21 = vld [vmem:[%s13711_s9 + $0x5a0] ss:$48 sps:$4 sm:$0xff]   ;;  %v11652_v47 = vld [vmem:[%s13711_s9 + $0x424] ss:$48 sps:$4 sm:$0xff]  }
 0x572   : > { %v11629_v22 = vld [vmem:[%s13711_s9 + $0xba0] ss:$48 sps:$4 sm:$0xff]   ;;  %v11655_v9 = vld [vmem:[%s13711_s9 + $0xa24] ss:$48 sps:$4 sm:$0xff]  }
 0x573   : > { %8763 = vmatpush1.bf16.msra.mxu0 %v11590_v31  ;;  %v11653_v30 = vld [vmem:[%s13711_s9 + $0xa20] ss:$48 sps:$4 sm:$0xff]  }
 0x574   : > { %8804 = vmatpush1.bf16.msra.mxu1 %v11593_v33  ;;  %8764 = vmatprep.subr.bf16.mxu0 %v11598_v34  ;;  %v3668_v33 = vrot.slane %v13844_v11, 4  ;;  %v3675_v34 = vadd.f32 %v3674_v45, %v13846_v17 }
 0x575   : > { %8805 = vmatprep.subr.bf16.mxu1 %v11601_v35 }
 0x577   : > { %8765 = vmatpush1.bf16.msra.mxu0 %v11596_v15 }
 0x578   : > { %8806 = vmatpush1.bf16.msra.mxu1 %v11599_v10  ;;  %8766 = vmatprep.subr.bf16.mxu0 %v11604_v16  ;;  %v11658_v10 = vld [vmem:[%s13711_s9 + $0x3c4] ss:$48 sps:$4 sm:$0xff]  }
 0x579   : > { %8807 = vmatprep.subr.bf16.mxu1 %v11607_v49  ;;  %v11661_v16 = vld [vmem:[%s13711_s9 + $0x9c4] ss:$48 sps:$4 sm:$0xff]   ;;  %v11656_v49 = vld [vmem:[%s13711_s9 + $0x3c0] ss:$48 sps:$4 sm:$0xff]  }
 0x57b   : > { %8767 = vmatpush1.bf16.msra.mxu0 %v11602_v51  ;;  %v11659_v51 = vld [vmem:[%s13711_s9 + $0x9c0] ss:$48 sps:$4 sm:$0xff]  }
 0x57c   : > { %8808 = vmatpush1.bf16.msra.mxu1 %v11605_v53  ;;  %8768 = vmatprep.subr.bf16.mxu0 %v11610_v55  ;;  %v3669_v55 = vadd.f32 %v3668_v33, %v13844_v11 }
 0x57d   : > { %8809 = vmatprep.subr.bf16.mxu1 %v11613_v57  ;;  %v3676_v57 = vrot.slane %v3675_v34, 2 }
 0x57f   : > { %8769 = vmatpush1.bf16.msra.mxu0 %v11608_v59 }
 0x580   : > { %8810 = vmatpush1.bf16.msra.mxu1 %v11611_v41  ;;  %8770 = vmatprep.subr.bf16.mxu0 %v11616_v62  ;;  %v11662_v41 = vld [vmem:[%s13711_s9 + $0x360] ss:$48 sps:$4 sm:$0xff]  }
 0x581   : > { %8811 = vmatprep.subr.bf16.mxu1 %v11619_v63 }
 0x583   : > { %8771 = vmatpush1.bf16.msra.mxu0 %v11614_v1 }
 0x584   : > { %8812 = vmatpush1.bf16.msra.mxu1 %v11617_v2  ;;  %8772 = vmatprep.subr.bf16.mxu0 %v11622_v5  ;;  %v3677_v5 = vadd.f32 %v3676_v57, %v3675_v34 }
 0x585   : > { %8813 = vmatprep.subr.bf16.mxu1 %v11625_v7  ;;  %v11668_v7 = vld [vmem:[%s13711_s9 + $0x300] ss:$48 sps:$4 sm:$0xff]  }
 0x587   : > { %8773 = vmatpush1.bf16.msra.mxu0 %v11620_v12  ;;  %v11671_v12 = vld [vmem:[%s13711_s9 + $0x900] ss:$48 sps:$4 sm:$0xff]  }
 0x588   : > { %8814 = vmatpush1.bf16.msra.mxu1 %v11623_v14  ;;  %8774 = vmatprep.subr.bf16.mxu0 %v11628_v18 }
 0x589   : > { %8815 = vmatprep.subr.bf16.mxu1 %v11631_v8 }
 0x58b   : > { %8775 = vmatpush2.bf16.msra.mxu0 %v11626_v21 }
 0x58c   : > { %8816 = vmatpush2.bf16.msra.mxu1 %v11629_v22 }
 0x5aa   : > { %v3456_v25 = vpop.f32.mrf.mxu0 }
 0x5ab   : > { %v3497_v23 = vpop.f32.mrf.mxu1 }
 0x5ac   : > { %v13848_v26 = vadd.f32 %v3497_v23, %v3456_v25  ;;  %v3458_v24 = vpop.f32.mrf.mxu0  ;;  %v11634_v25 = vld [vmem:[%s13711_s9 + $0x544] ss:$48 sps:$4 sm:$0xff]  }
 0x5ad   : > { %v3499_v27 = vpop.f32.mrf.mxu1  ;;  %v11637_v23 = vld [vmem:[%s13711_s9 + $0xb44] ss:$48 sps:$4 sm:$0xff]   ;;  %8776 = vmatprep.subr.bf16.mxu0 %v11634_v25  ;;  %v3678_v25 = vrot.slane %v3677_v5, 1 }
 0x5ae   : > { %v13850_v19 = vadd.f32 %v3499_v27, %v3458_v24  ;;  %v3460_v28 = vpop.f32.mrf.mxu0  ;;  %v11632_v24 = vld [vmem:[%s13711_s9 + $0x540] ss:$48 sps:$4 sm:$0xff]   ;;  %8817 = vmatprep.subr.bf16.mxu1 %v11637_v23  ;;  %v3680_v31 = vrot.slane %v13848_v26, 4  ;;  %v11676_v23 = vld [vmem:[%s13711_s9 + $0xea4] ss:$48 sps:$4 sm:$0xff]  }
 0x5af   : > { %v3501_v32 = vpop.f32.mrf.mxu1  ;;  %v11635_v27 = vld [vmem:[%s13711_s9 + $0xb40] ss:$48 sps:$4 sm:$0xff]   ;;  %8777 = vmatpush2.bf16.msra.mxu0 %v11632_v24  ;;  %v11640_v28 = vld [vmem:[%s13711_s9 + $0x4e4] ss:$48 sps:$4 sm:$0xff]  }
 0x5b0   : > { %v3461_v36 = vpop.f32.mrf.mxu0  ;;  %8818 = vmatpush2.bf16.msra.mxu1 %v11635_v27  ;;  %v11643_v32 = vld [vmem:[%s13711_s9 + $0xae4] ss:$48 sps:$4 sm:$0xff]   ;;  %8778 = vmatprep.subr.bf16.mxu0 %v11640_v28  ;;  %v3686_v46 = vrot.slane %v13850_v19, 4  ;;  %v3681_v53 = vadd.f32 %v3680_v31, %v13848_v26 }
 0x5b1   : > { %v3502_v39 = vpop.f32.mrf.mxu1  ;;  %v11638_v36 = vld [vmem:[%s13711_s9 + $0x4e0] ss:$48 sps:$4 sm:$0xff]   ;;  %8819 = vmatprep.subr.bf16.mxu1 %v11643_v32  ;;  %v11679_v24 = vld [vmem:[%s13711_s9 + $0x14a4] ss:$48 sps:$4 sm:$0xff]  }
 0x5b2   : > { %v11641_v39 = vld [vmem:[%s13711_s9 + $0xae0] ss:$48 sps:$4 sm:$0xff]   ;;  %v3687_v35 = vadd.f32 %v3686_v46, %v13850_v19  ;;  %v3682_v62 = vrot.slane %v3681_v53, 2 }
 0x5b3   : > { %8779 = vmatpush2.bf16.msra.mxu0 %v11638_v36 }
 0x5b4   : > { %8820 = vmatpush2.bf16.msra.mxu1 %v11641_v39  ;;  %8780 = vmatprep.subr.bf16.mxu0 %v11646_v13  ;;  %v3683_v14 = vadd.f32 %v3682_v62, %v3681_v53  ;;  %v3679_v13 = vadd.f32 %v3678_v25, %v3677_v5 }
 0x5b5   : > { %8821 = vmatprep.subr.bf16.mxu1 %v11649_v40 }
 0x5b6   : > { %v3684_v27 = vrot.slane %v3683_v14, 1 }
 0x5b7   : > { %8781 = vmatpush2.bf16.msra.mxu0 %v11644_v43 }
 0x5b8   : > { %8822 = vmatpush2.bf16.msra.mxu1 %v11647_v44  ;;  %8782 = vmatprep.subr.bf16.mxu0 %v11652_v47  ;;  %v3685_v40 = vadd.f32 %v3684_v27, %v3683_v14  ;;  %v13936_v47 = vmul.f32 0.125, %v3679_v13 }
 0x5b9   : > { %8823 = vmatprep.subr.bf16.mxu1 %v11655_v9 }
 0x5ba   : > { %v13938_v9 = vmul.f32 0.125, %v3685_v40  ;;  %v3725_v34 = vsub.f32 %v13846_v17, %v13936_v47 }
 0x5bb   : > { %8783 = vmatpush2.bf16.msra.mxu0 %v11650_v29 }
 0x5bc   : > { %8824 = vmatpush2.bf16.msra.mxu1 %v11653_v30  ;;  %8784 = vmatprep.subr.bf16.mxu0 %v11658_v10 }
 0x5bd   : > { %8825 = vmatprep.subr.bf16.mxu1 %v11661_v16 }
 0x5bf   : > { %8785 = vmatpush2.bf16.msra.mxu0 %v11656_v49 }
 0x5c0   : > { %8826 = vmatpush2.bf16.msra.mxu1 %v11659_v51  ;;  %v3733_v51 = vmul.f32 %v3725_v34, %v3725_v34 }
 0x5ea   : > { %v3538_v54 = vpop.f32.mrf.mxu0 }
 0x5eb   : > { %v3579_v58 = vpop.f32.mrf.mxu1 }
 0x5ec   : > { %v13875_v42 = vadd.f32 %v3579_v58, %v3538_v54  ;;  %v3540_v60 = vpop.f32.mrf.mxu0  ;;  %v3688_v58 = vrot.slane %v3687_v35, 2 }
 0x5ed   : > { %v3581_v37 = vpop.f32.mrf.mxu1 }
 0x5ee   : > { %v13878_v38 = vadd.f32 %v3581_v37, %v3540_v60  ;;  %v3542_v61 = vpop.f32.mrf.mxu0  ;;  %v3692_v54 = vrot.slane %v13875_v42, 4  ;;  %v11664_v60 = vld [vmem:[%s13711_s9 + $0x364] ss:$48 sps:$4 sm:$0xff]   ;;  %v11665_v37 = vld [vmem:[%s13711_s9 + $0x960] ss:$48 sps:$4 sm:$0xff]   ;;  %v3689_v1 = vadd.f32 %v3688_v58, %v3687_v35  ;;  %v3726_v35 = vsub.f32 %v13848_v26, %v13938_v9 }
 0x5ef   : > { %v3583_v0 = vpop.f32.mrf.mxu1  ;;  %v11667_v61 = vld [vmem:[%s13711_s9 + $0x964] ss:$48 sps:$4 sm:$0xff]   ;;  %8786 = vmatprep.subr.bf16.mxu0 %v11664_v60  ;;  %v3746_v60 = vrot.slane %v3733_v51, 4 }
 0x5f0   : > { %v3543_v3 = vpop.f32.mrf.mxu0  ;;  %v3698_v15 = vrot.slane %v13878_v38, 4  ;;  %v3693_v63 = vadd.f32 %v3692_v54, %v13875_v42  ;;  %v3670_v0 = vrot.slane %v3669_v55, 2  ;;  %8827 = vmatprep.subr.bf16.mxu1 %v11667_v61  ;;  %8787 = vmatpush2.bf16.msra.mxu0 %v11662_v41  ;;  %v3690_v21 = vrot.slane %v3689_v1, 1 }
 0x5f1   : > { %v3584_v4 = vpop.f32.mrf.mxu1  ;;  %8828 = vmatpush2.bf16.msra.mxu1 %v11665_v37  ;;  %v11670_v3 = vld [vmem:[%s13711_s9 + $0x304] ss:$48 sps:$4 sm:$0xff]   ;;  %v3734_v53 = vmul.f32 %v3726_v35, %v3726_v35 }
 0x5f2   : > { %v3699_v59 = vadd.f32 %v3698_v15, %v13878_v38  ;;  %v11673_v4 = vld [vmem:[%s13711_s9 + $0x904] ss:$48 sps:$4 sm:$0xff]   ;;  %v3694_v18 = vrot.slane %v3693_v63, 2  ;;  %8788 = vmatprep.subr.bf16.mxu0 %v11670_v3  ;;  %v3671_v8 = vadd.f32 %v3670_v0, %v3669_v55  ;;  %v3691_v36 = vadd.f32 %v3690_v21, %v3689_v1 }
 0x5f3   : > { %8829 = vmatprep.subr.bf16.mxu1 %v11673_v4  ;;  %v3752_v37 = vrot.slane %v3734_v53, 4 }
 0x5f4   : > { %v3700_v2 = vrot.slane %v3699_v59, 2  ;;  %8789 = vmatpush2.bf16.msra.mxu0 %v11668_v7  ;;  %v3695_v28 = vadd.f32 %v3694_v18, %v3693_v63  ;;  %v3672_v32 = vrot.slane %v3671_v8, 1  ;;  %v13934_v45 = vmul.f32 0.125, %v3691_v36 }
 0x5f5   : > { %8830 = vmatpush2.bf16.msra.mxu1 %v11671_v12  ;;  %8840 = vmatprep.subr.bf16.mxu0 %v11676_v23  ;;  %v3747_v12 = vadd.f32 %v3746_v60, %v3733_v51  ;;  %v3753_v18 = vadd.f32 %v3752_v37, %v3734_v53 }
 0x5f6   : > { %v3701_v22 = vadd.f32 %v3700_v2, %v3699_v59  ;;  %8881 = vmatprep.subr.bf16.mxu1 %v11679_v24  ;;  %v3696_v43 = vrot.slane %v3695_v28, 1  ;;  %v3673_v44 = vadd.f32 %v3672_v32, %v3671_v8  ;;  %v3727_v31 = vsub.f32 %v13850_v19, %v13934_v45 }
 0x5f7   : > { %v3754_v13 = vrot.slane %v3753_v18, 2 }
 0x5f8   : > { %v3702_v39 = vrot.slane %v3701_v22, 1  ;;  %v3697_v29 = vadd.f32 %v3696_v43, %v3695_v28  ;;  %v13940_v30 = vmul.f32 0.125, %v3673_v44  ;;  %v3735_v16 = vmul.f32 %v3727_v31, %v3727_v31 }
 0x5fa   : > { %v3703_v46 = vadd.f32 %v3702_v39, %v3701_v22  ;;  %v13950_v15 = vmul.f32 0.125, %v3697_v29  ;;  %v3724_v10 = vsub.f32 %v13844_v11, %v13940_v30  ;;  %v3758_v57 = vrot.slane %v3735_v16, 4 }
 0x5fb   : > { %v3748_v39 = vrot.slane %v3747_v12, 2 }
 0x5fc   : > { %v13944_v33 = vmul.f32 0.125, %v3703_v46  ;;  %v3728_v54 = vsub.f32 %v13875_v42, %v13950_v15  ;;  %v3732_v55 = vmul.f32 %v3724_v10, %v3724_v10  ;;  %v3759_v2 = vadd.f32 %v3758_v57, %v3735_v16 }
 0x5fd   : > { %v3749_v10 = vadd.f32 %v3748_v39, %v3747_v12  ;;  %v3755_v16 = vadd.f32 %v3754_v13, %v3753_v18 }
 0x5fe   : > { %v3729_v49 = vsub.f32 %v13878_v38, %v13944_v33  ;;  %v3736_v61 = vmul.f32 %v3728_v54, %v3728_v54  ;;  %v3740_v0 = vrot.slane %v3732_v55, 4  ;;  %v3760_v27 = vrot.slane %v3759_v2, 2 }
 0x5ff   : > { %v3750_v60 = vrot.slane %v3749_v10, 1 }
 0x600   : > { %v3737_v58 = vmul.f32 %v3729_v49, %v3729_v49  ;;  %v3764_v8 = vrot.slane %v3736_v61, 4  ;;  %v3741_v23 = vadd.f32 %v3740_v0, %v3732_v55  ;;  %v3761_v29 = vadd.f32 %v3760_v27, %v3759_v2 }
 0x602   : > { %v3770_v3 = vrot.slane %v3737_v58, 4  ;;  %v3765_v40 = vadd.f32 %v3764_v8, %v3736_v61  ;;  %v3742_v46 = vrot.slane %v3741_v23, 2  ;;  %v3762_v55 = vrot.slane %v3761_v29, 1 }
 0x604   : > { %v3771_v28 = vadd.f32 %v3770_v3, %v3737_v58  ;;  %v3766_v49 = vrot.slane %v3765_v40, 2  ;;  %v3743_v54 = vadd.f32 %v3742_v46, %v3741_v23 }
 0x606   : > { %v3772_v31 = vrot.slane %v3771_v28, 2  ;;  %v3767_v37 = vadd.f32 %v3766_v49, %v3765_v40  ;;  %v3744_v0 = vrot.slane %v3743_v54, 1 }
 0x608   : > { %v3773_v57 = vadd.f32 %v3772_v31, %v3771_v28 }
 0x60a   : > { %v3774_v2 = vrot.slane %v3773_v57, 1 }
 0x62a   : > { %v3620_v59 = vpop.f32.mrf.mxu0 }
 0x62b   : > { %v3661_v41 = vpop.f32.mrf.mxu1 }
 0x62c   : > { %v13958_v62 = vadd.f32 %v3661_v41, %v3620_v59  ;;  %v3622_v63 = vpop.f32.mrf.mxu0  ;;  %v3756_v41 = vrot.slane %v3755_v16, 1 }
 0x62d   : > { %v3663_v1 = vpop.f32.mrf.mxu1 }
 0x62e   : > { %v3704_v4 = vrot.slane %v13958_v62, 4  ;;  %v13961_v5 = vadd.f32 %v3663_v1, %v3622_v63  ;;  %v3624_v7 = vpop.f32.mrf.mxu0  ;;  %v3763_v1 = vadd.f32 %v3762_v55, %v3761_v29  ;;  %v3757_v12 = vadd.f32 %v3756_v41, %v3755_v16 }
 0x62f   : > { %v3665_v14 = vpop.f32.mrf.mxu1  ;;  %v3751_v7 = vadd.f32 %v3750_v60, %v3749_v10 }
 0x630   : > { %v3705_v21 = vadd.f32 %v3704_v4, %v13958_v62  ;;  %v3710_v22 = vrot.slane %v13961_v5, 4  ;;  %v3625_v25 = vpop.f32.mrf.mxu0  ;;  %v3768_v14 = vrot.slane %v3767_v37, 1  ;;  %v3790_v28 = vmul.f32 0.125, %v3757_v12 }
 0x631   : > { %v3666_v24 = vpop.f32.mrf.mxu1  ;;  %v3775_v25 = vadd.f32 %v3774_v2, %v3773_v57  ;;  %v3789_v27 = vmul.f32 0.125, %v3751_v7 }
 0x632   : > { %v3706_v32 = vrot.slane %v3705_v21, 2  ;;  %v3711_v36 = vadd.f32 %v3710_v22, %v13961_v5  ;;  %v3791_v22 = vmul.f32 0.125, %v3763_v1  ;;  %v3799_v31 = vadd.f32 1e-05, %v3790_v28 }
 0x633   : > { %v3798_v29 = vadd.f32 1e-05, %v3789_v27 }
 0x634   : > { %v3707_v43 = vadd.f32 %v3706_v32, %v3705_v21  ;;  %v3712_v44 = vrot.slane %v3711_v36, 2  ;;  %v3745_v21 = vadd.f32 %v3744_v0, %v3743_v54  ;;  %v3769_v32 = vadd.f32 %v3768_v14, %v3767_v37 }
 0x635   : > { %v3800_v40 = vadd.f32 1e-05, %v3791_v22 }
 0x636   : > { %v3708_v34 = vrot.slane %v3707_v43, 1  ;;  %v3713_v35 = vadd.f32 %v3712_v44, %v3711_v36  ;;  %v3788_v13 = vmul.f32 0.125, %v3745_v21 }
 0x637   : > { %12758 = vrsqrt.f32 %v3800_v40  ;;  %v13984_v40 = vsub.s32 5, %v13717_v50 }
 0x638   : > { %v3709_v51 = vadd.f32 %v3708_v34, %v3707_v43  ;;  %v3714_v53 = vrot.slane %v3713_v35, 1  ;;  %v3793_v43 = vmul.f32 0.125, %v3775_v25  ;;  %v3792_v34 = vmul.f32 0.125, %v3769_v32 }
 0x639   : > { %v3797_v16 = vadd.f32 1e-05, %v3788_v13  ;;  %12760 = vrsqrt.f32 %v3798_v29  ;;  %v13981_v13 = vsub.s32 4, %v13717_v50 }
 0x63a   : > { %v13966_v58 = vmul.f32 0.125, %v3709_v51  ;;  %v3715_v59 = vadd.f32 %v3714_v53, %v3713_v35  ;;  %v3802_v49 = vadd.f32 1e-05, %v3793_v43  ;;  %12762 = vrsqrt.f32 %v3799_v31 }
 0x63b   : > { %v3801_v54 = vadd.f32 1e-05, %v3792_v34  ;;  %12764 = vrsqrt.f32 %v3797_v16  ;;  %v13987_v43 = vsub.s32 6, %v13717_v50 }
 0x63c   : > { %v3730_v61 = vsub.f32 %v13958_v62, %v13966_v58  ;;  %v13970_v63 = vmul.f32 0.125, %v3715_v59  ;;  %12766 = vrsqrt.f32 %v3802_v49 }
 0x63d   : > { %12768 = vrsqrt.f32 %v3801_v54 }
 0x63e   : > { %v3738_v3 = vmul.f32 %v3730_v61, %v3730_v61  ;;  %v3731_v4 = vsub.f32 %v13961_v5, %v13970_v63 }
 0x640   : > { %v3776_v18 = vrot.slane %v3738_v3, 4  ;;  %v3739_v8 = vmul.f32 %v3731_v4, %v3731_v4 }
 0x642   : > { %v3777_v23 = vadd.f32 %v3776_v18, %v3738_v3  ;;  %v3782_v24 = vrot.slane %v3739_v8, 4 }
 0x644   : > { %v3778_v36 = vrot.slane %v3777_v23, 2  ;;  %v3783_v39 = vadd.f32 %v3782_v24, %v3739_v8  ;;  %v12759_v37 = vpop.eup %12758 }
 0x646   : > { %v3779_v44 = vadd.f32 %v3778_v36, %v3777_v23  ;;  %v3784_v46 = vrot.slane %v3783_v39, 2  ;;  %v12761_v61 = vpop.eup %12760  ;;  %v3796_v36 = vld [vmem:[#allocation20] sm:$0xff] }
 0x647   : > { %v12763_v0 = vpop.eup %12762 }
 0x648   : > { %v3780_v35 = vrot.slane %v3779_v44, 1  ;;  %v3785_v10 = vadd.f32 %v3784_v46, %v3783_v39  ;;  %v12765_v1 = vpop.eup %12764  ;;  %v3822_v2 = vcombine.low %v12763_v0, %v12759_v37 }
 0x649   : > { %v12767_v3 = vpop.eup %12766  ;;  %v3821_v4 = vcombine.low %v12765_v1, %v12761_v61 }
 0x64a   : > { %v3781_v51 = vadd.f32 %v3780_v35, %v3779_v44  ;;  %v3786_v53 = vrot.slane %v3785_v10, 1  ;;  %v12769_v7 = vpop.eup %12768  ;;  %v3838_v14 = vrot.slane %v3822_v2, %v13725_v48  ;;  %v13990_v44 = vsub.s32 7, %v13717_v50 }
 0x64b   : > { %v3823_v18 = vcombine.low %v12769_v7, %v12767_v3  ;;  %v3831_v21 = vrot.slane %v3821_v4, %v13725_v48  ;;  %v3872_v3 = vld [vmem:[#allocation22] sm:$0xff] }
 0x64c   : > { %v3794_v55 = vmul.f32 0.125, %v3781_v51  ;;  %v3787_v57 = vadd.f32 %v3786_v53, %v3785_v10 }
 0x64d   : > { %v3853_v25 = vcombine.low %v3831_v21, %v3838_v14  ;;  %v3845_v23 = vrot.slane %v3823_v18, %v13725_v48 }
 0x64e   : > { %v3803_v59 = vadd.f32 1e-05, %v3794_v55  ;;  %v3795_v60 = vmul.f32 0.125, %v3787_v57 }
 0x64f   : > { %v3861_v28 = vrot.slane %v3853_v25, %v13725_v48 }
 0x650   : > { %v3804_v41 = vadd.f32 1e-05, %v3795_v60  ;;  %12770 = vrsqrt.f32 %v3803_v59 }
 0x652   : > { %12772 = vrsqrt.f32 %v3804_v41 }
 0x65d   : > { %v12771_v12 = vpop.eup %12770 }
 0x65f   : > { %v12773_v8 = vpop.eup %12772 }
 0x660   : > { %v3824_v22 = vcombine.low %v12771_v12, %v12773_v8 }
 0x662   : > { %v3852_v24 = vrot.slane %v3824_v22, %v13725_v48 }
 0x664   : > { %v3854_v27 = vcombine.low %v3845_v23, %v3852_v24 }
 0x666   : > { %v3868_v32 = vrot.slane %v3854_v27, %v13725_v48 }
 0x668   : > { %v3869_v39 = vcombine.low %v3861_v28, %v3868_v32 }
 0x66a   : > { %v3871_v46 = vmul.f32 %v3869_v39, %v3796_v36 }
 0x66c   : > { %v3877_v29 = vrot.slane %v3871_v46, %v13720_v52  ;;  %v3881_v31 = vrot.slane %v3871_v46, %v13730_v56  ;;  %v3885_v34 = vrot.slane %v3871_v46, %v13790_v20  ;;  %v3889_v35 = vrot.slane %v3871_v46, %v13793_v6 }
 0x66d   : > { %v3893_v10 = vrot.slane %v3871_v46, %v13981_v13  ;;  %v3897_v16 = vrot.slane %v3871_v46, %v13984_v40  ;;  %v3901_v49 = vrot.slane %v3871_v46, %v13987_v43  ;;  %v3905_v51 = vrot.slane %v3871_v46, %v13990_v44 }
 0x66e   : > { %v3914_v50 = vmul.f32 %v3877_v29, %v13940_v30  ;;  %v3915_v53 = vmul.f32 %v3881_v31, %v13936_v47  ;;  %v3916_v54 = vmul.f32 %v3885_v34, %v13938_v9  ;;  %v3917_v55 = vmul.f32 %v3889_v35, %v13934_v45 }
 0x66f   : > { %v3918_v57 = vmul.f32 %v3893_v10, %v13950_v15  ;;  %v3919_v59 = vmul.f32 %v3897_v16, %v13944_v33  ;;  %v3920_v60 = vmul.f32 %v3901_v49, %v13966_v58  ;;  %v3921_v41 = vmul.f32 %v3905_v51, %v13970_v63 }
 0x670   : > { %v3930_v37 = vcombine.low %v3914_v50, %v3915_v53  ;;  %v3931_v61 = vcombine.low %v3916_v54, %v3917_v55  ;;  %v3987_v4 = vmul.f32 %v3901_v49, %v13958_v62  ;;  %v3988_v12 = vmul.f32 %v3905_v51, %v13961_v5 }
 0x671   : > { %v3932_v0 = vcombine.low %v3918_v57, %v3919_v59  ;;  %v3933_v1 = vcombine.low %v3920_v60, %v3921_v41  ;;  %v3982_v14 = vmul.f32 %v3881_v31, %v13846_v17  ;;  %v3984_v18 = vmul.f32 %v3889_v35, %v13850_v19 }
 0x672   : > { %v3940_v30 = vrot.slane %v3930_v37, %v13725_v48  ;;  %v3947_v47 = vrot.slane %v3931_v61, %v13725_v48  ;;  %v3981_v8 = vmul.f32 %v3877_v29, %v13844_v11  ;;  %v3983_v21 = vmul.f32 %v3885_v34, %v13848_v26 }
 0x673   : > { %v3954_v9 = vrot.slane %v3932_v0, %v13725_v48  ;;  %v3961_v45 = vrot.slane %v3933_v1, %v13725_v48  ;;  %v3986_v22 = vmul.f32 %v3897_v16, %v13878_v38  ;;  %v3985_v25 = vmul.f32 %v3893_v10, %v13875_v42 }
 0x674   : > { %v3962_v2 = vcombine.low %v3940_v30, %v3947_v47 }
 0x675   : > { %v3963_v15 = vcombine.low %v3954_v9, %v3961_v45 }
 0x676   : > { %v3970_v33 = vrot.slane %v3962_v2, %v13725_v48 }
 0x677   : > { %v3977_v58 = vrot.slane %v3963_v15, %v13725_v48 }
 0x679   : > { %v3978_v63 = vcombine.low %v3970_v33, %v3977_v58 }
 0x67b   : > { %v3980_v7 = vsub.f32 %v3872_v3, %v3978_v63  ;;  %v11674_v63 = vld [vmem:[%s13711_s9 + $0xea0] ss:$48 sps:$4 sm:$0xff]  }
 0x67d   : > { %v4021_v48 = vrot.slane %v3980_v7, %v13990_v44  ;;  %v3997_v23 = vrot.slane %v3980_v7, %v13730_v56  ;;  %v4005_v62 = vrot.slane %v3980_v7, %v13793_v6  ;;  %v3993_v5 = vrot.slane %v3980_v7, %v13720_v52 }
 0x67e   : > { %v4001_v17 = vrot.slane %v3980_v7, %v13790_v20  ;;  %v4013_v19 = vrot.slane %v3980_v7, %v13984_v40  ;;  %v4009_v11 = vrot.slane %v3980_v7, %v13981_v13  ;;  %v4017_v26 = vrot.slane %v3980_v7, %v13987_v43  ;;  %v11677_v7 = vld [vmem:[%s13711_s9 + $0x14a0] ss:$48 sps:$4 sm:$0xff]  }
 0x67f   : > { %v4037_v24 = vadd.f32 %v4021_v48, %v3988_v12  ;;  %v4031_v38 = vadd.f32 %v3997_v23, %v3982_v14  ;;  %v4033_v27 = vadd.f32 %v4005_v62, %v3984_v18  ;;  %v4030_v42 = vadd.f32 %v3993_v5, %v3981_v8  ;;  %v11682_v8 = vld [vmem:[%s13711_s9 + $0xe44] ss:$48 sps:$4 sm:$0xff]   ;;  %v11680_v48 = vld [vmem:[%s13711_s9 + $0xe40] ss:$48 sps:$4 sm:$0xff]  }
 0x680   : > { %v4032_v28 = vadd.f32 %v4001_v17, %v3983_v21  ;;  %v4035_v32 = vadd.f32 %v4013_v19, %v3986_v22  ;;  %v14030_v36 = vadd.f32 %v4009_v11, %v3985_v25  ;;  %v14032_v39 = vadd.f32 %v4017_v26, %v3987_v4  ;;  %v11685_v22 = vld [vmem:[%s13711_s9 + $0x1444] ss:$48 sps:$4 sm:$0xff]   ;;  %v11683_v23 = vld [vmem:[%s13711_s9 + $0x1440] ss:$48 sps:$4 sm:$0xff]  }
 0x681   : > { %v4053_v46 = vmul.f32 0.70710677, %v4037_v24  ;;  %v4047_v29 = vmul.f32 0.70710677, %v4031_v38  ;;  %v4049_v31 = vmul.f32 0.70710677, %v4033_v27 }
 0x682   : > { %v4046_v34 = vmul.f32 0.70710677, %v4030_v42  ;;  %v4048_v35 = vmul.f32 0.70710677, %v4032_v28  ;;  %v4051_v10 = vmul.f32 0.70710677, %v4035_v32 }
 0x683   : > { %12774 = verf.f32 %v4053_v46  ;;  %v4039_v50 = vmul.f32 0.5, %v4031_v38  ;;  %v4041_v57 = vmul.f32 0.5, %v4033_v27  ;;  %v4038_v37 = vmul.f32 0.5, %v4030_v42  ;;  %v11688_v62 = vld [vmem:[%s13711_s9 + $0xde4] ss:$48 sps:$4 sm:$0xff]  }
 0x684   : > { %12776 = verf.f32 %v4047_v29  ;;  %v4045_v1 = vmul.f32 0.5, %v4037_v24  ;;  %v4040_v47 = vmul.f32 0.5, %v4032_v28  ;;  %v4043_v15 = vmul.f32 0.5, %v4035_v32  ;;  %v11691_v5 = vld [vmem:[%s13711_s9 + $0x13e4] ss:$48 sps:$4 sm:$0xff]  }
 0x685   : > { %12778 = verf.f32 %v4049_v31  ;;  %v11686_v17 = vld [vmem:[%s13711_s9 + $0xde0] ss:$48 sps:$4 sm:$0xff]   ;;  %v11694_v11 = vld [vmem:[%s13711_s9 + $0xd84] ss:$48 sps:$4 sm:$0xff]  }
 0x686   : > { %12780 = verf.f32 %v4046_v34  ;;  %v11689_v19 = vld [vmem:[%s13711_s9 + $0x13e0] ss:$48 sps:$4 sm:$0xff]   ;;  %v11697_v26 = vld [vmem:[%s13711_s9 + $0x1384] ss:$48 sps:$4 sm:$0xff]  }
 0x687   : > { %12782 = verf.f32 %v4048_v35  ;;  %v11692_v24 = vld [vmem:[%s13711_s9 + $0xd80] ss:$48 sps:$4 sm:$0xff]   ;;  %v11700_v27 = vld [vmem:[%s13711_s9 + $0xd24] ss:$48 sps:$4 sm:$0xff]  }
 0x688   : > { %12784 = verf.f32 %v4051_v10  ;;  %v11695_v38 = vld [vmem:[%s13711_s9 + $0x1380] ss:$48 sps:$4 sm:$0xff]   ;;  %v11703_v42 = vld [vmem:[%s13711_s9 + $0x1324] ss:$48 sps:$4 sm:$0xff]  }
 0x689   : > { %v11698_v28 = vld [vmem:[%s13711_s9 + $0xd20] ss:$48 sps:$4 sm:$0xff]   ;;  %v11706_v46 = vld [vmem:[%s13711_s9 + $0xcc4] ss:$48 sps:$4 sm:$0xff]  }
 0x68a   : > { %v11701_v32 = vld [vmem:[%s13711_s9 + $0x1320] ss:$48 sps:$4 sm:$0xff]   ;;  %v11709_v29 = vld [vmem:[%s13711_s9 + $0x12c4] ss:$48 sps:$4 sm:$0xff]  }
 0x68b   : > { %v11704_v31 = vld [vmem:[%s13711_s9 + $0xcc0] ss:$48 sps:$4 sm:$0xff]   ;;  %v11712_v35 = vld [vmem:[%s13711_s9 + $0xc64] ss:$48 sps:$4 sm:$0xff]  }
 0x68c   : > { %v11707_v34 = vld [vmem:[%s13711_s9 + $0x12c0] ss:$48 sps:$4 sm:$0xff]   ;;  %v11715_v10 = vld [vmem:[%s13711_s9 + $0x1264] ss:$48 sps:$4 sm:$0xff]  }
 0x690   : > { %v12775_v16 = vpop.eup %12774 }
 0x691   : > { %v12777_v49 = vpop.eup %12776  ;;  %v4069_v55 = vadd.f32 1.0, %v12775_v16  ;;  %v11710_v16 = vld [vmem:[%s13711_s9 + $0xc60] ss:$48 sps:$4 sm:$0xff]  }
 0x692   : > { %v12779_v51 = vpop.eup %12778  ;;  %v4063_v53 = vadd.f32 1.0, %v12777_v49  ;;  %v11713_v49 = vld [vmem:[%s13711_s9 + $0x1260] ss:$48 sps:$4 sm:$0xff]  }
 0x693   : > { %v12781_v54 = vpop.eup %12780  ;;  %v4065_v59 = vadd.f32 1.0, %v12779_v51  ;;  %v4077_v58 = vmul.f32 %v4069_v55, %v4045_v1  ;;  %v11718_v51 = vld [vmem:[%s13711_s9 + $0xc04] ss:$48 sps:$4 sm:$0xff]  }
 0x694   : > { %v12783_v60 = vpop.eup %12782  ;;  %v4071_v41 = vmul.f32 %v4063_v53, %v4039_v50  ;;  %v4062_v61 = vadd.f32 1.0, %v12781_v54  ;;  %v11721_v50 = vld [vmem:[%s13711_s9 + $0x1204] ss:$48 sps:$4 sm:$0xff]   ;;  %v11716_v53 = vld [vmem:[%s13711_s9 + $0xc00] ss:$48 sps:$4 sm:$0xff]  }
 0x695   : > { %v12785_v0 = vpop.eup %12784  ;;  %v4073_v30 = vmul.f32 %v4065_v59, %v4041_v57  ;;  %v4064_v9 = vadd.f32 1.0, %v12783_v60  ;;  %v14051_v25 = vpack.c.bf16 %v4077_v58, %v4077_v58  ;;  %v11719_v54 = vld [vmem:[%s13711_s9 + $0x1200] ss:$48 sps:$4 sm:$0xff]   ;;  %v11724_v55 = vld [vmem:[%s13711_s9 + $0x11a4] ss:$48 sps:$4 sm:$0xff]  }
 0x696   : > { %v14034_v45 = vpack.c.bf16 %v4071_v41, %v4071_v41  ;;  %v4070_v2 = vmul.f32 %v4062_v61, %v4038_v37  ;;  %v4067_v33 = vadd.f32 1.0, %v12785_v0  ;;  %v11727_v57 = vld [vmem:[%s13711_s9 + $0x17a4] ss:$48 sps:$4 sm:$0xff]   ;;  %v11722_v59 = vld [vmem:[%s13711_s9 + $0x11a0] ss:$48 sps:$4 sm:$0xff]  }
 0x697   : > { %v14036_v3 = vpack.c.bf16 %v4073_v30, %v4073_v30  ;;  %v4072_v4 = vmul.f32 %v4064_v9, %v4040_v47  ;;  %v11725_v60 = vld [vmem:[%s13711_s9 + $0x17a0] ss:$48 sps:$4 sm:$0xff]   ;;  %v11730_v41 = vld [vmem:[%s13711_s9 + $0x1144] ss:$48 sps:$4 sm:$0xff]   ;;  %v4050_v30 = vmul.f32 0.70710677, %v14030_v36 }
 0x698   : > { %8790 = vmatprep.mubr.bf16.mxu0 %v14034_v45  ;;  %v14041_v12 = vpack.c.bf16 %v4070_v2, %v4070_v2  ;;  %v4075_v14 = vmul.f32 %v4067_v33, %v4043_v15  ;;  %v11733_v37 = vld [vmem:[%s13711_s9 + $0x1744] ss:$48 sps:$4 sm:$0xff]   ;;  %v11728_v61 = vld [vmem:[%s13711_s9 + $0x1140] ss:$48 sps:$4 sm:$0xff]   ;;  %v4052_v9 = vmul.f32 0.70710677, %v14032_v39 }
 0x699   : > { %8831 = vmatprep.mubr.bf16.mxu1 %v14036_v3  ;;  %v14044_v18 = vpack.c.bf16 %v4072_v4, %v4072_v4  ;;  %v11731_v0 = vld [vmem:[%s13711_s9 + $0x1740] ss:$48 sps:$4 sm:$0xff]   ;;  %v11736_v1 = vld [vmem:[%s13711_s9 + $0x10e4] ss:$48 sps:$4 sm:$0xff]   ;;  %12786 = verf.f32 %v4050_v30  ;;  %v11791_v30 = vld [vmem:[%s13711_s9 + $0x788] ss:$48 sps:$4 sm:$0xff]  }
 0x69a   : > { %8791 = vmatmul.mubr.bf16.vlgmr.msra.gmra.mxu0 %v14041_v12  ;;  %v14048_v21 = vpack.c.bf16 %v4075_v14, %v4075_v14  ;;  %v11739_v47 = vld [vmem:[%s13711_s9 + $0x16e4] ss:$48 sps:$4 sm:$0xff]   ;;  %v11734_v2 = vld [vmem:[%s13711_s9 + $0x10e0] ss:$48 sps:$4 sm:$0xff]   ;;  %12788 = verf.f32 %v4052_v9  ;;  %v11799_v9 = vld [vmem:[%s13711_s9 + $0x72c] ss:$48 sps:$4 sm:$0xff]  }
 0x69b   : > { %8832 = vmatmul.mubr.bf16.vlgmr.msra.gmra.mxu1 %v14044_v18  ;;  %8841 = vmatpush1.bf16.msra.mxu0 %v11674_v63  ;;  %v11737_v15 = vld [vmem:[%s13711_s9 + $0x16e0] ss:$48 sps:$4 sm:$0xff]   ;;  %v11742_v33 = vld [vmem:[%s13711_s9 + $0x1084] ss:$48 sps:$4 sm:$0xff]  }
 0x69c   : > { %8882 = vmatpush1.bf16.msra.mxu1 %v11677_v7  ;;  %8872 = vmatprep.mubr.bf16.mxu0 %v14048_v21  ;;  %v11745_v58 = vld [vmem:[%s13711_s9 + $0x1684] ss:$48 sps:$4 sm:$0xff]   ;;  %v11740_v63 = vld [vmem:[%s13711_s9 + $0x1080] ss:$48 sps:$4 sm:$0xff]  }
 0x69d   : > { %8913 = vmatprep.mubr.bf16.mxu1 %v14051_v25  ;;  %8842 = vmatprep.subr.bf16.mxu0 %v11682_v8  ;;  %v11743_v4 = vld [vmem:[%s13711_s9 + $0x1680] ss:$48 sps:$4 sm:$0xff]   ;;  %v11748_v7 = vld [vmem:[%s13711_s9 + $0x1024] ss:$48 sps:$4 sm:$0xff]  }
 0x69e   : > { %8883 = vmatprep.subr.bf16.mxu1 %v11685_v22  ;;  %v11751_v14 = vld [vmem:[%s13711_s9 + $0x1624] ss:$48 sps:$4 sm:$0xff]   ;;  %v11746_v8 = vld [vmem:[%s13711_s9 + $0x1020] ss:$48 sps:$4 sm:$0xff]  }
 0x69f   : > { %8843 = vmatpush1.bf16.msra.mxu0 %v11680_v48  ;;  %v11749_v22 = vld [vmem:[%s13711_s9 + $0x1620] ss:$48 sps:$4 sm:$0xff]   ;;  %v11754_v48 = vld [vmem:[%s13711_s9 + $0xfc4] ss:$48 sps:$4 sm:$0xff]  }
 0x6a0   : > { %8884 = vmatpush1.bf16.msra.mxu1 %v11683_v23  ;;  %8844 = vmatprep.subr.bf16.mxu0 %v11688_v62  ;;  %v11757_v23 = vld [vmem:[%s13711_s9 + $0x15c4] ss:$48 sps:$4 sm:$0xff]   ;;  %v11752_v62 = vld [vmem:[%s13711_s9 + $0xfc0] ss:$48 sps:$4 sm:$0xff]  }
 0x6a1   : > { %8885 = vmatprep.subr.bf16.mxu1 %v11691_v5  ;;  %v11755_v5 = vld [vmem:[%s13711_s9 + $0x15c0] ss:$48 sps:$4 sm:$0xff]  }
 0x6a3   : > { %8845 = vmatpush1.bf16.msra.mxu0 %v11686_v17  ;;  %v11760_v17 = vld [vmem:[%s13711_s9 + $0xf64] ss:$48 sps:$4 sm:$0xff]  }
 0x6a4   : > { %8886 = vmatpush1.bf16.msra.mxu1 %v11689_v19  ;;  %8846 = vmatprep.subr.bf16.mxu0 %v11694_v11  ;;  %v11763_v11 = vld [vmem:[%s13711_s9 + $0x1564] ss:$48 sps:$4 sm:$0xff]  }
 0x6a5   : > { %8887 = vmatprep.subr.bf16.mxu1 %v11697_v26 }
 0x6a6   : > { %v12787_v19 = vpop.eup %12786 }
 0x6a7   : > { %8847 = vmatpush1.bf16.msra.mxu0 %v11692_v24  ;;  %v12789_v26 = vpop.eup %12788  ;;  %v11758_v24 = vld [vmem:[%s13711_s9 + $0xf60] ss:$48 sps:$4 sm:$0xff]  }
 0x6a8   : > { %8888 = vmatpush1.bf16.msra.mxu1 %v11695_v38  ;;  %8848 = vmatprep.subr.bf16.mxu0 %v11700_v27  ;;  %v11761_v38 = vld [vmem:[%s13711_s9 + $0x1560] ss:$48 sps:$4 sm:$0xff]   ;;  %v11766_v27 = vld [vmem:[%s13711_s9 + $0xf04] ss:$48 sps:$4 sm:$0xff]  }
 0x6a9   : > { %8889 = vmatprep.subr.bf16.mxu1 %v11703_v42  ;;  %v4066_v42 = vadd.f32 1.0, %v12787_v19  ;;  %v11823_v19 = vld [vmem:[%s13711_s9 + $0xbac] ss:$48 sps:$4 sm:$0xff]  }
 0x6ab   : > { %8849 = vmatpush1.bf16.msra.mxu0 %v11698_v28  ;;  %v11769_v28 = vld [vmem:[%s13711_s9 + $0x1504] ss:$48 sps:$4 sm:$0xff]  }
 0x6ac   : > { %8890 = vmatpush1.bf16.msra.mxu1 %v11701_v32  ;;  %8850 = vmatprep.subr.bf16.mxu0 %v11706_v46  ;;  %v4068_v32 = vadd.f32 1.0, %v12789_v26  ;;  %v4042_v46 = vmul.f32 0.5, %v14030_v36  ;;  %v11821_v26 = vld [vmem:[%s13711_s9 + $0xba8] ss:$48 sps:$4 sm:$0xff]  }
 0x6ad   : > { %8891 = vmatprep.subr.bf16.mxu1 %v11709_v29  ;;  %v11764_v29 = vld [vmem:[%s13711_s9 + $0xf00] ss:$48 sps:$4 sm:$0xff]  }
 0x6af   : > { %8851 = vmatpush1.bf16.msra.mxu0 %v11704_v31  ;;  %v4044_v31 = vmul.f32 0.5, %v14032_v39  ;;  %v11773_v39 = vld [vmem:[%s13711_s9 + $0x8a8] ss:$48 sps:$4 sm:$0xff]  }
 0x6b0   : > { %8892 = vmatpush1.bf16.msra.mxu1 %v11707_v34  ;;  %8852 = vmatprep.subr.bf16.mxu0 %v11712_v35  ;;  %v11767_v34 = vld [vmem:[%s13711_s9 + $0x1500] ss:$48 sps:$4 sm:$0xff]   ;;  %v4074_v35 = vmul.f32 %v4066_v42, %v4042_v46  ;;  %v11827_v42 = vld [vmem:[%s13711_s9 + $0xb48] ss:$48 sps:$4 sm:$0xff]  }
 0x6b1   : > { %8893 = vmatprep.subr.bf16.mxu1 %v11715_v10  ;;  %v11772_v10 = vld [vmem:[%s13711_s9 + $0x2ac] ss:$48 sps:$4 sm:$0xff]   ;;  %v11830_v46 = vld [vmem:[%s13711_s9 + $0x4e8] ss:$48 sps:$4 sm:$0xff]  }
 0x6b2   : > { %v14121_v36 = vpack.c.bf16 %v4074_v35, %v4074_v35  ;;  %v11836_v35 = vld [vmem:[%s13711_s9 + $0x488] ss:$48 sps:$4 sm:$0xff]  }
 0x6b3   : > { %8853 = vmatpush1.bf16.msra.mxu0 %v11710_v16  ;;  %v4076_v16 = vmul.f32 %v4068_v32, %v4044_v31  ;;  %v11835_v32 = vld [vmem:[%s13711_s9 + $0xaec] ss:$48 sps:$4 sm:$0xff]  }
 0x6b4   : > { %8894 = vmatpush1.bf16.msra.mxu1 %v11713_v49  ;;  %8854 = vmatprep.subr.bf16.mxu0 %v11718_v51  ;;  %v11775_v49 = vld [vmem:[%s13711_s9 + $0x8ac] ss:$48 sps:$4 sm:$0xff]   ;;  %v11770_v51 = vld [vmem:[%s13711_s9 + $0x2a8] ss:$48 sps:$4 sm:$0xff]  }
 0x6b5   : > { %8895 = vmatprep.subr.bf16.mxu1 %v11721_v50  ;;  %v14124_v50 = vpack.c.bf16 %v4076_v16, %v4076_v16  ;;  %v11838_v31 = vld [vmem:[%s13711_s9 + $0x48c] ss:$48 sps:$4 sm:$0xff]  }
 0x6b6   : > { %v11844_v16 = vld [vmem:[%s13711_s9 + $0x42c] ss:$48 sps:$4 sm:$0xff]  }
 0x6b7   : > { %8855 = vmatpush1.bf16.msra.mxu0 %v11716_v53  ;;  %v11778_v53 = vld [vmem:[%s13711_s9 + $0x24c] ss:$48 sps:$4 sm:$0xff]  }
 0x6b8   : > { %8896 = vmatpush1.bf16.msra.mxu1 %v11719_v54  ;;  %8856 = vmatprep.subr.bf16.mxu0 %v11724_v55  ;;  %v11781_v54 = vld [vmem:[%s13711_s9 + $0x84c] ss:$48 sps:$4 sm:$0xff]   ;;  %v11776_v55 = vld [vmem:[%s13711_s9 + $0x248] ss:$48 sps:$4 sm:$0xff]  }
 0x6b9   : > { %8897 = vmatprep.subr.bf16.mxu1 %v11727_v57  ;;  %v11779_v57 = vld [vmem:[%s13711_s9 + $0x848] ss:$48 sps:$4 sm:$0xff]  }
 0x6bb   : > { %8857 = vmatpush2.bf16.msra.mxu0 %v11722_v59  ;;  %v11784_v59 = vld [vmem:[%s13711_s9 + $0x1ec] ss:$48 sps:$4 sm:$0xff]  }
 0x6bc   : > { %8898 = vmatpush2.bf16.msra.mxu1 %v11725_v60  ;;  %8858 = vmatprep.subr.bf16.mxu0 %v11730_v41  ;;  %v11787_v60 = vld [vmem:[%s13711_s9 + $0x7ec] ss:$48 sps:$4 sm:$0xff]   ;;  %v11782_v41 = vld [vmem:[%s13711_s9 + $0x1e8] ss:$48 sps:$4 sm:$0xff]  }
 0x6bd   : > { %8899 = vmatprep.subr.bf16.mxu1 %v11733_v37  ;;  %v11785_v37 = vld [vmem:[%s13711_s9 + $0x7e8] ss:$48 sps:$4 sm:$0xff]  }
 0x6bf   : > { %8859 = vmatpush2.bf16.msra.mxu0 %v11728_v61  ;;  %v11790_v61 = vld [vmem:[%s13711_s9 + $0x18c] ss:$48 sps:$4 sm:$0xff]  }
 0x6c0   : > { %8900 = vmatpush2.bf16.msra.mxu1 %v11731_v0  ;;  %8860 = vmatprep.subr.bf16.mxu0 %v11736_v1  ;;  %v11793_v0 = vld [vmem:[%s13711_s9 + $0x78c] ss:$48 sps:$4 sm:$0xff]   ;;  %v11788_v1 = vld [vmem:[%s13711_s9 + $0x188] ss:$48 sps:$4 sm:$0xff]  }
 0x6c1   : > { %8901 = vmatprep.subr.bf16.mxu1 %v11739_v47  ;;  %v11796_v47 = vld [vmem:[%s13711_s9 + $0x12c] ss:$48 sps:$4 sm:$0xff]  }
 0x6c3   : > { %8861 = vmatpush2.bf16.msra.mxu0 %v11734_v2  ;;  %v11794_v2 = vld [vmem:[%s13711_s9 + $0x128] ss:$48 sps:$4 sm:$0xff]  }
 0x6c4   : > { %8902 = vmatpush2.bf16.msra.mxu1 %v11737_v15  ;;  %8862 = vmatprep.subr.bf16.mxu0 %v11742_v33  ;;  %v11797_v15 = vld [vmem:[%s13711_s9 + $0x728] ss:$48 sps:$4 sm:$0xff]   ;;  %v11802_v33 = vld [vmem:[%s13711_s9 + $0xcc] ss:$48 sps:$4 sm:$0xff]  }
 0x6c5   : > { %8903 = vmatprep.subr.bf16.mxu1 %v11745_v58  ;;  %v11805_v58 = vld [vmem:[%s13711_s9 + $0x6cc] ss:$48 sps:$4 sm:$0xff]  }
 0x6c7   : > { %8863 = vmatpush2.bf16.msra.mxu0 %v11740_v63  ;;  %v11800_v63 = vld [vmem:[%s13711_s9 + $0xc8] ss:$48 sps:$4 sm:$0xff]  }
 0x6c8   : > { %8904 = vmatpush2.bf16.msra.mxu1 %v11743_v4  ;;  %8864 = vmatprep.subr.bf16.mxu0 %v11748_v7  ;;  %v11803_v4 = vld [vmem:[%s13711_s9 + $0x6c8] ss:$48 sps:$4 sm:$0xff]   ;;  %v11808_v7 = vld [vmem:[%s13711_s9 + $0x6c] ss:$48 sps:$4 sm:$0xff]  }
 0x6c9   : > { %8905 = vmatprep.subr.bf16.mxu1 %v11751_v14  ;;  %v11811_v14 = vld [vmem:[%s13711_s9 + $0x66c] ss:$48 sps:$4 sm:$0xff]  }
 0x6cb   : > { %8865 = vmatpush2.bf16.msra.mxu0 %v11746_v8  ;;  %v11806_v8 = vld [vmem:[%s13711_s9 + $0x68] ss:$48 sps:$4 sm:$0xff]  }
 0x6cc   : > { %8906 = vmatpush2.bf16.msra.mxu1 %v11749_v22  ;;  %8866 = vmatprep.subr.bf16.mxu0 %v11754_v48  ;;  %v11809_v22 = vld [vmem:[%s13711_s9 + $0x668] ss:$48 sps:$4 sm:$0xff]   ;;  %v11814_v48 = vld [vmem:[%s13711_s9 + $0xc] ss:$48 sps:$4 sm:$0xff]  }
 0x6cd   : > { %8907 = vmatprep.subr.bf16.mxu1 %v11757_v23  ;;  %v11817_v23 = vld [vmem:[%s13711_s9 + $0x60c] ss:$48 sps:$4 sm:$0xff]  }
 0x6cf   : > { %8867 = vmatpush2.bf16.msra.mxu0 %v11752_v62  ;;  %v11812_v62 = vld [vmem:[%s13711_s9 + $0x8] ss:$48 sps:$4 sm:$0xff]  }
 0x6d0   : > { %8908 = vmatpush2.bf16.msra.mxu1 %v11755_v5  ;;  %8868 = vmatprep.subr.bf16.mxu0 %v11760_v17  ;;  %v11815_v5 = vld [vmem:[%s13711_s9 + $0x608] ss:$48 sps:$4 sm:$0xff]   ;;  %v11820_v17 = vld [vmem:[%s13711_s9 + $0x5ac] ss:$48 sps:$4 sm:$0xff]  }
 0x6d1   : > { %8909 = vmatprep.subr.bf16.mxu1 %v11763_v11  ;;  %v11818_v11 = vld [vmem:[%s13711_s9 + $0x5a8] ss:$48 sps:$4 sm:$0xff]  }
 0x6d3   : > { %8869 = vmatpush2.bf16.msra.mxu0 %v11758_v24  ;;  %v11826_v24 = vld [vmem:[%s13711_s9 + $0x54c] ss:$48 sps:$4 sm:$0xff]  }
 0x6d4   : > { %8910 = vmatpush2.bf16.msra.mxu1 %v11761_v38  ;;  %8870 = vmatprep.subr.bf16.mxu0 %v11766_v27  ;;  %v11829_v38 = vld [vmem:[%s13711_s9 + $0xb4c] ss:$48 sps:$4 sm:$0xff]   ;;  %v11824_v27 = vld [vmem:[%s13711_s9 + $0x548] ss:$48 sps:$4 sm:$0xff]  }
 0x6d5   : > { %8911 = vmatprep.subr.bf16.mxu1 %v11769_v28  ;;  %v11832_v28 = vld [vmem:[%s13711_s9 + $0x4ec] ss:$48 sps:$4 sm:$0xff]  }
 0x6d7   : > { %8871 = vmatpush2.bf16.msra.mxu0 %v11764_v29  ;;  %v11833_v29 = vld [vmem:[%s13711_s9 + $0xae8] ss:$48 sps:$4 sm:$0xff]  }
 0x6d8   : > { %8912 = vmatpush2.bf16.msra.mxu1 %v11767_v34  ;;  %8922 = vmatprep.subr.bf16.mxu0 %v11772_v10  ;;  %v11841_v34 = vld [vmem:[%s13711_s9 + $0xa8c] ss:$48 sps:$4 sm:$0xff]   ;;  %v11839_v10 = vld [vmem:[%s13711_s9 + $0xa88] ss:$48 sps:$4 sm:$0xff]  }
 0x6d9   : > { %8963 = vmatprep.subr.bf16.mxu1 %v11775_v49  ;;  %v11847_v49 = vld [vmem:[%s13711_s9 + $0xa2c] ss:$48 sps:$4 sm:$0xff]  }
 0x6da   : > { %8873 = vmatmul.mubr.bf16.vlgmr.msra.gmra.mxu0 %v14121_v36 }
 0x6db   : > { %8914 = vmatmul.mubr.bf16.vlgmr.msra.gmra.mxu1 %v14124_v50  ;;  %8923 = vmatpush1.bf16.msra.mxu0 %v11770_v51  ;;  %v11842_v51 = vld [vmem:[%s13711_s9 + $0x428] ss:$48 sps:$4 sm:$0xff]  }
 0x6dc   : > { %8954 = vmatprep.mubr.bf16.mxu0 %v14034_v45  ;;  %8964 = vmatpush1.bf16.msra.mxu1 %v11773_v39  ;;  %v11845_v39 = vld [vmem:[%s13711_s9 + $0xa28] ss:$48 sps:$4 sm:$0xff]  }
 0x6dd   : > { %8995 = vmatprep.mubr.bf16.mxu1 %v14036_v3  ;;  %8924 = vmatprep.subr.bf16.mxu0 %v11778_v53  ;;  %v11850_v53 = vld [vmem:[%s13711_s9 + $0x3cc] ss:$48 sps:$4 sm:$0xff]  }
 0x6de   : > { %8965 = vmatprep.subr.bf16.mxu1 %v11781_v54  ;;  %v11853_v54 = vld [vmem:[%s13711_s9 + $0x9cc] ss:$48 sps:$4 sm:$0xff]  }
 0x6df   : > { %8925 = vmatpush1.bf16.msra.mxu0 %v11776_v55  ;;  %v11848_v55 = vld [vmem:[%s13711_s9 + $0x3c8] ss:$48 sps:$4 sm:$0xff]  }
 0x6e0   : > { %8966 = vmatpush1.bf16.msra.mxu1 %v11779_v57  ;;  %8926 = vmatprep.subr.bf16.mxu0 %v11784_v59  ;;  %v11851_v57 = vld [vmem:[%s13711_s9 + $0x9c8] ss:$48 sps:$4 sm:$0xff]   ;;  %v11856_v59 = vld [vmem:[%s13711_s9 + $0x36c] ss:$48 sps:$4 sm:$0xff]  }
 0x6e1   : > { %8967 = vmatprep.subr.bf16.mxu1 %v11787_v60  ;;  %v11859_v60 = vld [vmem:[%s13711_s9 + $0x96c] ss:$48 sps:$4 sm:$0xff]  }
 0x6e3   : > { %8927 = vmatpush1.bf16.msra.mxu0 %v11782_v41  ;;  %v11854_v41 = vld [vmem:[%s13711_s9 + $0x368] ss:$48 sps:$4 sm:$0xff]  }
 0x6e4   : > { %8968 = vmatpush1.bf16.msra.mxu1 %v11785_v37  ;;  %8928 = vmatprep.subr.bf16.mxu0 %v11790_v61  ;;  %v11857_v37 = vld [vmem:[%s13711_s9 + $0x968] ss:$48 sps:$4 sm:$0xff]   ;;  %v11862_v61 = vld [vmem:[%s13711_s9 + $0x30c] ss:$48 sps:$4 sm:$0xff]  }
 0x6e5   : > { %8969 = vmatprep.subr.bf16.mxu1 %v11793_v0  ;;  %v11865_v0 = vld [vmem:[%s13711_s9 + $0x90c] ss:$48 sps:$4 sm:$0xff]  }
 0x6e7   : > { %8929 = vmatpush1.bf16.msra.mxu0 %v11788_v1  ;;  %v11860_v1 = vld [vmem:[%s13711_s9 + $0x308] ss:$48 sps:$4 sm:$0xff]  }
 0x6e8   : > { %8970 = vmatpush1.bf16.msra.mxu1 %v11791_v30  ;;  %8930 = vmatprep.subr.bf16.mxu0 %v11796_v47  ;;  %v11863_v30 = vld [vmem:[%s13711_s9 + $0x908] ss:$48 sps:$4 sm:$0xff]   ;;  %v11868_v47 = vld [vmem:[%s13711_s9 + $0xeac] ss:$48 sps:$4 sm:$0xff]  }
 0x6e9   : > { %8971 = vmatprep.subr.bf16.mxu1 %v11799_v9  ;;  %v11871_v9 = vld [vmem:[%s13711_s9 + $0x14ac] ss:$48 sps:$4 sm:$0xff]  }
 0x6eb   : > { %8931 = vmatpush1.bf16.msra.mxu0 %v11794_v2  ;;  %v11866_v2 = vld [vmem:[%s13711_s9 + $0xea8] ss:$48 sps:$4 sm:$0xff]  }
 0x6ec   : > { %8972 = vmatpush1.bf16.msra.mxu1 %v11797_v15  ;;  %8932 = vmatprep.subr.bf16.mxu0 %v11802_v33  ;;  %v11869_v15 = vld [vmem:[%s13711_s9 + $0x14a8] ss:$48 sps:$4 sm:$0xff]   ;;  %v11874_v33 = vld [vmem:[%s13711_s9 + $0xe4c] ss:$48 sps:$4 sm:$0xff]  }
 0x6ed   : > { %8973 = vmatprep.subr.bf16.mxu1 %v11805_v58  ;;  %v11877_v58 = vld [vmem:[%s13711_s9 + $0x144c] ss:$48 sps:$4 sm:$0xff]  }
 0x6ef   : > { %8933 = vmatpush1.bf16.msra.mxu0 %v11800_v63  ;;  %v11872_v63 = vld [vmem:[%s13711_s9 + $0xe48] ss:$48 sps:$4 sm:$0xff]  }
 0x6f0   : > { %8974 = vmatpush1.bf16.msra.mxu1 %v11803_v4  ;;  %8934 = vmatprep.subr.bf16.mxu0 %v11808_v7  ;;  %v11875_v4 = vld [vmem:[%s13711_s9 + $0x1448] ss:$48 sps:$4 sm:$0xff]   ;;  %v11880_v7 = vld [vmem:[%s13711_s9 + $0xdec] ss:$48 sps:$4 sm:$0xff]  }
 0x6f1   : > { %8975 = vmatprep.subr.bf16.mxu1 %v11811_v14  ;;  %v11883_v14 = vld [vmem:[%s13711_s9 + $0x13ec] ss:$48 sps:$4 sm:$0xff]  }
 0x6f3   : > { %8935 = vmatpush1.bf16.msra.mxu0 %v11806_v8  ;;  %v11878_v8 = vld [vmem:[%s13711_s9 + $0xde8] ss:$48 sps:$4 sm:$0xff]  }
 0x6f4   : > { %8976 = vmatpush1.bf16.msra.mxu1 %v11809_v22  ;;  %8936 = vmatprep.subr.bf16.mxu0 %v11814_v48  ;;  %v11881_v22 = vld [vmem:[%s13711_s9 + $0x13e8] ss:$48 sps:$4 sm:$0xff]   ;;  %v11886_v48 = vld [vmem:[%s13711_s9 + $0xd8c] ss:$48 sps:$4 sm:$0xff]  }
 0x6f5   : > { %8977 = vmatprep.subr.bf16.mxu1 %v11817_v23  ;;  %v11889_v23 = vld [vmem:[%s13711_s9 + $0x138c] ss:$48 sps:$4 sm:$0xff]  }
 0x6f7   : > { %8937 = vmatpush1.bf16.msra.mxu0 %v11812_v62  ;;  %v11884_v62 = vld [vmem:[%s13711_s9 + $0xd88] ss:$48 sps:$4 sm:$0xff]  }
 0x6f8   : > { %8978 = vmatpush1.bf16.msra.mxu1 %v11815_v5  ;;  %8938 = vmatprep.subr.bf16.mxu0 %v11820_v17  ;;  %v11887_v5 = vld [vmem:[%s13711_s9 + $0x1388] ss:$48 sps:$4 sm:$0xff]   ;;  %v11892_v17 = vld [vmem:[%s13711_s9 + $0xd2c] ss:$48 sps:$4 sm:$0xff]  }
 0x6f9   : > { %8979 = vmatprep.subr.bf16.mxu1 %v11823_v19  ;;  %v11895_v19 = vld [vmem:[%s13711_s9 + $0x132c] ss:$48 sps:$4 sm:$0xff]  }
 0x6fb   : > { %8939 = vmatpush2.bf16.msra.mxu0 %v11818_v11  ;;  %v11890_v11 = vld [vmem:[%s13711_s9 + $0xd28] ss:$48 sps:$4 sm:$0xff]  }
 0x6fc   : > { %8980 = vmatpush2.bf16.msra.mxu1 %v11821_v26  ;;  %8940 = vmatprep.subr.bf16.mxu0 %v11826_v24  ;;  %v11893_v26 = vld [vmem:[%s13711_s9 + $0x1328] ss:$48 sps:$4 sm:$0xff]   ;;  %v11898_v24 = vld [vmem:[%s13711_s9 + $0xccc] ss:$48 sps:$4 sm:$0xff]  }
 0x6fd   : > { %8981 = vmatprep.subr.bf16.mxu1 %v11829_v38  ;;  %v11901_v38 = vld [vmem:[%s13711_s9 + $0x12cc] ss:$48 sps:$4 sm:$0xff]  }
 0x6ff   : > { %8941 = vmatpush2.bf16.msra.mxu0 %v11824_v27  ;;  %v11896_v27 = vld [vmem:[%s13711_s9 + $0xcc8] ss:$48 sps:$4 sm:$0xff]  }
 0x700   : > { %8982 = vmatpush2.bf16.msra.mxu1 %v11827_v42  ;;  %8942 = vmatprep.subr.bf16.mxu0 %v11832_v28  ;;  %v11899_v42 = vld [vmem:[%s13711_s9 + $0x12c8] ss:$48 sps:$4 sm:$0xff]   ;;  %v11904_v28 = vld [vmem:[%s13711_s9 + $0xc6c] ss:$48 sps:$4 sm:$0xff]  }
 0x701   : > { %8983 = vmatprep.subr.bf16.mxu1 %v11835_v32  ;;  %v11907_v32 = vld [vmem:[%s13711_s9 + $0x126c] ss:$48 sps:$4 sm:$0xff]  }
 0x703   : > { %8943 = vmatpush2.bf16.msra.mxu0 %v11830_v46  ;;  %v11902_v46 = vld [vmem:[%s13711_s9 + $0xc68] ss:$48 sps:$4 sm:$0xff]  }
 0x704   : > { %8984 = vmatpush2.bf16.msra.mxu1 %v11833_v29  ;;  %8944 = vmatprep.subr.bf16.mxu0 %v11838_v31  ;;  %v11905_v29 = vld [vmem:[%s13711_s9 + $0x1268] ss:$48 sps:$4 sm:$0xff]   ;;  %v11910_v31 = vld [vmem:[%s13711_s9 + $0xc0c] ss:$48 sps:$4 sm:$0xff]  }
 0x705   : > { %8985 = vmatprep.subr.bf16.mxu1 %v11841_v34  ;;  %v11913_v34 = vld [vmem:[%s13711_s9 + $0x120c] ss:$48 sps:$4 sm:$0xff]  }
 0x707   : > { %8945 = vmatpush2.bf16.msra.mxu0 %v11836_v35  ;;  %v11908_v35 = vld [vmem:[%s13711_s9 + $0xc08] ss:$48 sps:$4 sm:$0xff]  }
 0x708   : > { %8986 = vmatpush2.bf16.msra.mxu1 %v11839_v10  ;;  %8946 = vmatprep.subr.bf16.mxu0 %v11844_v16  ;;  %v11911_v10 = vld [vmem:[%s13711_s9 + $0x1208] ss:$48 sps:$4 sm:$0xff]   ;;  %v11916_v16 = vld [vmem:[%s13711_s9 + $0x11ac] ss:$48 sps:$4 sm:$0xff]  }
 0x709   : > { %8987 = vmatprep.subr.bf16.mxu1 %v11847_v49  ;;  %v11919_v49 = vld [vmem:[%s13711_s9 + $0x17ac] ss:$48 sps:$4 sm:$0xff]  }
 0x70b   : > { %8947 = vmatpush2.bf16.msra.mxu0 %v11842_v51  ;;  %v11914_v51 = vld [vmem:[%s13711_s9 + $0x11a8] ss:$48 sps:$4 sm:$0xff]  }
 0x70c   : > { %8988 = vmatpush2.bf16.msra.mxu1 %v11845_v39  ;;  %8948 = vmatprep.subr.bf16.mxu0 %v11850_v53  ;;  %v11917_v39 = vld [vmem:[%s13711_s9 + $0x17a8] ss:$48 sps:$4 sm:$0xff]   ;;  %v11922_v53 = vld [vmem:[%s13711_s9 + $0x114c] ss:$48 sps:$4 sm:$0xff]  }
 0x70d   : > { %8989 = vmatprep.subr.bf16.mxu1 %v11853_v54  ;;  %v11925_v54 = vld [vmem:[%s13711_s9 + $0x174c] ss:$48 sps:$4 sm:$0xff]  }
 0x70f   : > { %8949 = vmatpush2.bf16.msra.mxu0 %v11848_v55  ;;  %v11920_v55 = vld [vmem:[%s13711_s9 + $0x1148] ss:$48 sps:$4 sm:$0xff]  }
 0x710   : > { %8990 = vmatpush2.bf16.msra.mxu1 %v11851_v57  ;;  %8950 = vmatprep.subr.bf16.mxu0 %v11856_v59  ;;  %v11923_v57 = vld [vmem:[%s13711_s9 + $0x1748] ss:$48 sps:$4 sm:$0xff]   ;;  %v11928_v59 = vld [vmem:[%s13711_s9 + $0x10ec] ss:$48 sps:$4 sm:$0xff]  }
 0x711   : > { %8991 = vmatprep.subr.bf16.mxu1 %v11859_v60  ;;  %v11931_v60 = vld [vmem:[%s13711_s9 + $0x16ec] ss:$48 sps:$4 sm:$0xff]  }
 0x713   : > { %8951 = vmatpush2.bf16.msra.mxu0 %v11854_v41  ;;  %v11926_v41 = vld [vmem:[%s13711_s9 + $0x10e8] ss:$48 sps:$4 sm:$0xff]  }
 0x714   : > { %8992 = vmatpush2.bf16.msra.mxu1 %v11857_v37  ;;  %8952 = vmatprep.subr.bf16.mxu0 %v11862_v61  ;;  %v11929_v37 = vld [vmem:[%s13711_s9 + $0x16e8] ss:$48 sps:$4 sm:$0xff]   ;;  %v11934_v61 = vld [vmem:[%s13711_s9 + $0x108c] ss:$48 sps:$4 sm:$0xff]  }
 0x715   : > { %8993 = vmatprep.subr.bf16.mxu1 %v11865_v0  ;;  %v11937_v0 = vld [vmem:[%s13711_s9 + $0x168c] ss:$48 sps:$4 sm:$0xff]  }
 0x717   : > { %8953 = vmatpush2.bf16.msra.mxu0 %v11860_v1  ;;  %v11932_v1 = vld [vmem:[%s13711_s9 + $0x1088] ss:$48 sps:$4 sm:$0xff]  }
 0x718   : > { %8994 = vmatpush2.bf16.msra.mxu1 %v11863_v30  ;;  %9004 = vmatprep.subr.bf16.mxu0 %v11868_v47  ;;  %v11935_v30 = vld [vmem:[%s13711_s9 + $0x1688] ss:$48 sps:$4 sm:$0xff]   ;;  %v11940_v47 = vld [vmem:[%s13711_s9 + $0x102c] ss:$48 sps:$4 sm:$0xff]  }
 0x719   : > { %9045 = vmatprep.subr.bf16.mxu1 %v11871_v9  ;;  %v11943_v9 = vld [vmem:[%s13711_s9 + $0x162c] ss:$48 sps:$4 sm:$0xff]  }
 0x71a   : > { %8955 = vmatmul.mubr.bf16.vlgmr.msra.gmra.mxu0 %v14041_v12 }
 0x71b   : > { %8996 = vmatmul.mubr.bf16.vlgmr.msra.gmra.mxu1 %v14044_v18  ;;  %9005 = vmatpush1.bf16.msra.mxu0 %v11866_v2  ;;  %v11938_v2 = vld [vmem:[%s13711_s9 + $0x1028] ss:$48 sps:$4 sm:$0xff]  }
 0x71c   : > { %9036 = vmatprep.mubr.bf16.mxu0 %v14048_v21  ;;  %9046 = vmatpush1.bf16.msra.mxu1 %v11869_v15  ;;  %v11941_v15 = vld [vmem:[%s13711_s9 + $0x1628] ss:$48 sps:$4 sm:$0xff]  }
 0x71d   : > { %9077 = vmatprep.mubr.bf16.mxu1 %v14051_v25  ;;  %9006 = vmatprep.subr.bf16.mxu0 %v11874_v33  ;;  %v11946_v33 = vld [vmem:[%s13711_s9 + $0xfcc] ss:$48 sps:$4 sm:$0xff]  }
 0x71e   : > { %9047 = vmatprep.subr.bf16.mxu1 %v11877_v58  ;;  %v11949_v58 = vld [vmem:[%s13711_s9 + $0x15cc] ss:$48 sps:$4 sm:$0xff]  }
 0x71f   : > { %9007 = vmatpush1.bf16.msra.mxu0 %v11872_v63  ;;  %v11944_v63 = vld [vmem:[%s13711_s9 + $0xfc8] ss:$48 sps:$4 sm:$0xff]  }
 0x720   : > { %9048 = vmatpush1.bf16.msra.mxu1 %v11875_v4  ;;  %9008 = vmatprep.subr.bf16.mxu0 %v11880_v7  ;;  %v11947_v4 = vld [vmem:[%s13711_s9 + $0x15c8] ss:$48 sps:$4 sm:$0xff]   ;;  %v11952_v7 = vld [vmem:[%s13711_s9 + $0xf6c] ss:$48 sps:$4 sm:$0xff]  }
 0x721   : > { %9049 = vmatprep.subr.bf16.mxu1 %v11883_v14  ;;  %v11955_v14 = vld [vmem:[%s13711_s9 + $0x156c] ss:$48 sps:$4 sm:$0xff]  }
 0x723   : > { %9009 = vmatpush1.bf16.msra.mxu0 %v11878_v8  ;;  %v11950_v8 = vld [vmem:[%s13711_s9 + $0xf68] ss:$48 sps:$4 sm:$0xff]  }
 0x724   : > { %9050 = vmatpush1.bf16.msra.mxu1 %v11881_v22  ;;  %9010 = vmatprep.subr.bf16.mxu0 %v11886_v48  ;;  %v11953_v22 = vld [vmem:[%s13711_s9 + $0x1568] ss:$48 sps:$4 sm:$0xff]   ;;  %v11958_v48 = vld [vmem:[%s13711_s9 + $0xf0c] ss:$48 sps:$4 sm:$0xff]  }
 0x725   : > { %9051 = vmatprep.subr.bf16.mxu1 %v11889_v23  ;;  %v11961_v23 = vld [vmem:[%s13711_s9 + $0x150c] ss:$48 sps:$4 sm:$0xff]  }
 0x727   : > { %9011 = vmatpush1.bf16.msra.mxu0 %v11884_v62  ;;  %v11956_v62 = vld [vmem:[%s13711_s9 + $0xf08] ss:$48 sps:$4 sm:$0xff]  }
 0x728   : > { %9052 = vmatpush1.bf16.msra.mxu1 %v11887_v5  ;;  %9012 = vmatprep.subr.bf16.mxu0 %v11892_v17  ;;  %v11959_v5 = vld [vmem:[%s13711_s9 + $0x1508] ss:$48 sps:$4 sm:$0xff]   ;;  %v11964_v17 = vld [vmem:[%s13711_s9 + $0x2b4] ss:$48 sps:$4 sm:$0xff]  }
 0x729   : > { %9053 = vmatprep.subr.bf16.mxu1 %v11895_v19  ;;  %v11967_v19 = vld [vmem:[%s13711_s9 + $0x8b4] ss:$48 sps:$4 sm:$0xff]  }
 0x72b   : > { %9013 = vmatpush1.bf16.msra.mxu0 %v11890_v11  ;;  %v11962_v11 = vld [vmem:[%s13711_s9 + $0x2b0] ss:$48 sps:$4 sm:$0xff]  }
 0x72c   : > { %9054 = vmatpush1.bf16.msra.mxu1 %v11893_v26  ;;  %9014 = vmatprep.subr.bf16.mxu0 %v11898_v24  ;;  %v11965_v26 = vld [vmem:[%s13711_s9 + $0x8b0] ss:$48 sps:$4 sm:$0xff]   ;;  %v11970_v24 = vld [vmem:[%s13711_s9 + $0x254] ss:$48 sps:$4 sm:$0xff]  }
 0x72d   : > { %9055 = vmatprep.subr.bf16.mxu1 %v11901_v38 }
 0x72f   : > { %9015 = vmatpush1.bf16.msra.mxu0 %v11896_v27  ;;  %v11973_v27 = vld [vmem:[%s13711_s9 + $0x854] ss:$48 sps:$4 sm:$0xff]  }
 0x730   : > { %9056 = vmatpush1.bf16.msra.mxu1 %v11899_v42  ;;  %9016 = vmatprep.subr.bf16.mxu0 %v11904_v28  ;;  %v11968_v28 = vld [vmem:[%s13711_s9 + $0x250] ss:$48 sps:$4 sm:$0xff]  }
 0x731   : > { %9057 = vmatprep.subr.bf16.mxu1 %v11907_v32 }
 0x733   : > { %9017 = vmatpush1.bf16.msra.mxu0 %v11902_v46  ;;  %v11971_v46 = vld [vmem:[%s13711_s9 + $0x850] ss:$48 sps:$4 sm:$0xff]  }
 0x734   : > { %9058 = vmatpush1.bf16.msra.mxu1 %v11905_v29  ;;  %9018 = vmatprep.subr.bf16.mxu0 %v11910_v31  ;;  %v11976_v29 = vld [vmem:[%s13711_s9 + $0x1f4] ss:$48 sps:$4 sm:$0xff]  }
 0x735   : > { %9059 = vmatprep.subr.bf16.mxu1 %v11913_v34  ;;  %v11979_v34 = vld [vmem:[%s13711_s9 + $0x7f4] ss:$48 sps:$4 sm:$0xff]  }
 0x737   : > { %9019 = vmatpush1.bf16.msra.mxu0 %v11908_v35 }
 0x738   : > { %9060 = vmatpush1.bf16.msra.mxu1 %v11911_v10  ;;  %9020 = vmatprep.subr.bf16.mxu0 %v11916_v16  ;;  %v11974_v16 = vld [vmem:[%s13711_s9 + $0x1f0] ss:$48 sps:$4 sm:$0xff]  }
 0x739   : > { %9061 = vmatprep.subr.bf16.mxu1 %v11919_v49 }
 0x73b   : > { %9021 = vmatpush2.bf16.msra.mxu0 %v11914_v51  ;;  %v11977_v51 = vld [vmem:[%s13711_s9 + $0x7f0] ss:$48 sps:$4 sm:$0xff]  }
 0x73c   : > { %9062 = vmatpush2.bf16.msra.mxu1 %v11917_v39  ;;  %9022 = vmatprep.subr.bf16.mxu0 %v11922_v53  ;;  %v11982_v39 = vld [vmem:[%s13711_s9 + $0x194] ss:$48 sps:$4 sm:$0xff]  }
 0x73d   : > { %9063 = vmatprep.subr.bf16.mxu1 %v11925_v54  ;;  %v11985_v54 = vld [vmem:[%s13711_s9 + $0x794] ss:$48 sps:$4 sm:$0xff]  }
 0x73f   : > { %9023 = vmatpush2.bf16.msra.mxu0 %v11920_v55  ;;  %v11980_v55 = vld [vmem:[%s13711_s9 + $0x190] ss:$48 sps:$4 sm:$0xff]  }
 0x740   : > { %9064 = vmatpush2.bf16.msra.mxu1 %v11923_v57  ;;  %9024 = vmatprep.subr.bf16.mxu0 %v11928_v59  ;;  %v11983_v57 = vld [vmem:[%s13711_s9 + $0x790] ss:$48 sps:$4 sm:$0xff]   ;;  %v11988_v59 = vld [vmem:[%s13711_s9 + $0x134] ss:$48 sps:$4 sm:$0xff]  }
 0x741   : > { %9065 = vmatprep.subr.bf16.mxu1 %v11931_v60  ;;  %v11991_v60 = vld [vmem:[%s13711_s9 + $0x734] ss:$48 sps:$4 sm:$0xff]  }
 0x743   : > { %9025 = vmatpush2.bf16.msra.mxu0 %v11926_v41  ;;  %v11986_v41 = vld [vmem:[%s13711_s9 + $0x130] ss:$48 sps:$4 sm:$0xff]  }
 0x744   : > { %9066 = vmatpush2.bf16.msra.mxu1 %v11929_v37  ;;  %9026 = vmatprep.subr.bf16.mxu0 %v11934_v61  ;;  %v11989_v37 = vld [vmem:[%s13711_s9 + $0x730] ss:$48 sps:$4 sm:$0xff]   ;;  %v11994_v61 = vld [vmem:[%s13711_s9 + $0xd4] ss:$48 sps:$4 sm:$0xff]  }
 0x745   : > { %9067 = vmatprep.subr.bf16.mxu1 %v11937_v0  ;;  %v11997_v0 = vld [vmem:[%s13711_s9 + $0x6d4] ss:$48 sps:$4 sm:$0xff]  }
 0x747   : > { %9027 = vmatpush2.bf16.msra.mxu0 %v11932_v1  ;;  %v11992_v1 = vld [vmem:[%s13711_s9 + $0xd0] ss:$48 sps:$4 sm:$0xff]  }
 0x748   : > { %9068 = vmatpush2.bf16.msra.mxu1 %v11935_v30  ;;  %9028 = vmatprep.subr.bf16.mxu0 %v11940_v47  ;;  %v11995_v30 = vld [vmem:[%s13711_s9 + $0x6d0] ss:$48 sps:$4 sm:$0xff]   ;;  %v12000_v47 = vld [vmem:[%s13711_s9 + $0x74] ss:$48 sps:$4 sm:$0xff]  }
 0x749   : > { %9069 = vmatprep.subr.bf16.mxu1 %v11943_v9  ;;  %v12003_v9 = vld [vmem:[%s13711_s9 + $0x674] ss:$48 sps:$4 sm:$0xff]  }
 0x74b   : > { %9029 = vmatpush2.bf16.msra.mxu0 %v11938_v2  ;;  %v11998_v2 = vld [vmem:[%s13711_s9 + $0x70] ss:$48 sps:$4 sm:$0xff]  }
 0x74c   : > { %9070 = vmatpush2.bf16.msra.mxu1 %v11941_v15  ;;  %9030 = vmatprep.subr.bf16.mxu0 %v11946_v33  ;;  %v12001_v15 = vld [vmem:[%s13711_s9 + $0x670] ss:$48 sps:$4 sm:$0xff]   ;;  %v12006_v33 = vld [vmem:[%s13711_s9 + $0x14] ss:$48 sps:$4 sm:$0xff]  }
 0x74d   : > { %9071 = vmatprep.subr.bf16.mxu1 %v11949_v58  ;;  %v12009_v58 = vld [vmem:[%s13711_s9 + $0x614] ss:$48 sps:$4 sm:$0xff]  }
 0x74f   : > { %9031 = vmatpush2.bf16.msra.mxu0 %v11944_v63  ;;  %v12004_v63 = vld [vmem:[%s13711_s9 + $0x10] ss:$48 sps:$4 sm:$0xff]  }
 0x750   : > { %9072 = vmatpush2.bf16.msra.mxu1 %v11947_v4  ;;  %9032 = vmatprep.subr.bf16.mxu0 %v11952_v7  ;;  %v12007_v4 = vld [vmem:[%s13711_s9 + $0x610] ss:$48 sps:$4 sm:$0xff]   ;;  %v12012_v7 = vld [vmem:[%s13711_s9 + $0x5b4] ss:$48 sps:$4 sm:$0xff]  }
 0x751   : > { %9073 = vmatprep.subr.bf16.mxu1 %v11955_v14  ;;  %v12015_v14 = vld [vmem:[%s13711_s9 + $0xbb4] ss:$48 sps:$4 sm:$0xff]  }
 0x753   : > { %9033 = vmatpush2.bf16.msra.mxu0 %v11950_v8  ;;  %v12010_v8 = vld [vmem:[%s13711_s9 + $0x5b0] ss:$48 sps:$4 sm:$0xff]  }
 0x754   : > { %9074 = vmatpush2.bf16.msra.mxu1 %v11953_v22  ;;  %9034 = vmatprep.subr.bf16.mxu0 %v11958_v48  ;;  %v12013_v22 = vld [vmem:[%s13711_s9 + $0xbb0] ss:$48 sps:$4 sm:$0xff]   ;;  %v12018_v48 = vld [vmem:[%s13711_s9 + $0x554] ss:$48 sps:$4 sm:$0xff]  }
 0x755   : > { %9075 = vmatprep.subr.bf16.mxu1 %v11961_v23  ;;  %v12021_v23 = vld [vmem:[%s13711_s9 + $0xb54] ss:$48 sps:$4 sm:$0xff]  }
 0x757   : > { %9035 = vmatpush2.bf16.msra.mxu0 %v11956_v62  ;;  %v12016_v62 = vld [vmem:[%s13711_s9 + $0x550] ss:$48 sps:$4 sm:$0xff]  }
 0x758   : > { %9076 = vmatpush2.bf16.msra.mxu1 %v11959_v5  ;;  %9086 = vmatprep.subr.bf16.mxu0 %v11964_v17  ;;  %v12019_v5 = vld [vmem:[%s13711_s9 + $0xb50] ss:$48 sps:$4 sm:$0xff]   ;;  %v12024_v17 = vld [vmem:[%s13711_s9 + $0x4f4] ss:$48 sps:$4 sm:$0xff]  }
 0x759   : > { %9127 = vmatprep.subr.bf16.mxu1 %v11967_v19  ;;  %v12027_v19 = vld [vmem:[%s13711_s9 + $0xaf4] ss:$48 sps:$4 sm:$0xff]  }
 0x75a   : > { %9037 = vmatmul.mubr.bf16.vlgmr.msra.gmra.mxu0 %v14121_v36  ;;  %v14264_v38 = vpop.f32.mrf.mxu0 }
 0x75b   : > { %9078 = vmatmul.mubr.bf16.vlgmr.msra.gmra.mxu1 %v14124_v50  ;;  %v14268_v42 = vpop.f32.mrf.mxu1  ;;  %9087 = vmatpush1.bf16.msra.mxu0 %v11962_v11  ;;  %v12022_v11 = vld [vmem:[%s13711_s9 + $0x4f0] ss:$48 sps:$4 sm:$0xff]  }
 0x75c   : > { %9118 = vmatprep.mubr.bf16.mxu0 %v14034_v45  ;;  %9128 = vmatpush1.bf16.msra.mxu1 %v11965_v26  ;;  %v14272_v32 = vpop.f32.mrf.mxu0  ;;  %v12025_v26 = vld [vmem:[%s13711_s9 + $0xaf0] ss:$48 sps:$4 sm:$0xff]  }
 0x75d   : > { %9159 = vmatprep.mubr.bf16.mxu1 %v14036_v3  ;;  %v14277_v31 = vpop.f32.mrf.mxu1  ;;  %9088 = vmatprep.subr.bf16.mxu0 %v11970_v24  ;;  %v12030_v24 = vld [vmem:[%s13711_s9 + $0x494] ss:$48 sps:$4 sm:$0xff]  }
 0x75e   : > { %9129 = vmatprep.subr.bf16.mxu1 %v11973_v27  ;;  %v8796_v35 = vpop.f32.mrf.mxu0  ;;  %v12033_v27 = vld [vmem:[%s13711_s9 + $0xa94] ss:$48 sps:$4 sm:$0xff]  }
 0x75f   : > { %v8837_v10 = vpop.f32.mrf.mxu1  ;;  %9089 = vmatpush1.bf16.msra.mxu0 %v11968_v28  ;;  %v12028_v28 = vld [vmem:[%s13711_s9 + $0x490] ss:$48 sps:$4 sm:$0xff]  }
 0x760   : > { %9130 = vmatpush1.bf16.msra.mxu1 %v11971_v46  ;;  %v8797_v49 = vpop.f32.mrf.mxu0  ;;  %9090 = vmatprep.subr.bf16.mxu0 %v11976_v29  ;;  %v12031_v46 = vld [vmem:[%s13711_s9 + $0xa90] ss:$48 sps:$4 sm:$0xff]   ;;  %v12036_v29 = vld [vmem:[%s13711_s9 + $0x434] ss:$48 sps:$4 sm:$0xff]  }
 0x761   : > { %v8838_v53 = vpop.f32.mrf.mxu1  ;;  %9131 = vmatprep.subr.bf16.mxu1 %v11979_v34  ;;  %v12039_v34 = vld [vmem:[%s13711_s9 + $0xa34] ss:$48 sps:$4 sm:$0xff]   ;;  %v12034_v35 = vld [vmem:[%s13711_s9 + $0x430] ss:$48 sps:$4 sm:$0xff]  }
 0x762   : > { %v12037_v10 = vld [vmem:[%s13711_s9 + $0xa30] ss:$48 sps:$4 sm:$0xff]   ;;  %v12045_v49 = vld [vmem:[%s13711_s9 + $0x9d4] ss:$48 sps:$4 sm:$0xff]  }
 0x763   : > { %9091 = vmatpush1.bf16.msra.mxu0 %v11974_v16  ;;  %v12042_v16 = vld [vmem:[%s13711_s9 + $0x3d4] ss:$48 sps:$4 sm:$0xff]  }
 0x764   : > { %9132 = vmatpush1.bf16.msra.mxu1 %v11977_v51  ;;  %9092 = vmatprep.subr.bf16.mxu0 %v11982_v39  ;;  %v12040_v51 = vld [vmem:[%s13711_s9 + $0x3d0] ss:$48 sps:$4 sm:$0xff]   ;;  %v12048_v53 = vld [vmem:[%s13711_s9 + $0x374] ss:$48 sps:$4 sm:$0xff]  }
 0x765   : > { %9133 = vmatprep.subr.bf16.mxu1 %v11985_v54  ;;  %v12043_v39 = vld [vmem:[%s13711_s9 + $0x9d0] ss:$48 sps:$4 sm:$0xff]   ;;  %v12051_v54 = vld [vmem:[%s13711_s9 + $0x974] ss:$48 sps:$4 sm:$0xff]  }
 0x767   : > { %9093 = vmatpush1.bf16.msra.mxu0 %v11980_v55  ;;  %v14332_v55 = vld [vmem:[%s14329_s23] sm:$0xff] }
 0x768   : > { %9134 = vmatpush1.bf16.msra.mxu1 %v11983_v57  ;;  %9094 = vmatprep.subr.bf16.mxu0 %v11988_v59  ;;  %v12046_v57 = vld [vmem:[%s13711_s9 + $0x370] ss:$48 sps:$4 sm:$0xff]  }
 0x769   : > { %9135 = vmatprep.subr.bf16.mxu1 %v11991_v60  ;;  %v12049_v59 = vld [vmem:[%s13711_s9 + $0x970] ss:$48 sps:$4 sm:$0xff]   ;;  %v12054_v60 = vld [vmem:[%s13711_s9 + $0x314] ss:$48 sps:$4 sm:$0xff]  }
 0x76b   : > { %9095 = vmatpush1.bf16.msra.mxu0 %v11986_v41  ;;  %v4861_v41 = vrot.slane %v14332_v55, %v13720_v52 }
 0x76c   : > { %9136 = vmatpush1.bf16.msra.mxu1 %v11989_v37  ;;  %9096 = vmatprep.subr.bf16.mxu0 %v11994_v61  ;;  %v12057_v37 = vld [vmem:[%s13711_s9 + $0x914] ss:$48 sps:$4 sm:$0xff]   ;;  %v4865_v61 = vrot.slane %v14332_v55, %v13730_v56 }
 0x76d   : > { %9137 = vmatprep.subr.bf16.mxu1 %v11997_v0  ;;  %v12052_v0 = vld [vmem:[%s13711_s9 + $0x310] ss:$48 sps:$4 sm:$0xff]  }
 0x76f   : > { %9097 = vmatpush1.bf16.msra.mxu0 %v11992_v1  ;;  %v12055_v1 = vld [vmem:[%s13711_s9 + $0x910] ss:$48 sps:$4 sm:$0xff]  }
 0x770   : > { %9138 = vmatpush1.bf16.msra.mxu1 %v11995_v30  ;;  %9098 = vmatprep.subr.bf16.mxu0 %v12000_v47  ;;  %v12060_v30 = vld [vmem:[%s13711_s9 + $0xeb4] ss:$48 sps:$4 sm:$0xff]   ;;  %v8793_v47 = vadd.f32 %v14264_v38, %v4861_v41 }
 0x771   : > { %9139 = vmatprep.subr.bf16.mxu1 %v12003_v9  ;;  %v12063_v9 = vld [vmem:[%s13711_s9 + $0x14b4] ss:$48 sps:$4 sm:$0xff]  }
 0x772   : > { %v12069_v38 = vld [vmem:[%s13711_s9 + $0x1454] ss:$48 sps:$4 sm:$0xff]  }
 0x773   : > { %9099 = vmatpush1.bf16.msra.mxu0 %v11998_v2  ;;  %v8795_v2 = vadd.f32 %v14272_v32, %v4865_v61  ;;  %v12096_v41 = vld [vmem:[%s13711_s9 + $0xc74] ss:$48 sps:$4 sm:$0xff]  }
 0x774   : > { %9140 = vmatpush1.bf16.msra.mxu1 %v12001_v15  ;;  %9100 = vmatprep.subr.bf16.mxu0 %v12006_v33  ;;  %v12058_v15 = vld [vmem:[%s13711_s9 + $0xeb0] ss:$48 sps:$4 sm:$0xff]  }
 0x775   : > { %9141 = vmatprep.subr.bf16.mxu1 %v12009_v58  ;;  %v12061_v33 = vld [vmem:[%s13711_s9 + $0x14b0] ss:$48 sps:$4 sm:$0xff]   ;;  %v8834_v58 = vadd.f32 %v14268_v42, %v8793_v47 }
 0x776   : > { %v12097_v47 = vld [vmem:[%s13711_s9 + $0x1270] ss:$48 sps:$4 sm:$0xff]  }
 0x777   : > { %9101 = vmatpush1.bf16.msra.mxu0 %v12004_v63  ;;  %v12066_v63 = vld [vmem:[%s13711_s9 + $0xe54] ss:$48 sps:$4 sm:$0xff]  }
 0x778   : > { %9142 = vmatpush1.bf16.msra.mxu1 %v12007_v4  ;;  %9102 = vmatprep.subr.bf16.mxu0 %v12012_v7  ;;  %v8836_v7 = vadd.f32 %v14277_v31, %v8795_v2 }
 0x779   : > { %9143 = vmatprep.subr.bf16.mxu1 %v12015_v14 }
 0x77b   : > { %9103 = vmatpush2.bf16.msra.mxu0 %v12010_v8  ;;  %v12064_v8 = vld [vmem:[%s13711_s9 + $0xe50] ss:$48 sps:$4 sm:$0xff]  }
 0x77c   : > { %9144 = vmatpush2.bf16.msra.mxu1 %v12013_v22  ;;  %9104 = vmatprep.subr.bf16.mxu0 %v12018_v48  ;;  %v12067_v22 = vld [vmem:[%s13711_s9 + $0x1450] ss:$48 sps:$4 sm:$0xff]   ;;  %v12072_v48 = vld [vmem:[%s13711_s9 + $0xdf4] ss:$48 sps:$4 sm:$0xff]  }
 0x77d   : > { %9145 = vmatprep.subr.bf16.mxu1 %v12021_v23 }
 0x77f   : > { %9105 = vmatpush2.bf16.msra.mxu0 %v12016_v62 }
 0x780   : > { %9146 = vmatpush2.bf16.msra.mxu1 %v12019_v5  ;;  %9106 = vmatprep.subr.bf16.mxu0 %v12024_v17  ;;  %v12075_v5 = vld [vmem:[%s13711_s9 + $0x13f4] ss:$48 sps:$4 sm:$0xff]  }
 0x781   : > { %9147 = vmatprep.subr.bf16.mxu1 %v12027_v19 }
 0x783   : > { %9107 = vmatpush2.bf16.msra.mxu0 %v12022_v11 }
 0x784   : > { %9148 = vmatpush2.bf16.msra.mxu1 %v12025_v26  ;;  %9108 = vmatprep.subr.bf16.mxu0 %v12030_v24  ;;  %v12070_v24 = vld [vmem:[%s13711_s9 + $0xdf0] ss:$48 sps:$4 sm:$0xff]  }
 0x785   : > { %9149 = vmatprep.subr.bf16.mxu1 %v12033_v27 }
 0x787   : > { %9109 = vmatpush2.bf16.msra.mxu0 %v12028_v28  ;;  %v12073_v28 = vld [vmem:[%s13711_s9 + $0x13f0] ss:$48 sps:$4 sm:$0xff]  }
 0x788   : > { %9150 = vmatpush2.bf16.msra.mxu1 %v12031_v46  ;;  %9110 = vmatprep.subr.bf16.mxu0 %v12036_v29  ;;  %v12078_v46 = vld [vmem:[%s13711_s9 + $0xd94] ss:$48 sps:$4 sm:$0xff]  }
 0x789   : > { %9151 = vmatprep.subr.bf16.mxu1 %v12039_v34 }
 0x78b   : > { %9111 = vmatpush2.bf16.msra.mxu0 %v12034_v35  ;;  %v12081_v35 = vld [vmem:[%s13711_s9 + $0x1394] ss:$48 sps:$4 sm:$0xff]  }
 0x78c   : > { %9152 = vmatpush2.bf16.msra.mxu1 %v12037_v10  ;;  %9112 = vmatprep.subr.bf16.mxu0 %v12042_v16  ;;  %v12076_v10 = vld [vmem:[%s13711_s9 + $0xd90] ss:$48 sps:$4 sm:$0xff]  }
 0x78d   : > { %9153 = vmatprep.subr.bf16.mxu1 %v12045_v49  ;;  %v12079_v16 = vld [vmem:[%s13711_s9 + $0x1390] ss:$48 sps:$4 sm:$0xff]   ;;  %v12084_v49 = vld [vmem:[%s13711_s9 + $0xd34] ss:$48 sps:$4 sm:$0xff]  }
 0x78f   : > { %9113 = vmatpush2.bf16.msra.mxu0 %v12040_v51  ;;  %v12087_v51 = vld [vmem:[%s13711_s9 + $0x1334] ss:$48 sps:$4 sm:$0xff]  }
 0x790   : > { %9154 = vmatpush2.bf16.msra.mxu1 %v12043_v39  ;;  %9114 = vmatprep.subr.bf16.mxu0 %v12048_v53  ;;  %v12082_v39 = vld [vmem:[%s13711_s9 + $0xd30] ss:$48 sps:$4 sm:$0xff]  }
 0x791   : > { %9155 = vmatprep.subr.bf16.mxu1 %v12051_v54  ;;  %v12085_v53 = vld [vmem:[%s13711_s9 + $0x1330] ss:$48 sps:$4 sm:$0xff]   ;;  %v12090_v54 = vld [vmem:[%s13711_s9 + $0xcd4] ss:$48 sps:$4 sm:$0xff]  }
 0x793   : > { %9115 = vmatpush2.bf16.msra.mxu0 %v12046_v57  ;;  %v12093_v57 = vld [vmem:[%s13711_s9 + $0x12d4] ss:$48 sps:$4 sm:$0xff]  }
 0x794   : > { %9156 = vmatpush2.bf16.msra.mxu1 %v12049_v59  ;;  %9116 = vmatprep.subr.bf16.mxu0 %v12054_v60  ;;  %v12088_v59 = vld [vmem:[%s13711_s9 + $0xcd0] ss:$48 sps:$4 sm:$0xff]  }
 0x795   : > { %9157 = vmatprep.subr.bf16.mxu1 %v12057_v37  ;;  %v12091_v60 = vld [vmem:[%s13711_s9 + $0x12d0] ss:$48 sps:$4 sm:$0xff]   ;;  %v12099_v37 = vld [vmem:[%s13711_s9 + $0x1274] ss:$48 sps:$4 sm:$0xff]  }
 0x797   : > { %9117 = vmatpush2.bf16.msra.mxu0 %v12052_v0 }
 0x798   : > { %9158 = vmatpush2.bf16.msra.mxu1 %v12055_v1  ;;  %9168 = vmatprep.subr.bf16.mxu0 %v12060_v30  ;;  %v12094_v1 = vld [vmem:[%s13711_s9 + $0xc70] ss:$48 sps:$4 sm:$0xff]  }
 0x799   : > { %9209 = vmatprep.subr.bf16.mxu1 %v12063_v9  ;;  %v12102_v9 = vld [vmem:[%s13711_s9 + $0xc14] ss:$48 sps:$4 sm:$0xff]  }
 0x79a   : > { %v8874_v4 = vpop.f32.mrf.mxu0  ;;  %9119 = vmatmul.mubr.bf16.vlgmr.msra.gmra.mxu0 %v14041_v12 }
 0x79b   : > { %v8875_v32 = vadd.f32 %v8874_v4, %v8834_v58  ;;  %v8915_v14 = vpop.f32.mrf.mxu1  ;;  %9160 = vmatmul.mubr.bf16.vlgmr.msra.gmra.mxu1 %v14044_v18  ;;  %9169 = vmatpush1.bf16.msra.mxu0 %v12058_v15  ;;  %v12105_v15 = vld [vmem:[%s13711_s9 + $0x1214] ss:$48 sps:$4 sm:$0xff]   ;;  %v12103_v58 = vld [vmem:[%s13711_s9 + $0x1210] ss:$48 sps:$4 sm:$0xff]  }
 0x79c   : > { %9200 = vmatprep.mubr.bf16.mxu0 %v14048_v21  ;;  %9210 = vmatpush1.bf16.msra.mxu1 %v12061_v33  ;;  %v8876_v42 = vpop.f32.mrf.mxu0  ;;  %v12100_v33 = vld [vmem:[%s13711_s9 + $0xc10] ss:$48 sps:$4 sm:$0xff]   ;;  %v12111_v4 = vld [vmem:[%s13711_s9 + $0x17b4] ss:$48 sps:$4 sm:$0xff]  }
 0x79d   : > { %v8916_v23 = vadd.f32 %v8915_v14, %v8875_v32  ;;  %9241 = vmatprep.mubr.bf16.mxu1 %v14051_v25  ;;  %v8877_v31 = vadd.f32 %v8876_v42, %v8836_v7  ;;  %v8917_v62 = vpop.f32.mrf.mxu1  ;;  %9170 = vmatprep.subr.bf16.mxu0 %v12066_v63  ;;  %v12108_v63 = vld [vmem:[%s13711_s9 + $0x11b4] ss:$48 sps:$4 sm:$0xff]   ;;  %v12109_v7 = vld [vmem:[%s13711_s9 + $0x17b0] ss:$48 sps:$4 sm:$0xff]  }
 0x79e   : > { %v8878_v17 = vpop.f32.mrf.mxu0  ;;  %9211 = vmatprep.subr.bf16.mxu1 %v12069_v38  ;;  %v12106_v38 = vld [vmem:[%s13711_s9 + $0x11b0] ss:$48 sps:$4 sm:$0xff]   ;;  %v12114_v32 = vld [vmem:[%s13711_s9 + $0x1154] ss:$48 sps:$4 sm:$0xff]  }
 0x79f   : > { %v11201_v19 = vmul.f32 -1.442695, %v8916_v23  ;;  %v8918_v11 = vadd.f32 %v8917_v62, %v8877_v31  ;;  %v8919_v26 = vpop.f32.mrf.mxu1  ;;  %9171 = vmatpush1.bf16.msra.mxu0 %v12064_v8  ;;  %v12117_v14 = vld [vmem:[%s13711_s9 + $0x1754] ss:$48 sps:$4 sm:$0xff]   ;;  %v12112_v8 = vld [vmem:[%s13711_s9 + $0x1150] ss:$48 sps:$4 sm:$0xff]  }
 0x7a0   : > { %9212 = vmatpush1.bf16.msra.mxu1 %v12067_v22  ;;  %v8879_v27 = vpop.f32.mrf.mxu0  ;;  %9172 = vmatprep.subr.bf16.mxu0 %v12072_v48  ;;  %v12115_v42 = vld [vmem:[%s13711_s9 + $0x1750] ss:$48 sps:$4 sm:$0xff]   ;;  %v12120_v22 = vld [vmem:[%s13711_s9 + $0x10f4] ss:$48 sps:$4 sm:$0xff]  }
 0x7a1   : > { %12790 = vpow2.f32 %v11201_v19  ;;  %v11202_v29 = vmul.f32 -1.442695, %v8918_v11  ;;  %v8920_v34 = vpop.f32.mrf.mxu1  ;;  %9213 = vmatprep.subr.bf16.mxu1 %v12075_v5  ;;  %v12123_v48 = vld [vmem:[%s13711_s9 + $0x16f4] ss:$48 sps:$4 sm:$0xff]   ;;  %v12118_v31 = vld [vmem:[%s13711_s9 + $0x10f0] ss:$48 sps:$4 sm:$0xff]  }
 0x7a2   : > { %v12121_v5 = vld [vmem:[%s13711_s9 + $0x16f0] ss:$48 sps:$4 sm:$0xff]   ;;  %v12126_v17 = vld [vmem:[%s13711_s9 + $0x1094] ss:$48 sps:$4 sm:$0xff]  }
 0x7a3   : > { %12792 = vpow2.f32 %v11202_v29  ;;  %9173 = vmatpush1.bf16.msra.mxu0 %v12070_v24  ;;  %v12129_v19 = vld [vmem:[%s13711_s9 + $0x1694] ss:$48 sps:$4 sm:$0xff]   ;;  %v12124_v11 = vld [vmem:[%s13711_s9 + $0x1090] ss:$48 sps:$4 sm:$0xff]  }
 0x7a4   : > { %9214 = vmatpush1.bf16.msra.mxu1 %v12073_v28  ;;  %9174 = vmatprep.subr.bf16.mxu0 %v12078_v46  ;;  %v12127_v26 = vld [vmem:[%s13711_s9 + $0x1690] ss:$48 sps:$4 sm:$0xff]   ;;  %v12132_v24 = vld [vmem:[%s13711_s9 + $0x1034] ss:$48 sps:$4 sm:$0xff]  }
 0x7a5   : > { %9215 = vmatprep.subr.bf16.mxu1 %v12081_v35  ;;  %v12135_v27 = vld [vmem:[%s13711_s9 + $0x1634] ss:$48 sps:$4 sm:$0xff]   ;;  %v12130_v28 = vld [vmem:[%s13711_s9 + $0x1030] ss:$48 sps:$4 sm:$0xff]  }
 0x7a6   : > { %v12133_v46 = vld [vmem:[%s13711_s9 + $0x1630] ss:$48 sps:$4 sm:$0xff]   ;;  %v12138_v29 = vld [vmem:[%s13711_s9 + $0xfd4] ss:$48 sps:$4 sm:$0xff]  }
 0x7a7   : > { %9175 = vmatpush1.bf16.msra.mxu0 %v12076_v10  ;;  %v12141_v34 = vld [vmem:[%s13711_s9 + $0x15d4] ss:$48 sps:$4 sm:$0xff]   ;;  %v12136_v35 = vld [vmem:[%s13711_s9 + $0xfd0] ss:$48 sps:$4 sm:$0xff]  }
 0x7a8   : > { %9216 = vmatpush1.bf16.msra.mxu1 %v12079_v16  ;;  %9176 = vmatprep.subr.bf16.mxu0 %v12084_v49  ;;  %v12139_v10 = vld [vmem:[%s13711_s9 + $0x15d0] ss:$48 sps:$4 sm:$0xff]   ;;  %v12144_v16 = vld [vmem:[%s13711_s9 + $0xf74] ss:$48 sps:$4 sm:$0xff]  }
 0x7a9   : > { %9217 = vmatprep.subr.bf16.mxu1 %v12087_v51  ;;  %v12147_v49 = vld [vmem:[%s13711_s9 + $0x1574] ss:$48 sps:$4 sm:$0xff]   ;;  %v12142_v51 = vld [vmem:[%s13711_s9 + $0xf70] ss:$48 sps:$4 sm:$0xff]  }
 0x7ab   : > { %9177 = vmatpush1.bf16.msra.mxu0 %v12082_v39  ;;  %v12145_v39 = vld [vmem:[%s13711_s9 + $0x1570] ss:$48 sps:$4 sm:$0xff]  }
 0x7ac   : > { %9218 = vmatpush1.bf16.msra.mxu1 %v12085_v53  ;;  %9178 = vmatprep.subr.bf16.mxu0 %v12090_v54  ;;  %v12150_v53 = vld [vmem:[%s13711_s9 + $0xf14] ss:$48 sps:$4 sm:$0xff]  }
 0x7ad   : > { %9219 = vmatprep.subr.bf16.mxu1 %v12093_v57  ;;  %v12153_v54 = vld [vmem:[%s13711_s9 + $0x1514] ss:$48 sps:$4 sm:$0xff]   ;;  %v12148_v57 = vld [vmem:[%s13711_s9 + $0xf10] ss:$48 sps:$4 sm:$0xff]  }
 0x7ae   : > { %v12791_v61 = vpop.eup %12790 }
 0x7af   : > { %v9778_v0 = vadd.f32 1.0, %v12791_v61  ;;  %9179 = vmatpush1.bf16.msra.mxu0 %v12088_v59  ;;  %v12151_v59 = vld [vmem:[%s13711_s9 + $0x1510] ss:$48 sps:$4 sm:$0xff]   ;;  %v12157_v61 = vld [vmem:[%s13711_s9 + $0x8b8] ss:$48 sps:$4 sm:$0xff]  }
 0x7b0   : > { %v12793_v30 = vpop.eup %12792  ;;  %9220 = vmatpush1.bf16.msra.mxu1 %v12091_v60  ;;  %9180 = vmatprep.subr.bf16.mxu0 %v12096_v41  ;;  %v12156_v60 = vld [vmem:[%s13711_s9 + $0x2bc] ss:$48 sps:$4 sm:$0xff]  }
 0x7b1   : > { %12794 = vrcp.f32 %v9778_v0  ;;  %v9779_v2 = vadd.f32 1.0, %v12793_v30  ;;  %9221 = vmatprep.subr.bf16.mxu1 %v12099_v37  ;;  %v12159_v41 = vld [vmem:[%s13711_s9 + $0x8bc] ss:$48 sps:$4 sm:$0xff]   ;;  %v12154_v37 = vld [vmem:[%s13711_s9 + $0x2b8] ss:$48 sps:$4 sm:$0xff]  }
 0x7b2   : > { %v12162_v0 = vld [vmem:[%s13711_s9 + $0x25c] ss:$48 sps:$4 sm:$0xff]  }
 0x7b3   : > { %12796 = vrcp.f32 %v9779_v2  ;;  %9181 = vmatpush1.bf16.msra.mxu0 %v12094_v1  ;;  %v12165_v30 = vld [vmem:[%s13711_s9 + $0x85c] ss:$48 sps:$4 sm:$0xff]  }
 0x7b4   : > { %9222 = vmatpush1.bf16.msra.mxu1 %v12097_v47  ;;  %9182 = vmatprep.subr.bf16.mxu0 %v12102_v9  ;;  %v12160_v9 = vld [vmem:[%s13711_s9 + $0x258] ss:$48 sps:$4 sm:$0xff]  }
 0x7b5   : > { %9223 = vmatprep.subr.bf16.mxu1 %v12105_v15  ;;  %v12163_v15 = vld [vmem:[%s13711_s9 + $0x858] ss:$48 sps:$4 sm:$0xff]  }
 0x7b7   : > { %9183 = vmatpush1.bf16.msra.mxu0 %v12100_v33  ;;  %v12168_v33 = vld [vmem:[%s13711_s9 + $0x1fc] ss:$48 sps:$4 sm:$0xff]  }
 0x7b8   : > { %9224 = vmatpush1.bf16.msra.mxu1 %v12103_v58  ;;  %9184 = vmatprep.subr.bf16.mxu0 %v12108_v63  ;;  %v12171_v63 = vld [vmem:[%s13711_s9 + $0x7fc] ss:$48 sps:$4 sm:$0xff]  }
 0x7b9   : > { %9225 = vmatprep.subr.bf16.mxu1 %v12111_v4 }
 0x7bb   : > { %9185 = vmatpush2.bf16.msra.mxu0 %v12106_v38 }
 0x7bc   : > { %9226 = vmatpush2.bf16.msra.mxu1 %v12109_v7  ;;  %9186 = vmatprep.subr.bf16.mxu0 %v12114_v32  ;;  %v12166_v7 = vld [vmem:[%s13711_s9 + $0x1f8] ss:$48 sps:$4 sm:$0xff]  }
 0x7bd   : > { %9227 = vmatprep.subr.bf16.mxu1 %v12117_v14  ;;  %v12169_v14 = vld [vmem:[%s13711_s9 + $0x7f8] ss:$48 sps:$4 sm:$0xff]  }
 0x7be   : > { %v12795_v23 = vpop.eup %12794 }
 0x7bf   : > { %9814 = vst [vmem:[%s14395_s16] sm:$0xff] %v12795_v23  ;;  %9187 = vmatpush2.bf16.msra.mxu0 %v12112_v8  ;;  %v12174_v8 = vld [vmem:[%s13711_s9 + $0x19c] ss:$48 sps:$4 sm:$0xff]   ;;  %v12175_v23 = vld [vmem:[%s13711_s9 + $0x798] ss:$48 sps:$4 sm:$0xff]  }
 0x7c0   : > { %v12797_v62 = vpop.eup %12796  ;;  %9228 = vmatpush2.bf16.msra.mxu1 %v12115_v42  ;;  %9188 = vmatprep.subr.bf16.mxu0 %v12120_v22  ;;  %v12177_v22 = vld [vmem:[%s13711_s9 + $0x79c] ss:$48 sps:$4 sm:$0xff]  }
 0x7c1   : > { %9815 = vst [vmem:[%s14395_s16 + $0x8] sm:$0xff] %v12797_v62  ;;  %9229 = vmatprep.subr.bf16.mxu1 %v12123_v48  ;;  %v12172_v48 = vld [vmem:[%s13711_s9 + $0x198] ss:$48 sps:$4 sm:$0xff]   ;;  %v12183_v62 = vld [vmem:[%s13711_s9 + $0x73c] ss:$48 sps:$4 sm:$0xff]  }
 0x7c3   : > { %9189 = vmatpush2.bf16.msra.mxu0 %v12118_v31  ;;  %v12180_v31 = vld [vmem:[%s13711_s9 + $0x13c] ss:$48 sps:$4 sm:$0xff]  }
 0x7c4   : > { %9230 = vmatpush2.bf16.msra.mxu1 %v12121_v5  ;;  %9190 = vmatprep.subr.bf16.mxu0 %v12126_v17  ;;  %v12178_v5 = vld [vmem:[%s13711_s9 + $0x138] ss:$48 sps:$4 sm:$0xff]  }
 0x7c5   : > { %9231 = vmatprep.subr.bf16.mxu1 %v12129_v19  ;;  %v12181_v17 = vld [vmem:[%s13711_s9 + $0x738] ss:$48 sps:$4 sm:$0xff]   ;;  %v12186_v19 = vld [vmem:[%s13711_s9 + $0xdc] ss:$48 sps:$4 sm:$0xff]  }
 0x7c7   : > { %9191 = vmatpush2.bf16.msra.mxu0 %v12124_v11  ;;  %v12189_v11 = vld [vmem:[%s13711_s9 + $0x6dc] ss:$48 sps:$4 sm:$0xff]  }
 0x7c8   : > { %9232 = vmatpush2.bf16.msra.mxu1 %v12127_v26  ;;  %9192 = vmatprep.subr.bf16.mxu0 %v12132_v24  ;;  %v12184_v26 = vld [vmem:[%s13711_s9 + $0xd8] ss:$48 sps:$4 sm:$0xff]  }
 0x7c9   : > { %9233 = vmatprep.subr.bf16.mxu1 %v12135_v27  ;;  %v12187_v24 = vld [vmem:[%s13711_s9 + $0x6d8] ss:$48 sps:$4 sm:$0xff]   ;;  %v12192_v27 = vld [vmem:[%s13711_s9 + $0x7c] ss:$48 sps:$4 sm:$0xff]  }
 0x7cb   : > { %9193 = vmatpush2.bf16.msra.mxu0 %v12130_v28  ;;  %v12195_v28 = vld [vmem:[%s13711_s9 + $0x67c] ss:$48 sps:$4 sm:$0xff]  }
 0x7cc   : > { %9234 = vmatpush2.bf16.msra.mxu1 %v12133_v46  ;;  %9194 = vmatprep.subr.bf16.mxu0 %v12138_v29  ;;  %v12190_v46 = vld [vmem:[%s13711_s9 + $0x78] ss:$48 sps:$4 sm:$0xff]  }
 0x7cd   : > { %9235 = vmatprep.subr.bf16.mxu1 %v12141_v34  ;;  %v12193_v29 = vld [vmem:[%s13711_s9 + $0x678] ss:$48 sps:$4 sm:$0xff]   ;;  %v12198_v34 = vld [vmem:[%s13711_s9 + $0x1c] ss:$48 sps:$4 sm:$0xff]  }
 0x7cf   : > { %9195 = vmatpush2.bf16.msra.mxu0 %v12136_v35  ;;  %v12201_v35 = vld [vmem:[%s13711_s9 + $0x61c] ss:$48 sps:$4 sm:$0xff]  }
 0x7d0   : > { %9236 = vmatpush2.bf16.msra.mxu1 %v12139_v10  ;;  %9196 = vmatprep.subr.bf16.mxu0 %v12144_v16  ;;  %v12196_v10 = vld [vmem:[%s13711_s9 + $0x18] ss:$48 sps:$4 sm:$0xff]  }
 0x7d1   : > { %9237 = vmatprep.subr.bf16.mxu1 %v12147_v49  ;;  %v12199_v16 = vld [vmem:[%s13711_s9 + $0x618] ss:$48 sps:$4 sm:$0xff]   ;;  %v12204_v49 = vld [vmem:[%s13711_s9 + $0x5bc] ss:$48 sps:$4 sm:$0xff]  }
 0x7d3   : > { %9197 = vmatpush2.bf16.msra.mxu0 %v12142_v51  ;;  %v12207_v51 = vld [vmem:[%s13711_s9 + $0xbbc] ss:$48 sps:$4 sm:$0xff]  }
 0x7d4   : > { %9238 = vmatpush2.bf16.msra.mxu1 %v12145_v39  ;;  %9198 = vmatprep.subr.bf16.mxu0 %v12150_v53  ;;  %v12202_v39 = vld [vmem:[%s13711_s9 + $0x5b8] ss:$48 sps:$4 sm:$0xff]  }
 0x7d5   : > { %9239 = vmatprep.subr.bf16.mxu1 %v12153_v54  ;;  %v12205_v53 = vld [vmem:[%s13711_s9 + $0xbb8] ss:$48 sps:$4 sm:$0xff]   ;;  %v12210_v54 = vld [vmem:[%s13711_s9 + $0x55c] ss:$48 sps:$4 sm:$0xff]  }
 0x7d7   : > { %9199 = vmatpush2.bf16.msra.mxu0 %v12148_v57  ;;  %v12213_v57 = vld [vmem:[%s13711_s9 + $0xb5c] ss:$48 sps:$4 sm:$0xff]  }
 0x7d8   : > { %9240 = vmatpush2.bf16.msra.mxu1 %v12151_v59  ;;  %9250 = vmatprep.subr.bf16.mxu0 %v12156_v60  ;;  %v12208_v59 = vld [vmem:[%s13711_s9 + $0x558] ss:$48 sps:$4 sm:$0xff]  }
 0x7d9   : > { %9291 = vmatprep.subr.bf16.mxu1 %v12159_v41  ;;  %v12211_v60 = vld [vmem:[%s13711_s9 + $0xb58] ss:$48 sps:$4 sm:$0xff]   ;;  %v12216_v41 = vld [vmem:[%s13711_s9 + $0x4fc] ss:$48 sps:$4 sm:$0xff]  }
 0x7da   : > { %v14426_v1 = vpop.f32.mrf.mxu0  ;;  %9201 = vmatmul.mubr.bf16.vlgmr.msra.gmra.mxu0 %v14121_v36 }
 0x7db   : > { %v14430_v47 = vpop.f32.mrf.mxu1  ;;  %9242 = vmatmul.mubr.bf16.vlgmr.msra.gmra.mxu1 %v14124_v50  ;;  %9251 = vmatpush1.bf16.msra.mxu0 %v12154_v37  ;;  %v12219_v37 = vld [vmem:[%s13711_s9 + $0xafc] ss:$48 sps:$4 sm:$0xff]  }
 0x7dc   : > { %9282 = vmatprep.mubr.bf16.mxu0 %v14034_v45  ;;  %9292 = vmatpush1.bf16.msra.mxu1 %v12157_v61  ;;  %v14435_v2 = vpop.f32.mrf.mxu0  ;;  %v12214_v61 = vld [vmem:[%s13711_s9 + $0x4f8] ss:$48 sps:$4 sm:$0xff]  }
 0x7dd   : > { %9323 = vmatprep.mubr.bf16.mxu1 %v14036_v3  ;;  %v14440_v58 = vpop.f32.mrf.mxu1  ;;  %9252 = vmatprep.subr.bf16.mxu0 %v12162_v0  ;;  %v12217_v0 = vld [vmem:[%s13711_s9 + $0xaf8] ss:$48 sps:$4 sm:$0xff]  }
 0x7de   : > { %v8960_v4 = vpop.f32.mrf.mxu0  ;;  %9293 = vmatprep.subr.bf16.mxu1 %v12165_v30  ;;  %v12222_v30 = vld [vmem:[%s13711_s9 + $0x49c] ss:$48 sps:$4 sm:$0xff]  }
 0x7df   : > { %v9001_v38 = vpop.f32.mrf.mxu1  ;;  %9253 = vmatpush1.bf16.msra.mxu0 %v12160_v9  ;;  %v12225_v9 = vld [vmem:[%s13711_s9 + $0xa9c] ss:$48 sps:$4 sm:$0xff]  }
 0x7e0   : > { %9294 = vmatpush1.bf16.msra.mxu1 %v12163_v15  ;;  %v8961_v32 = vpop.f32.mrf.mxu0  ;;  %9254 = vmatprep.subr.bf16.mxu0 %v12168_v33  ;;  %v12220_v15 = vld [vmem:[%s13711_s9 + $0x498] ss:$48 sps:$4 sm:$0xff]   ;;  %v12231_v4 = vld [vmem:[%s13711_s9 + $0xa3c] ss:$48 sps:$4 sm:$0xff]  }
 0x7e1   : > { %v9002_v42 = vpop.f32.mrf.mxu1  ;;  %9295 = vmatprep.subr.bf16.mxu1 %v12171_v63  ;;  %v12223_v33 = vld [vmem:[%s13711_s9 + $0xa98] ss:$48 sps:$4 sm:$0xff]   ;;  %v12228_v63 = vld [vmem:[%s13711_s9 + $0x43c] ss:$48 sps:$4 sm:$0xff]  }
 0x7e2   : > { %v12226_v38 = vld [vmem:[%s13711_s9 + $0x438] ss:$48 sps:$4 sm:$0xff]   ;;  %v12234_v32 = vld [vmem:[%s13711_s9 + $0x3dc] ss:$48 sps:$4 sm:$0xff]  }
 0x7e3   : > { %9255 = vmatpush1.bf16.msra.mxu0 %v12166_v7  ;;  %v12229_v7 = vld [vmem:[%s13711_s9 + $0xa38] ss:$48 sps:$4 sm:$0xff]  }
 0x7e4   : > { %9296 = vmatpush1.bf16.msra.mxu1 %v12169_v14  ;;  %9256 = vmatprep.subr.bf16.mxu0 %v12174_v8  ;;  %v12237_v14 = vld [vmem:[%s13711_s9 + $0x9dc] ss:$48 sps:$4 sm:$0xff]   ;;  %v12232_v8 = vld [vmem:[%s13711_s9 + $0x3d8] ss:$48 sps:$4 sm:$0xff]  }
 0x7e5   : > { %9297 = vmatprep.subr.bf16.mxu1 %v12177_v22  ;;  %v12235_v42 = vld [vmem:[%s13711_s9 + $0x9d8] ss:$48 sps:$4 sm:$0xff]   ;;  %v12240_v22 = vld [vmem:[%s13711_s9 + $0x37c] ss:$48 sps:$4 sm:$0xff]  }
 0x7e7   : > { %9257 = vmatpush1.bf16.msra.mxu0 %v12172_v48  ;;  %v12243_v48 = vld [vmem:[%s13711_s9 + $0x97c] ss:$48 sps:$4 sm:$0xff]  }
 0x7e8   : > { %9298 = vmatpush1.bf16.msra.mxu1 %v12175_v23  ;;  %9258 = vmatprep.subr.bf16.mxu0 %v12180_v31  ;;  %v12238_v23 = vld [vmem:[%s13711_s9 + $0x378] ss:$48 sps:$4 sm:$0xff]  }
 0x7e9   : > { %9299 = vmatprep.subr.bf16.mxu1 %v12183_v62  ;;  %v12241_v31 = vld [vmem:[%s13711_s9 + $0x978] ss:$48 sps:$4 sm:$0xff]   ;;  %v12246_v62 = vld [vmem:[%s13711_s9 + $0x31c] ss:$48 sps:$4 sm:$0xff]  }
 0x7eb   : > { %9259 = vmatpush1.bf16.msra.mxu0 %v12178_v5  ;;  %v4869_v5 = vrot.slane %v14332_v55, %v13790_v20 }
 0x7ec   : > { %9300 = vmatpush1.bf16.msra.mxu1 %v12181_v17  ;;  %9260 = vmatprep.subr.bf16.mxu0 %v12186_v19  ;;  %v12249_v17 = vld [vmem:[%s13711_s9 + $0x91c] ss:$48 sps:$4 sm:$0xff]   ;;  %v4873_v19 = vrot.slane %v14332_v55, %v13793_v6  ;;  %v12253_v55 = vld [vmem:[%s13711_s9 + $0x14b8] ss:$48 sps:$4 sm:$0xff]  }
 0x7ed   : > { %9301 = vmatprep.subr.bf16.mxu1 %v12189_v11  ;;  %v12244_v11 = vld [vmem:[%s13711_s9 + $0x318] ss:$48 sps:$4 sm:$0xff]  }
 0x7ef   : > { %9261 = vmatpush1.bf16.msra.mxu0 %v12184_v26  ;;  %v12247_v26 = vld [vmem:[%s13711_s9 + $0x918] ss:$48 sps:$4 sm:$0xff]  }
 0x7f0   : > { %9302 = vmatpush1.bf16.msra.mxu1 %v12187_v24  ;;  %9262 = vmatprep.subr.bf16.mxu0 %v12192_v27  ;;  %v12252_v24 = vld [vmem:[%s13711_s9 + $0xebc] ss:$48 sps:$4 sm:$0xff]   ;;  %v8957_v27 = vadd.f32 %v14426_v1, %v4869_v5 }
 0x7f1   : > { %9303 = vmatprep.subr.bf16.mxu1 %v12195_v28  ;;  %v12255_v28 = vld [vmem:[%s13711_s9 + $0x14bc] ss:$48 sps:$4 sm:$0xff]  }
 0x7f2   : > { %v12261_v1 = vld [vmem:[%s13711_s9 + $0x145c] ss:$48 sps:$4 sm:$0xff]  }
 0x7f3   : > { %9263 = vmatpush1.bf16.msra.mxu0 %v12190_v46  ;;  %v8959_v46 = vadd.f32 %v14435_v2, %v4873_v19  ;;  %v12291_v5 = vld [vmem:[%s13711_s9 + $0x127c] ss:$48 sps:$4 sm:$0xff]  }
 0x7f4   : > { %9304 = vmatpush1.bf16.msra.mxu1 %v12193_v29  ;;  %9264 = vmatprep.subr.bf16.mxu0 %v12198_v34  ;;  %v12250_v29 = vld [vmem:[%s13711_s9 + $0xeb8] ss:$48 sps:$4 sm:$0xff]   ;;  %v8998_v34 = vadd.f32 %v14430_v47, %v8957_v27  ;;  %v12294_v27 = vld [vmem:[%s13711_s9 + $0xc1c] ss:$48 sps:$4 sm:$0xff]  }
 0x7f5   : > { %9305 = vmatprep.subr.bf16.mxu1 %v12201_v35  ;;  %v12258_v35 = vld [vmem:[%s13711_s9 + $0xe5c] ss:$48 sps:$4 sm:$0xff]  }
 0x7f7   : > { %9265 = vmatpush1.bf16.msra.mxu0 %v12196_v10 }
 0x7f8   : > { %9306 = vmatpush1.bf16.msra.mxu1 %v12199_v16  ;;  %9266 = vmatprep.subr.bf16.mxu0 %v12204_v49  ;;  %v9000_v16 = vadd.f32 %v14440_v58, %v8959_v46  ;;  %v12297_v46 = vld [vmem:[%s13711_s9 + $0x121c] ss:$48 sps:$4 sm:$0xff]  }
 0x7f9   : > { %9307 = vmatprep.subr.bf16.mxu1 %v12207_v51  ;;  %v12256_v51 = vld [vmem:[%s13711_s9 + $0xe58] ss:$48 sps:$4 sm:$0xff]  }
 0x7fb   : > { %9267 = vmatpush2.bf16.msra.mxu0 %v12202_v39  ;;  %v12259_v39 = vld [vmem:[%s13711_s9 + $0x1458] ss:$48 sps:$4 sm:$0xff]  }
 0x7fc   : > { %9308 = vmatpush2.bf16.msra.mxu1 %v12205_v53  ;;  %9268 = vmatprep.subr.bf16.mxu0 %v12210_v54  ;;  %v12264_v53 = vld [vmem:[%s13711_s9 + $0xdfc] ss:$48 sps:$4 sm:$0xff]  }
 0x7fd   : > { %9309 = vmatprep.subr.bf16.mxu1 %v12213_v57 }
 0x7ff   : > { %9269 = vmatpush2.bf16.msra.mxu0 %v12208_v59  ;;  %v12267_v59 = vld [vmem:[%s13711_s9 + $0x13fc] ss:$48 sps:$4 sm:$0xff]  }
 0x800   : > { %9310 = vmatpush2.bf16.msra.mxu1 %v12211_v60  ;;  %9270 = vmatprep.subr.bf16.mxu0 %v12216_v41 }
 0x801   : > { %9311 = vmatprep.subr.bf16.mxu1 %v12219_v37 }
 0x803   : > { %9271 = vmatpush2.bf16.msra.mxu0 %v12214_v61 }
 0x804   : > { %9312 = vmatpush2.bf16.msra.mxu1 %v12217_v0  ;;  %9272 = vmatprep.subr.bf16.mxu0 %v12222_v30  ;;  %v12262_v0 = vld [vmem:[%s13711_s9 + $0xdf8] ss:$48 sps:$4 sm:$0xff]  }
 0x805   : > { %9313 = vmatprep.subr.bf16.mxu1 %v12225_v9  ;;  %v12265_v9 = vld [vmem:[%s13711_s9 + $0x13f8] ss:$48 sps:$4 sm:$0xff]  }
 0x807   : > { %9273 = vmatpush2.bf16.msra.mxu0 %v12220_v15  ;;  %v12270_v15 = vld [vmem:[%s13711_s9 + $0xd9c] ss:$48 sps:$4 sm:$0xff]  }
 0x808   : > { %9314 = vmatpush2.bf16.msra.mxu1 %v12223_v33  ;;  %9274 = vmatprep.subr.bf16.mxu0 %v12228_v63 }
 0x809   : > { %9315 = vmatprep.subr.bf16.mxu1 %v12231_v4  ;;  %v12273_v4 = vld [vmem:[%s13711_s9 + $0x139c] ss:$48 sps:$4 sm:$0xff]  }
 0x80b   : > { %9275 = vmatpush2.bf16.msra.mxu0 %v12226_v38  ;;  %v12268_v38 = vld [vmem:[%s13711_s9 + $0xd98] ss:$48 sps:$4 sm:$0xff]  }
 0x80c   : > { %9316 = vmatpush2.bf16.msra.mxu1 %v12229_v7  ;;  %9276 = vmatprep.subr.bf16.mxu0 %v12234_v32  ;;  %v12271_v7 = vld [vmem:[%s13711_s9 + $0x1398] ss:$48 sps:$4 sm:$0xff]   ;;  %v12276_v32 = vld [vmem:[%s13711_s9 + $0xd3c] ss:$48 sps:$4 sm:$0xff]  }
 0x80d   : > { %9317 = vmatprep.subr.bf16.mxu1 %v12237_v14  ;;  %v12279_v14 = vld [vmem:[%s13711_s9 + $0x133c] ss:$48 sps:$4 sm:$0xff]  }
 0x80f   : > { %9277 = vmatpush2.bf16.msra.mxu0 %v12232_v8  ;;  %v12274_v8 = vld [vmem:[%s13711_s9 + $0xd38] ss:$48 sps:$4 sm:$0xff]  }
 0x810   : > { %9318 = vmatpush2.bf16.msra.mxu1 %v12235_v42  ;;  %9278 = vmatprep.subr.bf16.mxu0 %v12240_v22  ;;  %v12277_v42 = vld [vmem:[%s13711_s9 + $0x1338] ss:$48 sps:$4 sm:$0xff]   ;;  %v12282_v22 = vld [vmem:[%s13711_s9 + $0xcdc] ss:$48 sps:$4 sm:$0xff]  }
 0x811   : > { %9319 = vmatprep.subr.bf16.mxu1 %v12243_v48  ;;  %v12285_v48 = vld [vmem:[%s13711_s9 + $0x12dc] ss:$48 sps:$4 sm:$0xff]  }
 0x813   : > { %9279 = vmatpush2.bf16.msra.mxu0 %v12238_v23  ;;  %v12280_v23 = vld [vmem:[%s13711_s9 + $0xcd8] ss:$48 sps:$4 sm:$0xff]  }
 0x814   : > { %9320 = vmatpush2.bf16.msra.mxu1 %v12241_v31  ;;  %9280 = vmatprep.subr.bf16.mxu0 %v12246_v62  ;;  %v12283_v31 = vld [vmem:[%s13711_s9 + $0x12d8] ss:$48 sps:$4 sm:$0xff]   ;;  %v12288_v62 = vld [vmem:[%s13711_s9 + $0xc7c] ss:$48 sps:$4 sm:$0xff]  }
 0x815   : > { %9321 = vmatprep.subr.bf16.mxu1 %v12249_v17 }
 0x817   : > { %9281 = vmatpush2.bf16.msra.mxu0 %v12244_v11  ;;  %v12286_v11 = vld [vmem:[%s13711_s9 + $0xc78] ss:$48 sps:$4 sm:$0xff]  }
 0x818   : > { %9322 = vmatpush2.bf16.msra.mxu1 %v12247_v26  ;;  %9332 = vmatprep.subr.bf16.mxu0 %v12252_v24  ;;  %v12289_v24 = vld [vmem:[%s13711_s9 + $0x1278] ss:$48 sps:$4 sm:$0xff]  }
 0x819   : > { %9373 = vmatprep.subr.bf16.mxu1 %v12255_v28 }
 0x81a   : > { %v9038_v10 = vpop.f32.mrf.mxu0  ;;  %9283 = vmatmul.mubr.bf16.vlgmr.msra.gmra.mxu0 %v14041_v12 }
 0x81b   : > { %v9039_v2 = vadd.f32 %v9038_v10, %v8998_v34  ;;  %v9079_v49 = vpop.f32.mrf.mxu1  ;;  %9324 = vmatmul.mubr.bf16.vlgmr.msra.gmra.mxu1 %v14044_v18  ;;  %9333 = vmatpush1.bf16.msra.mxu0 %v12250_v29  ;;  %v12292_v29 = vld [vmem:[%s13711_s9 + $0xc18] ss:$48 sps:$4 sm:$0xff]   ;;  %v12300_v34 = vld [vmem:[%s13711_s9 + $0x11bc] ss:$48 sps:$4 sm:$0xff]  }
 0x81c   : > { %9364 = vmatprep.mubr.bf16.mxu0 %v14048_v21  ;;  %9374 = vmatpush1.bf16.msra.mxu1 %v12253_v55  ;;  %v9040_v47 = vpop.f32.mrf.mxu0  ;;  %v12295_v55 = vld [vmem:[%s13711_s9 + $0x1218] ss:$48 sps:$4 sm:$0xff]  }
 0x81d   : > { %v9080_v54 = vadd.f32 %v9079_v49, %v9039_v2  ;;  %9405 = vmatprep.mubr.bf16.mxu1 %v14051_v25  ;;  %v9041_v58 = vadd.f32 %v9040_v47, %v9000_v16  ;;  %v9081_v57 = vpop.f32.mrf.mxu1  ;;  %9334 = vmatprep.subr.bf16.mxu0 %v12258_v35  ;;  %v12303_v35 = vld [vmem:[%s13711_s9 + $0x17bc] ss:$48 sps:$4 sm:$0xff]   ;;  %v12298_v10 = vld [vmem:[%s13711_s9 + $0x11b8] ss:$48 sps:$4 sm:$0xff]  }
 0x81e   : > { %v9042_v60 = vpop.f32.mrf.mxu0  ;;  %9375 = vmatprep.subr.bf16.mxu1 %v12261_v1  ;;  %v12301_v1 = vld [vmem:[%s13711_s9 + $0x17b8] ss:$48 sps:$4 sm:$0xff]   ;;  %v12306_v16 = vld [vmem:[%s13711_s9 + $0x115c] ss:$48 sps:$4 sm:$0xff]  }
 0x81f   : > { %v11203_v41 = vmul.f32 -1.442695, %v9080_v54  ;;  %v9082_v37 = vadd.f32 %v9081_v57, %v9041_v58  ;;  %v9083_v61 = vpop.f32.mrf.mxu1  ;;  %9335 = vmatpush1.bf16.msra.mxu0 %v12256_v51  ;;  %v12309_v2 = vld [vmem:[%s13711_s9 + $0x175c] ss:$48 sps:$4 sm:$0xff]   ;;  %v12304_v49 = vld [vmem:[%s13711_s9 + $0x1158] ss:$48 sps:$4 sm:$0xff]  }
 0x820   : > { %9376 = vmatpush1.bf16.msra.mxu1 %v12259_v39  ;;  %v9043_v30 = vpop.f32.mrf.mxu0  ;;  %9336 = vmatprep.subr.bf16.mxu0 %v12264_v53  ;;  %v12307_v51 = vld [vmem:[%s13711_s9 + $0x1758] ss:$48 sps:$4 sm:$0xff]   ;;  %v12312_v47 = vld [vmem:[%s13711_s9 + $0x10fc] ss:$48 sps:$4 sm:$0xff]  }
 0x821   : > { %12798 = vpow2.f32 %v11203_v41  ;;  %v11204_v33 = vmul.f32 -1.442695, %v9082_v37  ;;  %v9084_v63 = vpop.f32.mrf.mxu1  ;;  %9377 = vmatprep.subr.bf16.mxu1 %v12267_v59  ;;  %v12315_v39 = vld [vmem:[%s13711_s9 + $0x16fc] ss:$48 sps:$4 sm:$0xff]   ;;  %v12310_v54 = vld [vmem:[%s13711_s9 + $0x10f8] ss:$48 sps:$4 sm:$0xff]  }
 0x822   : > { %v12313_v57 = vld [vmem:[%s13711_s9 + $0x16f8] ss:$48 sps:$4 sm:$0xff]   ;;  %v12318_v59 = vld [vmem:[%s13711_s9 + $0x109c] ss:$48 sps:$4 sm:$0xff]  }
 0x823   : > { %12800 = vpow2.f32 %v11204_v33  ;;  %9337 = vmatpush1.bf16.msra.mxu0 %v12262_v0  ;;  %v12321_v60 = vld [vmem:[%s13711_s9 + $0x169c] ss:$48 sps:$4 sm:$0xff]   ;;  %v12316_v41 = vld [vmem:[%s13711_s9 + $0x1098] ss:$48 sps:$4 sm:$0xff]  }
 0x824   : > { %9378 = vmatpush1.bf16.msra.mxu1 %v12265_v9  ;;  %9338 = vmatprep.subr.bf16.mxu0 %v12270_v15  ;;  %v12319_v37 = vld [vmem:[%s13711_s9 + $0x1698] ss:$48 sps:$4 sm:$0xff]   ;;  %v12324_v61 = vld [vmem:[%s13711_s9 + $0x103c] ss:$48 sps:$4 sm:$0xff]  }
 0x825   : > { %9379 = vmatprep.subr.bf16.mxu1 %v12273_v4  ;;  %v12327_v0 = vld [vmem:[%s13711_s9 + $0x163c] ss:$48 sps:$4 sm:$0xff]   ;;  %v12322_v30 = vld [vmem:[%s13711_s9 + $0x1038] ss:$48 sps:$4 sm:$0xff]  }
 0x826   : > { %v12325_v9 = vld [vmem:[%s13711_s9 + $0x1638] ss:$48 sps:$4 sm:$0xff]   ;;  %v12330_v15 = vld [vmem:[%s13711_s9 + $0xfdc] ss:$48 sps:$4 sm:$0xff]  }
 0x827   : > { %9339 = vmatpush1.bf16.msra.mxu0 %v12268_v38  ;;  %v12333_v33 = vld [vmem:[%s13711_s9 + $0x15dc] ss:$48 sps:$4 sm:$0xff]   ;;  %v12328_v63 = vld [vmem:[%s13711_s9 + $0xfd8] ss:$48 sps:$4 sm:$0xff]  }
 0x828   : > { %9380 = vmatpush1.bf16.msra.mxu1 %v12271_v7  ;;  %9340 = vmatprep.subr.bf16.mxu0 %v12276_v32  ;;  %v12331_v4 = vld [vmem:[%s13711_s9 + $0x15d8] ss:$48 sps:$4 sm:$0xff]   ;;  %v12336_v38 = vld [vmem:[%s13711_s9 + $0xf7c] ss:$48 sps:$4 sm:$0xff]  }
 0x829   : > { %9381 = vmatprep.subr.bf16.mxu1 %v12279_v14  ;;  %v12339_v7 = vld [vmem:[%s13711_s9 + $0x157c] ss:$48 sps:$4 sm:$0xff]   ;;  %v12334_v32 = vld [vmem:[%s13711_s9 + $0xf78] ss:$48 sps:$4 sm:$0xff]  }
 0x82a   : > { %v12337_v14 = vld [vmem:[%s13711_s9 + $0x1578] ss:$48 sps:$4 sm:$0xff]  }
 0x82b   : > { %9341 = vmatpush1.bf16.msra.mxu0 %v12274_v8  ;;  %v12342_v8 = vld [vmem:[%s13711_s9 + $0xf1c] ss:$48 sps:$4 sm:$0xff]  }
 0x82c   : > { %9382 = vmatpush1.bf16.msra.mxu1 %v12277_v42  ;;  %9342 = vmatprep.subr.bf16.mxu0 %v12282_v22  ;;  %v12345_v42 = vld [vmem:[%s13711_s9 + $0x151c] ss:$48 sps:$4 sm:$0xff]   ;;  %v12340_v22 = vld [vmem:[%s13711_s9 + $0xf18] ss:$48 sps:$4 sm:$0xff]  }
 0x82d   : > { %9383 = vmatprep.subr.bf16.mxu1 %v12285_v48  ;;  %v12343_v48 = vld [vmem:[%s13711_s9 + $0x1518] ss:$48 sps:$4 sm:$0xff]  }
 0x82e   : > { %v12799_v17 = vpop.eup %12798 }
 0x82f   : > { %v9780_v19 = vadd.f32 1.0, %v12799_v17  ;;  %9343 = vmatpush1.bf16.msra.mxu0 %v12280_v23  ;;  %v12348_v23 = vld [vmem:[%s13711_s9 + $0x2c4] ss:$48 sps:$4 sm:$0xff]  }
 0x830   : > { %v12801_v26 = vpop.eup %12800  ;;  %9384 = vmatpush1.bf16.msra.mxu1 %v12283_v31  ;;  %9344 = vmatprep.subr.bf16.mxu0 %v12288_v62  ;;  %v12351_v31 = vld [vmem:[%s13711_s9 + $0x8c4] ss:$48 sps:$4 sm:$0xff]   ;;  %v12346_v62 = vld [vmem:[%s13711_s9 + $0x2c0] ss:$48 sps:$4 sm:$0xff]  }
 0x831   : > { %12802 = vrcp.f32 %v9780_v19  ;;  %v9781_v28 = vadd.f32 1.0, %v12801_v26  ;;  %9385 = vmatprep.subr.bf16.mxu1 %v12291_v5  ;;  %v12349_v5 = vld [vmem:[%s13711_s9 + $0x8c0] ss:$48 sps:$4 sm:$0xff]   ;;  %v12354_v17 = vld [vmem:[%s13711_s9 + $0x264] ss:$48 sps:$4 sm:$0xff]  }
 0x833   : > { %12804 = vrcp.f32 %v9781_v28  ;;  %9345 = vmatpush1.bf16.msra.mxu0 %v12286_v11  ;;  %v12357_v11 = vld [vmem:[%s13711_s9 + $0x864] ss:$48 sps:$4 sm:$0xff]   ;;  %v12355_v28 = vld [vmem:[%s13711_s9 + $0x860] ss:$48 sps:$4 sm:$0xff]  }
 0x834   : > { %9386 = vmatpush1.bf16.msra.mxu1 %v12289_v24  ;;  %9346 = vmatprep.subr.bf16.mxu0 %v12294_v27  ;;  %v12352_v24 = vld [vmem:[%s13711_s9 + $0x260] ss:$48 sps:$4 sm:$0xff]  }
 0x835   : > { %9387 = vmatprep.subr.bf16.mxu1 %v12297_v46  ;;  %v12360_v46 = vld [vmem:[%s13711_s9 + $0x204] ss:$48 sps:$4 sm:$0xff]  }
 0x837   : > { %9347 = vmatpush1.bf16.msra.mxu0 %v12292_v29 }
 0x838   : > { %9388 = vmatpush1.bf16.msra.mxu1 %v12295_v55  ;;  %9348 = vmatprep.subr.bf16.mxu0 %v12300_v34  ;;  %v12363_v55 = vld [vmem:[%s13711_s9 + $0x804] ss:$48 sps:$4 sm:$0xff]  }
 0x839   : > { %9389 = vmatprep.subr.bf16.mxu1 %v12303_v35 }
 0x83b   : > { %9349 = vmatpush2.bf16.msra.mxu0 %v12298_v10  ;;  %v12358_v10 = vld [vmem:[%s13711_s9 + $0x200] ss:$48 sps:$4 sm:$0xff]  }
 0x83c   : > { %9390 = vmatpush2.bf16.msra.mxu1 %v12301_v1  ;;  %9350 = vmatprep.subr.bf16.mxu0 %v12306_v16  ;;  %v12361_v16 = vld [vmem:[%s13711_s9 + $0x800] ss:$48 sps:$4 sm:$0xff]  }
 0x83d   : > { %9391 = vmatprep.subr.bf16.mxu1 %v12309_v2  ;;  %v12366_v2 = vld [vmem:[%s13711_s9 + $0x1a4] ss:$48 sps:$4 sm:$0xff]  }
 0x83e   : > { %v12803_v53 = vpop.eup %12802 }
 0x83f   : > { %9816 = vst [vmem:[%s14395_s16 + $0x10] sm:$0xff] %v12803_v53  ;;  %9351 = vmatpush2.bf16.msra.mxu0 %v12304_v49  ;;  %v12372_v53 = vld [vmem:[%s13711_s9 + $0x144] ss:$48 sps:$4 sm:$0xff]  }
 0x840   : > { %v12805_v58 = vpop.eup %12804  ;;  %9392 = vmatpush2.bf16.msra.mxu1 %v12307_v51  ;;  %9352 = vmatprep.subr.bf16.mxu0 %v12312_v47  ;;  %v12369_v51 = vld [vmem:[%s13711_s9 + $0x7a4] ss:$48 sps:$4 sm:$0xff]   ;;  %v12364_v47 = vld [vmem:[%s13711_s9 + $0x1a0] ss:$48 sps:$4 sm:$0xff]  }
 0x841   : > { %9817 = vst [vmem:[%s14395_s16 + $0x18] sm:$0xff] %v12805_v58  ;;  %9393 = vmatprep.subr.bf16.mxu1 %v12315_v39  ;;  %v12367_v39 = vld [vmem:[%s13711_s9 + $0x7a0] ss:$48 sps:$4 sm:$0xff]  }
 0x842   : > { %v12370_v58 = vld [vmem:[%s13711_s9 + $0x140] ss:$48 sps:$4 sm:$0xff]  }
 0x843   : > { %9353 = vmatpush2.bf16.msra.mxu0 %v12310_v54  ;;  %v12375_v54 = vld [vmem:[%s13711_s9 + $0x744] ss:$48 sps:$4 sm:$0xff]  }
 0x844   : > { %9394 = vmatpush2.bf16.msra.mxu1 %v12313_v57  ;;  %9354 = vmatprep.subr.bf16.mxu0 %v12318_v59  ;;  %v12373_v57 = vld [vmem:[%s13711_s9 + $0x740] ss:$48 sps:$4 sm:$0xff]   ;;  %v12378_v59 = vld [vmem:[%s13711_s9 + $0xe4] ss:$48 sps:$4 sm:$0xff]  }
 0x845   : > { %9395 = vmatprep.subr.bf16.mxu1 %v12321_v60  ;;  %v12381_v60 = vld [vmem:[%s13711_s9 + $0x6e4] ss:$48 sps:$4 sm:$0xff]  }
 0x847   : > { %9355 = vmatpush2.bf16.msra.mxu0 %v12316_v41  ;;  %v12376_v41 = vld [vmem:[%s13711_s9 + $0xe0] ss:$48 sps:$4 sm:$0xff]  }
 0x848   : > { %9396 = vmatpush2.bf16.msra.mxu1 %v12319_v37  ;;  %9356 = vmatprep.subr.bf16.mxu0 %v12324_v61  ;;  %v12379_v37 = vld [vmem:[%s13711_s9 + $0x6e0] ss:$48 sps:$4 sm:$0xff]   ;;  %v12384_v61 = vld [vmem:[%s13711_s9 + $0x84] ss:$48 sps:$4 sm:$0xff]  }
 0x849   : > { %9397 = vmatprep.subr.bf16.mxu1 %v12327_v0  ;;  %v12387_v0 = vld [vmem:[%s13711_s9 + $0x684] ss:$48 sps:$4 sm:$0xff]  }
 0x84b   : > { %9357 = vmatpush2.bf16.msra.mxu0 %v12322_v30  ;;  %v12382_v30 = vld [vmem:[%s13711_s9 + $0x80] ss:$48 sps:$4 sm:$0xff]  }
 0x84c   : > { %9398 = vmatpush2.bf16.msra.mxu1 %v12325_v9  ;;  %9358 = vmatprep.subr.bf16.mxu0 %v12330_v15  ;;  %v12385_v9 = vld [vmem:[%s13711_s9 + $0x680] ss:$48 sps:$4 sm:$0xff]   ;;  %v12390_v15 = vld [vmem:[%s13711_s9 + $0x24] ss:$48 sps:$4 sm:$0xff]  }
 0x84d   : > { %9399 = vmatprep.subr.bf16.mxu1 %v12333_v33  ;;  %v12393_v33 = vld [vmem:[%s13711_s9 + $0x624] ss:$48 sps:$4 sm:$0xff]  }
 0x84f   : > { %9359 = vmatpush2.bf16.msra.mxu0 %v12328_v63  ;;  %v12388_v63 = vld [vmem:[%s13711_s9 + $0x20] ss:$48 sps:$4 sm:$0xff]  }
 0x850   : > { %9400 = vmatpush2.bf16.msra.mxu1 %v12331_v4  ;;  %9360 = vmatprep.subr.bf16.mxu0 %v12336_v38  ;;  %v12391_v4 = vld [vmem:[%s13711_s9 + $0x620] ss:$48 sps:$4 sm:$0xff]   ;;  %v12396_v38 = vld [vmem:[%s13711_s9 + $0x5c4] ss:$48 sps:$4 sm:$0xff]  }
 0x851   : > { %9401 = vmatprep.subr.bf16.mxu1 %v12339_v7  ;;  %v12399_v7 = vld [vmem:[%s13711_s9 + $0xbc4] ss:$48 sps:$4 sm:$0xff]  }
 0x853   : > { %9361 = vmatpush2.bf16.msra.mxu0 %v12334_v32  ;;  %v12394_v32 = vld [vmem:[%s13711_s9 + $0x5c0] ss:$48 sps:$4 sm:$0xff]  }
 0x854   : > { %9402 = vmatpush2.bf16.msra.mxu1 %v12337_v14  ;;  %9362 = vmatprep.subr.bf16.mxu0 %v12342_v8  ;;  %v12397_v14 = vld [vmem:[%s13711_s9 + $0xbc0] ss:$48 sps:$4 sm:$0xff]   ;;  %v12402_v8 = vld [vmem:[%s13711_s9 + $0x564] ss:$48 sps:$4 sm:$0xff]  }
 0x855   : > { %9403 = vmatprep.subr.bf16.mxu1 %v12345_v42  ;;  %v12405_v42 = vld [vmem:[%s13711_s9 + $0xb64] ss:$48 sps:$4 sm:$0xff]  }
 0x857   : > { %9363 = vmatpush2.bf16.msra.mxu0 %v12340_v22  ;;  %v12400_v22 = vld [vmem:[%s13711_s9 + $0x560] ss:$48 sps:$4 sm:$0xff]  }
 0x858   : > { %9404 = vmatpush2.bf16.msra.mxu1 %v12343_v48  ;;  %9414 = vmatprep.subr.bf16.mxu0 %v12348_v23  ;;  %v12403_v48 = vld [vmem:[%s13711_s9 + $0xb60] ss:$48 sps:$4 sm:$0xff]   ;;  %v12408_v23 = vld [vmem:[%s13711_s9 + $0x504] ss:$48 sps:$4 sm:$0xff]  }
 0x859   : > { %9455 = vmatprep.subr.bf16.mxu1 %v12351_v31  ;;  %v12411_v31 = vld [vmem:[%s13711_s9 + $0xb04] ss:$48 sps:$4 sm:$0xff]  }
 0x85a   : > { %v14580_v19 = vpop.f32.mrf.mxu0  ;;  %9365 = vmatmul.mubr.bf16.vlgmr.msra.gmra.mxu0 %v14121_v36 }
 0x85b   : > { %v14584_v26 = vpop.f32.mrf.mxu1  ;;  %9406 = vmatmul.mubr.bf16.vlgmr.msra.gmra.mxu1 %v14124_v50  ;;  %9415 = vmatpush1.bf16.msra.mxu0 %v12346_v62  ;;  %v12406_v62 = vld [vmem:[%s13711_s9 + $0x500] ss:$48 sps:$4 sm:$0xff]  }
 0x85c   : > { %9446 = vmatprep.mubr.bf16.mxu0 %v14034_v45  ;;  %9456 = vmatpush1.bf16.msra.mxu1 %v12349_v5  ;;  %v14589_v27 = vpop.f32.mrf.mxu0  ;;  %v12409_v5 = vld [vmem:[%s13711_s9 + $0xb00] ss:$48 sps:$4 sm:$0xff]  }
 0x85d   : > { %9487 = vmatprep.mubr.bf16.mxu1 %v14036_v3  ;;  %v14594_v29 = vpop.f32.mrf.mxu1  ;;  %9416 = vmatprep.subr.bf16.mxu0 %v12354_v17  ;;  %v12414_v17 = vld [vmem:[%s13711_s9 + $0x4a4] ss:$48 sps:$4 sm:$0xff]  }
 0x85e   : > { %v9124_v34 = vpop.f32.mrf.mxu0  ;;  %9457 = vmatprep.subr.bf16.mxu1 %v12357_v11  ;;  %v12417_v11 = vld [vmem:[%s13711_s9 + $0xaa4] ss:$48 sps:$4 sm:$0xff]  }
 0x85f   : > { %v9165_v35 = vpop.f32.mrf.mxu1  ;;  %9417 = vmatpush1.bf16.msra.mxu0 %v12352_v24  ;;  %v12412_v24 = vld [vmem:[%s13711_s9 + $0x4a0] ss:$48 sps:$4 sm:$0xff]  }
 0x860   : > { %9458 = vmatpush1.bf16.msra.mxu1 %v12355_v28  ;;  %v9125_v1 = vpop.f32.mrf.mxu0  ;;  %9418 = vmatprep.subr.bf16.mxu0 %v12360_v46  ;;  %v12415_v28 = vld [vmem:[%s13711_s9 + $0xaa0] ss:$48 sps:$4 sm:$0xff]   ;;  %v12420_v46 = vld [vmem:[%s13711_s9 + $0x444] ss:$48 sps:$4 sm:$0xff]  }
 0x861   : > { %v9166_v49 = vpop.f32.mrf.mxu1  ;;  %9459 = vmatprep.subr.bf16.mxu1 %v12363_v55  ;;  %v12423_v55 = vld [vmem:[%s13711_s9 + $0xa44] ss:$48 sps:$4 sm:$0xff]   ;;  %v12418_v34 = vld [vmem:[%s13711_s9 + $0x440] ss:$48 sps:$4 sm:$0xff]  }
 0x862   : > { %v12421_v35 = vld [vmem:[%s13711_s9 + $0xa40] ss:$48 sps:$4 sm:$0xff]   ;;  %v12429_v1 = vld [vmem:[%s13711_s9 + $0x9e4] ss:$48 sps:$4 sm:$0xff]  }
 0x863   : > { %9419 = vmatpush1.bf16.msra.mxu0 %v12358_v10  ;;  %v12426_v10 = vld [vmem:[%s13711_s9 + $0x3e4] ss:$48 sps:$4 sm:$0xff]  }
 0x864   : > { %9460 = vmatpush1.bf16.msra.mxu1 %v12361_v16  ;;  %9420 = vmatprep.subr.bf16.mxu0 %v12366_v2  ;;  %v12424_v16 = vld [vmem:[%s13711_s9 + $0x3e0] ss:$48 sps:$4 sm:$0xff]   ;;  %v12432_v49 = vld [vmem:[%s13711_s9 + $0x384] ss:$48 sps:$4 sm:$0xff]  }
 0x865   : > { %9461 = vmatprep.subr.bf16.mxu1 %v12369_v51  ;;  %v12427_v2 = vld [vmem:[%s13711_s9 + $0x9e0] ss:$48 sps:$4 sm:$0xff]   ;;  %v12435_v51 = vld [vmem:[%s13711_s9 + $0x984] ss:$48 sps:$4 sm:$0xff]  }
 0x867   : > { %9421 = vmatpush1.bf16.msra.mxu0 %v12364_v47  ;;  %v12430_v47 = vld [vmem:[%s13711_s9 + $0x380] ss:$48 sps:$4 sm:$0xff]  }
 0x868   : > { %9462 = vmatpush1.bf16.msra.mxu1 %v12367_v39  ;;  %9422 = vmatprep.subr.bf16.mxu0 %v12372_v53  ;;  %v12433_v39 = vld [vmem:[%s13711_s9 + $0x980] ss:$48 sps:$4 sm:$0xff]   ;;  %v12438_v53 = vld [vmem:[%s13711_s9 + $0x324] ss:$48 sps:$4 sm:$0xff]  }
 0x869   : > { %9463 = vmatprep.subr.bf16.mxu1 %v12375_v54  ;;  %v14649_v54 = vld [vmem:[%s14329_s23] sm:$0xff] }
 0x86b   : > { %9423 = vmatpush1.bf16.msra.mxu0 %v12370_v58  ;;  %v4877_v58 = vrot.slane %v14649_v54, %v13981_v13 }
 0x86c   : > { %9464 = vmatpush1.bf16.msra.mxu1 %v12373_v57  ;;  %9424 = vmatprep.subr.bf16.mxu0 %v12378_v59  ;;  %v12441_v57 = vld [vmem:[%s13711_s9 + $0x924] ss:$48 sps:$4 sm:$0xff]   ;;  %v4881_v59 = vrot.slane %v14649_v54, %v13984_v40  ;;  %v12445_v40 = vld [vmem:[%s13711_s9 + $0x14c0] ss:$48 sps:$4 sm:$0xff]  }
 0x86d   : > { %9465 = vmatprep.subr.bf16.mxu1 %v12381_v60  ;;  %v12436_v60 = vld [vmem:[%s13711_s9 + $0x320] ss:$48 sps:$4 sm:$0xff]  }
 0x86e   : > { %v9123_v13 = vadd.f32 %v14589_v27, %v4881_v59  ;;  %v12478_v59 = vld [vmem:[%s13711_s9 + $0xc80] ss:$48 sps:$4 sm:$0xff]  }
 0x86f   : > { %9425 = vmatpush1.bf16.msra.mxu0 %v12376_v41  ;;  %v12439_v41 = vld [vmem:[%s13711_s9 + $0x920] ss:$48 sps:$4 sm:$0xff]  }
 0x870   : > { %9466 = vmatpush1.bf16.msra.mxu1 %v12379_v37  ;;  %9426 = vmatprep.subr.bf16.mxu0 %v12384_v61  ;;  %v12444_v37 = vld [vmem:[%s13711_s9 + $0xec4] ss:$48 sps:$4 sm:$0xff]   ;;  %v9121_v61 = vadd.f32 %v14580_v19, %v4877_v58 }
 0x871   : > { %9467 = vmatprep.subr.bf16.mxu1 %v12387_v0  ;;  %v12447_v0 = vld [vmem:[%s13711_s9 + $0x14c4] ss:$48 sps:$4 sm:$0xff]  }
 0x872   : > { %v12453_v19 = vld [vmem:[%s13711_s9 + $0x1464] ss:$48 sps:$4 sm:$0xff]  }
 0x873   : > { %9427 = vmatpush1.bf16.msra.mxu0 %v12382_v30  ;;  %v12442_v30 = vld [vmem:[%s13711_s9 + $0xec0] ss:$48 sps:$4 sm:$0xff]  }
 0x874   : > { %9468 = vmatpush1.bf16.msra.mxu1 %v12385_v9  ;;  %9428 = vmatprep.subr.bf16.mxu0 %v12390_v15  ;;  %v9162_v9 = vadd.f32 %v14584_v26, %v9121_v61  ;;  %v12450_v15 = vld [vmem:[%s13711_s9 + $0xe64] ss:$48 sps:$4 sm:$0xff]  }
 0x875   : > { %9469 = vmatprep.subr.bf16.mxu1 %v12393_v33 }
 0x877   : > { %9429 = vmatpush1.bf16.msra.mxu0 %v12388_v63  ;;  %v9164_v63 = vadd.f32 %v14594_v29, %v9123_v13  ;;  %v12484_v13 = vld [vmem:[%s13711_s9 + $0xc20] ss:$48 sps:$4 sm:$0xff]  }
 0x878   : > { %9470 = vmatpush1.bf16.msra.mxu1 %v12391_v4  ;;  %9430 = vmatprep.subr.bf16.mxu0 %v12396_v38  ;;  %v12448_v38 = vld [vmem:[%s13711_s9 + $0xe60] ss:$48 sps:$4 sm:$0xff]  }
 0x879   : > { %9471 = vmatprep.subr.bf16.mxu1 %v12399_v7  ;;  %v12451_v7 = vld [vmem:[%s13711_s9 + $0x1460] ss:$48 sps:$4 sm:$0xff]  }
 0x87b   : > { %9431 = vmatpush2.bf16.msra.mxu0 %v12394_v32  ;;  %v12456_v32 = vld [vmem:[%s13711_s9 + $0xe04] ss:$48 sps:$4 sm:$0xff]  }
 0x87c   : > { %9472 = vmatpush2.bf16.msra.mxu1 %v12397_v14  ;;  %9432 = vmatprep.subr.bf16.mxu0 %v12402_v8 }
 0x87d   : > { %9473 = vmatprep.subr.bf16.mxu1 %v12405_v42  ;;  %v12459_v42 = vld [vmem:[%s13711_s9 + $0x1404] ss:$48 sps:$4 sm:$0xff]  }
 0x87f   : > { %9433 = vmatpush2.bf16.msra.mxu0 %v12400_v22 }
 0x880   : > { %9474 = vmatpush2.bf16.msra.mxu1 %v12403_v48  ;;  %9434 = vmatprep.subr.bf16.mxu0 %v12408_v23 }
 0x881   : > { %9475 = vmatprep.subr.bf16.mxu1 %v12411_v31 }
 0x883   : > { %9435 = vmatpush2.bf16.msra.mxu0 %v12406_v62  ;;  %v12454_v62 = vld [vmem:[%s13711_s9 + $0xe00] ss:$48 sps:$4 sm:$0xff]  }
 0x884   : > { %9476 = vmatpush2.bf16.msra.mxu1 %v12409_v5  ;;  %9436 = vmatprep.subr.bf16.mxu0 %v12414_v17  ;;  %v12457_v17 = vld [vmem:[%s13711_s9 + $0x1400] ss:$48 sps:$4 sm:$0xff]  }
 0x885   : > { %9477 = vmatprep.subr.bf16.mxu1 %v12417_v11  ;;  %v12462_v11 = vld [vmem:[%s13711_s9 + $0xda4] ss:$48 sps:$4 sm:$0xff]  }
 0x887   : > { %9437 = vmatpush2.bf16.msra.mxu0 %v12412_v24 }
 0x888   : > { %9478 = vmatpush2.bf16.msra.mxu1 %v12415_v28  ;;  %9438 = vmatprep.subr.bf16.mxu0 %v12420_v46  ;;  %v12465_v46 = vld [vmem:[%s13711_s9 + $0x13a4] ss:$48 sps:$4 sm:$0xff]  }
 0x889   : > { %9479 = vmatprep.subr.bf16.mxu1 %v12423_v55  ;;  %v12460_v55 = vld [vmem:[%s13711_s9 + $0xda0] ss:$48 sps:$4 sm:$0xff]  }
 0x88b   : > { %9439 = vmatpush2.bf16.msra.mxu0 %v12418_v34  ;;  %v12463_v34 = vld [vmem:[%s13711_s9 + $0x13a0] ss:$48 sps:$4 sm:$0xff]  }
 0x88c   : > { %9480 = vmatpush2.bf16.msra.mxu1 %v12421_v35  ;;  %9440 = vmatprep.subr.bf16.mxu0 %v12426_v10  ;;  %v12468_v35 = vld [vmem:[%s13711_s9 + $0xd44] ss:$48 sps:$4 sm:$0xff]  }
 0x88d   : > { %9481 = vmatprep.subr.bf16.mxu1 %v12429_v1  ;;  %v12471_v10 = vld [vmem:[%s13711_s9 + $0x1344] ss:$48 sps:$4 sm:$0xff]   ;;  %v12466_v1 = vld [vmem:[%s13711_s9 + $0xd40] ss:$48 sps:$4 sm:$0xff]  }
 0x88f   : > { %9441 = vmatpush2.bf16.msra.mxu0 %v12424_v16  ;;  %v12469_v16 = vld [vmem:[%s13711_s9 + $0x1340] ss:$48 sps:$4 sm:$0xff]  }
 0x890   : > { %9482 = vmatpush2.bf16.msra.mxu1 %v12427_v2  ;;  %9442 = vmatprep.subr.bf16.mxu0 %v12432_v49  ;;  %v12474_v2 = vld [vmem:[%s13711_s9 + $0xce4] ss:$48 sps:$4 sm:$0xff]  }
 0x891   : > { %9483 = vmatprep.subr.bf16.mxu1 %v12435_v51  ;;  %v12477_v49 = vld [vmem:[%s13711_s9 + $0x12e4] ss:$48 sps:$4 sm:$0xff]   ;;  %v12472_v51 = vld [vmem:[%s13711_s9 + $0xce0] ss:$48 sps:$4 sm:$0xff]  }
 0x893   : > { %9443 = vmatpush2.bf16.msra.mxu0 %v12430_v47  ;;  %v12475_v47 = vld [vmem:[%s13711_s9 + $0x12e0] ss:$48 sps:$4 sm:$0xff]  }
 0x894   : > { %9484 = vmatpush2.bf16.msra.mxu1 %v12433_v39  ;;  %9444 = vmatprep.subr.bf16.mxu0 %v12438_v53  ;;  %v12480_v39 = vld [vmem:[%s13711_s9 + $0xc84] ss:$48 sps:$4 sm:$0xff]  }
 0x895   : > { %9485 = vmatprep.subr.bf16.mxu1 %v12441_v57  ;;  %v12483_v53 = vld [vmem:[%s13711_s9 + $0x1284] ss:$48 sps:$4 sm:$0xff]  }
 0x897   : > { %9445 = vmatpush2.bf16.msra.mxu0 %v12436_v60 }
 0x898   : > { %9486 = vmatpush2.bf16.msra.mxu1 %v12439_v41  ;;  %9496 = vmatprep.subr.bf16.mxu0 %v12444_v37  ;;  %v12481_v41 = vld [vmem:[%s13711_s9 + $0x1280] ss:$48 sps:$4 sm:$0xff]   ;;  %v12486_v37 = vld [vmem:[%s13711_s9 + $0xc24] ss:$48 sps:$4 sm:$0xff]  }
 0x899   : > { %9537 = vmatprep.subr.bf16.mxu1 %v12447_v0  ;;  %v12489_v0 = vld [vmem:[%s13711_s9 + $0x1224] ss:$48 sps:$4 sm:$0xff]  }
 0x89a   : > { %v9202_v33 = vpop.f32.mrf.mxu0  ;;  %9447 = vmatmul.mubr.bf16.vlgmr.msra.gmra.mxu0 %v14041_v12 }
 0x89b   : > { %v9203_v27 = vadd.f32 %v9202_v33, %v9162_v9  ;;  %v9243_v4 = vpop.f32.mrf.mxu1  ;;  %9488 = vmatmul.mubr.bf16.vlgmr.msra.gmra.mxu1 %v14044_v18  ;;  %9497 = vmatpush1.bf16.msra.mxu0 %v12442_v30  ;;  %v12487_v30 = vld [vmem:[%s13711_s9 + $0x1220] ss:$48 sps:$4 sm:$0xff]   ;;  %v12495_v9 = vld [vmem:[%s13711_s9 + $0x17c4] ss:$48 sps:$4 sm:$0xff]  }
 0x89c   : > { %9528 = vmatprep.mubr.bf16.mxu0 %v14048_v21  ;;  %9538 = vmatpush1.bf16.msra.mxu1 %v12445_v40  ;;  %v9204_v26 = vpop.f32.mrf.mxu0  ;;  %v12492_v40 = vld [vmem:[%s13711_s9 + $0x11c4] ss:$48 sps:$4 sm:$0xff]   ;;  %v12493_v33 = vld [vmem:[%s13711_s9 + $0x17c0] ss:$48 sps:$4 sm:$0xff]  }
 0x89d   : > { %v9244_v14 = vadd.f32 %v9243_v4, %v9203_v27  ;;  %9569 = vmatprep.mubr.bf16.mxu1 %v14051_v25  ;;  %v9205_v29 = vadd.f32 %v9204_v26, %v9164_v63  ;;  %v9245_v8 = vpop.f32.mrf.mxu1  ;;  %9498 = vmatprep.subr.bf16.mxu0 %v12450_v15  ;;  %v12490_v15 = vld [vmem:[%s13711_s9 + $0x11c0] ss:$48 sps:$4 sm:$0xff]   ;;  %v12501_v63 = vld [vmem:[%s13711_s9 + $0x1764] ss:$48 sps:$4 sm:$0xff]  }
 0x89e   : > { %v9206_v22 = vpop.f32.mrf.mxu0  ;;  %9539 = vmatprep.subr.bf16.mxu1 %v12453_v19  ;;  %v12498_v19 = vld [vmem:[%s13711_s9 + $0x1164] ss:$48 sps:$4 sm:$0xff]   ;;  %v12496_v27 = vld [vmem:[%s13711_s9 + $0x1160] ss:$48 sps:$4 sm:$0xff]  }
 0x89f   : > { %v11205_v48 = vmul.f32 -1.442695, %v9244_v14  ;;  %v9246_v23 = vadd.f32 %v9245_v8, %v9205_v29  ;;  %v9247_v31 = vpop.f32.mrf.mxu1  ;;  %9499 = vmatpush1.bf16.msra.mxu0 %v12448_v38  ;;  %v12499_v4 = vld [vmem:[%s13711_s9 + $0x1760] ss:$48 sps:$4 sm:$0xff]   ;;  %v12504_v38 = vld [vmem:[%s13711_s9 + $0x1104] ss:$48 sps:$4 sm:$0xff]  }
 0x8a0   : > { %9540 = vmatpush1.bf16.msra.mxu1 %v12451_v7  ;;  %v9207_v5 = vpop.f32.mrf.mxu0  ;;  %9500 = vmatprep.subr.bf16.mxu0 %v12456_v32  ;;  %v12507_v26 = vld [vmem:[%s13711_s9 + $0x1704] ss:$48 sps:$4 sm:$0xff]   ;;  %v12502_v32 = vld [vmem:[%s13711_s9 + $0x1100] ss:$48 sps:$4 sm:$0xff]  }
 0x8a1   : > { %12806 = vpow2.f32 %v11205_v48  ;;  %v11206_v24 = vmul.f32 -1.442695, %v9246_v23  ;;  %v9248_v28 = vpop.f32.mrf.mxu1  ;;  %9541 = vmatprep.subr.bf16.mxu1 %v12459_v42  ;;  %v12505_v29 = vld [vmem:[%s13711_s9 + $0x1700] ss:$48 sps:$4 sm:$0xff]   ;;  %v12510_v8 = vld [vmem:[%s13711_s9 + $0x10a4] ss:$48 sps:$4 sm:$0xff]  }
 0x8a2   : > { %v12513_v42 = vld [vmem:[%s13711_s9 + $0x16a4] ss:$48 sps:$4 sm:$0xff]   ;;  %v12508_v22 = vld [vmem:[%s13711_s9 + $0x10a0] ss:$48 sps:$4 sm:$0xff]  }
 0x8a3   : > { %12808 = vpow2.f32 %v11206_v24  ;;  %9501 = vmatpush1.bf16.msra.mxu0 %v12454_v62  ;;  %v12511_v48 = vld [vmem:[%s13711_s9 + $0x16a0] ss:$48 sps:$4 sm:$0xff]   ;;  %v12516_v23 = vld [vmem:[%s13711_s9 + $0x1044] ss:$48 sps:$4 sm:$0xff]  }
 0x8a4   : > { %9542 = vmatpush1.bf16.msra.mxu1 %v12457_v17  ;;  %9502 = vmatprep.subr.bf16.mxu0 %v12462_v11  ;;  %v12519_v31 = vld [vmem:[%s13711_s9 + $0x1644] ss:$48 sps:$4 sm:$0xff]   ;;  %v12514_v62 = vld [vmem:[%s13711_s9 + $0x1040] ss:$48 sps:$4 sm:$0xff]  }
 0x8a5   : > { %9543 = vmatprep.subr.bf16.mxu1 %v12465_v46  ;;  %v12517_v5 = vld [vmem:[%s13711_s9 + $0x1640] ss:$48 sps:$4 sm:$0xff]   ;;  %v12522_v17 = vld [vmem:[%s13711_s9 + $0xfe4] ss:$48 sps:$4 sm:$0xff]  }
 0x8a6   : > { %v12525_v11 = vld [vmem:[%s13711_s9 + $0x15e4] ss:$48 sps:$4 sm:$0xff]   ;;  %v12520_v24 = vld [vmem:[%s13711_s9 + $0xfe0] ss:$48 sps:$4 sm:$0xff]  }
 0x8a7   : > { %9503 = vmatpush1.bf16.msra.mxu0 %v12460_v55  ;;  %v12523_v28 = vld [vmem:[%s13711_s9 + $0x15e0] ss:$48 sps:$4 sm:$0xff]   ;;  %v12528_v46 = vld [vmem:[%s13711_s9 + $0xf84] ss:$48 sps:$4 sm:$0xff]  }
 0x8a8   : > { %9544 = vmatpush1.bf16.msra.mxu1 %v12463_v34  ;;  %9504 = vmatprep.subr.bf16.mxu0 %v12468_v35  ;;  %v12531_v55 = vld [vmem:[%s13711_s9 + $0x1584] ss:$48 sps:$4 sm:$0xff]   ;;  %v12526_v34 = vld [vmem:[%s13711_s9 + $0xf80] ss:$48 sps:$4 sm:$0xff]  }
 0x8a9   : > { %9545 = vmatprep.subr.bf16.mxu1 %v12471_v10  ;;  %v12529_v35 = vld [vmem:[%s13711_s9 + $0x1580] ss:$48 sps:$4 sm:$0xff]   ;;  %v12534_v10 = vld [vmem:[%s13711_s9 + $0xf24] ss:$48 sps:$4 sm:$0xff]  }
 0x8ab   : > { %9505 = vmatpush1.bf16.msra.mxu0 %v12466_v1  ;;  %v12537_v1 = vld [vmem:[%s13711_s9 + $0x1524] ss:$48 sps:$4 sm:$0xff]  }
 0x8ac   : > { %9546 = vmatpush1.bf16.msra.mxu1 %v12469_v16  ;;  %9506 = vmatprep.subr.bf16.mxu0 %v12474_v2  ;;  %v12532_v16 = vld [vmem:[%s13711_s9 + $0xf20] ss:$48 sps:$4 sm:$0xff]  }
 0x8ad   : > { %9547 = vmatprep.subr.bf16.mxu1 %v12477_v49  ;;  %v12535_v2 = vld [vmem:[%s13711_s9 + $0x1520] ss:$48 sps:$4 sm:$0xff]   ;;  %v12540_v49 = vld [vmem:[%s13711_s9 + $0x2cc] ss:$48 sps:$4 sm:$0xff]  }
 0x8ae   : > { %v12807_v58 = vpop.eup %12806 }
 0x8af   : > { %v9782_v57 = vadd.f32 1.0, %v12807_v58  ;;  %9507 = vmatpush1.bf16.msra.mxu0 %v12472_v51  ;;  %v12543_v51 = vld [vmem:[%s13711_s9 + $0x8cc] ss:$48 sps:$4 sm:$0xff]  }
 0x8b0   : > { %v12809_v60 = vpop.eup %12808  ;;  %9548 = vmatpush1.bf16.msra.mxu1 %v12475_v47  ;;  %9508 = vmatprep.subr.bf16.mxu0 %v12480_v39  ;;  %v12538_v47 = vld [vmem:[%s13711_s9 + $0x2c8] ss:$48 sps:$4 sm:$0xff]  }
 0x8b1   : > { %12810 = vrcp.f32 %v9782_v57  ;;  %v9783_v61 = vadd.f32 1.0, %v12809_v60  ;;  %9549 = vmatprep.subr.bf16.mxu1 %v12483_v53  ;;  %v12541_v39 = vld [vmem:[%s13711_s9 + $0x8c8] ss:$48 sps:$4 sm:$0xff]   ;;  %v12546_v53 = vld [vmem:[%s13711_s9 + $0x26c] ss:$48 sps:$4 sm:$0xff]  }
 0x8b2   : > { %v12549_v57 = vld [vmem:[%s13711_s9 + $0x86c] ss:$48 sps:$4 sm:$0xff]   ;;  %v12544_v60 = vld [vmem:[%s13711_s9 + $0x268] ss:$48 sps:$4 sm:$0xff]  }
 0x8b3   : > { %12812 = vrcp.f32 %v9783_v61  ;;  %9509 = vmatpush1.bf16.msra.mxu0 %v12478_v59  ;;  %v12552_v61 = vld [vmem:[%s13711_s9 + $0x20c] ss:$48 sps:$4 sm:$0xff]  }
 0x8b4   : > { %9550 = vmatpush1.bf16.msra.mxu1 %v12481_v41  ;;  %9510 = vmatprep.subr.bf16.mxu0 %v12486_v37  ;;  %v12547_v37 = vld [vmem:[%s13711_s9 + $0x868] ss:$48 sps:$4 sm:$0xff]  }
 0x8b5   : > { %9551 = vmatprep.subr.bf16.mxu1 %v12489_v0 }
 0x8b7   : > { %9511 = vmatpush1.bf16.msra.mxu0 %v12484_v13  ;;  %v12555_v13 = vld [vmem:[%s13711_s9 + $0x80c] ss:$48 sps:$4 sm:$0xff]  }
 0x8b8   : > { %9552 = vmatpush1.bf16.msra.mxu1 %v12487_v30  ;;  %9512 = vmatprep.subr.bf16.mxu0 %v12492_v40 }
 0x8b9   : > { %9553 = vmatprep.subr.bf16.mxu1 %v12495_v9 }
 0x8bb   : > { %9513 = vmatpush2.bf16.msra.mxu0 %v12490_v15  ;;  %v12553_v15 = vld [vmem:[%s13711_s9 + $0x808] ss:$48 sps:$4 sm:$0xff]  }
 0x8bc   : > { %9554 = vmatpush2.bf16.msra.mxu1 %v12493_v33  ;;  %9514 = vmatprep.subr.bf16.mxu0 %v12498_v19  ;;  %v12561_v19 = vld [vmem:[%s13711_s9 + $0x7ac] ss:$48 sps:$4 sm:$0xff]  }
 0x8bd   : > { %9555 = vmatprep.subr.bf16.mxu1 %v12501_v63  ;;  %v12556_v63 = vld [vmem:[%s13711_s9 + $0x1a8] ss:$48 sps:$4 sm:$0xff]  }
 0x8be   : > { %v12811_v7 = vpop.eup %12810 }
 0x8bf   : > { %9818 = vst [vmem:[%s14395_s16 + $0x20] sm:$0xff] %v12811_v7  ;;  %9515 = vmatpush2.bf16.msra.mxu0 %v12496_v27  ;;  %v12559_v27 = vld [vmem:[%s13711_s9 + $0x7a8] ss:$48 sps:$4 sm:$0xff]  }
 0x8c0   : > { %v12813_v14 = vpop.eup %12812  ;;  %9556 = vmatpush2.bf16.msra.mxu1 %v12499_v4  ;;  %9516 = vmatprep.subr.bf16.mxu0 %v12504_v38  ;;  %v12564_v4 = vld [vmem:[%s13711_s9 + $0x14c] ss:$48 sps:$4 sm:$0xff]   ;;  %v12565_v7 = vld [vmem:[%s13711_s9 + $0x748] ss:$48 sps:$4 sm:$0xff]  }
 0x8c1   : > { %9819 = vst [vmem:[%s14395_s16 + $0x28] sm:$0xff] %v12813_v14  ;;  %9557 = vmatprep.subr.bf16.mxu1 %v12507_v26  ;;  %v12567_v38 = vld [vmem:[%s13711_s9 + $0x74c] ss:$48 sps:$4 sm:$0xff]   ;;  %v12562_v26 = vld [vmem:[%s13711_s9 + $0x148] ss:$48 sps:$4 sm:$0xff]  }
 0x8c2   : > { %v12573_v14 = vld [vmem:[%s13711_s9 + $0x6ec] ss:$48 sps:$4 sm:$0xff]  }
 0x8c3   : > { %9517 = vmatpush2.bf16.msra.mxu0 %v12502_v32  ;;  %v12570_v32 = vld [vmem:[%s13711_s9 + $0xec] ss:$48 sps:$4 sm:$0xff]  }
 0x8c4   : > { %9558 = vmatpush2.bf16.msra.mxu1 %v12505_v29  ;;  %9518 = vmatprep.subr.bf16.mxu0 %v12510_v8  ;;  %v12568_v29 = vld [vmem:[%s13711_s9 + $0xe8] ss:$48 sps:$4 sm:$0xff]  }
 0x8c5   : > { %9559 = vmatprep.subr.bf16.mxu1 %v12513_v42  ;;  %v12571_v8 = vld [vmem:[%s13711_s9 + $0x6e8] ss:$48 sps:$4 sm:$0xff]   ;;  %v12576_v42 = vld [vmem:[%s13711_s9 + $0x8c] ss:$48 sps:$4 sm:$0xff]  }
 0x8c7   : > { %9519 = vmatpush2.bf16.msra.mxu0 %v12508_v22  ;;  %v12579_v22 = vld [vmem:[%s13711_s9 + $0x68c] ss:$48 sps:$4 sm:$0xff]  }
 0x8c8   : > { %9560 = vmatpush2.bf16.msra.mxu1 %v12511_v48  ;;  %9520 = vmatprep.subr.bf16.mxu0 %v12516_v23  ;;  %v12574_v48 = vld [vmem:[%s13711_s9 + $0x88] ss:$48 sps:$4 sm:$0xff]  }
 0x8c9   : > { %9561 = vmatprep.subr.bf16.mxu1 %v12519_v31  ;;  %v12577_v23 = vld [vmem:[%s13711_s9 + $0x688] ss:$48 sps:$4 sm:$0xff]   ;;  %v12582_v31 = vld [vmem:[%s13711_s9 + $0x2c] ss:$48 sps:$4 sm:$0xff]  }
 0x8cb   : > { %9521 = vmatpush2.bf16.msra.mxu0 %v12514_v62  ;;  %v12585_v62 = vld [vmem:[%s13711_s9 + $0x62c] ss:$48 sps:$4 sm:$0xff]  }
 0x8cc   : > { %9562 = vmatpush2.bf16.msra.mxu1 %v12517_v5  ;;  %9522 = vmatprep.subr.bf16.mxu0 %v12522_v17  ;;  %v12580_v5 = vld [vmem:[%s13711_s9 + $0x28] ss:$48 sps:$4 sm:$0xff]  }
 0x8cd   : > { %9563 = vmatprep.subr.bf16.mxu1 %v12525_v11  ;;  %v12583_v17 = vld [vmem:[%s13711_s9 + $0x628] ss:$48 sps:$4 sm:$0xff]   ;;  %v12588_v11 = vld [vmem:[%s13711_s9 + $0x5cc] ss:$48 sps:$4 sm:$0xff]  }
 0x8cf   : > { %9523 = vmatpush2.bf16.msra.mxu0 %v12520_v24  ;;  %v12591_v24 = vld [vmem:[%s13711_s9 + $0xbcc] ss:$48 sps:$4 sm:$0xff]  }
 0x8d0   : > { %9564 = vmatpush2.bf16.msra.mxu1 %v12523_v28  ;;  %9524 = vmatprep.subr.bf16.mxu0 %v12528_v46  ;;  %v12586_v28 = vld [vmem:[%s13711_s9 + $0x5c8] ss:$48 sps:$4 sm:$0xff]  }
 0x8d1   : > { %9565 = vmatprep.subr.bf16.mxu1 %v12531_v55  ;;  %v12589_v46 = vld [vmem:[%s13711_s9 + $0xbc8] ss:$48 sps:$4 sm:$0xff]   ;;  %v12594_v55 = vld [vmem:[%s13711_s9 + $0x56c] ss:$48 sps:$4 sm:$0xff]  }
 0x8d3   : > { %9525 = vmatpush2.bf16.msra.mxu0 %v12526_v34  ;;  %v12597_v34 = vld [vmem:[%s13711_s9 + $0xb6c] ss:$48 sps:$4 sm:$0xff]  }
 0x8d4   : > { %9566 = vmatpush2.bf16.msra.mxu1 %v12529_v35  ;;  %9526 = vmatprep.subr.bf16.mxu0 %v12534_v10  ;;  %v12592_v35 = vld [vmem:[%s13711_s9 + $0x568] ss:$48 sps:$4 sm:$0xff]  }
 0x8d5   : > { %9567 = vmatprep.subr.bf16.mxu1 %v12537_v1  ;;  %v12595_v10 = vld [vmem:[%s13711_s9 + $0xb68] ss:$48 sps:$4 sm:$0xff]   ;;  %v12600_v1 = vld [vmem:[%s13711_s9 + $0x50c] ss:$48 sps:$4 sm:$0xff]  }
 0x8d7   : > { %9527 = vmatpush2.bf16.msra.mxu0 %v12532_v16  ;;  %v12603_v16 = vld [vmem:[%s13711_s9 + $0xb0c] ss:$48 sps:$4 sm:$0xff]  }
 0x8d8   : > { %9568 = vmatpush2.bf16.msra.mxu1 %v12535_v2  ;;  %9578 = vmatprep.subr.bf16.mxu0 %v12540_v49  ;;  %v12598_v2 = vld [vmem:[%s13711_s9 + $0x508] ss:$48 sps:$4 sm:$0xff]  }
 0x8d9   : > { %9619 = vmatprep.subr.bf16.mxu1 %v12543_v51  ;;  %v12601_v49 = vld [vmem:[%s13711_s9 + $0xb08] ss:$48 sps:$4 sm:$0xff]   ;;  %v12606_v51 = vld [vmem:[%s13711_s9 + $0x4ac] ss:$48 sps:$4 sm:$0xff]  }
 0x8da   : > { %v14737_v58 = vpop.f32.mrf.mxu0  ;;  %9529 = vmatmul.mubr.bf16.vlgmr.msra.gmra.mxu0 %v14121_v36 }
 0x8db   : > { %v14741_v59 = vpop.f32.mrf.mxu1  ;;  %9570 = vmatmul.mubr.bf16.vlgmr.msra.gmra.mxu1 %v14124_v50  ;;  %9579 = vmatpush1.bf16.msra.mxu0 %v12538_v47  ;;  %v12609_v47 = vld [vmem:[%s13711_s9 + $0xaac] ss:$48 sps:$4 sm:$0xff]  }
 0x8dc   : > { %9610 = vmatprep.mubr.bf16.mxu0 %v14034_v45  ;;  %9620 = vmatpush1.bf16.msra.mxu1 %v12541_v39  ;;  %v14746_v41 = vpop.f32.mrf.mxu0  ;;  %v12550_v45 = vld [vmem:[%s13711_s9 + $0x208] ss:$48 sps:$4 sm:$0xff]  }
 0x8dd   : > { %9651 = vmatprep.mubr.bf16.mxu1 %v14036_v3  ;;  %v14751_v0 = vpop.f32.mrf.mxu1  ;;  %9580 = vmatprep.subr.bf16.mxu0 %v12546_v53  ;;  %v12558_v3 = vld [vmem:[%s13711_s9 + $0x1ac] ss:$48 sps:$4 sm:$0xff]   ;;  %v12604_v39 = vld [vmem:[%s13711_s9 + $0x4a8] ss:$48 sps:$4 sm:$0xff]  }
 0x8de   : > { %v9288_v30 = vpop.f32.mrf.mxu0  ;;  %9621 = vmatprep.subr.bf16.mxu1 %v12549_v57  ;;  %v12607_v53 = vld [vmem:[%s13711_s9 + $0xaa8] ss:$48 sps:$4 sm:$0xff]   ;;  %v12612_v57 = vld [vmem:[%s13711_s9 + $0x44c] ss:$48 sps:$4 sm:$0xff]  }
 0x8df   : > { %v9329_v40 = vpop.f32.mrf.mxu1  ;;  %9581 = vmatpush1.bf16.msra.mxu0 %v12544_v60  ;;  %v12615_v60 = vld [vmem:[%s13711_s9 + $0xa4c] ss:$48 sps:$4 sm:$0xff]  }
 0x8e0   : > { %9622 = vmatpush1.bf16.msra.mxu1 %v12547_v37  ;;  %v9289_v9 = vpop.f32.mrf.mxu0  ;;  %9582 = vmatprep.subr.bf16.mxu0 %v12552_v61  ;;  %v12610_v37 = vld [vmem:[%s13711_s9 + $0x448] ss:$48 sps:$4 sm:$0xff]   ;;  %v12621_v30 = vld [vmem:[%s13711_s9 + $0x9ec] ss:$48 sps:$4 sm:$0xff]  }
 0x8e1   : > { %v9330_v33 = vpop.f32.mrf.mxu1  ;;  %9623 = vmatprep.subr.bf16.mxu1 %v12555_v13  ;;  %v12613_v61 = vld [vmem:[%s13711_s9 + $0xa48] ss:$48 sps:$4 sm:$0xff]   ;;  %v12618_v13 = vld [vmem:[%s13711_s9 + $0x3ec] ss:$48 sps:$4 sm:$0xff]  }
 0x8e2   : > { %v12616_v40 = vld [vmem:[%s13711_s9 + $0x3e8] ss:$48 sps:$4 sm:$0xff]   ;;  %v12624_v9 = vld [vmem:[%s13711_s9 + $0x38c] ss:$48 sps:$4 sm:$0xff]  }
 0x8e3   : > { %9583 = vmatpush1.bf16.msra.mxu0 %v12550_v45  ;;  %v12619_v45 = vld [vmem:[%s13711_s9 + $0x9e8] ss:$48 sps:$4 sm:$0xff]  }
 0x8e4   : > { %9624 = vmatpush1.bf16.msra.mxu1 %v12553_v15  ;;  %9584 = vmatprep.subr.bf16.mxu0 %v12558_v3  ;;  %v12627_v15 = vld [vmem:[%s13711_s9 + $0x98c] ss:$48 sps:$4 sm:$0xff]   ;;  %v12622_v3 = vld [vmem:[%s13711_s9 + $0x388] ss:$48 sps:$4 sm:$0xff]  }
 0x8e5   : > { %9625 = vmatprep.subr.bf16.mxu1 %v12561_v19  ;;  %v12625_v33 = vld [vmem:[%s13711_s9 + $0x988] ss:$48 sps:$4 sm:$0xff]   ;;  %v12630_v19 = vld [vmem:[%s13711_s9 + $0x32c] ss:$48 sps:$4 sm:$0xff]  }
 0x8e7   : > { %9585 = vmatpush1.bf16.msra.mxu0 %v12556_v63  ;;  %v4885_v63 = vrot.slane %v14649_v54, %v13987_v43 }
 0x8e8   : > { %9626 = vmatpush1.bf16.msra.mxu1 %v12559_v27  ;;  %9586 = vmatprep.subr.bf16.mxu0 %v12564_v4  ;;  %v12633_v27 = vld [vmem:[%s13711_s9 + $0x92c] ss:$48 sps:$4 sm:$0xff]   ;;  %v4889_v4 = vrot.slane %v14649_v54, %v13990_v44  ;;  %v12637_v44 = vld [vmem:[%s13711_s9 + $0x14c8] ss:$48 sps:$4 sm:$0xff]  }
 0x8e9   : > { %9627 = vmatprep.subr.bf16.mxu1 %v12567_v38  ;;  %v12628_v38 = vld [vmem:[%s13711_s9 + $0x328] ss:$48 sps:$4 sm:$0xff]  }
 0x8ea   : > { %v9287_v43 = vadd.f32 %v14746_v41, %v4889_v4  ;;  %v12687_v4 = vld [vmem:[%s13711_s9 + $0x17cc] ss:$48 sps:$4 sm:$0xff]  }
 0x8eb   : > { %9587 = vmatpush1.bf16.msra.mxu0 %v12562_v26  ;;  %v12631_v26 = vld [vmem:[%s13711_s9 + $0x928] ss:$48 sps:$4 sm:$0xff]  }
 0x8ec   : > { %9628 = vmatpush1.bf16.msra.mxu1 %v12565_v7  ;;  %9588 = vmatprep.subr.bf16.mxu0 %v12570_v32  ;;  %v12636_v7 = vld [vmem:[%s13711_s9 + $0xecc] ss:$48 sps:$4 sm:$0xff]   ;;  %v9285_v32 = vadd.f32 %v14737_v58, %v4885_v63  ;;  %v12679_v63 = vld [vmem:[%s13711_s9 + $0x1228] ss:$48 sps:$4 sm:$0xff]  }
 0x8ed   : > { %9629 = vmatprep.subr.bf16.mxu1 %v12573_v14  ;;  %v12639_v14 = vld [vmem:[%s13711_s9 + $0x14cc] ss:$48 sps:$4 sm:$0xff]  }
 0x8ee   : > { %v9326_v54 = vadd.f32 %v14741_v59, %v9285_v32  ;;  %v12645_v58 = vld [vmem:[%s13711_s9 + $0x146c] ss:$48 sps:$4 sm:$0xff]  }
 0x8ef   : > { %9589 = vmatpush1.bf16.msra.mxu0 %v12568_v29  ;;  %v12634_v29 = vld [vmem:[%s13711_s9 + $0xec8] ss:$48 sps:$4 sm:$0xff]   ;;  %v12693_v32 = vld [vmem:[%s13711_s9 + $0x176c] ss:$48 sps:$4 sm:$0xff]  }
 0x8f0   : > { %9630 = vmatpush1.bf16.msra.mxu1 %v12571_v8  ;;  %9590 = vmatprep.subr.bf16.mxu0 %v12576_v42  ;;  %v12642_v8 = vld [vmem:[%s13711_s9 + $0xe6c] ss:$48 sps:$4 sm:$0xff]  }
 0x8f1   : > { %9631 = vmatprep.subr.bf16.mxu1 %v12579_v22  ;;  %v9328_v22 = vadd.f32 %v14751_v0, %v9287_v43  ;;  %v12691_v43 = vld [vmem:[%s13711_s9 + $0x1768] ss:$48 sps:$4 sm:$0xff]  }
 0x8f3   : > { %9591 = vmatpush1.bf16.msra.mxu0 %v12574_v48 }
 0x8f4   : > { %9632 = vmatpush1.bf16.msra.mxu1 %v12577_v23  ;;  %9592 = vmatprep.subr.bf16.mxu0 %v12582_v31  ;;  %v12640_v23 = vld [vmem:[%s13711_s9 + $0xe68] ss:$48 sps:$4 sm:$0xff]  }
 0x8f5   : > { %9633 = vmatprep.subr.bf16.mxu1 %v12585_v62  ;;  %v12643_v31 = vld [vmem:[%s13711_s9 + $0x1468] ss:$48 sps:$4 sm:$0xff]   ;;  %v12648_v62 = vld [vmem:[%s13711_s9 + $0xe0c] ss:$48 sps:$4 sm:$0xff]  }
 0x8f7   : > { %9593 = vmatpush1.bf16.msra.mxu0 %v12580_v5 }
 0x8f8   : > { %9634 = vmatpush1.bf16.msra.mxu1 %v12583_v17  ;;  %9594 = vmatprep.subr.bf16.mxu0 %v12588_v11  ;;  %v12651_v17 = vld [vmem:[%s13711_s9 + $0x140c] ss:$48 sps:$4 sm:$0xff]  }
 0x8f9   : > { %9635 = vmatprep.subr.bf16.mxu1 %v12591_v24 }
 0x8fb   : > { %9595 = vmatpush2.bf16.msra.mxu0 %v12586_v28  ;;  %v12646_v28 = vld [vmem:[%s13711_s9 + $0xe08] ss:$48 sps:$4 sm:$0xff]  }
 0x8fc   : > { %9636 = vmatpush2.bf16.msra.mxu1 %v12589_v46  ;;  %9596 = vmatprep.subr.bf16.mxu0 %v12594_v55  ;;  %v12654_v55 = vld [vmem:[%s13711_s9 + $0xdac] ss:$48 sps:$4 sm:$0xff]  }
 0x8fd   : > { %9637 = vmatprep.subr.bf16.mxu1 %v12597_v34 }
 0x8ff   : > { %9597 = vmatpush2.bf16.msra.mxu0 %v12592_v35 }
 0x900   : > { %9638 = vmatpush2.bf16.msra.mxu1 %v12595_v10  ;;  %9598 = vmatprep.subr.bf16.mxu0 %v12600_v1  ;;  %v12657_v10 = vld [vmem:[%s13711_s9 + $0x13ac] ss:$48 sps:$4 sm:$0xff]   ;;  %v12652_v1 = vld [vmem:[%s13711_s9 + $0xda8] ss:$48 sps:$4 sm:$0xff]  }
 0x901   : > { %9639 = vmatprep.subr.bf16.mxu1 %v12603_v16  ;;  %v12655_v16 = vld [vmem:[%s13711_s9 + $0x13a8] ss:$48 sps:$4 sm:$0xff]  }
 0x903   : > { %9599 = vmatpush2.bf16.msra.mxu0 %v12598_v2  ;;  %v12660_v2 = vld [vmem:[%s13711_s9 + $0xd4c] ss:$48 sps:$4 sm:$0xff]  }
 0x904   : > { %9640 = vmatpush2.bf16.msra.mxu1 %v12601_v49  ;;  %9600 = vmatprep.subr.bf16.mxu0 %v12606_v51  ;;  %v12663_v49 = vld [vmem:[%s13711_s9 + $0x134c] ss:$48 sps:$4 sm:$0xff]   ;;  %v12658_v51 = vld [vmem:[%s13711_s9 + $0xd48] ss:$48 sps:$4 sm:$0xff]  }
 0x905   : > { %9641 = vmatprep.subr.bf16.mxu1 %v12609_v47  ;;  %v12661_v47 = vld [vmem:[%s13711_s9 + $0x1348] ss:$48 sps:$4 sm:$0xff]  }
 0x907   : > { %9601 = vmatpush2.bf16.msra.mxu0 %v12604_v39  ;;  %v12666_v39 = vld [vmem:[%s13711_s9 + $0xcec] ss:$48 sps:$4 sm:$0xff]  }
 0x908   : > { %9642 = vmatpush2.bf16.msra.mxu1 %v12607_v53  ;;  %9602 = vmatprep.subr.bf16.mxu0 %v12612_v57  ;;  %v12669_v53 = vld [vmem:[%s13711_s9 + $0x12ec] ss:$48 sps:$4 sm:$0xff]   ;;  %v12664_v57 = vld [vmem:[%s13711_s9 + $0xce8] ss:$48 sps:$4 sm:$0xff]  }
 0x909   : > { %9643 = vmatprep.subr.bf16.mxu1 %v12615_v60  ;;  %v12667_v60 = vld [vmem:[%s13711_s9 + $0x12e8] ss:$48 sps:$4 sm:$0xff]  }
 0x90b   : > { %9603 = vmatpush2.bf16.msra.mxu0 %v12610_v37  ;;  %v12672_v37 = vld [vmem:[%s13711_s9 + $0xc8c] ss:$48 sps:$4 sm:$0xff]  }
 0x90c   : > { %9644 = vmatpush2.bf16.msra.mxu1 %v12613_v61  ;;  %9604 = vmatprep.subr.bf16.mxu0 %v12618_v13  ;;  %v12675_v61 = vld [vmem:[%s13711_s9 + $0x128c] ss:$48 sps:$4 sm:$0xff]  }
 0x90d   : > { %9645 = vmatprep.subr.bf16.mxu1 %v12621_v30 }
 0x90f   : > { %9605 = vmatpush2.bf16.msra.mxu0 %v12616_v40  ;;  %v12670_v40 = vld [vmem:[%s13711_s9 + $0xc88] ss:$48 sps:$4 sm:$0xff]  }
 0x910   : > { %9646 = vmatpush2.bf16.msra.mxu1 %v12619_v45  ;;  %9606 = vmatprep.subr.bf16.mxu0 %v12624_v9  ;;  %v12673_v9 = vld [vmem:[%s13711_s9 + $0x1288] ss:$48 sps:$4 sm:$0xff]  }
 0x911   : > { %9647 = vmatprep.subr.bf16.mxu1 %v12627_v15  ;;  %v12678_v15 = vld [vmem:[%s13711_s9 + $0xc2c] ss:$48 sps:$4 sm:$0xff]  }
 0x913   : > { %9607 = vmatpush2.bf16.msra.mxu0 %v12622_v3 }
 0x914   : > { %9648 = vmatpush2.bf16.msra.mxu1 %v12625_v33  ;;  %9608 = vmatprep.subr.bf16.mxu0 %v12630_v19  ;;  %v12681_v33 = vld [vmem:[%s13711_s9 + $0x122c] ss:$48 sps:$4 sm:$0xff]   ;;  %v12676_v19 = vld [vmem:[%s13711_s9 + $0xc28] ss:$48 sps:$4 sm:$0xff]  }
 0x915   : > { %9649 = vmatprep.subr.bf16.mxu1 %v12633_v27  ;;  %v12684_v27 = vld [vmem:[%s13711_s9 + $0x11cc] ss:$48 sps:$4 sm:$0xff]  }
 0x917   : > { %9609 = vmatpush2.bf16.msra.mxu0 %v12628_v38  ;;  %v12682_v38 = vld [vmem:[%s13711_s9 + $0x11c8] ss:$48 sps:$4 sm:$0xff]  }
 0x918   : > { %9650 = vmatpush2.bf16.msra.mxu1 %v12631_v26  ;;  %9660 = vmatprep.subr.bf16.mxu0 %v12636_v7  ;;  %v12685_v26 = vld [vmem:[%s13711_s9 + $0x17c8] ss:$48 sps:$4 sm:$0xff]   ;;  %v12690_v7 = vld [vmem:[%s13711_s9 + $0x116c] ss:$48 sps:$4 sm:$0xff]  }
 0x919   : > { %9701 = vmatprep.subr.bf16.mxu1 %v12639_v14  ;;  %v12688_v14 = vld [vmem:[%s13711_s9 + $0x1168] ss:$48 sps:$4 sm:$0xff]  }
 0x91a   : > { %v9366_v42 = vpop.f32.mrf.mxu0  ;;  %9611 = vmatmul.mubr.bf16.vlgmr.msra.gmra.mxu0 %v14041_v12 }
 0x91b   : > { %v9367_v41 = vadd.f32 %v9366_v42, %v9326_v54  ;;  %v9407_v48 = vpop.f32.mrf.mxu1  ;;  %9652 = vmatmul.mubr.bf16.vlgmr.msra.gmra.mxu1 %v14044_v18  ;;  %9661 = vmatpush1.bf16.msra.mxu0 %v12634_v29  ;;  %v12696_v29 = vld [vmem:[%s13711_s9 + $0x110c] ss:$48 sps:$4 sm:$0xff]  }
 0x91c   : > { %9692 = vmatprep.mubr.bf16.mxu0 %v14048_v21  ;;  %9702 = vmatpush1.bf16.msra.mxu1 %v12637_v44  ;;  %v9368_v59 = vpop.f32.mrf.mxu0  ;;  %v12699_v44 = vld [vmem:[%s13711_s9 + $0x170c] ss:$48 sps:$4 sm:$0xff]  }
 0x91d   : > { %v9408_v5 = vadd.f32 %v9407_v48, %v9367_v41  ;;  %9733 = vmatprep.mubr.bf16.mxu1 %v14051_v25  ;;  %v9369_v12 = vadd.f32 %v9368_v59, %v9328_v22  ;;  %v9409_v0 = vpop.f32.mrf.mxu1  ;;  %9662 = vmatprep.subr.bf16.mxu0 %v12642_v8  ;;  %v12649_v25 = vld [vmem:[%s13711_s9 + $0x1408] ss:$48 sps:$4 sm:$0xff]   ;;  %v12702_v22 = vld [vmem:[%s13711_s9 + $0x10ac] ss:$48 sps:$4 sm:$0xff]  }
 0x91e   : > { %v9370_v11 = vpop.f32.mrf.mxu0  ;;  %9703 = vmatprep.subr.bf16.mxu1 %v12645_v58  ;;  %v12694_v8 = vld [vmem:[%s13711_s9 + $0x1108] ss:$48 sps:$4 sm:$0xff]   ;;  %v12705_v41 = vld [vmem:[%s13711_s9 + $0x16ac] ss:$48 sps:$4 sm:$0xff]  }
 0x91f   : > { %v11207_v18 = vmul.f32 -1.442695, %v9408_v5  ;;  %v9410_v24 = vadd.f32 %v9409_v0, %v9369_v12  ;;  %v9411_v21 = vpop.f32.mrf.mxu1  ;;  %9663 = vmatpush1.bf16.msra.mxu0 %v12640_v23  ;;  %v12697_v58 = vld [vmem:[%s13711_s9 + $0x1708] ss:$48 sps:$4 sm:$0xff]   ;;  %v12708_v59 = vld [vmem:[%s13711_s9 + $0x104c] ss:$48 sps:$4 sm:$0xff]  }
 0x920   : > { %9704 = vmatpush1.bf16.msra.mxu1 %v12643_v31  ;;  %v9371_v46 = vpop.f32.mrf.mxu0  ;;  %9664 = vmatprep.subr.bf16.mxu0 %v12648_v62  ;;  %v12700_v48 = vld [vmem:[%s13711_s9 + $0x10a8] ss:$48 sps:$4 sm:$0xff]   ;;  %v12711_v31 = vld [vmem:[%s13711_s9 + $0x164c] ss:$48 sps:$4 sm:$0xff]  }
 0x921   : > { %12814 = vpow2.f32 %v11207_v18  ;;  %v11208_v34 = vmul.f32 -1.442695, %v9410_v24  ;;  %v9412_v35 = vpop.f32.mrf.mxu1  ;;  %9705 = vmatprep.subr.bf16.mxu1 %v12651_v17  ;;  %v12703_v23 = vld [vmem:[%s13711_s9 + $0x16a8] ss:$48 sps:$4 sm:$0xff]   ;;  %v12714_v12 = vld [vmem:[%s13711_s9 + $0xfec] ss:$48 sps:$4 sm:$0xff]  }
 0x922   : > { %v12706_v62 = vld [vmem:[%s13711_s9 + $0x1048] ss:$48 sps:$4 sm:$0xff]   ;;  %v12717_v0 = vld [vmem:[%s13711_s9 + $0x15ec] ss:$48 sps:$4 sm:$0xff]  }
 0x923   : > { %12816 = vpow2.f32 %v11208_v34  ;;  %9665 = vmatpush1.bf16.msra.mxu0 %v12646_v28  ;;  %v12709_v5 = vld [vmem:[%s13711_s9 + $0x1648] ss:$48 sps:$4 sm:$0xff]   ;;  %v12720_v18 = vld [vmem:[%s13711_s9 + $0xf8c] ss:$48 sps:$4 sm:$0xff]  }
 0x924   : > { %9706 = vmatpush1.bf16.msra.mxu1 %v12649_v25  ;;  %9666 = vmatprep.subr.bf16.mxu0 %v12654_v55  ;;  %v12712_v17 = vld [vmem:[%s13711_s9 + $0xfe8] ss:$48 sps:$4 sm:$0xff]   ;;  %v12723_v24 = vld [vmem:[%s13711_s9 + $0x158c] ss:$48 sps:$4 sm:$0xff]  }
 0x925   : > { %9707 = vmatprep.subr.bf16.mxu1 %v12657_v10  ;;  %v12715_v11 = vld [vmem:[%s13711_s9 + $0x15e8] ss:$48 sps:$4 sm:$0xff]   ;;  %v12726_v46 = vld [vmem:[%s13711_s9 + $0xf2c] ss:$48 sps:$4 sm:$0xff]  }
 0x926   : > { %v12718_v21 = vld [vmem:[%s13711_s9 + $0xf88] ss:$48 sps:$4 sm:$0xff]   ;;  %v12729_v25 = vld [vmem:[%s13711_s9 + $0x152c] ss:$48 sps:$4 sm:$0xff]  }
 0x927   : > { %9667 = vmatpush1.bf16.msra.mxu0 %v12652_v1  ;;  %v12721_v28 = vld [vmem:[%s13711_s9 + $0x1588] ss:$48 sps:$4 sm:$0xff]  }
 0x928   : > { %9708 = vmatpush1.bf16.msra.mxu1 %v12655_v16  ;;  %9668 = vmatprep.subr.bf16.mxu0 %v12660_v2  ;;  %v12724_v55 = vld [vmem:[%s13711_s9 + $0xf28] ss:$48 sps:$4 sm:$0xff]  }
 0x929   : > { %9709 = vmatprep.subr.bf16.mxu1 %v12663_v49  ;;  %v12727_v34 = vld [vmem:[%s13711_s9 + $0x1528] ss:$48 sps:$4 sm:$0xff]  }
 0x92b   : > { %9669 = vmatpush1.bf16.msra.mxu0 %v12658_v51 }
 0x92c   : > { %9710 = vmatpush1.bf16.msra.mxu1 %v12661_v47  ;;  %9670 = vmatprep.subr.bf16.mxu0 %v12666_v39  ;;  %v4855_v39 = vld [vmem:[%s14329_s23 + $0x8] sm:$0xf] }
 0x92d   : > { %9711 = vmatprep.subr.bf16.mxu1 %v12669_v53  ;;  %v4893_v53 = vrot.slane %v4855_v39, %v13720_v52 }
 0x92e   : > { %v12815_v13 = vpop.eup %12814 }
 0x92f   : > { %v9784_v30 = vadd.f32 1.0, %v12815_v13  ;;  %9671 = vmatpush1.bf16.msra.mxu0 %v12664_v57  ;;  %v4897_v57 = vrot.slane %v4855_v39, %v13730_v56 }
 0x930   : > { %v12817_v45 = vpop.eup %12816  ;;  %9712 = vmatpush1.bf16.msra.mxu1 %v12667_v60  ;;  %9672 = vmatprep.subr.bf16.mxu0 %v12672_v37 }
 0x931   : > { %12818 = vrcp.f32 %v9784_v30  ;;  %v9785_v3 = vadd.f32 1.0, %v12817_v45  ;;  %9713 = vmatprep.subr.bf16.mxu1 %v12675_v61 }
 0x933   : > { %12820 = vrcp.f32 %v9785_v3  ;;  %9673 = vmatpush1.bf16.msra.mxu0 %v12670_v40 }
 0x934   : > { %9714 = vmatpush1.bf16.msra.mxu1 %v12673_v9  ;;  %9674 = vmatprep.subr.bf16.mxu0 %v12678_v15 }
 0x935   : > { %9715 = vmatprep.subr.bf16.mxu1 %v12681_v33 }
 0x937   : > { %9675 = vmatpush1.bf16.msra.mxu0 %v12676_v19 }
 0x938   : > { %9716 = vmatpush1.bf16.msra.mxu1 %v12679_v63  ;;  %9676 = vmatprep.subr.bf16.mxu0 %v12684_v27 }
 0x939   : > { %9717 = vmatprep.subr.bf16.mxu1 %v12687_v4 }
 0x93b   : > { %9677 = vmatpush2.bf16.msra.mxu0 %v12682_v38 }
 0x93c   : > { %9718 = vmatpush2.bf16.msra.mxu1 %v12685_v26  ;;  %9678 = vmatprep.subr.bf16.mxu0 %v12690_v7 }
 0x93d   : > { %9719 = vmatprep.subr.bf16.mxu1 %v12693_v32 }
 0x93e   : > { %v12819_v54 = vpop.eup %12818 }
 0x93f   : > { %9820 = vst [vmem:[%s14395_s16 + $0x30] sm:$0xff] %v12819_v54  ;;  %9679 = vmatpush2.bf16.msra.mxu0 %v12688_v14 }
 0x940   : > { %v12821_v42 = vpop.eup %12820  ;;  %9720 = vmatpush2.bf16.msra.mxu1 %v12691_v43  ;;  %9680 = vmatprep.subr.bf16.mxu0 %v12696_v29 }
 0x941   : > { %9821 = vst [vmem:[%s14395_s16 + $0x38] sm:$0xff] %v12821_v42  ;;  %9721 = vmatprep.subr.bf16.mxu1 %v12699_v44 }
 0x943   : > { %9681 = vmatpush2.bf16.msra.mxu0 %v12694_v8 }
 0x944   : > { %9722 = vmatpush2.bf16.msra.mxu1 %v12697_v58  ;;  %9682 = vmatprep.subr.bf16.mxu0 %v12702_v22 }
 0x945   : > { %9723 = vmatprep.subr.bf16.mxu1 %v12705_v41  ;;  %v4901_v41 = vrot.slane %v4855_v39, %v13790_v20 }
 0x947   : > { %9683 = vmatpush2.bf16.msra.mxu0 %v12700_v48  ;;  %v4905_v48 = vrot.slane %v4855_v39, %v13793_v6 }
 0x948   : > { %9724 = vmatpush2.bf16.msra.mxu1 %v12703_v23  ;;  %9684 = vmatprep.subr.bf16.mxu0 %v12708_v59 }
 0x949   : > { %9725 = vmatprep.subr.bf16.mxu1 %v12711_v31 }
 0x94b   : > { %9685 = vmatpush2.bf16.msra.mxu0 %v12706_v62 }
 0x94c   : > { %9726 = vmatpush2.bf16.msra.mxu1 %v12709_v5  ;;  %9686 = vmatprep.subr.bf16.mxu0 %v12714_v12 }
 0x94d   : > { %9727 = vmatprep.subr.bf16.mxu1 %v12717_v0 }
 0x94f   : > { %9687 = vmatpush2.bf16.msra.mxu0 %v12712_v17 }
 0x950   : > { %9728 = vmatpush2.bf16.msra.mxu1 %v12715_v11  ;;  %9688 = vmatprep.subr.bf16.mxu0 %v12720_v18 }
 0x951   : > { %9729 = vmatprep.subr.bf16.mxu1 %v12723_v24 }
 0x953   : > { %9689 = vmatpush2.bf16.msra.mxu0 %v12718_v21 }
 0x954   : > { %9730 = vmatpush2.bf16.msra.mxu1 %v12721_v28  ;;  %9690 = vmatprep.subr.bf16.mxu0 %v12726_v46 }
 0x955   : > { %9731 = vmatprep.subr.bf16.mxu1 %v12729_v25 }
 0x957   : > { %9691 = vmatpush2.bf16.msra.mxu0 %v12724_v55 }
 0x958   : > { %9732 = vmatpush2.bf16.msra.mxu1 %v12727_v34 }
 0x95a   : > { %v9448_v35 = vpop.f32.mrf.mxu0  ;;  %9693 = vmatmul.mubr.bf16.vlgmr.msra.gmra.mxu0 %v14121_v36 }
 0x95b   : > { %v9489_v10 = vpop.f32.mrf.mxu1  ;;  %9734 = vmatmul.mubr.bf16.vlgmr.msra.gmra.mxu1 %v14124_v50  ;;  %v9449_v60 = vadd.f32 %v9448_v35, %v4893_v53 }
 0x95c   : > { %v9450_v1 = vpop.f32.mrf.mxu0 }
 0x95d   : > { %v9491_v16 = vpop.f32.mrf.mxu1  ;;  %v9451_v37 = vadd.f32 %v9450_v1, %v4897_v57  ;;  %v9490_v61 = vadd.f32 %v9489_v10, %v9449_v60 }
 0x95e   : > { %v9452_v2 = vpop.f32.mrf.mxu0 }
 0x95f   : > { %v9493_v49 = vpop.f32.mrf.mxu1  ;;  %v9492_v30 = vadd.f32 %v9491_v16, %v9451_v37 }
 0x960   : > { %v9453_v51 = vpop.f32.mrf.mxu0 }
 0x961   : > { %v9494_v47 = vpop.f32.mrf.mxu1 }
 0x99a   : > { %v9530_v13 = vpop.f32.mrf.mxu0 }
 0x99b   : > { %v9531_v36 = vadd.f32 %v9530_v13, %v9490_v61  ;;  %v9571_v40 = vpop.f32.mrf.mxu1 }
 0x99c   : > { %v9532_v45 = vpop.f32.mrf.mxu0 }
 0x99d   : > { %v9572_v50 = vadd.f32 %v9571_v40, %v9531_v36  ;;  %v9533_v9 = vadd.f32 %v9532_v45, %v9492_v30  ;;  %v9573_v15 = vpop.f32.mrf.mxu1 }
 0x99e   : > { %v9534_v3 = vpop.f32.mrf.mxu0 }
 0x99f   : > { %v11209_v33 = vmul.f32 -1.442695, %v9572_v50  ;;  %v9574_v19 = vadd.f32 %v9573_v15, %v9533_v9  ;;  %v9575_v63 = vpop.f32.mrf.mxu1 }
 0x9a0   : > { %v9535_v52 = vpop.f32.mrf.mxu0 }
 0x9a1   : > { %12822 = vpow2.f32 %v11209_v33  ;;  %v11210_v56 = vmul.f32 -1.442695, %v9574_v19  ;;  %v9576_v27 = vpop.f32.mrf.mxu1 }
 0x9a3   : > { %12824 = vpow2.f32 %v11210_v56 }
 0x9ae   : > { %v12823_v4 = vpop.eup %12822 }
 0x9af   : > { %v9786_v38 = vadd.f32 1.0, %v12823_v4 }
 0x9b0   : > { %v12825_v26 = vpop.eup %12824 }
 0x9b1   : > { %12826 = vrcp.f32 %v9786_v38  ;;  %v9787_v7 = vadd.f32 1.0, %v12825_v26 }
 0x9b3   : > { %12828 = vrcp.f32 %v9787_v7 }
 0x9be   : > { %v12827_v32 = vpop.eup %12826 }
 0x9bf   : > { %9822 = vst [vmem:[%s14395_s16 + $0x40] sm:$0xff] %v12827_v32 }
 0x9c0   : > { %v12829_v14 = vpop.eup %12828 }
 0x9c1   : > { %9823 = vst [vmem:[%s14395_s16 + $0x48] sm:$0xff] %v12829_v14 }
 0x9da   : > { %v9612_v43 = vpop.f32.mrf.mxu0 }
 0x9db   : > { %v9653_v29 = vpop.f32.mrf.mxu1  ;;  %v9613_v23 = vadd.f32 %v9612_v43, %v4901_v41 }
 0x9dc   : > { %v9614_v44 = vpop.f32.mrf.mxu0 }
 0x9dd   : > { %v9655_v54 = vpop.f32.mrf.mxu1  ;;  %v9615_v59 = vadd.f32 %v9614_v44, %v4905_v48  ;;  %v9654_v31 = vadd.f32 %v9653_v29, %v9613_v23 }
 0x9de   : > { %v9616_v8 = vpop.f32.mrf.mxu0 }
 0x9df   : > { %v9657_v42 = vpop.f32.mrf.mxu1  ;;  %v9656_v5 = vadd.f32 %v9655_v54, %v9615_v59 }
 0x9e0   : > { %v9617_v58 = vpop.f32.mrf.mxu0 }
 0x9e1   : > { %v9658_v22 = vpop.f32.mrf.mxu1 }
 0xa1a   : > { %v9694_v62 = vpop.f32.mrf.mxu0 }
 0xa1b   : > { %v9695_v12 = vadd.f32 %v9694_v62, %v9654_v31  ;;  %v9735_v0 = vpop.f32.mrf.mxu1 }
 0xa1c   : > { %v9696_v17 = vpop.f32.mrf.mxu0 }
 0xa1d   : > { %v9736_v11 = vadd.f32 %v9735_v0, %v9695_v12  ;;  %v9697_v18 = vadd.f32 %v9696_v17, %v9656_v5  ;;  %v9737_v24 = vpop.f32.mrf.mxu1 }
 0xa1e   : > { %v9698_v21 = vpop.f32.mrf.mxu0 }
 0xa1f   : > { %v11211_v28 = vmul.f32 -1.442695, %v9736_v11  ;;  %v9738_v46 = vadd.f32 %v9737_v24, %v9697_v18  ;;  %v9739_v20 = vpop.f32.mrf.mxu1 }
 0xa20   : > { %v9699_v25 = vpop.f32.mrf.mxu0 }
 0xa21   : > { %12830 = vpow2.f32 %v11211_v28  ;;  %v11212_v6 = vmul.f32 -1.442695, %v9738_v46  ;;  %v9740_v55 = vpop.f32.mrf.mxu1 }
 0xa23   : > { %12832 = vpow2.f32 %v11212_v6 }
 0xa2e   : > { %v12831_v34 = vpop.eup %12830 }
 0xa2f   : > { %v9788_v35 = vadd.f32 1.0, %v12831_v34 }
 0xa30   : > { %v12833_v10 = vpop.eup %12832 }
 0xa31   : > { %12834 = vrcp.f32 %v9788_v35  ;;  %v9789_v1 = vadd.f32 1.0, %v12833_v10 }
 0xa33   : > { %12836 = vrcp.f32 %v9789_v1 }
 0xa3e   : > { %v12835_v16 = vpop.eup %12834 }
 0xa3f   : > { %9824 = vst [vmem:[%s14395_s16 + $0x50] sm:$0xff] %v12835_v16 }
 0xa40   : > { %v12837_v2 = vpop.eup %12836 }
 0xa41   : > { %9825 = vst [vmem:[%s14395_s16 + $0x58] sm:$0xff] %v12837_v2 }
 0xa42   : > { %13246 = shalt.err (!%p13243_p6)
}
 0xa43   : > { %s13247_s15 = scalar_lea.hbm %s14901_s14, 1536  ;;  %s13251_s9 = scalar_lea.hbm %s15023_s30, 3072 }
 0xa44   : > { %p13248_p4 = scmp.ne.s32.totalorder %s14901_s14, %s13247_s15  ;;  %p13252_p13 = scmp.lt.s32.totalorder %s14901_s14, %s15023_s30 }
 0xa45   : > { %p13253_p0 = scmp.lt.s32.totalorder %s13251_s9, %s13247_s15 }
 0xa46   : > { %p13249_p7 = pnand %p13248_p4, %p15024_p1 }
 0xa47   : > { %p13254_p2 = por %p13253_p0, %p13252_p13 }
 0xa48   : > { %p13250_p11 = pneg %p13249_p7 }
 0xa4a   : > { %p13255_p3 = pnand %p13254_p2, %p13250_p11 }
 0xa4c   : > { %13258 = shalt.err (!%p13255_p3)
}
 0xa4d   : > { %11309 = dma.vmem_to_hbm [thread:$0]  (%p15024_p1), %s9842_s28, 1536, %s14901_s14, %s9827_s29  }
 0xa4e PF: > { %s9853_s12 = sand.u32 1, %s13313_s18   ;;  %p15025_p9 = scmp.ne.s32.totalorder %s14994_s22, 0 }
 0xa4f   : > { %p15026_p8 = scmp.ge.s32.totalorder %s13325_s21, 2  ;;  %s9854_s16 = scalar_lea.sflag [#allocation4], %s9853_s12 }
 0xa51   : > { %p11359_p12 = pnand %p15026_p8, %p15025_p9 }
 0xa53   : > { %p11360_p10 = pneg %p11359_p12 }
 0xa55   : > { %13308 = dma.done.wait (%p11360_p10), %s9854_s16, 1536  }
 0xa56   : > { %13310 = vsyncadd (%p11360_p10), %s9854_s16, 4294965760  ;;  %s15027_s5 = sld [smem:[#allocation37_spill]]  ;;  %p35_p5 = scmp.ge.s32.totalorder %s13534_s17, 4  }
 0xa57   : > { %s15028_s18 = smov %s13317_s19  ;;  %s15029_s19 = smov %s13321_s20 }
 0xa58   : > { %s15031_s21 = smov %s13534_s17  ;;  %37 = sbr.rel (!%p35_p5) target bundleno = 25 (0x19), region = 189 }
 0xa5c   : > { %s15030_s20 = smov %s15027_s5 }
 0xa5d   :  { %9859 = vsyncpa [#allocation3], 1 }
 0xa5e   :  { %9861 = vsyncpa [#allocation3 + $0x1], 1 }
 0xa5f   :  { %9862 = vsyncpa [#allocation6], 1 }
 0xa60   :  { %9863 = vsyncpa [#allocation9], 1 }
 0xa61   :  { %9864 = vsyncpa [#allocation12], 1 }
 0xa62   :  { %9865 = vsyncpa [#allocation15], 1 }
 0xa63   :  { %9866 = vsyncpa [#allocation18], 1 }
 0xa64   :  { %9867 = vsyncpa [#allocation21], 1 }
 0xa65   :  { %9868 = vsyncpa [#allocation24], 1 }
 0xa66   :  { %9870 = vsyncpa [#allocation24 + $0x1], 1 }
 0xa67   :  { %9871 = vsyncpa [#allocation4], 1 }
 0xa68   :  { %9873 = vsyncpa [#allocation4 + $0x1], 1 }

</bundles_post_ra>
